<compile_context>
chip_gen: v6e
topology: v6e:2x2x1
jax: 0.10.0
libtpu: 0.0.40
codegen_flags: <defaults>
</compile_context>

<pallas_src>
import functools

import jax
import jax.numpy as jnp
from jax import lax
from jax.experimental import pallas as pl
from jax.experimental.pallas import tpu as pltpu


# ---------------------------------------------------------------------------
# Fused CNN kernel: im2col conv (3x3, pad=1) + ReLU + global mean pool + LSTM
# input projection.  One grid step processes T frames.
# ---------------------------------------------------------------------------
def _cnn_gates_kernel(p_ref, w_ref, cb_ref, wih_ref, lb_ref, out_ref, *, T, HW, COUT):
    # p_ref  : (T, HW, 9C)   bf16 im2col patches for T frames
    # w_ref  : (9C, COUT)    bf16 conv weights (3x3 taps folded into K)
    # cb_ref : (1, COUT)     f32  conv bias
    # wih_ref: (COUT, 4*HID) bf16 LSTM input-projection weights
    # lb_ref : (1, 4*HID)    f32  combined LSTM bias (b_ih + b_hh)
    # out_ref: (T, 4*HID)    f32  per-frame input gates (lane-dense output slab)
    p = p_ref[...]
    p2d = p.reshape(T * HW, p.shape[-1])                                  # (T*HW, 9C)
    feat = jnp.dot(p2d, w_ref[...], preferred_element_type=jnp.float32)   # (T*HW, COUT)
    feat = jnp.maximum(feat + cb_ref[...], 0.0)                           # bias + ReLU (f32)
    pooled = jnp.mean(feat.reshape(T, HW, COUT), axis=1)                  # (T, COUT) global mean pool
    gates = jnp.dot(pooled.astype(jnp.bfloat16), wih_ref[...],
                    preferred_element_type=jnp.float32) + lb_ref[...]     # (T, 4*HID)
    out_ref[...] = gates


def _largest_valid_chunk(n, bytes_per_row, budget=2 * 1024 * 1024):
    # Chunk T must equal n, or be a multiple of 8 that divides n (output-block
    # tiling rule), and the input block should stay inside a modest VMEM budget
    # (double-buffered by the pipeline; v7x has only 64 MiB VMEM per core).
    best_div = n
    for t in range(n, 0, -1):
        ok_shape = (t == n) or (n % t == 0 and t % 8 == 0)
        if not ok_shape:
            continue
        if t * bytes_per_row <= budget:
            return t
        best_div = min(best_div, t)
    return best_div  # fallback: smallest valid divisor (may exceed budget)


def cnn_to_gates(frames_nchw, conv_w, conv_b, w_ih, lstm_b):
    # frames_nchw: (N, C, H, W) -> returns gates_in: (N, 4*HID) f32
    N, C, H, W = frames_nchw.shape
    COUT = conv_w.shape[-1]
    G4 = w_ih.shape[-1]
    HW = H * W
    K9 = 9 * C

    # im2col in the wrapper so the kernel sees a lane-dense (rows, 9C) matrix.
    x = jnp.transpose(frames_nchw, (0, 2, 3, 1))                 # (N, H, W, C)
    xp = jnp.pad(x, ((0, 0), (1, 1), (1, 1), (0, 0)))            # (N, H+2, W+2, C)
    patches = jnp.stack(
        [xp[:, kh:kh + H, kw:kw + W, :] for kh in range(3) for kw in range(3)],
        axis=3,
    ).reshape(N, HW, K9).astype(jnp.bfloat16)                    # (N, HW, 9C)

    w9 = conv_w.reshape(K9, COUT).astype(jnp.bfloat16)
    cb = conv_b.reshape(1, COUT).astype(jnp.float32)
    wih = w_ih.astype(jnp.bfloat16)
    lb = lstm_b.reshape(1, G4).astype(jnp.float32)

    T = _largest_valid_chunk(N, HW * K9 * 2)
    kernel = functools.partial(_cnn_gates_kernel, T=T, HW=HW, COUT=COUT)
    return pl.pallas_call(
        kernel,
        out_shape=jax.ShapeDtypeStruct((N, G4), jnp.float32),
        grid_spec=pltpu.PrefetchScalarGridSpec(
            num_scalar_prefetch=0,
            grid=(N // T,),
            in_specs=[
                pl.BlockSpec((T, HW, K9), lambda i: (i, 0, 0)),
                pl.BlockSpec((K9, COUT), lambda i: (0, 0)),      # grid-invariant weights
                pl.BlockSpec((1, COUT), lambda i: (0, 0)),
                pl.BlockSpec((COUT, G4), lambda i: (0, 0)),
                pl.BlockSpec((1, G4), lambda i: (0, 0)),
            ],
            out_specs=pl.BlockSpec((T, G4), lambda i: (i, 0)),
        ),
        compiler_params=pltpu.CompilerParams(
            dimension_semantics=("parallel",),                   # frame axis shards across TCs (v7x)
            vmem_limit_bytes=32 * 1024 * 1024,
        ),
    )(patches, w9, cb, wih, lb)


# ---------------------------------------------------------------------------
# LSTM recurrence kernel: TS time steps per grid iteration, gate-major layout,
# (h, c) carried in VMEM scratch across grid steps.
# ---------------------------------------------------------------------------
def _lstm_kernel(g_ref, whh_ref, out_ref, h_sc, c_sc, *, TS):
    # g_ref  : (TS, 4, B, HID) f32  precomputed input gates (x @ W_ih + b), gate-major
    # whh_ref: (4, HID, HID)   bf16 recurrent weights per gate (i, f, g, o)
    # out_ref: (TS, B, HID)    f32  hidden states
    # h_sc,c_sc: (B, HID)      f32  carried state
    @pl.when(pl.program_id(0) == 0)
    def _():
        h_sc[...] = jnp.zeros_like(h_sc)
        c_sc[...] = jnp.zeros_like(c_sc)

    whh = whh_ref[...]  # (4, HID, HID) bf16, held hot across the whole chunk

    def step(t, carry):
        h, c = carry
        g_in = g_ref[t]                      # (4, B, HID) f32
        hb = h.astype(jnp.bfloat16)
        # Four small independent MXU dots (pipeline back-to-back); only the
        # h dependency is sequential.
        zi = g_in[0] + jnp.dot(hb, whh[0], preferred_element_type=jnp.float32)
        zf = g_in[1] + jnp.dot(hb, whh[1], preferred_element_type=jnp.float32)
        zg = g_in[2] + jnp.dot(hb, whh[2], preferred_element_type=jnp.float32)
        zo = g_in[3] + jnp.dot(hb, whh[3], preferred_element_type=jnp.float32)
        i_g = jax.nn.sigmoid(zi)             # elementwise gate math kept f32 (v5e-safe)
        f_g = jax.nn.sigmoid(zf)
        g_g = jnp.tanh(zg)
        o_g = jax.nn.sigmoid(zo)
        c_new = f_g * c + i_g * g_g
        h_new = o_g * jnp.tanh(c_new)
        out_ref[t] = h_new
        return h_new, c_new

    h_f, c_f = lax.fori_loop(0, TS, step, (h_sc[...], c_sc[...]), unroll=True)
    h_sc[...] = h_f
    c_sc[...] = c_f


def lstm_recurrence(gates_sgbh, w_hh):
    # gates_sgbh: (S, 4, B, HID) f32 ; w_hh: (4, HID, HID) -> returns (S, B, HID)
    S, _, B, HID = gates_sgbh.shape
    whh = w_hh.astype(jnp.bfloat16)

    # Largest chunk (<= 32 steps, divides S) so short sequences run in 1 grid step.
    TS = S
    while TS > 1 and (S % TS or TS > 32):
        TS -= 1

    kernel = functools.partial(_lstm_kernel, TS=TS)
    return pl.pallas_call(
        kernel,
        out_shape=jax.ShapeDtypeStruct((S, B, HID), jnp.float32),
        grid_spec=pltpu.PrefetchScalarGridSpec(
            num_scalar_prefetch=0,
            grid=(S // TS,),
            in_specs=[
                pl.BlockSpec((TS, 4, B, HID), lambda i: (i, 0, 0, 0)),
                pl.BlockSpec((4, HID, HID), lambda i: (0, 0, 0)),   # grid-invariant
            ],
            out_specs=pl.BlockSpec((TS, B, HID), lambda i: (i, 0, 0)),
            scratch_shapes=[
                pltpu.VMEM((B, HID), jnp.float32),
                pltpu.VMEM((B, HID), jnp.float32),
            ],
        ),
        compiler_params=pltpu.CompilerParams(
            dimension_semantics=("arbitrary",),                     # time carry -> sequential
            vmem_limit_bytes=32 * 1024 * 1024,
        ),
    )(gates_sgbh, whh)


# ---------------------------------------------------------------------------
# Full forward: GptLipReadingModel.forward semantics (up to `return lstm_out`)
# ---------------------------------------------------------------------------
def gpt_lip_reading_forward(x, target_length, params):
    # x: (B, S, C, H, W)
    # TODO(synk): lstm_model's use of `target_length` is not defined in the snippet; it is ignored.
    B, S, C, H, W = x.shape
    frames = x.reshape(B * S, C, H, W)
    HID = params["w_hh"].shape[-1]

    # CNN + ReLU + mean-pool + hoisted LSTM input projection, fused in one kernel.
    gates_in = cnn_to_gates(
        frames, params["conv_w"], params["conv_b"], params["w_ih"], params["lstm_b"]
    )  # (B*S, 4*HID)

    # Gate-major, time-leading layout for the recurrence kernel (tiny transpose in XLA).
    gates = gates_in.reshape(B, S, 4, HID).transpose(1, 2, 0, 3)    # (S, 4, B, HID)
    h_seq = lstm_recurrence(gates, params["w_hh"])                  # (S, B, HID)
    return jnp.transpose(h_seq, (1, 0, 2))                          # (B, S, HID)


# ---------------------------------------------------------------------------
# Pure-JAX f32 reference (same synthetic CNN/LSTM definitions)
# ---------------------------------------------------------------------------
def reference_forward(x, params):
    B, S, C, H, W = x.shape
    N = B * S
    HID = params["w_hh"].shape[-1]
    hi = jax.lax.Precision.HIGHEST

    frames = jnp.transpose(x.reshape(N, C, H, W), (0, 2, 3, 1))
    xp = jnp.pad(frames, ((0, 0), (1, 1), (1, 1), (0, 0)))
    pats = jnp.stack(
        [xp[:, kh:kh + H, kw:kw + W, :] for kh in range(3) for kw in range(3)], axis=3
    ).reshape(N, H * W, 9 * C)
    w = params["conv_w"].reshape(9 * C, -1)
    feat = jnp.maximum(jnp.einsum("nrk,kc->nrc", pats, w, precision=hi) + params["conv_b"], 0.0)
    pooled = feat.mean(axis=1)                                              # (N, COUT)
    gates_in = jnp.dot(pooled, params["w_ih"], precision=hi) + params["lstm_b"]
    gates_in = gates_in.reshape(B, S, 4, HID)

    def step(carry, g_t):                                                   # g_t: (B, 4, HID)
        h, c = carry
        z = g_t + jnp.einsum("bh,ghk->bgk", h, params["w_hh"], precision=hi)
        i = jax.nn.sigmoid(z[:, 0])
        f = jax.nn.sigmoid(z[:, 1])
        g = jnp.tanh(z[:, 2])
        o = jax.nn.sigmoid(z[:, 3])
        c = f * c + i * g
        h = o * jnp.tanh(c)
        return (h, c), h

    init = (jnp.zeros((B, HID), jnp.float32), jnp.zeros((B, HID), jnp.float32))
    _, hs = jax.lax.scan(step, init, jnp.transpose(gates_in, (1, 0, 2, 3)))
    return jnp.transpose(hs, (1, 0, 2))                                     # (B, S, HID)


if __name__ == "__main__":
    # Small shapes consistent with the module's (B, S, C, H, W) input.
    B, S, C, H, W = 2, 8, 4, 16, 16
    COUT = 32      # CNN feature dim (LSTM input size)
    HID = 32       # LSTM hidden size (stand-in for the 256 implied by nn.Linear(256, 768))

    key = jax.random.PRNGKey(0)
    kx, kcw, kih, khh, kb = jax.random.split(key, 5)

    x = jax.random.normal(kx, (B, S, C, H, W), jnp.float32)
    params = {
        "conv_w": jax.random.normal(kcw, (3, 3, C, COUT), jnp.float32) * 0.1,
        "conv_b": jnp.zeros((COUT,), jnp.float32),
        "w_ih": jax.random.normal(kih, (COUT, 4 * HID), jnp.float32) * 0.1,
        "w_hh": jax.random.normal(khh, (4, HID, HID), jnp.float32) * 0.1,   # per-gate (i,f,g,o)
        "lstm_b": jax.random.normal(kb, (4 * HID,), jnp.float32) * 0.1,     # b_ih + b_hh combined
    }

    out = jax.jit(gpt_lip_reading_forward, static_argnums=(1,))(x, S, params)
    out = jax.block_until_ready(out)
    assert out.shape == (B, S, HID), out.shape
    assert jnp.all(jnp.isfinite(out))

    ref = reference_forward(x, params)
    max_err = float(jnp.max(jnp.abs(out - ref)))
    assert max_err < 5e-2, f"max abs error vs reference: {max_err}"
    print("KERNEL_OK")
</pallas_src>

<mosaic_0001>
module attributes {stable_mosaic.version = 11 : i64} {
  func.func @_cnn_gates_kernel(%arg0: i32, %arg1: memref<16x256x36xbf16, #tpu.memory_space<vmem>>, %arg2: memref<36x32xbf16, #tpu.memory_space<vmem>>, %arg3: memref<1x32xf32, #tpu.memory_space<vmem>>, %arg4: memref<32x128xbf16, #tpu.memory_space<vmem>>, %arg5: memref<1x128xf32, #tpu.memory_space<vmem>>, %arg6: memref<16x128xf32, #tpu.memory_space<vmem>>) attributes {dimension_semantics = [#tpu.dimension_semantics<parallel>], iteration_bounds = array<i64: 1>, scalar_prefetch = 0 : i64, scratch_operands = 0 : i64, tpu.core_type = #tpu.core_type<tc>, window_params = [{transform_indices = @transform_0, window_bounds = array<i64: 16, 256, 36>}, {pipeline_mode = #tpu.pipeline_mode<synchronous>, transform_indices = @transform_1, window_bounds = array<i64: 36, 32>}, {pipeline_mode = #tpu.pipeline_mode<synchronous>, transform_indices = @transform_2, window_bounds = array<i64: 1, 32>}, {pipeline_mode = #tpu.pipeline_mode<synchronous>, transform_indices = @transform_3, window_bounds = array<i64: 32, 128>}, {pipeline_mode = #tpu.pipeline_mode<synchronous>, transform_indices = @transform_4, window_bounds = array<i64: 1, 128>}, {transform_indices = @transform_5, window_bounds = array<i64: 16, 128>}]} {
    %c0 = arith.constant 0 : index
    %c0_0 = arith.constant 0 : index
    %c0_1 = arith.constant 0 : index
    %0 = vector.load %arg1[%c0, %c0_0, %c0_1] : memref<16x256x36xbf16, #tpu.memory_space<vmem>>, vector<16x256x36xbf16>
    %1 = vector.shape_cast %0 : vector<16x256x36xbf16> to vector<4096x36xbf16>
    %c0_2 = arith.constant 0 : index
    %c0_3 = arith.constant 0 : index
    %2 = vector.load %arg2[%c0_2, %c0_3] : memref<36x32xbf16, #tpu.memory_space<vmem>>, vector<36x32xbf16>
    %cst = arith.constant dense<0.000000e+00> : vector<4096x32xf32>
    %3 = tpu.matmul %1, %2, %cst {dimension_numbers = #tpu.dot_dimension_numbers<[1], [0], [0], [1], [0, 0, 1, 1], [], []>} : vector<4096x36xbf16>, vector<36x32xbf16>, vector<4096x32xf32> -> vector<4096x32xf32>
    %c0_4 = arith.constant 0 : index
    %c0_5 = arith.constant 0 : index
    %4 = vector.load %arg3[%c0_4, %c0_5] : memref<1x32xf32, #tpu.memory_space<vmem>>, vector<1x32xf32>
    %5 = vector.broadcast %4 : vector<1x32xf32> to vector<4096x32xf32>
    %6 = arith.addf %3, %5 : vector<4096x32xf32>
    %cst_6 = arith.constant 0.000000e+00 : f32
    %7 = vector.broadcast %cst_6 : f32 to vector<4096x32xf32>
    %8 = arith.maximumf %6, %7 : vector<4096x32xf32>
    %9 = vector.shape_cast %8 : vector<4096x32xf32> to vector<16x256x32xf32>
    %cst_7 = arith.constant dense<0.000000e+00> : vector<16x32xf32>
    %10 = vector.multi_reduction <add>, %9, %cst_7 [1] : vector<16x256x32xf32> to vector<16x32xf32>
    %cst_8 = arith.constant 2.560000e+02 : f32
    %11 = vector.broadcast %cst_8 : f32 to vector<16x32xf32>
    %12 = arith.divf %10, %11 : vector<16x32xf32>
    %13 = arith.truncf %12 : vector<16x32xf32> to vector<16x32xbf16>
    %c0_9 = arith.constant 0 : index
    %c0_10 = arith.constant 0 : index
    %14 = vector.load %arg4[%c0_9, %c0_10] : memref<32x128xbf16, #tpu.memory_space<vmem>>, vector<32x128xbf16>
    %cst_11 = arith.constant dense<0.000000e+00> : vector<16x128xf32>
    %15 = tpu.matmul %13, %14, %cst_11 {dimension_numbers = #tpu.dot_dimension_numbers<[1], [0], [0], [1], [0, 0, 1, 1], [], []>} : vector<16x32xbf16>, vector<32x128xbf16>, vector<16x128xf32> -> vector<16x128xf32>
    %c0_12 = arith.constant 0 : index
    %c0_13 = arith.constant 0 : index
    %16 = vector.load %arg5[%c0_12, %c0_13] : memref<1x128xf32, #tpu.memory_space<vmem>>, vector<1x128xf32>
    %17 = vector.broadcast %16 : vector<1x128xf32> to vector<16x128xf32>
    %18 = arith.addf %15, %17 : vector<16x128xf32>
    %c0_14 = arith.constant 0 : index
    %c0_15 = arith.constant 0 : index
    %19 = vector.load %arg6[%c0_14, %c0_15] : memref<16x128xf32, #tpu.memory_space<vmem>>, vector<16x128xf32>
    tpu.vector_store %arg6[%c0_14, %c0_15], %18 {strides = array<i32>} : memref<16x128xf32, #tpu.memory_space<vmem>>, vector<16x128xf32>,
    return
  }
  func.func @transform_0(%arg0: i32) -> (i32, i32, i32) {
    %c0_i32 = arith.constant 0 : i32
    %c0_i32_0 = arith.constant 0 : i32
    %c0_i32_1 = arith.constant 0 : i32
    return %arg0, %c0_i32, %c0_i32_0 : i32, i32, i32
  }
  func.func @transform_1(%arg0: i32) -> (i32, i32) {
    %c0_i32 = arith.constant 0 : i32
    %c0_i32_0 = arith.constant 0 : i32
    %c0_i32_1 = arith.constant 0 : i32
    return %c0_i32, %c0_i32_0 : i32, i32
  }
  func.func @transform_2(%arg0: i32) -> (i32, i32) {
    %c0_i32 = arith.constant 0 : i32
    %c0_i32_0 = arith.constant 0 : i32
    %c0_i32_1 = arith.constant 0 : i32
    return %c0_i32, %c0_i32_0 : i32, i32
  }
  func.func @transform_3(%arg0: i32) -> (i32, i32) {
    %c0_i32 = arith.constant 0 : i32
    %c0_i32_0 = arith.constant 0 : i32
    %c0_i32_1 = arith.constant 0 : i32
    return %c0_i32, %c0_i32_0 : i32, i32
  }
  func.func @transform_4(%arg0: i32) -> (i32, i32) {
    %c0_i32 = arith.constant 0 : i32
    %c0_i32_0 = arith.constant 0 : i32
    %c0_i32_1 = arith.constant 0 : i32
    return %c0_i32, %c0_i32_0 : i32, i32
  }
  func.func @transform_5(%arg0: i32) -> (i32, i32) {
    %c0_i32 = arith.constant 0 : i32
    %c0_i32_0 = arith.constant 0 : i32
    return %arg0, %c0_i32 : i32, i32
  }
}

module attributes {stable_mosaic.version = 11 : i64} {
  func.func @_lstm_kernel(%arg0: i32, %arg1: memref<8x4x2x32xf32, #tpu.memory_space<vmem>>, %arg2: memref<4x32x32xbf16, #tpu.memory_space<vmem>>, %arg3: memref<8x2x32xf32, #tpu.memory_space<vmem>>, %arg4: memref<2x32xf32, #tpu.memory_space<vmem>>, %arg5: memref<2x32xf32, #tpu.memory_space<vmem>>) attributes {dimension_semantics = [#tpu.dimension_semantics<arbitrary>], iteration_bounds = array<i64: 1>, scalar_prefetch = 0 : i64, scratch_operands = 2 : i64, tpu.core_type = #tpu.core_type<tc>, window_params = [{transform_indices = @transform_0, window_bounds = array<i64: 8, 4, 2, 32>}, {pipeline_mode = #tpu.pipeline_mode<synchronous>, transform_indices = @transform_1, window_bounds = array<i64: 4, 32, 32>}, {transform_indices = @transform_2, window_bounds = array<i64: 8, 2, 32>}]} {
    %c0_i32 = arith.constant 0 : i32
    %0 = arith.cmpi eq, %arg0, %c0_i32 : i32
    %1 = arith.extui %0 : i1 to i32
    %c0_i32_0 = arith.constant 0 : i32
    %2 = arith.cmpi ne, %1, %c0_i32_0 : i32
    scf.if %2 {
      %cst_107 = arith.constant 0.000000e+00 : f32
      %432 = vector.broadcast %cst_107 : f32 to vector<2x32xf32>
      %c0_108 = arith.constant 0 : index
      %c0_109 = arith.constant 0 : index
      %433 = vector.load %arg4[%c0_108, %c0_109] : memref<2x32xf32, #tpu.memory_space<vmem>>, vector<2x32xf32>
      tpu.vector_store %arg4[%c0_108, %c0_109], %432 {strides = array<i32>} : memref<2x32xf32, #tpu.memory_space<vmem>>, vector<2x32xf32>,
      %cst_110 = arith.constant 0.000000e+00 : f32
      %434 = vector.broadcast %cst_110 : f32 to vector<2x32xf32>
      %c0_111 = arith.constant 0 : index
      %c0_112 = arith.constant 0 : index
      %435 = vector.load %arg5[%c0_111, %c0_112] : memref<2x32xf32, #tpu.memory_space<vmem>>, vector<2x32xf32>
      tpu.vector_store %arg5[%c0_111, %c0_112], %434 {strides = array<i32>} : memref<2x32xf32, #tpu.memory_space<vmem>>, vector<2x32xf32>,
    } else {
    }
    %c0 = arith.constant 0 : index
    %c0_1 = arith.constant 0 : index
    %c0_2 = arith.constant 0 : index
    %3 = vector.load %arg2[%c0, %c0_1, %c0_2] : memref<4x32x32xbf16, #tpu.memory_space<vmem>>, vector<4x32x32xbf16>
    %c0_3 = arith.constant 0 : index
    %c0_4 = arith.constant 0 : index
    %4 = vector.load %arg4[%c0_3, %c0_4] : memref<2x32xf32, #tpu.memory_space<vmem>>, vector<2x32xf32>
    %c0_5 = arith.constant 0 : index
    %c0_6 = arith.constant 0 : index
    %5 = vector.load %arg5[%c0_5, %c0_6] : memref<2x32xf32, #tpu.memory_space<vmem>>, vector<2x32xf32>
    %c0_i32_7 = arith.constant 0 : i32
    %6 = arith.index_cast %c0_i32_7 : i32 to index
    %c0_8 = arith.constant 0 : index
    %c0_9 = arith.constant 0 : index
    %c0_10 = arith.constant 0 : index
    %7 = vector.load %arg1[%6, %c0_8, %c0_9, %c0_10] : memref<8x4x2x32xf32, #tpu.memory_space<vmem>>, vector<1x4x2x32xf32>
    %8 = vector.shape_cast %7 : vector<1x4x2x32xf32> to vector<4x2x32xf32>
    %9 = arith.truncf %4 : vector<2x32xf32> to vector<2x32xbf16>
    %10 = vector.extract_strided_slice %8 {offsets = [0, 0, 0], sizes = [1, 2, 32], strides = [1, 1, 1]} : vector<4x2x32xf32> to vector<1x2x32xf32>
    %11 = vector.shape_cast %10 : vector<1x2x32xf32> to vector<2x32xf32>
    %12 = vector.extract_strided_slice %3 {offsets = [0, 0, 0], sizes = [1, 32, 32], strides = [1, 1, 1]} : vector<4x32x32xbf16> to vector<1x32x32xbf16>
    %13 = vector.shape_cast %12 : vector<1x32x32xbf16> to vector<32x32xbf16>
    %cst = arith.constant dense<0.000000e+00> : vector<2x32xf32>
    %14 = tpu.matmul %9, %13, %cst {dimension_numbers = #tpu.dot_dimension_numbers<[1], [0], [0], [1], [0, 0, 1, 1], [], []>} : vector<2x32xbf16>, vector<32x32xbf16>, vector<2x32xf32> -> vector<2x32xf32>
    %15 = arith.addf %11, %14 : vector<2x32xf32>
    %16 = vector.extract_strided_slice %8 {offsets = [1, 0, 0], sizes = [1, 2, 32], strides = [1, 1, 1]} : vector<4x2x32xf32> to vector<1x2x32xf32>
    %17 = vector.shape_cast %16 : vector<1x2x32xf32> to vector<2x32xf32>
    %18 = vector.extract_strided_slice %3 {offsets = [1, 0, 0], sizes = [1, 32, 32], strides = [1, 1, 1]} : vector<4x32x32xbf16> to vector<1x32x32xbf16>
    %19 = vector.shape_cast %18 : vector<1x32x32xbf16> to vector<32x32xbf16>
    %cst_11 = arith.constant dense<0.000000e+00> : vector<2x32xf32>
    %20 = tpu.matmul %9, %19, %cst_11 {dimension_numbers = #tpu.dot_dimension_numbers<[1], [0], [0], [1], [0, 0, 1, 1], [], []>} : vector<2x32xbf16>, vector<32x32xbf16>, vector<2x32xf32> -> vector<2x32xf32>
    %21 = arith.addf %17, %20 : vector<2x32xf32>
    %22 = vector.extract_strided_slice %8 {offsets = [2, 0, 0], sizes = [1, 2, 32], strides = [1, 1, 1]} : vector<4x2x32xf32> to vector<1x2x32xf32>
    %23 = vector.shape_cast %22 : vector<1x2x32xf32> to vector<2x32xf32>
    %24 = vector.extract_strided_slice %3 {offsets = [2, 0, 0], sizes = [1, 32, 32], strides = [1, 1, 1]} : vector<4x32x32xbf16> to vector<1x32x32xbf16>
    %25 = vector.shape_cast %24 : vector<1x32x32xbf16> to vector<32x32xbf16>
    %cst_12 = arith.constant dense<0.000000e+00> : vector<2x32xf32>
    %26 = tpu.matmul %9, %25, %cst_12 {dimension_numbers = #tpu.dot_dimension_numbers<[1], [0], [0], [1], [0, 0, 1, 1], [], []>} : vector<2x32xbf16>, vector<32x32xbf16>, vector<2x32xf32> -> vector<2x32xf32>
    %27 = arith.addf %23, %26 : vector<2x32xf32>
    %28 = vector.extract_strided_slice %8 {offsets = [3, 0, 0], sizes = [1, 2, 32], strides = [1, 1, 1]} : vector<4x2x32xf32> to vector<1x2x32xf32>
    %29 = vector.shape_cast %28 : vector<1x2x32xf32> to vector<2x32xf32>
    %30 = vector.extract_strided_slice %3 {offsets = [3, 0, 0], sizes = [1, 32, 32], strides = [1, 1, 1]} : vector<4x32x32xbf16> to vector<1x32x32xbf16>
    %31 = vector.shape_cast %30 : vector<1x32x32xbf16> to vector<32x32xbf16>
    %cst_13 = arith.constant dense<0.000000e+00> : vector<2x32xf32>
    %32 = tpu.matmul %9, %31, %cst_13 {dimension_numbers = #tpu.dot_dimension_numbers<[1], [0], [0], [1], [0, 0, 1, 1], [], []>} : vector<2x32xbf16>, vector<32x32xbf16>, vector<2x32xf32> -> vector<2x32xf32>
    %33 = arith.addf %29, %32 : vector<2x32xf32>
    %34 = arith.negf %15 : vector<2x32xf32>
    %35 = math.exp %34 : vector<2x32xf32>
    %cst_14 = arith.constant 1.000000e+00 : f32
    %36 = vector.broadcast %cst_14 : f32 to vector<2x32xf32>
    %37 = arith.addf %36, %35 : vector<2x32xf32>
    %38 = arith.divf %36, %37 : vector<2x32xf32>
    %39 = arith.negf %21 : vector<2x32xf32>
    %40 = math.exp %39 : vector<2x32xf32>
    %cst_15 = arith.constant 1.000000e+00 : f32
    %41 = vector.broadcast %cst_15 : f32 to vector<2x32xf32>
    %42 = arith.addf %41, %40 : vector<2x32xf32>
    %43 = arith.divf %41, %42 : vector<2x32xf32>
    %44 = math.tanh %27 : vector<2x32xf32>
    %45 = arith.negf %33 : vector<2x32xf32>
    %46 = math.exp %45 : vector<2x32xf32>
    %cst_16 = arith.constant 1.000000e+00 : f32
    %47 = vector.broadcast %cst_16 : f32 to vector<2x32xf32>
    %48 = arith.addf %47, %46 : vector<2x32xf32>
    %49 = arith.divf %47, %48 : vector<2x32xf32>
    %50 = arith.mulf %43, %5 : vector<2x32xf32>
    %51 = arith.mulf %38, %44 : vector<2x32xf32>
    %52 = arith.addf %50, %51 : vector<2x32xf32>
    %53 = math.tanh %52 : vector<2x32xf32>
    %54 = arith.mulf %49, %53 : vector<2x32xf32>
    %55 = arith.index_cast %c0_i32_7 : i32 to index
    %c0_17 = arith.constant 0 : index
    %c0_18 = arith.constant 0 : index
    %56 = vector.load %arg3[%55, %c0_17, %c0_18] : memref<8x2x32xf32, #tpu.memory_space<vmem>>, vector<1x2x32xf32>
    %57 = vector.shape_cast %56 : vector<1x2x32xf32> to vector<2x32xf32>
    %58 = vector.shape_cast %54 : vector<2x32xf32> to vector<1x2x32xf32>
    tpu.vector_store %arg3[%55, %c0_17, %c0_18], %58 {strides = array<i32>} : memref<8x2x32xf32, #tpu.memory_space<vmem>>, vector<1x2x32xf32>,
    %c1_i32 = arith.constant 1 : i32
    %59 = arith.index_cast %c1_i32 : i32 to index
    %c0_19 = arith.constant 0 : index
    %c0_20 = arith.constant 0 : index
    %c0_21 = arith.constant 0 : index
    %60 = vector.load %arg1[%59, %c0_19, %c0_20, %c0_21] : memref<8x4x2x32xf32, #tpu.memory_space<vmem>>, vector<1x4x2x32xf32>
    %61 = vector.shape_cast %60 : vector<1x4x2x32xf32> to vector<4x2x32xf32>
    %62 = arith.truncf %54 : vector<2x32xf32> to vector<2x32xbf16>
    %63 = vector.extract_strided_slice %61 {offsets = [0, 0, 0], sizes = [1, 2, 32], strides = [1, 1, 1]} : vector<4x2x32xf32> to vector<1x2x32xf32>
    %64 = vector.shape_cast %63 : vector<1x2x32xf32> to vector<2x32xf32>
    %65 = vector.extract_strided_slice %3 {offsets = [0, 0, 0], sizes = [1, 32, 32], strides = [1, 1, 1]} : vector<4x32x32xbf16> to vector<1x32x32xbf16>
    %66 = vector.shape_cast %65 : vector<1x32x32xbf16> to vector<32x32xbf16>
    %cst_22 = arith.constant dense<0.000000e+00> : vector<2x32xf32>
    %67 = tpu.matmul %62, %66, %cst_22 {dimension_numbers = #tpu.dot_dimension_numbers<[1], [0], [0], [1], [0, 0, 1, 1], [], []>} : vector<2x32xbf16>, vector<32x32xbf16>, vector<2x32xf32> -> vector<2x32xf32>
    %68 = arith.addf %64, %67 : vector<2x32xf32>
    %69 = vector.extract_strided_slice %61 {offsets = [1, 0, 0], sizes = [1, 2, 32], strides = [1, 1, 1]} : vector<4x2x32xf32> to vector<1x2x32xf32>
    %70 = vector.shape_cast %69 : vector<1x2x32xf32> to vector<2x32xf32>
    %71 = vector.extract_strided_slice %3 {offsets = [1, 0, 0], sizes = [1, 32, 32], strides = [1, 1, 1]} : vector<4x32x32xbf16> to vector<1x32x32xbf16>
    %72 = vector.shape_cast %71 : vector<1x32x32xbf16> to vector<32x32xbf16>
    %cst_23 = arith.constant dense<0.000000e+00> : vector<2x32xf32>
    %73 = tpu.matmul %62, %72, %cst_23 {dimension_numbers = #tpu.dot_dimension_numbers<[1], [0], [0], [1], [0, 0, 1, 1], [], []>} : vector<2x32xbf16>, vector<32x32xbf16>, vector<2x32xf32> -> vector<2x32xf32>
    %74 = arith.addf %70, %73 : vector<2x32xf32>
    %75 = vector.extract_strided_slice %61 {offsets = [2, 0, 0], sizes = [1, 2, 32], strides = [1, 1, 1]} : vector<4x2x32xf32> to vector<1x2x32xf32>
    %76 = vector.shape_cast %75 : vector<1x2x32xf32> to vector<2x32xf32>
    %77 = vector.extract_strided_slice %3 {offsets = [2, 0, 0], sizes = [1, 32, 32], strides = [1, 1, 1]} : vector<4x32x32xbf16> to vector<1x32x32xbf16>
    %78 = vector.shape_cast %77 : vector<1x32x32xbf16> to vector<32x32xbf16>
    %cst_24 = arith.constant dense<0.000000e+00> : vector<2x32xf32>
    %79 = tpu.matmul %62, %78, %cst_24 {dimension_numbers = #tpu.dot_dimension_numbers<[1], [0], [0], [1], [0, 0, 1, 1], [], []>} : vector<2x32xbf16>, vector<32x32xbf16>, vector<2x32xf32> -> vector<2x32xf32>
    %80 = arith.addf %76, %79 : vector<2x32xf32>
    %81 = vector.extract_strided_slice %61 {offsets = [3, 0, 0], sizes = [1, 2, 32], strides = [1, 1, 1]} : vector<4x2x32xf32> to vector<1x2x32xf32>
    %82 = vector.shape_cast %81 : vector<1x2x32xf32> to vector<2x32xf32>
    %83 = vector.extract_strided_slice %3 {offsets = [3, 0, 0], sizes = [1, 32, 32], strides = [1, 1, 1]} : vector<4x32x32xbf16> to vector<1x32x32xbf16>
    %84 = vector.shape_cast %83 : vector<1x32x32xbf16> to vector<32x32xbf16>
    %cst_25 = arith.constant dense<0.000000e+00> : vector<2x32xf32>
    %85 = tpu.matmul %62, %84, %cst_25 {dimension_numbers = #tpu.dot_dimension_numbers<[1], [0], [0], [1], [0, 0, 1, 1], [], []>} : vector<2x32xbf16>, vector<32x32xbf16>, vector<2x32xf32> -> vector<2x32xf32>
    %86 = arith.addf %82, %85 : vector<2x32xf32>
    %87 = arith.negf %68 : vector<2x32xf32>
    %88 = math.exp %87 : vector<2x32xf32>
    %cst_26 = arith.constant 1.000000e+00 : f32
    %89 = vector.broadcast %cst_26 : f32 to vector<2x32xf32>
    %90 = arith.addf %89, %88 : vector<2x32xf32>
    %91 = arith.divf %89, %90 : vector<2x32xf32>
    %92 = arith.negf %74 : vector<2x32xf32>
    %93 = math.exp %92 : vector<2x32xf32>
    %cst_27 = arith.constant 1.000000e+00 : f32
    %94 = vector.broadcast %cst_27 : f32 to vector<2x32xf32>
    %95 = arith.addf %94, %93 : vector<2x32xf32>
    %96 = arith.divf %94, %95 : vector<2x32xf32>
    %97 = math.tanh %80 : vector<2x32xf32>
    %98 = arith.negf %86 : vector<2x32xf32>
    %99 = math.exp %98 : vector<2x32xf32>
    %cst_28 = arith.constant 1.000000e+00 : f32
    %100 = vector.broadcast %cst_28 : f32 to vector<2x32xf32>
    %101 = arith.addf %100, %99 : vector<2x32xf32>
    %102 = arith.divf %100, %101 : vector<2x32xf32>
    %103 = arith.mulf %96, %52 : vector<2x32xf32>
    %104 = arith.mulf %91, %97 : vector<2x32xf32>
    %105 = arith.addf %103, %104 : vector<2x32xf32>
    %106 = math.tanh %105 : vector<2x32xf32>
    %107 = arith.mulf %102, %106 : vector<2x32xf32>
    %108 = arith.index_cast %c1_i32 : i32 to index
    %c0_29 = arith.constant 0 : index
    %c0_30 = arith.constant 0 : index
    %109 = vector.load %arg3[%108, %c0_29, %c0_30] : memref<8x2x32xf32, #tpu.memory_space<vmem>>, vector<1x2x32xf32>
    %110 = vector.shape_cast %109 : vector<1x2x32xf32> to vector<2x32xf32>
    %111 = vector.shape_cast %107 : vector<2x32xf32> to vector<1x2x32xf32>
    tpu.vector_store %arg3[%108, %c0_29, %c0_30], %111 {strides = array<i32>} : memref<8x2x32xf32, #tpu.memory_space<vmem>>, vector<1x2x32xf32>,
    %c2_i32 = arith.constant 2 : i32
    %112 = arith.index_cast %c2_i32 : i32 to index
    %c0_31 = arith.constant 0 : index
    %c0_32 = arith.constant 0 : index
    %c0_33 = arith.constant 0 : index
    %113 = vector.load %arg1[%112, %c0_31, %c0_32, %c0_33] : memref<8x4x2x32xf32, #tpu.memory_space<vmem>>, vector<1x4x2x32xf32>
    %114 = vector.shape_cast %113 : vector<1x4x2x32xf32> to vector<4x2x32xf32>
    %115 = arith.truncf %107 : vector<2x32xf32> to vector<2x32xbf16>
    %116 = vector.extract_strided_slice %114 {offsets = [0, 0, 0], sizes = [1, 2, 32], strides = [1, 1, 1]} : vector<4x2x32xf32> to vector<1x2x32xf32>
    %117 = vector.shape_cast %116 : vector<1x2x32xf32> to vector<2x32xf32>
    %118 = vector.extract_strided_slice %3 {offsets = [0, 0, 0], sizes = [1, 32, 32], strides = [1, 1, 1]} : vector<4x32x32xbf16> to vector<1x32x32xbf16>
    %119 = vector.shape_cast %118 : vector<1x32x32xbf16> to vector<32x32xbf16>
    %cst_34 = arith.constant dense<0.000000e+00> : vector<2x32xf32>
    %120 = tpu.matmul %115, %119, %cst_34 {dimension_numbers = #tpu.dot_dimension_numbers<[1], [0], [0], [1], [0, 0, 1, 1], [], []>} : vector<2x32xbf16>, vector<32x32xbf16>, vector<2x32xf32> -> vector<2x32xf32>
    %121 = arith.addf %117, %120 : vector<2x32xf32>
    %122 = vector.extract_strided_slice %114 {offsets = [1, 0, 0], sizes = [1, 2, 32], strides = [1, 1, 1]} : vector<4x2x32xf32> to vector<1x2x32xf32>
    %123 = vector.shape_cast %122 : vector<1x2x32xf32> to vector<2x32xf32>
    %124 = vector.extract_strided_slice %3 {offsets = [1, 0, 0], sizes = [1, 32, 32], strides = [1, 1, 1]} : vector<4x32x32xbf16> to vector<1x32x32xbf16>
    %125 = vector.shape_cast %124 : vector<1x32x32xbf16> to vector<32x32xbf16>
    %cst_35 = arith.constant dense<0.000000e+00> : vector<2x32xf32>
    %126 = tpu.matmul %115, %125, %cst_35 {dimension_numbers = #tpu.dot_dimension_numbers<[1], [0], [0], [1], [0, 0, 1, 1], [], []>} : vector<2x32xbf16>, vector<32x32xbf16>, vector<2x32xf32> -> vector<2x32xf32>
    %127 = arith.addf %123, %126 : vector<2x32xf32>
    %128 = vector.extract_strided_slice %114 {offsets = [2, 0, 0], sizes = [1, 2, 32], strides = [1, 1, 1]} : vector<4x2x32xf32> to vector<1x2x32xf32>
    %129 = vector.shape_cast %128 : vector<1x2x32xf32> to vector<2x32xf32>
    %130 = vector.extract_strided_slice %3 {offsets = [2, 0, 0], sizes = [1, 32, 32], strides = [1, 1, 1]} : vector<4x32x32xbf16> to vector<1x32x32xbf16>
    %131 = vector.shape_cast %130 : vector<1x32x32xbf16> to vector<32x32xbf16>
    %cst_36 = arith.constant dense<0.000000e+00> : vector<2x32xf32>
    %132 = tpu.matmul %115, %131, %cst_36 {dimension_numbers = #tpu.dot_dimension_numbers<[1], [0], [0], [1], [0, 0, 1, 1], [], []>} : vector<2x32xbf16>, vector<32x32xbf16>, vector<2x32xf32> -> vector<2x32xf32>
    %133 = arith.addf %129, %132 : vector<2x32xf32>
    %134 = vector.extract_strided_slice %114 {offsets = [3, 0, 0], sizes = [1, 2, 32], strides = [1, 1, 1]} : vector<4x2x32xf32> to vector<1x2x32xf32>
    %135 = vector.shape_cast %134 : vector<1x2x32xf32> to vector<2x32xf32>
    %136 = vector.extract_strided_slice %3 {offsets = [3, 0, 0], sizes = [1, 32, 32], strides = [1, 1, 1]} : vector<4x32x32xbf16> to vector<1x32x32xbf16>
    %137 = vector.shape_cast %136 : vector<1x32x32xbf16> to vector<32x32xbf16>
    %cst_37 = arith.constant dense<0.000000e+00> : vector<2x32xf32>
    %138 = tpu.matmul %115, %137, %cst_37 {dimension_numbers = #tpu.dot_dimension_numbers<[1], [0], [0], [1], [0, 0, 1, 1], [], []>} : vector<2x32xbf16>, vector<32x32xbf16>, vector<2x32xf32> -> vector<2x32xf32>
    %139 = arith.addf %135, %138 : vector<2x32xf32>
    %140 = arith.negf %121 : vector<2x32xf32>
    %141 = math.exp %140 : vector<2x32xf32>
    %cst_38 = arith.constant 1.000000e+00 : f32
    %142 = vector.broadcast %cst_38 : f32 to vector<2x32xf32>
    %143 = arith.addf %142, %141 : vector<2x32xf32>
    %144 = arith.divf %142, %143 : vector<2x32xf32>
    %145 = arith.negf %127 : vector<2x32xf32>
    %146 = math.exp %145 : vector<2x32xf32>
    %cst_39 = arith.constant 1.000000e+00 : f32
    %147 = vector.broadcast %cst_39 : f32 to vector<2x32xf32>
    %148 = arith.addf %147, %146 : vector<2x32xf32>
    %149 = arith.divf %147, %148 : vector<2x32xf32>
    %150 = math.tanh %133 : vector<2x32xf32>
    %151 = arith.negf %139 : vector<2x32xf32>
    %152 = math.exp %151 : vector<2x32xf32>
    %cst_40 = arith.constant 1.000000e+00 : f32
    %153 = vector.broadcast %cst_40 : f32 to vector<2x32xf32>
    %154 = arith.addf %153, %152 : vector<2x32xf32>
    %155 = arith.divf %153, %154 : vector<2x32xf32>
    %156 = arith.mulf %149, %105 : vector<2x32xf32>
    %157 = arith.mulf %144, %150 : vector<2x32xf32>
    %158 = arith.addf %156, %157 : vector<2x32xf32>
    %159 = math.tanh %158 : vector<2x32xf32>
    %160 = arith.mulf %155, %159 : vector<2x32xf32>
    %161 = arith.index_cast %c2_i32 : i32 to index
    %c0_41 = arith.constant 0 : index
    %c0_42 = arith.constant 0 : index
    %162 = vector.load %arg3[%161, %c0_41, %c0_42] : memref<8x2x32xf32, #tpu.memory_space<vmem>>, vector<1x2x32xf32>
    %163 = vector.shape_cast %162 : vector<1x2x32xf32> to vector<2x32xf32>
    %164 = vector.shape_cast %160 : vector<2x32xf32> to vector<1x2x32xf32>
    tpu.vector_store %arg3[%161, %c0_41, %c0_42], %164 {strides = array<i32>} : memref<8x2x32xf32, #tpu.memory_space<vmem>>, vector<1x2x32xf32>,
    %c3_i32 = arith.constant 3 : i32
    %165 = arith.index_cast %c3_i32 : i32 to index
    %c0_43 = arith.constant 0 : index
    %c0_44 = arith.constant 0 : index
    %c0_45 = arith.constant 0 : index
    %166 = vector.load %arg1[%165, %c0_43, %c0_44, %c0_45] : memref<8x4x2x32xf32, #tpu.memory_space<vmem>>, vector<1x4x2x32xf32>
    %167 = vector.shape_cast %166 : vector<1x4x2x32xf32> to vector<4x2x32xf32>
    %168 = arith.truncf %160 : vector<2x32xf32> to vector<2x32xbf16>
    %169 = vector.extract_strided_slice %167 {offsets = [0, 0, 0], sizes = [1, 2, 32], strides = [1, 1, 1]} : vector<4x2x32xf32> to vector<1x2x32xf32>
    %170 = vector.shape_cast %169 : vector<1x2x32xf32> to vector<2x32xf32>
    %171 = vector.extract_strided_slice %3 {offsets = [0, 0, 0], sizes = [1, 32, 32], strides = [1, 1, 1]} : vector<4x32x32xbf16> to vector<1x32x32xbf16>
    %172 = vector.shape_cast %171 : vector<1x32x32xbf16> to vector<32x32xbf16>
    %cst_46 = arith.constant dense<0.000000e+00> : vector<2x32xf32>
    %173 = tpu.matmul %168, %172, %cst_46 {dimension_numbers = #tpu.dot_dimension_numbers<[1], [0], [0], [1], [0, 0, 1, 1], [], []>} : vector<2x32xbf16>, vector<32x32xbf16>, vector<2x32xf32> -> vector<2x32xf32>
    %174 = arith.addf %170, %173 : vector<2x32xf32>
    %175 = vector.extract_strided_slice %167 {offsets = [1, 0, 0], sizes = [1, 2, 32], strides = [1, 1, 1]} : vector<4x2x32xf32> to vector<1x2x32xf32>
    %176 = vector.shape_cast %175 : vector<1x2x32xf32> to vector<2x32xf32>
    %177 = vector.extract_strided_slice %3 {offsets = [1, 0, 0], sizes = [1, 32, 32], strides = [1, 1, 1]} : vector<4x32x32xbf16> to vector<1x32x32xbf16>
    %178 = vector.shape_cast %177 : vector<1x32x32xbf16> to vector<32x32xbf16>
    %cst_47 = arith.constant dense<0.000000e+00> : vector<2x32xf32>
    %179 = tpu.matmul %168, %178, %cst_47 {dimension_numbers = #tpu.dot_dimension_numbers<[1], [0], [0], [1], [0, 0, 1, 1], [], []>} : vector<2x32xbf16>, vector<32x32xbf16>, vector<2x32xf32> -> vector<2x32xf32>
    %180 = arith.addf %176, %179 : vector<2x32xf32>
    %181 = vector.extract_strided_slice %167 {offsets = [2, 0, 0], sizes = [1, 2, 32], strides = [1, 1, 1]} : vector<4x2x32xf32> to vector<1x2x32xf32>
    %182 = vector.shape_cast %181 : vector<1x2x32xf32> to vector<2x32xf32>
    %183 = vector.extract_strided_slice %3 {offsets = [2, 0, 0], sizes = [1, 32, 32], strides = [1, 1, 1]} : vector<4x32x32xbf16> to vector<1x32x32xbf16>
    %184 = vector.shape_cast %183 : vector<1x32x32xbf16> to vector<32x32xbf16>
    %cst_48 = arith.constant dense<0.000000e+00> : vector<2x32xf32>
    %185 = tpu.matmul %168, %184, %cst_48 {dimension_numbers = #tpu.dot_dimension_numbers<[1], [0], [0], [1], [0, 0, 1, 1], [], []>} : vector<2x32xbf16>, vector<32x32xbf16>, vector<2x32xf32> -> vector<2x32xf32>
    %186 = arith.addf %182, %185 : vector<2x32xf32>
    %187 = vector.extract_strided_slice %167 {offsets = [3, 0, 0], sizes = [1, 2, 32], strides = [1, 1, 1]} : vector<4x2x32xf32> to vector<1x2x32xf32>
    %188 = vector.shape_cast %187 : vector<1x2x32xf32> to vector<2x32xf32>
    %189 = vector.extract_strided_slice %3 {offsets = [3, 0, 0], sizes = [1, 32, 32], strides = [1, 1, 1]} : vector<4x32x32xbf16> to vector<1x32x32xbf16>
    %190 = vector.shape_cast %189 : vector<1x32x32xbf16> to vector<32x32xbf16>
    %cst_49 = arith.constant dense<0.000000e+00> : vector<2x32xf32>
    %191 = tpu.matmul %168, %190, %cst_49 {dimension_numbers = #tpu.dot_dimension_numbers<[1], [0], [0], [1], [0, 0, 1, 1], [], []>} : vector<2x32xbf16>, vector<32x32xbf16>, vector<2x32xf32> -> vector<2x32xf32>
    %192 = arith.addf %188, %191 : vector<2x32xf32>
    %193 = arith.negf %174 : vector<2x32xf32>
    %194 = math.exp %193 : vector<2x32xf32>
    %cst_50 = arith.constant 1.000000e+00 : f32
    %195 = vector.broadcast %cst_50 : f32 to vector<2x32xf32>
    %196 = arith.addf %195, %194 : vector<2x32xf32>
    %197 = arith.divf %195, %196 : vector<2x32xf32>
    %198 = arith.negf %180 : vector<2x32xf32>
    %199 = math.exp %198 : vector<2x32xf32>
    %cst_51 = arith.constant 1.000000e+00 : f32
    %200 = vector.broadcast %cst_51 : f32 to vector<2x32xf32>
    %201 = arith.addf %200, %199 : vector<2x32xf32>
    %202 = arith.divf %200, %201 : vector<2x32xf32>
    %203 = math.tanh %186 : vector<2x32xf32>
    %204 = arith.negf %192 : vector<2x32xf32>
    %205 = math.exp %204 : vector<2x32xf32>
    %cst_52 = arith.constant 1.000000e+00 : f32
    %206 = vector.broadcast %cst_52 : f32 to vector<2x32xf32>
    %207 = arith.addf %206, %205 : vector<2x32xf32>
    %208 = arith.divf %206, %207 : vector<2x32xf32>
    %209 = arith.mulf %202, %158 : vector<2x32xf32>
    %210 = arith.mulf %197, %203 : vector<2x32xf32>
    %211 = arith.addf %209, %210 : vector<2x32xf32>
    %212 = math.tanh %211 : vector<2x32xf32>
    %213 = arith.mulf %208, %212 : vector<2x32xf32>
    %214 = arith.index_cast %c3_i32 : i32 to index
    %c0_53 = arith.constant 0 : index
    %c0_54 = arith.constant 0 : index
    %215 = vector.load %arg3[%214, %c0_53, %c0_54] : memref<8x2x32xf32, #tpu.memory_space<vmem>>, vector<1x2x32xf32>
    %216 = vector.shape_cast %215 : vector<1x2x32xf32> to vector<2x32xf32>
    %217 = vector.shape_cast %213 : vector<2x32xf32> to vector<1x2x32xf32>
    tpu.vector_store %arg3[%214, %c0_53, %c0_54], %217 {strides = array<i32>} : memref<8x2x32xf32, #tpu.memory_space<vmem>>, vector<1x2x32xf32>,
    %c4_i32 = arith.constant 4 : i32
    %218 = arith.index_cast %c4_i32 : i32 to index
    %c0_55 = arith.constant 0 : index
    %c0_56 = arith.constant 0 : index
    %c0_57 = arith.constant 0 : index
    %219 = vector.load %arg1[%218, %c0_55, %c0_56, %c0_57] : memref<8x4x2x32xf32, #tpu.memory_space<vmem>>, vector<1x4x2x32xf32>
    %220 = vector.shape_cast %219 : vector<1x4x2x32xf32> to vector<4x2x32xf32>
    %221 = arith.truncf %213 : vector<2x32xf32> to vector<2x32xbf16>
    %222 = vector.extract_strided_slice %220 {offsets = [0, 0, 0], sizes = [1, 2, 32], strides = [1, 1, 1]} : vector<4x2x32xf32> to vector<1x2x32xf32>
    %223 = vector.shape_cast %222 : vector<1x2x32xf32> to vector<2x32xf32>
    %224 = vector.extract_strided_slice %3 {offsets = [0, 0, 0], sizes = [1, 32, 32], strides = [1, 1, 1]} : vector<4x32x32xbf16> to vector<1x32x32xbf16>
    %225 = vector.shape_cast %224 : vector<1x32x32xbf16> to vector<32x32xbf16>
    %cst_58 = arith.constant dense<0.000000e+00> : vector<2x32xf32>
    %226 = tpu.matmul %221, %225, %cst_58 {dimension_numbers = #tpu.dot_dimension_numbers<[1], [0], [0], [1], [0, 0, 1, 1], [], []>} : vector<2x32xbf16>, vector<32x32xbf16>, vector<2x32xf32> -> vector<2x32xf32>
    %227 = arith.addf %223, %226 : vector<2x32xf32>
    %228 = vector.extract_strided_slice %220 {offsets = [1, 0, 0], sizes = [1, 2, 32], strides = [1, 1, 1]} : vector<4x2x32xf32> to vector<1x2x32xf32>
    %229 = vector.shape_cast %228 : vector<1x2x32xf32> to vector<2x32xf32>
    %230 = vector.extract_strided_slice %3 {offsets = [1, 0, 0], sizes = [1, 32, 32], strides = [1, 1, 1]} : vector<4x32x32xbf16> to vector<1x32x32xbf16>
    %231 = vector.shape_cast %230 : vector<1x32x32xbf16> to vector<32x32xbf16>
    %cst_59 = arith.constant dense<0.000000e+00> : vector<2x32xf32>
    %232 = tpu.matmul %221, %231, %cst_59 {dimension_numbers = #tpu.dot_dimension_numbers<[1], [0], [0], [1], [0, 0, 1, 1], [], []>} : vector<2x32xbf16>, vector<32x32xbf16>, vector<2x32xf32> -> vector<2x32xf32>
    %233 = arith.addf %229, %232 : vector<2x32xf32>
    %234 = vector.extract_strided_slice %220 {offsets = [2, 0, 0], sizes = [1, 2, 32], strides = [1, 1, 1]} : vector<4x2x32xf32> to vector<1x2x32xf32>
    %235 = vector.shape_cast %234 : vector<1x2x32xf32> to vector<2x32xf32>
    %236 = vector.extract_strided_slice %3 {offsets = [2, 0, 0], sizes = [1, 32, 32], strides = [1, 1, 1]} : vector<4x32x32xbf16> to vector<1x32x32xbf16>
    %237 = vector.shape_cast %236 : vector<1x32x32xbf16> to vector<32x32xbf16>
    %cst_60 = arith.constant dense<0.000000e+00> : vector<2x32xf32>
    %238 = tpu.matmul %221, %237, %cst_60 {dimension_numbers = #tpu.dot_dimension_numbers<[1], [0], [0], [1], [0, 0, 1, 1], [], []>} : vector<2x32xbf16>, vector<32x32xbf16>, vector<2x32xf32> -> vector<2x32xf32>
    %239 = arith.addf %235, %238 : vector<2x32xf32>
    %240 = vector.extract_strided_slice %220 {offsets = [3, 0, 0], sizes = [1, 2, 32], strides = [1, 1, 1]} : vector<4x2x32xf32> to vector<1x2x32xf32>
    %241 = vector.shape_cast %240 : vector<1x2x32xf32> to vector<2x32xf32>
    %242 = vector.extract_strided_slice %3 {offsets = [3, 0, 0], sizes = [1, 32, 32], strides = [1, 1, 1]} : vector<4x32x32xbf16> to vector<1x32x32xbf16>
    %243 = vector.shape_cast %242 : vector<1x32x32xbf16> to vector<32x32xbf16>
    %cst_61 = arith.constant dense<0.000000e+00> : vector<2x32xf32>
    %244 = tpu.matmul %221, %243, %cst_61 {dimension_numbers = #tpu.dot_dimension_numbers<[1], [0], [0], [1], [0, 0, 1, 1], [], []>} : vector<2x32xbf16>, vector<32x32xbf16>, vector<2x32xf32> -> vector<2x32xf32>
    %245 = arith.addf %241, %244 : vector<2x32xf32>
    %246 = arith.negf %227 : vector<2x32xf32>
    %247 = math.exp %246 : vector<2x32xf32>
    %cst_62 = arith.constant 1.000000e+00 : f32
    %248 = vector.broadcast %cst_62 : f32 to vector<2x32xf32>
    %249 = arith.addf %248, %247 : vector<2x32xf32>
    %250 = arith.divf %248, %249 : vector<2x32xf32>
    %251 = arith.negf %233 : vector<2x32xf32>
    %252 = math.exp %251 : vector<2x32xf32>
    %cst_63 = arith.constant 1.000000e+00 : f32
    %253 = vector.broadcast %cst_63 : f32 to vector<2x32xf32>
    %254 = arith.addf %253, %252 : vector<2x32xf32>
    %255 = arith.divf %253, %254 : vector<2x32xf32>
    %256 = math.tanh %239 : vector<2x32xf32>
    %257 = arith.negf %245 : vector<2x32xf32>
    %258 = math.exp %257 : vector<2x32xf32>
    %cst_64 = arith.constant 1.000000e+00 : f32
    %259 = vector.broadcast %cst_64 : f32 to vector<2x32xf32>
    %260 = arith.addf %259, %258 : vector<2x32xf32>
    %261 = arith.divf %259, %260 : vector<2x32xf32>
    %262 = arith.mulf %255, %211 : vector<2x32xf32>
    %263 = arith.mulf %250, %256 : vector<2x32xf32>
    %264 = arith.addf %262, %263 : vector<2x32xf32>
    %265 = math.tanh %264 : vector<2x32xf32>
    %266 = arith.mulf %261, %265 : vector<2x32xf32>
    %267 = arith.index_cast %c4_i32 : i32 to index
    %c0_65 = arith.constant 0 : index
    %c0_66 = arith.constant 0 : index
    %268 = vector.load %arg3[%267, %c0_65, %c0_66] : memref<8x2x32xf32, #tpu.memory_space<vmem>>, vector<1x2x32xf32>
    %269 = vector.shape_cast %268 : vector<1x2x32xf32> to vector<2x32xf32>
    %270 = vector.shape_cast %266 : vector<2x32xf32> to vector<1x2x32xf32>
    tpu.vector_store %arg3[%267, %c0_65, %c0_66], %270 {strides = array<i32>} : memref<8x2x32xf32, #tpu.memory_space<vmem>>, vector<1x2x32xf32>,
    %c5_i32 = arith.constant 5 : i32
    %271 = arith.index_cast %c5_i32 : i32 to index
    %c0_67 = arith.constant 0 : index
    %c0_68 = arith.constant 0 : index
    %c0_69 = arith.constant 0 : index
    %272 = vector.load %arg1[%271, %c0_67, %c0_68, %c0_69] : memref<8x4x2x32xf32, #tpu.memory_space<vmem>>, vector<1x4x2x32xf32>
    %273 = vector.shape_cast %272 : vector<1x4x2x32xf32> to vector<4x2x32xf32>
    %274 = arith.truncf %266 : vector<2x32xf32> to vector<2x32xbf16>
    %275 = vector.extract_strided_slice %273 {offsets = [0, 0, 0], sizes = [1, 2, 32], strides = [1, 1, 1]} : vector<4x2x32xf32> to vector<1x2x32xf32>
    %276 = vector.shape_cast %275 : vector<1x2x32xf32> to vector<2x32xf32>
    %277 = vector.extract_strided_slice %3 {offsets = [0, 0, 0], sizes = [1, 32, 32], strides = [1, 1, 1]} : vector<4x32x32xbf16> to vector<1x32x32xbf16>
    %278 = vector.shape_cast %277 : vector<1x32x32xbf16> to vector<32x32xbf16>
    %cst_70 = arith.constant dense<0.000000e+00> : vector<2x32xf32>
    %279 = tpu.matmul %274, %278, %cst_70 {dimension_numbers = #tpu.dot_dimension_numbers<[1], [0], [0], [1], [0, 0, 1, 1], [], []>} : vector<2x32xbf16>, vector<32x32xbf16>, vector<2x32xf32> -> vector<2x32xf32>
    %280 = arith.addf %276, %279 : vector<2x32xf32>
    %281 = vector.extract_strided_slice %273 {offsets = [1, 0, 0], sizes = [1, 2, 32], strides = [1, 1, 1]} : vector<4x2x32xf32> to vector<1x2x32xf32>
    %282 = vector.shape_cast %281 : vector<1x2x32xf32> to vector<2x32xf32>
    %283 = vector.extract_strided_slice %3 {offsets = [1, 0, 0], sizes = [1, 32, 32], strides = [1, 1, 1]} : vector<4x32x32xbf16> to vector<1x32x32xbf16>
    %284 = vector.shape_cast %283 : vector<1x32x32xbf16> to vector<32x32xbf16>
    %cst_71 = arith.constant dense<0.000000e+00> : vector<2x32xf32>
    %285 = tpu.matmul %274, %284, %cst_71 {dimension_numbers = #tpu.dot_dimension_numbers<[1], [0], [0], [1], [0, 0, 1, 1], [], []>} : vector<2x32xbf16>, vector<32x32xbf16>, vector<2x32xf32> -> vector<2x32xf32>
    %286 = arith.addf %282, %285 : vector<2x32xf32>
    %287 = vector.extract_strided_slice %273 {offsets = [2, 0, 0], sizes = [1, 2, 32], strides = [1, 1, 1]} : vector<4x2x32xf32> to vector<1x2x32xf32>
    %288 = vector.shape_cast %287 : vector<1x2x32xf32> to vector<2x32xf32>
    %289 = vector.extract_strided_slice %3 {offsets = [2, 0, 0], sizes = [1, 32, 32], strides = [1, 1, 1]} : vector<4x32x32xbf16> to vector<1x32x32xbf16>
    %290 = vector.shape_cast %289 : vector<1x32x32xbf16> to vector<32x32xbf16>
    %cst_72 = arith.constant dense<0.000000e+00> : vector<2x32xf32>
    %291 = tpu.matmul %274, %290, %cst_72 {dimension_numbers = #tpu.dot_dimension_numbers<[1], [0], [0], [1], [0, 0, 1, 1], [], []>} : vector<2x32xbf16>, vector<32x32xbf16>, vector<2x32xf32> -> vector<2x32xf32>
    %292 = arith.addf %288, %291 : vector<2x32xf32>
    %293 = vector.extract_strided_slice %273 {offsets = [3, 0, 0], sizes = [1, 2, 32], strides = [1, 1, 1]} : vector<4x2x32xf32> to vector<1x2x32xf32>
    %294 = vector.shape_cast %293 : vector<1x2x32xf32> to vector<2x32xf32>
    %295 = vector.extract_strided_slice %3 {offsets = [3, 0, 0], sizes = [1, 32, 32], strides = [1, 1, 1]} : vector<4x32x32xbf16> to vector<1x32x32xbf16>
    %296 = vector.shape_cast %295 : vector<1x32x32xbf16> to vector<32x32xbf16>
    %cst_73 = arith.constant dense<0.000000e+00> : vector<2x32xf32>
    %297 = tpu.matmul %274, %296, %cst_73 {dimension_numbers = #tpu.dot_dimension_numbers<[1], [0], [0], [1], [0, 0, 1, 1], [], []>} : vector<2x32xbf16>, vector<32x32xbf16>, vector<2x32xf32> -> vector<2x32xf32>
    %298 = arith.addf %294, %297 : vector<2x32xf32>
    %299 = arith.negf %280 : vector<2x32xf32>
    %300 = math.exp %299 : vector<2x32xf32>
    %cst_74 = arith.constant 1.000000e+00 : f32
    %301 = vector.broadcast %cst_74 : f32 to vector<2x32xf32>
    %302 = arith.addf %301, %300 : vector<2x32xf32>
    %303 = arith.divf %301, %302 : vector<2x32xf32>
    %304 = arith.negf %286 : vector<2x32xf32>
    %305 = math.exp %304 : vector<2x32xf32>
    %cst_75 = arith.constant 1.000000e+00 : f32
    %306 = vector.broadcast %cst_75 : f32 to vector<2x32xf32>
    %307 = arith.addf %306, %305 : vector<2x32xf32>
    %308 = arith.divf %306, %307 : vector<2x32xf32>
    %309 = math.tanh %292 : vector<2x32xf32>
    %310 = arith.negf %298 : vector<2x32xf32>
    %311 = math.exp %310 : vector<2x32xf32>
    %cst_76 = arith.constant 1.000000e+00 : f32
    %312 = vector.broadcast %cst_76 : f32 to vector<2x32xf32>
    %313 = arith.addf %312, %311 : vector<2x32xf32>
    %314 = arith.divf %312, %313 : vector<2x32xf32>
    %315 = arith.mulf %308, %264 : vector<2x32xf32>
    %316 = arith.mulf %303, %309 : vector<2x32xf32>
    %317 = arith.addf %315, %316 : vector<2x32xf32>
    %318 = math.tanh %317 : vector<2x32xf32>
    %319 = arith.mulf %314, %318 : vector<2x32xf32>
    %320 = arith.index_cast %c5_i32 : i32 to index
    %c0_77 = arith.constant 0 : index
    %c0_78 = arith.constant 0 : index
    %321 = vector.load %arg3[%320, %c0_77, %c0_78] : memref<8x2x32xf32, #tpu.memory_space<vmem>>, vector<1x2x32xf32>
    %322 = vector.shape_cast %321 : vector<1x2x32xf32> to vector<2x32xf32>
    %323 = vector.shape_cast %319 : vector<2x32xf32> to vector<1x2x32xf32>
    tpu.vector_store %arg3[%320, %c0_77, %c0_78], %323 {strides = array<i32>} : memref<8x2x32xf32, #tpu.memory_space<vmem>>, vector<1x2x32xf32>,
    %c6_i32 = arith.constant 6 : i32
    %324 = arith.index_cast %c6_i32 : i32 to index
    %c0_79 = arith.constant 0 : index
    %c0_80 = arith.constant 0 : index
    %c0_81 = arith.constant 0 : index
    %325 = vector.load %arg1[%324, %c0_79, %c0_80, %c0_81] : memref<8x4x2x32xf32, #tpu.memory_space<vmem>>, vector<1x4x2x32xf32>
    %326 = vector.shape_cast %325 : vector<1x4x2x32xf32> to vector<4x2x32xf32>
    %327 = arith.truncf %319 : vector<2x32xf32> to vector<2x32xbf16>
    %328 = vector.extract_strided_slice %326 {offsets = [0, 0, 0], sizes = [1, 2, 32], strides = [1, 1, 1]} : vector<4x2x32xf32> to vector<1x2x32xf32>
    %329 = vector.shape_cast %328 : vector<1x2x32xf32> to vector<2x32xf32>
    %330 = vector.extract_strided_slice %3 {offsets = [0, 0, 0], sizes = [1, 32, 32], strides = [1, 1, 1]} : vector<4x32x32xbf16> to vector<1x32x32xbf16>
    %331 = vector.shape_cast %330 : vector<1x32x32xbf16> to vector<32x32xbf16>
    %cst_82 = arith.constant dense<0.000000e+00> : vector<2x32xf32>
    %332 = tpu.matmul %327, %331, %cst_82 {dimension_numbers = #tpu.dot_dimension_numbers<[1], [0], [0], [1], [0, 0, 1, 1], [], []>} : vector<2x32xbf16>, vector<32x32xbf16>, vector<2x32xf32> -> vector<2x32xf32>
    %333 = arith.addf %329, %332 : vector<2x32xf32>
    %334 = vector.extract_strided_slice %326 {offsets = [1, 0, 0], sizes = [1, 2, 32], strides = [1, 1, 1]} : vector<4x2x32xf32> to vector<1x2x32xf32>
    %335 = vector.shape_cast %334 : vector<1x2x32xf32> to vector<2x32xf32>
    %336 = vector.extract_strided_slice %3 {offsets = [1, 0, 0], sizes = [1, 32, 32], strides = [1, 1, 1]} : vector<4x32x32xbf16> to vector<1x32x32xbf16>
    %337 = vector.shape_cast %336 : vector<1x32x32xbf16> to vector<32x32xbf16>
    %cst_83 = arith.constant dense<0.000000e+00> : vector<2x32xf32>
    %338 = tpu.matmul %327, %337, %cst_83 {dimension_numbers = #tpu.dot_dimension_numbers<[1], [0], [0], [1], [0, 0, 1, 1], [], []>} : vector<2x32xbf16>, vector<32x32xbf16>, vector<2x32xf32> -> vector<2x32xf32>
    %339 = arith.addf %335, %338 : vector<2x32xf32>
    %340 = vector.extract_strided_slice %326 {offsets = [2, 0, 0], sizes = [1, 2, 32], strides = [1, 1, 1]} : vector<4x2x32xf32> to vector<1x2x32xf32>
    %341 = vector.shape_cast %340 : vector<1x2x32xf32> to vector<2x32xf32>
    %342 = vector.extract_strided_slice %3 {offsets = [2, 0, 0], sizes = [1, 32, 32], strides = [1, 1, 1]} : vector<4x32x32xbf16> to vector<1x32x32xbf16>
    %343 = vector.shape_cast %342 : vector<1x32x32xbf16> to vector<32x32xbf16>
    %cst_84 = arith.constant dense<0.000000e+00> : vector<2x32xf32>
    %344 = tpu.matmul %327, %343, %cst_84 {dimension_numbers = #tpu.dot_dimension_numbers<[1], [0], [0], [1], [0, 0, 1, 1], [], []>} : vector<2x32xbf16>, vector<32x32xbf16>, vector<2x32xf32> -> vector<2x32xf32>
    %345 = arith.addf %341, %344 : vector<2x32xf32>
    %346 = vector.extract_strided_slice %326 {offsets = [3, 0, 0], sizes = [1, 2, 32], strides = [1, 1, 1]} : vector<4x2x32xf32> to vector<1x2x32xf32>
    %347 = vector.shape_cast %346 : vector<1x2x32xf32> to vector<2x32xf32>
    %348 = vector.extract_strided_slice %3 {offsets = [3, 0, 0], sizes = [1, 32, 32], strides = [1, 1, 1]} : vector<4x32x32xbf16> to vector<1x32x32xbf16>
    %349 = vector.shape_cast %348 : vector<1x32x32xbf16> to vector<32x32xbf16>
    %cst_85 = arith.constant dense<0.000000e+00> : vector<2x32xf32>
    %350 = tpu.matmul %327, %349, %cst_85 {dimension_numbers = #tpu.dot_dimension_numbers<[1], [0], [0], [1], [0, 0, 1, 1], [], []>} : vector<2x32xbf16>, vector<32x32xbf16>, vector<2x32xf32> -> vector<2x32xf32>
    %351 = arith.addf %347, %350 : vector<2x32xf32>
    %352 = arith.negf %333 : vector<2x32xf32>
    %353 = math.exp %352 : vector<2x32xf32>
    %cst_86 = arith.constant 1.000000e+00 : f32
    %354 = vector.broadcast %cst_86 : f32 to vector<2x32xf32>
    %355 = arith.addf %354, %353 : vector<2x32xf32>
    %356 = arith.divf %354, %355 : vector<2x32xf32>
    %357 = arith.negf %339 : vector<2x32xf32>
    %358 = math.exp %357 : vector<2x32xf32>
    %cst_87 = arith.constant 1.000000e+00 : f32
    %359 = vector.broadcast %cst_87 : f32 to vector<2x32xf32>
    %360 = arith.addf %359, %358 : vector<2x32xf32>
    %361 = arith.divf %359, %360 : vector<2x32xf32>
    %362 = math.tanh %345 : vector<2x32xf32>
    %363 = arith.negf %351 : vector<2x32xf32>
    %364 = math.exp %363 : vector<2x32xf32>
    %cst_88 = arith.constant 1.000000e+00 : f32
    %365 = vector.broadcast %cst_88 : f32 to vector<2x32xf32>
    %366 = arith.addf %365, %364 : vector<2x32xf32>
    %367 = arith.divf %365, %366 : vector<2x32xf32>
    %368 = arith.mulf %361, %317 : vector<2x32xf32>
    %369 = arith.mulf %356, %362 : vector<2x32xf32>
    %370 = arith.addf %368, %369 : vector<2x32xf32>
    %371 = math.tanh %370 : vector<2x32xf32>
    %372 = arith.mulf %367, %371 : vector<2x32xf32>
    %373 = arith.index_cast %c6_i32 : i32 to index
    %c0_89 = arith.constant 0 : index
    %c0_90 = arith.constant 0 : index
    %374 = vector.load %arg3[%373, %c0_89, %c0_90] : memref<8x2x32xf32, #tpu.memory_space<vmem>>, vector<1x2x32xf32>
    %375 = vector.shape_cast %374 : vector<1x2x32xf32> to vector<2x32xf32>
    %376 = vector.shape_cast %372 : vector<2x32xf32> to vector<1x2x32xf32>
    tpu.vector_store %arg3[%373, %c0_89, %c0_90], %376 {strides = array<i32>} : memref<8x2x32xf32, #tpu.memory_space<vmem>>, vector<1x2x32xf32>,
    %c7_i32 = arith.constant 7 : i32
    %377 = arith.index_cast %c7_i32 : i32 to index
    %c0_91 = arith.constant 0 : index
    %c0_92 = arith.constant 0 : index
    %c0_93 = arith.constant 0 : index
    %378 = vector.load %arg1[%377, %c0_91, %c0_92, %c0_93] : memref<8x4x2x32xf32, #tpu.memory_space<vmem>>, vector<1x4x2x32xf32>
    %379 = vector.shape_cast %378 : vector<1x4x2x32xf32> to vector<4x2x32xf32>
    %380 = arith.truncf %372 : vector<2x32xf32> to vector<2x32xbf16>
    %381 = vector.extract_strided_slice %379 {offsets = [0, 0, 0], sizes = [1, 2, 32], strides = [1, 1, 1]} : vector<4x2x32xf32> to vector<1x2x32xf32>
    %382 = vector.shape_cast %381 : vector<1x2x32xf32> to vector<2x32xf32>
    %383 = vector.extract_strided_slice %3 {offsets = [0, 0, 0], sizes = [1, 32, 32], strides = [1, 1, 1]} : vector<4x32x32xbf16> to vector<1x32x32xbf16>
    %384 = vector.shape_cast %383 : vector<1x32x32xbf16> to vector<32x32xbf16>
    %cst_94 = arith.constant dense<0.000000e+00> : vector<2x32xf32>
    %385 = tpu.matmul %380, %384, %cst_94 {dimension_numbers = #tpu.dot_dimension_numbers<[1], [0], [0], [1], [0, 0, 1, 1], [], []>} : vector<2x32xbf16>, vector<32x32xbf16>, vector<2x32xf32> -> vector<2x32xf32>
    %386 = arith.addf %382, %385 : vector<2x32xf32>
    %387 = vector.extract_strided_slice %379 {offsets = [1, 0, 0], sizes = [1, 2, 32], strides = [1, 1, 1]} : vector<4x2x32xf32> to vector<1x2x32xf32>
    %388 = vector.shape_cast %387 : vector<1x2x32xf32> to vector<2x32xf32>
    %389 = vector.extract_strided_slice %3 {offsets = [1, 0, 0], sizes = [1, 32, 32], strides = [1, 1, 1]} : vector<4x32x32xbf16> to vector<1x32x32xbf16>
    %390 = vector.shape_cast %389 : vector<1x32x32xbf16> to vector<32x32xbf16>
    %cst_95 = arith.constant dense<0.000000e+00> : vector<2x32xf32>
    %391 = tpu.matmul %380, %390, %cst_95 {dimension_numbers = #tpu.dot_dimension_numbers<[1], [0], [0], [1], [0, 0, 1, 1], [], []>} : vector<2x32xbf16>, vector<32x32xbf16>, vector<2x32xf32> -> vector<2x32xf32>
    %392 = arith.addf %388, %391 : vector<2x32xf32>
    %393 = vector.extract_strided_slice %379 {offsets = [2, 0, 0], sizes = [1, 2, 32], strides = [1, 1, 1]} : vector<4x2x32xf32> to vector<1x2x32xf32>
    %394 = vector.shape_cast %393 : vector<1x2x32xf32> to vector<2x32xf32>
    %395 = vector.extract_strided_slice %3 {offsets = [2, 0, 0], sizes = [1, 32, 32], strides = [1, 1, 1]} : vector<4x32x32xbf16> to vector<1x32x32xbf16>
    %396 = vector.shape_cast %395 : vector<1x32x32xbf16> to vector<32x32xbf16>
    %cst_96 = arith.constant dense<0.000000e+00> : vector<2x32xf32>
    %397 = tpu.matmul %380, %396, %cst_96 {dimension_numbers = #tpu.dot_dimension_numbers<[1], [0], [0], [1], [0, 0, 1, 1], [], []>} : vector<2x32xbf16>, vector<32x32xbf16>, vector<2x32xf32> -> vector<2x32xf32>
    %398 = arith.addf %394, %397 : vector<2x32xf32>
    %399 = vector.extract_strided_slice %379 {offsets = [3, 0, 0], sizes = [1, 2, 32], strides = [1, 1, 1]} : vector<4x2x32xf32> to vector<1x2x32xf32>
    %400 = vector.shape_cast %399 : vector<1x2x32xf32> to vector<2x32xf32>
    %401 = vector.extract_strided_slice %3 {offsets = [3, 0, 0], sizes = [1, 32, 32], strides = [1, 1, 1]} : vector<4x32x32xbf16> to vector<1x32x32xbf16>
    %402 = vector.shape_cast %401 : vector<1x32x32xbf16> to vector<32x32xbf16>
    %cst_97 = arith.constant dense<0.000000e+00> : vector<2x32xf32>
    %403 = tpu.matmul %380, %402, %cst_97 {dimension_numbers = #tpu.dot_dimension_numbers<[1], [0], [0], [1], [0, 0, 1, 1], [], []>} : vector<2x32xbf16>, vector<32x32xbf16>, vector<2x32xf32> -> vector<2x32xf32>
    %404 = arith.addf %400, %403 : vector<2x32xf32>
    %405 = arith.negf %386 : vector<2x32xf32>
    %406 = math.exp %405 : vector<2x32xf32>
    %cst_98 = arith.constant 1.000000e+00 : f32
    %407 = vector.broadcast %cst_98 : f32 to vector<2x32xf32>
    %408 = arith.addf %407, %406 : vector<2x32xf32>
    %409 = arith.divf %407, %408 : vector<2x32xf32>
    %410 = arith.negf %392 : vector<2x32xf32>
    %411 = math.exp %410 : vector<2x32xf32>
    %cst_99 = arith.constant 1.000000e+00 : f32
    %412 = vector.broadcast %cst_99 : f32 to vector<2x32xf32>
    %413 = arith.addf %412, %411 : vector<2x32xf32>
    %414 = arith.divf %412, %413 : vector<2x32xf32>
    %415 = math.tanh %398 : vector<2x32xf32>
    %416 = arith.negf %404 : vector<2x32xf32>
    %417 = math.exp %416 : vector<2x32xf32>
    %cst_100 = arith.constant 1.000000e+00 : f32
    %418 = vector.broadcast %cst_100 : f32 to vector<2x32xf32>
    %419 = arith.addf %418, %417 : vector<2x32xf32>
    %420 = arith.divf %418, %419 : vector<2x32xf32>
    %421 = arith.mulf %414, %370 : vector<2x32xf32>
    %422 = arith.mulf %409, %415 : vector<2x32xf32>
    %423 = arith.addf %421, %422 : vector<2x32xf32>
    %424 = math.tanh %423 : vector<2x32xf32>
    %425 = arith.mulf %420, %424 : vector<2x32xf32>
    %426 = arith.index_cast %c7_i32 : i32 to index
    %c0_101 = arith.constant 0 : index
    %c0_102 = arith.constant 0 : index
    %427 = vector.load %arg3[%426, %c0_101, %c0_102] : memref<8x2x32xf32, #tpu.memory_space<vmem>>, vector<1x2x32xf32>
    %428 = vector.shape_cast %427 : vector<1x2x32xf32> to vector<2x32xf32>
    %429 = vector.shape_cast %425 : vector<2x32xf32> to vector<1x2x32xf32>
    tpu.vector_store %arg3[%426, %c0_101, %c0_102], %429 {strides = array<i32>} : memref<8x2x32xf32, #tpu.memory_space<vmem>>, vector<1x2x32xf32>,
    %c8_i32 = arith.constant 8 : i32
    %c0_103 = arith.constant 0 : index
    %c0_104 = arith.constant 0 : index
    %430 = vector.load %arg4[%c0_103, %c0_104] : memref<2x32xf32, #tpu.memory_space<vmem>>, vector<2x32xf32>
    tpu.vector_store %arg4[%c0_103, %c0_104], %425 {strides = array<i32>} : memref<2x32xf32, #tpu.memory_space<vmem>>, vector<2x32xf32>,
    %c0_105 = arith.constant 0 : index
    %c0_106 = arith.constant 0 : index
    %431 = vector.load %arg5[%c0_105, %c0_106] : memref<2x32xf32, #tpu.memory_space<vmem>>, vector<2x32xf32>
    tpu.vector_store %arg5[%c0_105, %c0_106], %423 {strides = array<i32>} : memref<2x32xf32, #tpu.memory_space<vmem>>, vector<2x32xf32>,
    return
  }
  func.func @transform_0(%arg0: i32) -> (i32, i32, i32, i32) {
    %c0_i32 = arith.constant 0 : i32
    %c0_i32_0 = arith.constant 0 : i32
    %c0_i32_1 = arith.constant 0 : i32
    %c0_i32_2 = arith.constant 0 : i32
    return %arg0, %c0_i32, %c0_i32_0, %c0_i32_1 : i32, i32, i32, i32
  }
  func.func @transform_1(%arg0: i32) -> (i32, i32, i32) {
    %c0_i32 = arith.constant 0 : i32
    %c0_i32_0 = arith.constant 0 : i32
    %c0_i32_1 = arith.constant 0 : i32
    %c0_i32_2 = arith.constant 0 : i32
    return %c0_i32, %c0_i32_0, %c0_i32_1 : i32, i32, i32
  }
  func.func @transform_2(%arg0: i32) -> (i32, i32, i32) {
    %c0_i32 = arith.constant 0 : i32
    %c0_i32_0 = arith.constant 0 : i32
    %c0_i32_1 = arith.constant 0 : i32
    return %arg0, %c0_i32, %c0_i32_0 : i32, i32, i32
  }
}

</mosaic_0001>

<bundles_post_ra>
// kernel: gpt_lip_reading_forward.3
= control target key start
LH: loop header
LB: loop body
LE: loop exit
PB: predicated region body
PF: predicated region fallthrough
CT: control target
= control target key end

     0   :  { %vm16_vm0 = vcmask 254976   ;;  %v2276_v0 = vmov 0.0   ;;  %vm2277_vm1 = vmmov 0   ;;  %vm54_vm2 = vcmask 261120   ;;  %s2727_s1 = inlined_call_operand.vmem [shape: bf16[4,32,32], index: 1, kind: input, shape index: {}]   ;;  %s2728_s0 = inlined_call_operand.vmem [shape: f32[8,4,2,32], index: 0, kind: input, shape index: {}]   ;;  %s2729_s2 = inlined_call_operand.vmem [shape: f32[8,2,32], index: 2, kind: output, shape index: {}]  }
   0x1   :  { %1878 = vmatprep.subr.bf16.mxu0 %v2276_v0  ;;  %1886 = vmatprep.subr.bf16.mxu1 %v2276_v0  ;;  %v2298_v1 = vld [vmem:[%s2727_s1 + $0x8] sm:$0xff]   ;;  %17 = vst.msk [vmem:[#allocation2] sm:$0x3] %vm16_vm0, %v2276_v0  ;;  %18 = vst.msk [vmem:[#allocation3] sm:$0x3] %vm16_vm0, %v2276_v0  ;;  %v2307_v2 = vld [vmem:[%s2727_s1 + $0x18] sm:$0xff]  }
   0x2   :  { %1882 = vmatprep.mubr.msk.bf16.mxu0 %vm2277_vm1, %v2276_v0  ;;  %1890 = vmatprep.mubr.msk.bf16.mxu1 %vm2277_vm1, %v2276_v0  ;;  %v2317_v3 = vld [vmem:[%s2727_s1] sm:$0xff]   ;;  %v2324_v4 = vld [vmem:[%s2727_s1 + $0x10] sm:$0xff]   ;;  %v2330_v5 = vld [vmem:[%s2727_s1 + $0x28] sm:$0xff]  }
   0x3   :  { %1879 = vmatpush3.bf16.msra.mxu0 %v2298_v1  ;;  %1887 = vmatpush3.bf16.msra.mxu1 %v2307_v2  ;;  %v2336_v6 = vld [vmem:[%s2727_s1 + $0x38] sm:$0xff]   ;;  %v2348_v9 = vld [vmem:[%s2727_s1 + $0x20] sm:$0xff]   ;;  %v2353_v10 = vld [vmem:[%s2727_s1 + $0x30] sm:$0xff]  }
   0x4   :  { %1880 = vmatprep.subr.bf16.mxu0 %v2276_v0  ;;  %1888 = vmatprep.subr.bf16.mxu1 %v2276_v0  ;;  %v37_v11 = vld [vmem:[%s2728_s0] sm:$0x3]  ;;  %v38_v12 = vld [vmem:[%s2728_s0 + $0x2] sm:$0x3]  ;;  %v40_v25 = vld [vmem:[%s2728_s0 + $0x6] sm:$0x3] }
   0x5   :  { %v39_v31 = vld [vmem:[%s2728_s0 + $0x4] sm:$0x3]  ;;  %v1698_v55 = vld [vmem:[%s2728_s0 + $0x8] sm:$0x3]  ;;  %v1699_v56 = vld [vmem:[%s2728_s0 + $0xa] sm:$0x3] }
   0x7   :  { %1881 = vmatpush3.bf16.msra.mxu0 %v2317_v3  ;;  %1889 = vmatpush3.bf16.msra.mxu1 %v2324_v4 }
   0x8   :  { %v35_v7 = vld [vmem:[#allocation2] sm:$0x3]  ;;  %1894 = vmatprep.subr.bf16.mxu0 %v2276_v0  ;;  %1902 = vmatprep.subr.bf16.mxu1 %v2276_v0  ;;  %v36_v44 = vld [vmem:[#allocation3] sm:$0x3] }
   0x9   :  { %v41_v8 = vpack.c.bf16 %v35_v7, %v35_v7 }
   0xb   :  { %1883 = vmatmul.mubr.msk.bf16.vlgmr.msra.gmra.mxu0 %vm54_vm2, %v41_v8  ;;  %1891 = vmatmul.mubr.msk.bf16.vlgmr.msra.gmra.mxu1 %vm54_vm2, %v41_v8 }
   0xc   :  { %1895 = vmatpush3.bf16.msra.mxu0 %v2330_v5  ;;  %1903 = vmatpush3.bf16.msra.mxu1 %v2336_v6 }
   0xd   :  { %1896 = vmatprep.subr.bf16.mxu0 %v2276_v0  ;;  %1904 = vmatprep.subr.bf16.mxu1 %v2276_v0 }
   0xe   :  { %1898 = vmatprep.mubr.msk.bf16.mxu0 %vm2277_vm1, %v2276_v0  ;;  %1906 = vmatprep.mubr.msk.bf16.mxu1 %vm2277_vm1, %v2276_v0 }
  0x10   :  { %1897 = vmatpush3.bf16.msra.mxu0 %v2348_v9  ;;  %1905 = vmatpush3.bf16.msra.mxu1 %v2353_v10 }
  0x11   :  { %1910 = vmatprep.subr.bf16.mxu0 %v2276_v0  ;;  %1918 = vmatprep.subr.bf16.mxu1 %v2276_v0 }
  0x13   :  { %1899 = vmatmul.mubr.msk.bf16.vlgmr.msra.gmra.mxu0 %vm54_vm2, %v41_v8  ;;  %1907 = vmatmul.mubr.msk.bf16.vlgmr.msra.gmra.mxu1 %vm54_vm2, %v41_v8 }
  0x14   :  { %1911 = vmatpush3.bf16.msra.mxu0 %v2298_v1  ;;  %1919 = vmatpush3.bf16.msra.mxu1 %v2307_v2 }
  0x15   :  { %1912 = vmatprep.subr.bf16.mxu0 %v2276_v0  ;;  %1920 = vmatprep.subr.bf16.mxu1 %v2276_v0 }
  0x16   :  { %1914 = vmatprep.mubr.msk.bf16.mxu0 %vm2277_vm1, %v2276_v0  ;;  %1922 = vmatprep.mubr.msk.bf16.mxu1 %vm2277_vm1, %v2276_v0 }
  0x18   :  { %1913 = vmatpush3.bf16.msra.mxu0 %v2317_v3  ;;  %1921 = vmatpush3.bf16.msra.mxu1 %v2324_v4 }
  0x19   :  { %1926 = vmatprep.subr.bf16.mxu0 %v2276_v0  ;;  %1934 = vmatprep.subr.bf16.mxu1 %v2276_v0 }
  0xcb   :  { %v92_v13 = vpop.f32.mrf.mxu0  ;;  %v145_v14 = vpop.f32.mrf.mxu1 }
  0xcc   :  { %v98_v15 = vadd.f32 %v92_v13, %v37_v11  ;;  %v151_v16 = vadd.f32 %v145_v14, %v38_v12 }
  0xcd   :  { %v1884_v17 = vpop.f32.mrf.mxu0  ;;  %v1892_v18 = vpop.f32.mrf.mxu1 }
  0xce   :  { %v1695_v19 = vmul.f32 -1.442695, %v98_v15  ;;  %v1696_v20 = vmul.f32 -1.442695, %v151_v16  ;;  %v1701_v15 = vld [vmem:[%s2728_s0 + $0xe] sm:$0x3] }
  0xcf   :  { %v95_v21 = vpop.f32.mrf.mxu0  ;;  %v148_v22 = vpop.f32.mrf.mxu1 }
  0xd0   :  { %2144 = vpow2.f32 %v1695_v19  ;;  %v1700_v22 = vld [vmem:[%s2728_s0 + $0xc] sm:$0x3] }
  0xd1   :  { %2146 = vpow2.f32 %v1696_v20  ;;  %v1885_v23 = vpop.f32.mrf.mxu0  ;;  %v1893_v24 = vpop.f32.mrf.mxu1 }
  0xd3   :  { %v198_v26 = vpop.f32.mrf.mxu0  ;;  %v251_v27 = vpop.f32.mrf.mxu1 }
  0xd4   :  { %v257_v28 = vadd.f32 %v251_v27, %v40_v25  ;;  %v204_v37 = vadd.f32 %v198_v26, %v39_v31 }
  0xd5   :  { %v1900_v29 = vpop.f32.mrf.mxu0  ;;  %v1908_v30 = vpop.f32.mrf.mxu1 }
  0xd6   :  { %v1697_v34 = vmul.f32 -1.442695, %v257_v28 }
  0xd7   :  { %v201_v32 = vpop.f32.mrf.mxu0  ;;  %v254_v33 = vpop.f32.mrf.mxu1 }
  0xd8   :  { %2148 = vpow2.f32 %v1697_v34 }
  0xd9   :  { %v1901_v35 = vpop.f32.mrf.mxu0  ;;  %v1909_v36 = vpop.f32.mrf.mxu1  ;;  %2150 = vtanh.f32 %v204_v37 }
  0xdd   :  { %v2145_v38 = vpop.eup %2144 }
  0xde   :  { %v2147_v39 = vpop.eup %2146  ;;  %v261_v40 = vadd.f32 1.0, %v2145_v38 }
  0xdf   :  { %v267_v41 = vadd.f32 1.0, %v2147_v39 }
  0xe0   :  { %2152 = vrcp.f32 %v261_v40 }
  0xe1   :  { %2154 = vrcp.f32 %v267_v41 }
  0xe5   :  { %v2149_v42 = vpop.eup %2148 }
  0xe6   :  { %v2151_v43 = vpop.eup %2150  ;;  %v274_v46 = vadd.f32 1.0, %v2149_v42 }
  0xe8   :  { %2156 = vrcp.f32 %v274_v46 }
  0xed   :  { %v2153_v45 = vpop.eup %2152 }
  0xee   :  { %v2155_v47 = vpop.eup %2154  ;;  %v278_v48 = vmul.f32 %v2153_v45, %v2151_v43  ;;  %v1710_v43 = vld [vmem:[%s2728_s0 + $0x10] sm:$0x3] }
  0xef   :  { %v277_v49 = vmul.f32 %v2155_v47, %v36_v44  ;;  %v1711_v44 = vld [vmem:[%s2728_s0 + $0x12] sm:$0x3] }
  0xf1   :  { %v2391_v50 = vadd.f32 %v278_v48, %v277_v49 }
  0xf3   :  { %2158 = vtanh.f32 %v2391_v50 }
  0xf5   :  { %v2157_v51 = vpop.eup %2156 }
 0x100   :  { %v2159_v52 = vpop.eup %2158 }
 0x101   :  { %v281_v53 = vmul.f32 %v2159_v52, %v2157_v51 }
 0x103   :  { %283 = vst.msk [vmem:[%s2729_s2] sm:$0x3] %vm16_vm0, %v281_v53  ;;  %v289_v54 = vpack.c.bf16 %v281_v53, %v281_v53 }
 0x105   :  { %1915 = vmatmul.mubr.msk.bf16.vlgmr.msra.gmra.mxu0 %vm54_vm2, %v289_v54  ;;  %1923 = vmatmul.mubr.msk.bf16.vlgmr.msra.gmra.mxu1 %vm54_vm2, %v289_v54 }
 0x106   :  { %1927 = vmatpush3.bf16.msra.mxu0 %v2330_v5  ;;  %1935 = vmatpush3.bf16.msra.mxu1 %v2336_v6 }
 0x107   :  { %1928 = vmatprep.subr.bf16.mxu0 %v2276_v0  ;;  %1936 = vmatprep.subr.bf16.mxu1 %v2276_v0 }
 0x108   :  { %1930 = vmatprep.mubr.msk.bf16.mxu0 %vm2277_vm1, %v2276_v0  ;;  %1938 = vmatprep.mubr.msk.bf16.mxu1 %vm2277_vm1, %v2276_v0 }
 0x10a   :  { %1929 = vmatpush3.bf16.msra.mxu0 %v2348_v9  ;;  %1937 = vmatpush3.bf16.msra.mxu1 %v2353_v10 }
 0x10b   :  { %1942 = vmatprep.subr.bf16.mxu0 %v2276_v0  ;;  %1950 = vmatprep.subr.bf16.mxu1 %v2276_v0 }
 0x10d   :  { %1931 = vmatmul.mubr.msk.bf16.vlgmr.msra.gmra.mxu0 %vm54_vm2, %v289_v54  ;;  %1939 = vmatmul.mubr.msk.bf16.vlgmr.msra.gmra.mxu1 %vm54_vm2, %v289_v54 }
 0x10e   :  { %1943 = vmatpush3.bf16.msra.mxu0 %v2298_v1  ;;  %1951 = vmatpush3.bf16.msra.mxu1 %v2307_v2 }
 0x10f   :  { %1944 = vmatprep.subr.bf16.mxu0 %v2276_v0  ;;  %1952 = vmatprep.subr.bf16.mxu1 %v2276_v0 }
 0x110   :  { %1946 = vmatprep.mubr.msk.bf16.mxu0 %vm2277_vm1, %v2276_v0  ;;  %1954 = vmatprep.mubr.msk.bf16.mxu1 %vm2277_vm1, %v2276_v0 }
 0x112   :  { %1945 = vmatpush3.bf16.msra.mxu0 %v2317_v3  ;;  %1953 = vmatpush3.bf16.msra.mxu1 %v2324_v4 }
 0x113   :  { %1958 = vmatprep.subr.bf16.mxu0 %v2276_v0  ;;  %1966 = vmatprep.subr.bf16.mxu1 %v2276_v0 }
 0x1c5   :  { %v327_v57 = vpop.f32.mrf.mxu0  ;;  %v368_v58 = vpop.f32.mrf.mxu1 }
 0x1c6   :  { %v333_v59 = vadd.f32 %v1698_v55, %v327_v57  ;;  %v374_v60 = vadd.f32 %v1699_v56, %v368_v58  ;;  %v1713_v58 = vld [vmem:[%s2728_s0 + $0x16] sm:$0x3] }
 0x1c7   :  { %v1916_v61 = vpop.f32.mrf.mxu0  ;;  %v1924_v62 = vpop.f32.mrf.mxu1 }
 0x1c8   :  { %v1706_v63 = vmul.f32 -1.442695, %v333_v59  ;;  %v1707_v7 = vmul.f32 -1.442695, %v374_v60 }
 0x1c9   :  { %v330_v8 = vpop.f32.mrf.mxu0  ;;  %v371_v11 = vpop.f32.mrf.mxu1 }
 0x1ca   :  { %2160 = vpow2.f32 %v1706_v63  ;;  %v1712_v8 = vld [vmem:[%s2728_s0 + $0x14] sm:$0x3] }
 0x1cb   :  { %2162 = vpow2.f32 %v1707_v7  ;;  %v1917_v12 = vpop.f32.mrf.mxu0  ;;  %v1925_v13 = vpop.f32.mrf.mxu1 }
 0x1cd   :  { %v409_v14 = vpop.f32.mrf.mxu0  ;;  %v450_v16 = vpop.f32.mrf.mxu1 }
 0x1ce   :  { %v456_v19 = vadd.f32 %v1701_v15, %v450_v16  ;;  %v415_v26 = vadd.f32 %v1700_v22, %v409_v14 }
 0x1cf   :  { %v1932_v17 = vpop.f32.mrf.mxu0  ;;  %v1940_v18 = vpop.f32.mrf.mxu1 }
 0x1d0   :  { %v1708_v25 = vmul.f32 -1.442695, %v456_v19 }
 0x1d1   :  { %v412_v20 = vpop.f32.mrf.mxu0  ;;  %v453_v21 = vpop.f32.mrf.mxu1 }
 0x1d2   :  { %2164 = vpow2.f32 %v1708_v25 }
 0x1d3   :  { %v1933_v23 = vpop.f32.mrf.mxu0  ;;  %v1941_v24 = vpop.f32.mrf.mxu1  ;;  %2166 = vtanh.f32 %v415_v26 }
 0x1d7   :  { %v2161_v27 = vpop.eup %2160 }
 0x1d8   :  { %v2163_v28 = vpop.eup %2162  ;;  %v460_v29 = vadd.f32 1.0, %v2161_v27 }
 0x1d9   :  { %v466_v30 = vadd.f32 1.0, %v2163_v28 }
 0x1da   :  { %2168 = vrcp.f32 %v460_v29 }
 0x1db   :  { %2170 = vrcp.f32 %v466_v30 }
 0x1df   :  { %v2165_v31 = vpop.eup %2164 }
 0x1e0   :  { %v2167_v32 = vpop.eup %2166  ;;  %v473_v36 = vadd.f32 1.0, %v2165_v31  ;;  %v1722_v31 = vld [vmem:[%s2728_s0 + $0x18] sm:$0x3] }
 0x1e2   :  { %2172 = vrcp.f32 %v473_v36 }
 0x1e7   :  { %v2169_v33 = vpop.eup %2168 }
 0x1e8   :  { %v2171_v34 = vpop.eup %2170  ;;  %v477_v35 = vmul.f32 %v2169_v33, %v2167_v32  ;;  %v1723_v32 = vld [vmem:[%s2728_s0 + $0x1a] sm:$0x3] }
 0x1e9   :  { %v476_v37 = vmul.f32 %v2171_v34, %v2391_v50 }
 0x1eb   :  { %v2439_v38 = vadd.f32 %v477_v35, %v476_v37 }
 0x1ed   :  { %2174 = vtanh.f32 %v2439_v38 }
 0x1ef   :  { %v2173_v39 = vpop.eup %2172 }
 0x1fa   :  { %v2175_v40 = vpop.eup %2174 }
 0x1fb   :  { %v480_v41 = vmul.f32 %v2175_v40, %v2173_v39 }
 0x1fd   :  { %1709 = vst.msk [vmem:[%s2729_s2 + $0x2] sm:$0x3] %vm16_vm0, %v480_v41  ;;  %v488_v42 = vpack.c.bf16 %v480_v41, %v480_v41 }
 0x1ff   :  { %1947 = vmatmul.mubr.msk.bf16.vlgmr.msra.gmra.mxu0 %vm54_vm2, %v488_v42  ;;  %1955 = vmatmul.mubr.msk.bf16.vlgmr.msra.gmra.mxu1 %vm54_vm2, %v488_v42 }
 0x200   :  { %1959 = vmatpush3.bf16.msra.mxu0 %v2330_v5  ;;  %1967 = vmatpush3.bf16.msra.mxu1 %v2336_v6 }
 0x201   :  { %1960 = vmatprep.subr.bf16.mxu0 %v2276_v0  ;;  %1968 = vmatprep.subr.bf16.mxu1 %v2276_v0 }
 0x202   :  { %1962 = vmatprep.mubr.msk.bf16.mxu0 %vm2277_vm1, %v2276_v0  ;;  %1970 = vmatprep.mubr.msk.bf16.mxu1 %vm2277_vm1, %v2276_v0 }
 0x204   :  { %1961 = vmatpush3.bf16.msra.mxu0 %v2348_v9  ;;  %1969 = vmatpush3.bf16.msra.mxu1 %v2353_v10 }
 0x205   :  { %1974 = vmatprep.subr.bf16.mxu0 %v2276_v0  ;;  %1982 = vmatprep.subr.bf16.mxu1 %v2276_v0 }
 0x207   :  { %1963 = vmatmul.mubr.msk.bf16.vlgmr.msra.gmra.mxu0 %vm54_vm2, %v488_v42  ;;  %1971 = vmatmul.mubr.msk.bf16.vlgmr.msra.gmra.mxu1 %vm54_vm2, %v488_v42 }
 0x208   :  { %1975 = vmatpush3.bf16.msra.mxu0 %v2298_v1  ;;  %1983 = vmatpush3.bf16.msra.mxu1 %v2307_v2 }
 0x209   :  { %1976 = vmatprep.subr.bf16.mxu0 %v2276_v0  ;;  %1984 = vmatprep.subr.bf16.mxu1 %v2276_v0 }
 0x20a   :  { %1978 = vmatprep.mubr.msk.bf16.mxu0 %vm2277_vm1, %v2276_v0  ;;  %1986 = vmatprep.mubr.msk.bf16.mxu1 %vm2277_vm1, %v2276_v0 }
 0x20c   :  { %1977 = vmatpush3.bf16.msra.mxu0 %v2317_v3  ;;  %1985 = vmatpush3.bf16.msra.mxu1 %v2324_v4 }
 0x20d   :  { %1990 = vmatprep.subr.bf16.mxu0 %v2276_v0  ;;  %1998 = vmatprep.subr.bf16.mxu1 %v2276_v0 }
 0x2bf   :  { %v526_v45 = vpop.f32.mrf.mxu0  ;;  %v567_v46 = vpop.f32.mrf.mxu1 }
 0x2c0   :  { %v532_v47 = vadd.f32 %v1710_v43, %v526_v45  ;;  %v573_v48 = vadd.f32 %v1711_v44, %v567_v46  ;;  %v1725_v46 = vld [vmem:[%s2728_s0 + $0x1e] sm:$0x3] }
 0x2c1   :  { %v1948_v49 = vpop.f32.mrf.mxu0  ;;  %v1956_v50 = vpop.f32.mrf.mxu1 }
 0x2c2   :  { %v1718_v51 = vmul.f32 -1.442695, %v532_v47  ;;  %v1719_v52 = vmul.f32 -1.442695, %v573_v48 }
 0x2c3   :  { %v529_v53 = vpop.f32.mrf.mxu0  ;;  %v570_v54 = vpop.f32.mrf.mxu1 }
 0x2c4   :  { %2176 = vpow2.f32 %v1718_v51  ;;  %v1724_v53 = vld [vmem:[%s2728_s0 + $0x1c] sm:$0x3] }
 0x2c5   :  { %2178 = vpow2.f32 %v1719_v52  ;;  %v1949_v55 = vpop.f32.mrf.mxu0  ;;  %v1957_v56 = vpop.f32.mrf.mxu1 }
 0x2c7   :  { %v608_v57 = vpop.f32.mrf.mxu0  ;;  %v649_v59 = vpop.f32.mrf.mxu1 }
 0x2c8   :  { %v655_v62 = vadd.f32 %v1713_v58, %v649_v59  ;;  %v614_v14 = vadd.f32 %v1712_v8, %v608_v57 }
 0x2c9   :  { %v1964_v60 = vpop.f32.mrf.mxu0  ;;  %v1972_v61 = vpop.f32.mrf.mxu1 }
 0x2ca   :  { %v1720_v13 = vmul.f32 -1.442695, %v655_v62 }
 0x2cb   :  { %v611_v63 = vpop.f32.mrf.mxu0  ;;  %v652_v7 = vpop.f32.mrf.mxu1 }
 0x2cc   :  { %2180 = vpow2.f32 %v1720_v13 }
 0x2cd   :  { %v1965_v11 = vpop.f32.mrf.mxu0  ;;  %v1973_v12 = vpop.f32.mrf.mxu1  ;;  %2182 = vtanh.f32 %v614_v14 }
 0x2d1   :  { %v2177_v15 = vpop.eup %2176 }
 0x2d2   :  { %v2179_v16 = vpop.eup %2178  ;;  %v659_v17 = vadd.f32 1.0, %v2177_v15 }
 0x2d3   :  { %v665_v18 = vadd.f32 1.0, %v2179_v16 }
 0x2d4   :  { %2184 = vrcp.f32 %v659_v17 }
 0x2d5   :  { %2186 = vrcp.f32 %v665_v18 }
 0x2d9   :  { %v2181_v19 = vpop.eup %2180 }
 0x2da   :  { %v2183_v20 = vpop.eup %2182  ;;  %v672_v24 = vadd.f32 1.0, %v2181_v19  ;;  %v1734_v19 = vld [vmem:[%s2728_s0 + $0x20] sm:$0x3] }
 0x2dc   :  { %2188 = vrcp.f32 %v672_v24 }
 0x2e1   :  { %v2185_v21 = vpop.eup %2184 }
 0x2e2   :  { %v2187_v22 = vpop.eup %2186  ;;  %v676_v23 = vmul.f32 %v2185_v21, %v2183_v20  ;;  %v1735_v20 = vld [vmem:[%s2728_s0 + $0x22] sm:$0x3] }
 0x2e3   :  { %v675_v25 = vmul.f32 %v2187_v22, %v2439_v38 }
 0x2e5   :  { %v2487_v26 = vadd.f32 %v676_v23, %v675_v25 }
 0x2e7   :  { %2190 = vtanh.f32 %v2487_v26 }
 0x2e9   :  { %v2189_v27 = vpop.eup %2188 }
 0x2f4   :  { %v2191_v28 = vpop.eup %2190 }
 0x2f5   :  { %v679_v29 = vmul.f32 %v2191_v28, %v2189_v27 }
 0x2f7   :  { %1721 = vst.msk [vmem:[%s2729_s2 + $0x4] sm:$0x3] %vm16_vm0, %v679_v29  ;;  %v687_v30 = vpack.c.bf16 %v679_v29, %v679_v29 }
 0x2f9   :  { %1979 = vmatmul.mubr.msk.bf16.vlgmr.msra.gmra.mxu0 %vm54_vm2, %v687_v30  ;;  %1987 = vmatmul.mubr.msk.bf16.vlgmr.msra.gmra.mxu1 %vm54_vm2, %v687_v30 }
 0x2fa   :  { %1991 = vmatpush3.bf16.msra.mxu0 %v2330_v5  ;;  %1999 = vmatpush3.bf16.msra.mxu1 %v2336_v6 }
 0x2fb   :  { %1992 = vmatprep.subr.bf16.mxu0 %v2276_v0  ;;  %2000 = vmatprep.subr.bf16.mxu1 %v2276_v0 }
 0x2fc   :  { %1994 = vmatprep.mubr.msk.bf16.mxu0 %vm2277_vm1, %v2276_v0  ;;  %2002 = vmatprep.mubr.msk.bf16.mxu1 %vm2277_vm1, %v2276_v0 }
 0x2fe   :  { %1993 = vmatpush3.bf16.msra.mxu0 %v2348_v9  ;;  %2001 = vmatpush3.bf16.msra.mxu1 %v2353_v10 }
 0x2ff   :  { %2006 = vmatprep.subr.bf16.mxu0 %v2276_v0  ;;  %2014 = vmatprep.subr.bf16.mxu1 %v2276_v0 }
 0x301   :  { %1995 = vmatmul.mubr.msk.bf16.vlgmr.msra.gmra.mxu0 %vm54_vm2, %v687_v30  ;;  %2003 = vmatmul.mubr.msk.bf16.vlgmr.msra.gmra.mxu1 %vm54_vm2, %v687_v30 }
 0x302   :  { %2007 = vmatpush3.bf16.msra.mxu0 %v2298_v1  ;;  %2015 = vmatpush3.bf16.msra.mxu1 %v2307_v2 }
 0x303   :  { %2008 = vmatprep.subr.bf16.mxu0 %v2276_v0  ;;  %2016 = vmatprep.subr.bf16.mxu1 %v2276_v0 }
 0x304   :  { %2010 = vmatprep.mubr.msk.bf16.mxu0 %vm2277_vm1, %v2276_v0  ;;  %2018 = vmatprep.mubr.msk.bf16.mxu1 %vm2277_vm1, %v2276_v0 }
 0x306   :  { %2009 = vmatpush3.bf16.msra.mxu0 %v2317_v3  ;;  %2017 = vmatpush3.bf16.msra.mxu1 %v2324_v4 }
 0x307   :  { %2022 = vmatprep.subr.bf16.mxu0 %v2276_v0  ;;  %2030 = vmatprep.subr.bf16.mxu1 %v2276_v0 }
 0x3b9   :  { %v725_v33 = vpop.f32.mrf.mxu0  ;;  %v766_v34 = vpop.f32.mrf.mxu1 }
 0x3ba   :  { %v731_v35 = vadd.f32 %v1722_v31, %v725_v33  ;;  %v772_v36 = vadd.f32 %v1723_v32, %v766_v34  ;;  %v1737_v34 = vld [vmem:[%s2728_s0 + $0x26] sm:$0x3] }
 0x3bb   :  { %v1980_v37 = vpop.f32.mrf.mxu0  ;;  %v1988_v38 = vpop.f32.mrf.mxu1 }
 0x3bc   :  { %v1730_v39 = vmul.f32 -1.442695, %v731_v35  ;;  %v1731_v40 = vmul.f32 -1.442695, %v772_v36 }
 0x3bd   :  { %v728_v41 = vpop.f32.mrf.mxu0  ;;  %v769_v42 = vpop.f32.mrf.mxu1 }
 0x3be   :  { %2192 = vpow2.f32 %v1730_v39  ;;  %v1736_v41 = vld [vmem:[%s2728_s0 + $0x24] sm:$0x3] }
 0x3bf   :  { %2194 = vpow2.f32 %v1731_v40  ;;  %v1981_v43 = vpop.f32.mrf.mxu0  ;;  %v1989_v44 = vpop.f32.mrf.mxu1 }
 0x3c1   :  { %v807_v45 = vpop.f32.mrf.mxu0  ;;  %v848_v47 = vpop.f32.mrf.mxu1 }
 0x3c2   :  { %v854_v50 = vadd.f32 %v1725_v46, %v848_v47  ;;  %v813_v57 = vadd.f32 %v1724_v53, %v807_v45 }
 0x3c3   :  { %v1996_v48 = vpop.f32.mrf.mxu0  ;;  %v2004_v49 = vpop.f32.mrf.mxu1 }
 0x3c4   :  { %v1732_v56 = vmul.f32 -1.442695, %v854_v50 }
 0x3c5   :  { %v810_v51 = vpop.f32.mrf.mxu0  ;;  %v851_v52 = vpop.f32.mrf.mxu1 }
 0x3c6   :  { %2196 = vpow2.f32 %v1732_v56 }
 0x3c7   :  { %v1997_v54 = vpop.f32.mrf.mxu0  ;;  %v2005_v55 = vpop.f32.mrf.mxu1  ;;  %2198 = vtanh.f32 %v813_v57 }
 0x3cb   :  { %v2193_v58 = vpop.eup %2192 }
 0x3cc   :  { %v2195_v59 = vpop.eup %2194  ;;  %v858_v60 = vadd.f32 1.0, %v2193_v58 }
 0x3cd   :  { %v864_v61 = vadd.f32 1.0, %v2195_v59 }
 0x3ce   :  { %2200 = vrcp.f32 %v858_v60 }
 0x3cf   :  { %2202 = vrcp.f32 %v864_v61 }
 0x3d3   :  { %v2197_v62 = vpop.eup %2196 }
 0x3d4   :  { %v2199_v63 = vpop.eup %2198  ;;  %v871_v12 = vadd.f32 1.0, %v2197_v62  ;;  %v1746_v62 = vld [vmem:[%s2728_s0 + $0x28] sm:$0x3] }
 0x3d6   :  { %2204 = vrcp.f32 %v871_v12 }
 0x3db   :  { %v2201_v7 = vpop.eup %2200 }
 0x3dc   :  { %v2203_v8 = vpop.eup %2202  ;;  %v875_v11 = vmul.f32 %v2201_v7, %v2199_v63  ;;  %v1747_v63 = vld [vmem:[%s2728_s0 + $0x2a] sm:$0x3] }
 0x3dd   :  { %v874_v13 = vmul.f32 %v2203_v8, %v2487_v26 }
 0x3df   :  { %v2535_v14 = vadd.f32 %v875_v11, %v874_v13 }
 0x3e1   :  { %2206 = vtanh.f32 %v2535_v14 }
 0x3e3   :  { %v2205_v15 = vpop.eup %2204 }
 0x3ee   :  { %v2207_v16 = vpop.eup %2206 }
 0x3ef   :  { %v878_v17 = vmul.f32 %v2207_v16, %v2205_v15 }
 0x3f1   :  { %1733 = vst.msk [vmem:[%s2729_s2 + $0x6] sm:$0x3] %vm16_vm0, %v878_v17  ;;  %v886_v18 = vpack.c.bf16 %v878_v17, %v878_v17 }
 0x3f3   :  { %2011 = vmatmul.mubr.msk.bf16.vlgmr.msra.gmra.mxu0 %vm54_vm2, %v886_v18  ;;  %2019 = vmatmul.mubr.msk.bf16.vlgmr.msra.gmra.mxu1 %vm54_vm2, %v886_v18 }
 0x3f4   :  { %2023 = vmatpush3.bf16.msra.mxu0 %v2330_v5  ;;  %2031 = vmatpush3.bf16.msra.mxu1 %v2336_v6 }
 0x3f5   :  { %2024 = vmatprep.subr.bf16.mxu0 %v2276_v0  ;;  %2032 = vmatprep.subr.bf16.mxu1 %v2276_v0 }
 0x3f6   :  { %2026 = vmatprep.mubr.msk.bf16.mxu0 %vm2277_vm1, %v2276_v0  ;;  %2034 = vmatprep.mubr.msk.bf16.mxu1 %vm2277_vm1, %v2276_v0 }
 0x3f8   :  { %2025 = vmatpush3.bf16.msra.mxu0 %v2348_v9  ;;  %2033 = vmatpush3.bf16.msra.mxu1 %v2353_v10 }
 0x3f9   :  { %2038 = vmatprep.subr.bf16.mxu0 %v2276_v0  ;;  %2046 = vmatprep.subr.bf16.mxu1 %v2276_v0 }
 0x3fb   :  { %2027 = vmatmul.mubr.msk.bf16.vlgmr.msra.gmra.mxu0 %vm54_vm2, %v886_v18  ;;  %2035 = vmatmul.mubr.msk.bf16.vlgmr.msra.gmra.mxu1 %vm54_vm2, %v886_v18 }
 0x3fc   :  { %2039 = vmatpush3.bf16.msra.mxu0 %v2298_v1  ;;  %2047 = vmatpush3.bf16.msra.mxu1 %v2307_v2 }
 0x3fd   :  { %2040 = vmatprep.subr.bf16.mxu0 %v2276_v0  ;;  %2048 = vmatprep.subr.bf16.mxu1 %v2276_v0 }
 0x3fe   :  { %2042 = vmatprep.mubr.msk.bf16.mxu0 %vm2277_vm1, %v2276_v0  ;;  %2050 = vmatprep.mubr.msk.bf16.mxu1 %vm2277_vm1, %v2276_v0 }
 0x400   :  { %2041 = vmatpush3.bf16.msra.mxu0 %v2317_v3  ;;  %2049 = vmatpush3.bf16.msra.mxu1 %v2324_v4 }
 0x401   :  { %2054 = vmatprep.subr.bf16.mxu0 %v2276_v0  ;;  %2062 = vmatprep.subr.bf16.mxu1 %v2276_v0 }
 0x4b3   :  { %v924_v21 = vpop.f32.mrf.mxu0  ;;  %v965_v22 = vpop.f32.mrf.mxu1 }
 0x4b4   :  { %v930_v23 = vadd.f32 %v1734_v19, %v924_v21  ;;  %v971_v24 = vadd.f32 %v1735_v20, %v965_v22  ;;  %v1749_v22 = vld [vmem:[%s2728_s0 + $0x2e] sm:$0x3] }
 0x4b5   :  { %v2012_v25 = vpop.f32.mrf.mxu0  ;;  %v2020_v26 = vpop.f32.mrf.mxu1 }
 0x4b6   :  { %v1742_v27 = vmul.f32 -1.442695, %v930_v23  ;;  %v1743_v28 = vmul.f32 -1.442695, %v971_v24 }
 0x4b7   :  { %v927_v29 = vpop.f32.mrf.mxu0  ;;  %v968_v30 = vpop.f32.mrf.mxu1 }
 0x4b8   :  { %2208 = vpow2.f32 %v1742_v27  ;;  %v1748_v29 = vld [vmem:[%s2728_s0 + $0x2c] sm:$0x3] }
 0x4b9   :  { %2210 = vpow2.f32 %v1743_v28  ;;  %v2013_v31 = vpop.f32.mrf.mxu0  ;;  %v2021_v32 = vpop.f32.mrf.mxu1 }
 0x4bb   :  { %v1006_v33 = vpop.f32.mrf.mxu0  ;;  %v1047_v35 = vpop.f32.mrf.mxu1 }
 0x4bc   :  { %v1053_v38 = vadd.f32 %v1737_v34, %v1047_v35  ;;  %v1012_v45 = vadd.f32 %v1736_v41, %v1006_v33 }
 0x4bd   :  { %v2028_v36 = vpop.f32.mrf.mxu0  ;;  %v2036_v37 = vpop.f32.mrf.mxu1 }
 0x4be   :  { %v1744_v44 = vmul.f32 -1.442695, %v1053_v38 }
 0x4bf   :  { %v1009_v39 = vpop.f32.mrf.mxu0  ;;  %v1050_v40 = vpop.f32.mrf.mxu1 }
 0x4c0   :  { %2212 = vpow2.f32 %v1744_v44 }
 0x4c1   :  { %v2029_v42 = vpop.f32.mrf.mxu0  ;;  %v2037_v43 = vpop.f32.mrf.mxu1  ;;  %2214 = vtanh.f32 %v1012_v45 }
 0x4c5   :  { %v2209_v46 = vpop.eup %2208 }
 0x4c6   :  { %v2211_v47 = vpop.eup %2210  ;;  %v1057_v48 = vadd.f32 1.0, %v2209_v46 }
 0x4c7   :  { %v1063_v49 = vadd.f32 1.0, %v2211_v47 }
 0x4c8   :  { %2216 = vrcp.f32 %v1057_v48 }
 0x4c9   :  { %2218 = vrcp.f32 %v1063_v49 }
 0x4cd   :  { %v2213_v50 = vpop.eup %2212 }
 0x4ce   :  { %v2215_v51 = vpop.eup %2214  ;;  %v1070_v55 = vadd.f32 1.0, %v2213_v50 }
 0x4d0   :  { %2220 = vrcp.f32 %v1070_v55 }
 0x4d5   :  { %v2217_v52 = vpop.eup %2216 }
 0x4d6   :  { %v2219_v53 = vpop.eup %2218  ;;  %v1074_v54 = vmul.f32 %v2217_v52, %v2215_v51 }
 0x4d7   :  { %v1073_v56 = vmul.f32 %v2219_v53, %v2535_v14 }
 0x4d9   :  { %v2583_v57 = vadd.f32 %v1074_v54, %v1073_v56 }
 0x4db   :  { %2222 = vtanh.f32 %v2583_v57 }
 0x4dd   :  { %v2221_v58 = vpop.eup %2220 }
 0x4e8   :  { %v2223_v59 = vpop.eup %2222 }
 0x4e9   :  { %v1077_v60 = vmul.f32 %v2223_v59, %v2221_v58 }
 0x4eb   :  { %1745 = vst.msk [vmem:[%s2729_s2 + $0x8] sm:$0x3] %vm16_vm0, %v1077_v60  ;;  %v1085_v61 = vpack.c.bf16 %v1077_v60, %v1077_v60 }
 0x4ed   :  { %2043 = vmatmul.mubr.msk.bf16.vlgmr.msra.gmra.mxu0 %vm54_vm2, %v1085_v61  ;;  %2051 = vmatmul.mubr.msk.bf16.vlgmr.msra.gmra.mxu1 %vm54_vm2, %v1085_v61 }
 0x4ee   :  { %2055 = vmatpush3.bf16.msra.mxu0 %v2330_v5  ;;  %2063 = vmatpush3.bf16.msra.mxu1 %v2336_v6 }
 0x4ef   :  { %2056 = vmatprep.subr.bf16.mxu0 %v2276_v0  ;;  %2064 = vmatprep.subr.bf16.mxu1 %v2276_v0 }
 0x4f0   :  { %2058 = vmatprep.mubr.msk.bf16.mxu0 %vm2277_vm1, %v2276_v0  ;;  %2066 = vmatprep.mubr.msk.bf16.mxu1 %vm2277_vm1, %v2276_v0 }
 0x4f2   :  { %2057 = vmatpush3.bf16.msra.mxu0 %v2348_v9  ;;  %2065 = vmatpush3.bf16.msra.mxu1 %v2353_v10 }
 0x4f3   :  { %2070 = vmatprep.subr.bf16.mxu0 %v2276_v0  ;;  %2078 = vmatprep.subr.bf16.mxu1 %v2276_v0 }
 0x4f5   :  { %2059 = vmatmul.mubr.msk.bf16.vlgmr.msra.gmra.mxu0 %vm54_vm2, %v1085_v61  ;;  %2067 = vmatmul.mubr.msk.bf16.vlgmr.msra.gmra.mxu1 %vm54_vm2, %v1085_v61 }
 0x4f6   :  { %2071 = vmatpush3.bf16.msra.mxu0 %v2298_v1  ;;  %2079 = vmatpush3.bf16.msra.mxu1 %v2307_v2 }
 0x4f7   :  { %2072 = vmatprep.subr.bf16.mxu0 %v2276_v0  ;;  %2080 = vmatprep.subr.bf16.mxu1 %v2276_v0 }
 0x4f8   :  { %2074 = vmatprep.mubr.msk.bf16.mxu0 %vm2277_vm1, %v2276_v0  ;;  %2082 = vmatprep.mubr.msk.bf16.mxu1 %vm2277_vm1, %v2276_v0 }
 0x4fa   :  { %2073 = vmatpush3.bf16.msra.mxu0 %v2317_v3  ;;  %2081 = vmatpush3.bf16.msra.mxu1 %v2324_v4 }
 0x4fb   :  { %2086 = vmatprep.subr.bf16.mxu0 %v2276_v0  ;;  %2094 = vmatprep.subr.bf16.mxu1 %v2276_v0 }
 0x5ad   :  { %v1123_v7 = vpop.f32.mrf.mxu0  ;;  %v1164_v8 = vpop.f32.mrf.mxu1 }
 0x5ae   :  { %v1129_v11 = vadd.f32 %v1746_v62, %v1123_v7  ;;  %v1170_v12 = vadd.f32 %v1747_v63, %v1164_v8  ;;  %v1760_v7 = vld [vmem:[%s2728_s0 + $0x34] sm:$0x3] }
 0x5af   :  { %v2044_v13 = vpop.f32.mrf.mxu0  ;;  %v2052_v14 = vpop.f32.mrf.mxu1 }
 0x5b0   :  { %v1754_v15 = vmul.f32 -1.442695, %v1129_v11  ;;  %v1755_v16 = vmul.f32 -1.442695, %v1170_v12 }
 0x5b1   :  { %v1126_v17 = vpop.f32.mrf.mxu0  ;;  %v1167_v18 = vpop.f32.mrf.mxu1 }
 0x5b2   :  { %2224 = vpow2.f32 %v1754_v15 }
 0x5b3   :  { %2226 = vpow2.f32 %v1755_v16  ;;  %v2045_v19 = vpop.f32.mrf.mxu0  ;;  %v2053_v20 = vpop.f32.mrf.mxu1 }
 0x5b5   :  { %v1205_v21 = vpop.f32.mrf.mxu0  ;;  %v1246_v23 = vpop.f32.mrf.mxu1 }
 0x5b6   :  { %v1252_v26 = vadd.f32 %v1749_v22, %v1246_v23  ;;  %v1211_v33 = vadd.f32 %v1748_v29, %v1205_v21 }
 0x5b7   :  { %v2060_v24 = vpop.f32.mrf.mxu0  ;;  %v2068_v25 = vpop.f32.mrf.mxu1 }
 0x5b8   :  { %v1756_v32 = vmul.f32 -1.442695, %v1252_v26 }
 0x5b9   :  { %v1208_v27 = vpop.f32.mrf.mxu0  ;;  %v1249_v28 = vpop.f32.mrf.mxu1 }
 0x5ba   :  { %2228 = vpow2.f32 %v1756_v32  ;;  %v2274_v32 = vld [vmem:[%s2727_s1 + $0x20] sm:$0xff]  }
 0x5bb   :  { %v2061_v30 = vpop.f32.mrf.mxu0  ;;  %v2069_v31 = vpop.f32.mrf.mxu1  ;;  %2230 = vtanh.f32 %v1211_v33  ;;  %v2275_v33 = vld [vmem:[%s2727_s1 + $0x30] sm:$0xff]  }
 0x5bc   :  { %v2272_v30 = vld [vmem:[%s2727_s1 + $0x28] sm:$0xff]   ;;  %v2273_v31 = vld [vmem:[%s2727_s1 + $0x38] sm:$0xff]  }
 0x5bf   :  { %v2225_v34 = vpop.eup %2224 }
 0x5c0   :  { %v2227_v35 = vpop.eup %2226  ;;  %v1256_v36 = vadd.f32 1.0, %v2225_v34  ;;  %v1770_v34 = vld [vmem:[%s2728_s0 + $0x38] sm:$0x3] }
 0x5c1   :  { %v1262_v37 = vadd.f32 1.0, %v2227_v35 }
 0x5c2   :  { %2232 = vrcp.f32 %v1256_v36 }
 0x5c3   :  { %2234 = vrcp.f32 %v1262_v37 }
 0x5c7   :  { %v2229_v38 = vpop.eup %2228 }
 0x5c8   :  { %v2231_v39 = vpop.eup %2230  ;;  %v1269_v43 = vadd.f32 1.0, %v2229_v38 }
 0x5ca   :  { %2236 = vrcp.f32 %v1269_v43 }
 0x5cf   :  { %v2233_v40 = vpop.eup %2232 }
 0x5d0   :  { %v2235_v41 = vpop.eup %2234  ;;  %v1273_v42 = vmul.f32 %v2233_v40, %v2231_v39 }
 0x5d1   :  { %v1272_v44 = vmul.f32 %v2235_v41, %v2583_v57  ;;  %v1761_v57 = vld [vmem:[%s2728_s0 + $0x36] sm:$0x3] }
 0x5d3   :  { %v2631_v45 = vadd.f32 %v1273_v42, %v1272_v44 }
 0x5d5   :  { %2238 = vtanh.f32 %v2631_v45 }
 0x5d7   :  { %v2237_v46 = vpop.eup %2236 }
 0x5e2   :  { %v2239_v47 = vpop.eup %2238 }
 0x5e3   :  { %v1276_v48 = vmul.f32 %v2239_v47, %v2237_v46 }
 0x5e5   :  { %1757 = vst.msk [vmem:[%s2729_s2 + $0xa] sm:$0x3] %vm16_vm0, %v1276_v48  ;;  %v1284_v49 = vpack.c.bf16 %v1276_v48, %v1276_v48  ;;  %v1773_v48 = vld [vmem:[%s2728_s0 + $0x3e] sm:$0x3] }
 0x5e7   :  { %2075 = vmatmul.mubr.msk.bf16.vlgmr.msra.gmra.mxu0 %vm54_vm2, %v1284_v49  ;;  %2083 = vmatmul.mubr.msk.bf16.vlgmr.msra.gmra.mxu1 %vm54_vm2, %v1284_v49 }
 0x5e8   :  { %2087 = vmatpush3.bf16.msra.mxu0 %v2330_v5  ;;  %2095 = vmatpush3.bf16.msra.mxu1 %v2336_v6 }
 0x5e9   :  { %2088 = vmatprep.subr.bf16.mxu0 %v2276_v0  ;;  %2096 = vmatprep.subr.bf16.mxu1 %v2276_v0 }
 0x5ea   :  { %2090 = vmatprep.mubr.msk.bf16.mxu0 %vm2277_vm1, %v2276_v0  ;;  %2098 = vmatprep.mubr.msk.bf16.mxu1 %vm2277_vm1, %v2276_v0 }
 0x5ec   :  { %2089 = vmatpush3.bf16.msra.mxu0 %v2348_v9  ;;  %2097 = vmatpush3.bf16.msra.mxu1 %v2353_v10 }
 0x5ed   :  { %2102 = vmatprep.subr.bf16.mxu0 %v2276_v0  ;;  %2110 = vmatprep.subr.bf16.mxu1 %v2276_v0 }
 0x5ef   :  { %2091 = vmatmul.mubr.msk.bf16.vlgmr.msra.gmra.mxu0 %vm54_vm2, %v1284_v49  ;;  %2099 = vmatmul.mubr.msk.bf16.vlgmr.msra.gmra.mxu1 %vm54_vm2, %v1284_v49 }
 0x5f0   :  { %2103 = vmatpush3.bf16.msra.mxu0 %v2298_v1  ;;  %2111 = vmatpush3.bf16.msra.mxu1 %v2307_v2  ;;  %v1758_v1 = vld [vmem:[%s2728_s0 + $0x30] sm:$0x3]  ;;  %v1759_v2 = vld [vmem:[%s2728_s0 + $0x32] sm:$0x3] }
 0x5f1   :  { %2104 = vmatprep.subr.bf16.mxu0 %v2276_v0  ;;  %2112 = vmatprep.subr.bf16.mxu1 %v2276_v0 }
 0x5f2   :  { %2106 = vmatprep.mubr.msk.bf16.mxu0 %vm2277_vm1, %v2276_v0  ;;  %2114 = vmatprep.mubr.msk.bf16.mxu1 %vm2277_vm1, %v2276_v0 }
 0x5f4   :  { %2105 = vmatpush3.bf16.msra.mxu0 %v2317_v3  ;;  %2113 = vmatpush3.bf16.msra.mxu1 %v2324_v4 }
 0x5f5   :  { %2118 = vmatprep.subr.bf16.mxu0 %v2276_v0  ;;  %2126 = vmatprep.subr.bf16.mxu1 %v2276_v0 }
 0x6a7   :  { %v1322_v5 = vpop.f32.mrf.mxu0  ;;  %v1363_v6 = vpop.f32.mrf.mxu1 }
 0x6a8   :  { %v1328_v9 = vadd.f32 %v1758_v1, %v1322_v5  ;;  %v1369_v10 = vadd.f32 %v1759_v2, %v1363_v6 }
 0x6a9   :  { %v2076_v50 = vpop.f32.mrf.mxu0  ;;  %v2084_v3 = vpop.f32.mrf.mxu1 }
 0x6aa   :  { %v1766_v51 = vmul.f32 -1.442695, %v1328_v9  ;;  %v1767_v4 = vmul.f32 -1.442695, %v1369_v10  ;;  %v1772_v10 = vld [vmem:[%s2728_s0 + $0x3c] sm:$0x3] }
 0x6ab   :  { %v1325_v52 = vpop.f32.mrf.mxu0  ;;  %v1366_v53 = vpop.f32.mrf.mxu1 }
 0x6ac   :  { %2240 = vpow2.f32 %v1766_v51 }
 0x6ad   :  { %2242 = vpow2.f32 %v1767_v4  ;;  %v2077_v54 = vpop.f32.mrf.mxu0  ;;  %v2085_v55 = vpop.f32.mrf.mxu1 }
 0x6af   :  { %v1404_v56 = vpop.f32.mrf.mxu0  ;;  %v1445_v58 = vpop.f32.mrf.mxu1 }
 0x6b0   :  { %v1451_v61 = vadd.f32 %v1761_v57, %v1445_v58  ;;  %v1410_v13 = vadd.f32 %v1760_v7, %v1404_v56 }
 0x6b1   :  { %v2092_v59 = vpop.f32.mrf.mxu0  ;;  %v2100_v60 = vpop.f32.mrf.mxu1 }
 0x6b2   :  { %v1768_v12 = vmul.f32 -1.442695, %v1451_v61 }
 0x6b3   :  { %v1407_v62 = vpop.f32.mrf.mxu0  ;;  %v1448_v63 = vpop.f32.mrf.mxu1 }
 0x6b4   :  { %2244 = vpow2.f32 %v1768_v12 }
 0x6b5   :  { %v2093_v8 = vpop.f32.mrf.mxu0  ;;  %v2101_v11 = vpop.f32.mrf.mxu1  ;;  %2246 = vtanh.f32 %v1410_v13 }
 0x6b9   :  { %v2241_v14 = vpop.eup %2240 }
 0x6ba   :  { %v2243_v15 = vpop.eup %2242  ;;  %v1455_v16 = vadd.f32 1.0, %v2241_v14 }
 0x6bb   :  { %v1461_v17 = vadd.f32 1.0, %v2243_v15 }
 0x6bc   :  { %2248 = vrcp.f32 %v1455_v16 }
 0x6bd   :  { %2250 = vrcp.f32 %v1461_v17 }
 0x6c1   :  { %v2245_v18 = vpop.eup %2244 }
 0x6c2   :  { %v2247_v19 = vpop.eup %2246  ;;  %v1468_v23 = vadd.f32 1.0, %v2245_v18 }
 0x6c4   :  { %2252 = vrcp.f32 %v1468_v23 }
 0x6c9   :  { %v2249_v20 = vpop.eup %2248 }
 0x6ca   :  { %v2251_v21 = vpop.eup %2250  ;;  %v1472_v22 = vmul.f32 %v2249_v20, %v2247_v19 }
 0x6cb   :  { %v1471_v24 = vmul.f32 %v2251_v21, %v2631_v45 }
 0x6cd   :  { %v2679_v25 = vadd.f32 %v1472_v22, %v1471_v24 }
 0x6cf   :  { %2254 = vtanh.f32 %v2679_v25 }
 0x6d1   :  { %v2253_v26 = vpop.eup %2252 }
 0x6dc   :  { %v2255_v27 = vpop.eup %2254 }
 0x6dd   :  { %v1475_v28 = vmul.f32 %v2255_v27, %v2253_v26 }
 0x6df   :  { %1769 = vst.msk [vmem:[%s2729_s2 + $0xc] sm:$0x3] %vm16_vm0, %v1475_v28  ;;  %v1483_v29 = vpack.c.bf16 %v1475_v28, %v1475_v28 }
 0x6e1   :  { %2107 = vmatmul.mubr.msk.bf16.vlgmr.msra.gmra.mxu0 %vm54_vm2, %v1483_v29  ;;  %2115 = vmatmul.mubr.msk.bf16.vlgmr.msra.gmra.mxu1 %vm54_vm2, %v1483_v29 }
 0x6e2   :  { %2119 = vmatpush3.bf16.msra.mxu0 %v2272_v30  ;;  %2127 = vmatpush3.bf16.msra.mxu1 %v2273_v31 }
 0x6e3   :  { %2120 = vmatprep.subr.bf16.mxu0 %v2276_v0  ;;  %2128 = vmatprep.subr.bf16.mxu1 %v2276_v0 }
 0x6e4   :  { %2122 = vmatprep.mubr.msk.bf16.mxu0 %vm2277_vm1, %v2276_v0  ;;  %2130 = vmatprep.mubr.msk.bf16.mxu1 %vm2277_vm1, %v2276_v0  ;;  %v1771_v0 = vld [vmem:[%s2728_s0 + $0x3a] sm:$0x3] }
 0x6e6   :  { %2121 = vmatpush3.bf16.msra.mxu0 %v2274_v32  ;;  %2129 = vmatpush3.bf16.msra.mxu1 %v2275_v33 }
 0x6e9   :  { %2123 = vmatmul.mubr.msk.bf16.vlgmr.msra.gmra.mxu0 %vm54_vm2, %v1483_v29  ;;  %2131 = vmatmul.mubr.msk.bf16.vlgmr.msra.gmra.mxu1 %vm54_vm2, %v1483_v29 }
 0x7a1   :  { %v1521_v35 = vpop.f32.mrf.mxu0  ;;  %v1562_v36 = vpop.f32.mrf.mxu1 }
 0x7a2   :  { %v1527_v37 = vadd.f32 %v1770_v34, %v1521_v35  ;;  %v1568_v38 = vadd.f32 %v1771_v0, %v1562_v36 }
 0x7a3   :  { %v2108_v39 = vpop.f32.mrf.mxu0  ;;  %v2116_v40 = vpop.f32.mrf.mxu1 }
 0x7a4   :  { %v1778_v41 = vmul.f32 -1.442695, %v1527_v37  ;;  %v1779_v42 = vmul.f32 -1.442695, %v1568_v38 }
 0x7a5   :  { %v1524_v43 = vpop.f32.mrf.mxu0  ;;  %v1565_v44 = vpop.f32.mrf.mxu1 }
 0x7a6   :  { %2256 = vpow2.f32 %v1778_v41 }
 0x7a7   :  { %2258 = vpow2.f32 %v1779_v42  ;;  %v2109_v45 = vpop.f32.mrf.mxu0  ;;  %v2117_v46 = vpop.f32.mrf.mxu1 }
 0x7a9   :  { %v1603_v47 = vpop.f32.mrf.mxu0  ;;  %v1644_v49 = vpop.f32.mrf.mxu1 }
 0x7aa   :  { %v1650_v5 = vadd.f32 %v1773_v48, %v1644_v49  ;;  %v1609_v4 = vadd.f32 %v1772_v10, %v1603_v47 }
 0x7ab   :  { %v2124_v1 = vpop.f32.mrf.mxu0  ;;  %v2132_v2 = vpop.f32.mrf.mxu1 }
 0x7ac   :  { %v1780_v51 = vmul.f32 -1.442695, %v1650_v5 }
 0x7ad   :  { %v1606_v6 = vpop.f32.mrf.mxu0  ;;  %v1647_v9 = vpop.f32.mrf.mxu1 }
 0x7ae   :  { %2260 = vpow2.f32 %v1780_v51 }
 0x7af   :  { %v2125_v50 = vpop.f32.mrf.mxu0  ;;  %v2133_v3 = vpop.f32.mrf.mxu1  ;;  %2262 = vtanh.f32 %v1609_v4 }
 0x7b3   :  { %v2257_v52 = vpop.eup %2256 }
 0x7b4   :  { %v2259_v53 = vpop.eup %2258  ;;  %v1654_v54 = vadd.f32 1.0, %v2257_v52 }
 0x7b5   :  { %v1660_v55 = vadd.f32 1.0, %v2259_v53 }
 0x7b6   :  { %2264 = vrcp.f32 %v1654_v54 }
 0x7b7   :  { %2266 = vrcp.f32 %v1660_v55 }
 0x7bb   :  { %v2261_v56 = vpop.eup %2260 }
 0x7bc   :  { %v2263_v57 = vpop.eup %2262  ;;  %v1667_v61 = vadd.f32 1.0, %v2261_v56 }
 0x7be   :  { %2268 = vrcp.f32 %v1667_v61 }
 0x7c3   :  { %v2265_v58 = vpop.eup %2264 }
 0x7c4   :  { %v2267_v59 = vpop.eup %2266  ;;  %v1671_v60 = vmul.f32 %v2265_v58, %v2263_v57 }
 0x7c5   :  { %v1670_v62 = vmul.f32 %v2267_v59, %v2679_v25 }
 0x7c7   :  { %v1672_v63 = vadd.f32 %v1671_v60, %v1670_v62 }
 0x7c9   :  { %2270 = vtanh.f32 %v1672_v63  ;;  %1678 = vst.msk [vmem:[#allocation3] sm:$0x3] %vm16_vm0, %v1672_v63 }
 0x7cb   :  { %v2269_v7 = vpop.eup %2268 }
 0x7d6   :  { %v2271_v8 = vpop.eup %2270 }
 0x7d7   :  { %v1674_v11 = vmul.f32 %v2271_v8, %v2269_v7 }
 0x7d9   :  { %1781 = vst.msk [vmem:[%s2729_s2 + $0xe] sm:$0x3] %vm16_vm0, %v1674_v11  ;;  %1677 = vst.msk [vmem:[#allocation2] sm:$0x3] %vm16_vm0, %v1674_v11 }

// kernel: gpt_lip_reading_forward.2
= control target key start
LH: loop header
LB: loop body
LE: loop exit
PB: predicated region body
PF: predicated region fallthrough
CT: control target
= control target key end

     0   :  { %vm2609_vm0 = vcmask 1041408   ;;  %vm1840_vm1 = vcmask 293888   ;;  %vm5206_vm2 = vcmask 261120   ;;  %vm6387_vm3 = vcmask 1041409   ;;  %s10941_s1 = inlined_call_operand.vmem [shape: bf16[36,32], index: 1, kind: input, shape index: {}]   ;;  %s10942_s0 = inlined_call_operand.vmem [shape: bf16[16,256,36], index: 0, kind: input, shape index: {}]   ;;  %s10943_s3 = inlined_call_operand.vmem [shape: bf16[32,128], index: 3, kind: input, shape index: {}]   ;;  %s10944_s2 = inlined_call_operand.vmem [shape: f32[1,32], index: 2, kind: input, shape index: {}]   ;;  %s10945_s4 = inlined_call_operand.vmem [shape: f32[1,128], index: 4, kind: input, shape index: {}]   ;;  %s10946_s5 = inlined_call_operand.vmem [shape: f32[16,128], index: 5, kind: output, shape index: {}]  }
   0x1   :  { %v7789_v0 = vld [vmem:[%s10941_s1 + $0x10] ss:$0 sps:$4 sm:$0x33]   ;;  %v7790_v1 = vld [vmem:[%s10941_s1 + $0x8] sm:$0xff]   ;;  %v7792_v3 = vld [vmem:[%s10942_s0] sm:$0xff]   ;;  %vm6389_vm4 = vcmask 1042434  }
   0x2   :  { %7785 = vmatprep.subr.msk.bf16.mxu0 %vm2609_vm0, %v7789_v0  ;;  %v2611_v2 = vsel %vm2609_vm0, %v7789_v0, 0  ;;  %7786 = vmatprep.subr.msk.bf16.mxu1 %vm2609_vm0, %v7789_v0  ;;  %v7791_v4 = vld [vmem:[%s10941_s1] sm:$0xff]   ;;  %v7793_v5 = vld [vmem:[%s10942_s0 + $0x8] sm:$0xff]   ;;  %v7794_v6 = vld [vmem:[%s10942_s0 + $0x10] sm:$0xff]   ;;  %vm6391_vm5 = vcmask 1043459   ;;  %vm6393_vm6 = vcmask 1044484  }
   0x3   :  { %7254 = vmatpush3.bf16.msra.mxu0 %v2611_v2  ;;  %7782 = vmatpush3.bf16.msra.mxu1 %v2611_v2  ;;  %v7795_v7 = vld [vmem:[%s10942_s0 + $0x18] sm:$0xff]   ;;  %v7796_v8 = vld [vmem:[%s10942_s0 + $0x20] sm:$0xff]   ;;  %v7808_v9 = vld [vmem:[%s10942_s0 + $0x410] sm:$0xff]   ;;  %vm6395_vm7 = vcmask 1045509   ;;  %vm6397_vm8 = vcmask 1046534   ;;  %vm6399_vm9 = vcmask 1047559  }
   0x4   :  { %7255 = vmatprep.subr.bf16.mxu0 %v7790_v1  ;;  %7780 = vmatprep.subr.bf16.mxu1 %v7790_v1  ;;  %v7809_v10 = vld [vmem:[%s10942_s0 + $0x418] sm:$0xff]   ;;  %v7812_v11 = vld [vmem:[%s10942_s0 + $0x420] sm:$0xff]   ;;  %v7797_v12 = vld [vmem:[%s10942_s0 + $0x28] sm:$0xff]   ;;  %vm8056_vm10 = vmmov 0  }
   0x5   :  { %7259 = vmatprep.mubr.msk.bf16.mxu0 %vm1840_vm1, %v7792_v3  ;;  %7519 = vmatprep.mubr.msk.bf16.mxu1 %vm1840_vm1, %v7808_v9  ;;  %v7798_v13 = vld [vmem:[%s10942_s0 + $0x30] sm:$0xff]   ;;  %v7813_v14 = vld [vmem:[%s10942_s0 + $0x428] sm:$0xff]   ;;  %v7799_v16 = vld [vmem:[%s10942_s0 + $0x38] sm:$0xff]  }
   0x6   :  { %v7816_v15 = vld [vmem:[%s10942_s0 + $0x430] sm:$0xff]   ;;  %v7800_v17 = vld [vmem:[%s10942_s0 + $0x40] sm:$0xff]   ;;  %v7817_v18 = vld [vmem:[%s10942_s0 + $0x438] sm:$0xff]  }
   0x7   :  { %7256 = vmatpush3.bf16.msra.mxu0 %v7790_v1  ;;  %7783 = vmatpush3.bf16.msra.mxu1 %v7790_v1  ;;  %v7820_v19 = vld [vmem:[%s10942_s0 + $0x440] sm:$0xff]   ;;  %v7801_v20 = vld [vmem:[%s10942_s0 + $0x48] sm:$0xff]   ;;  %v7802_v21 = vld [vmem:[%s10942_s0 + $0x50] sm:$0xff]  }
   0x8   :  { %7257 = vmatprep.subr.bf16.mxu0 %v7791_v4  ;;  %7781 = vmatprep.subr.bf16.mxu1 %v7791_v4  ;;  %v7821_v22 = vld [vmem:[%s10942_s0 + $0x448] sm:$0xff]   ;;  %v7824_v23 = vld [vmem:[%s10942_s0 + $0x450] sm:$0xff]   ;;  %v7803_v24 = vld [vmem:[%s10942_s0 + $0x58] sm:$0xff]  }
   0x9   :  { %v7804_v25 = vld [vmem:[%s10942_s0 + $0x60] sm:$0xff]   ;;  %v7825_v26 = vld [vmem:[%s10942_s0 + $0x458] sm:$0xff]   ;;  %v7805_v28 = vld [vmem:[%s10942_s0 + $0x68] sm:$0xff]  }
   0xa   :  { %v7828_v27 = vld [vmem:[%s10942_s0 + $0x460] sm:$0xff]   ;;  %v7806_v29 = vld [vmem:[%s10942_s0 + $0x70] sm:$0xff]   ;;  %v7829_v30 = vld [vmem:[%s10942_s0 + $0x468] sm:$0xff]  }
   0xb   :  { %7258 = vmatpush3.bf16.msra.mxu0 %v7791_v4  ;;  %7784 = vmatpush3.bf16.msra.mxu1 %v7791_v4  ;;  %v7832_v31 = vld [vmem:[%s10942_s0 + $0x470] sm:$0xff]   ;;  %v7807_v32 = vld [vmem:[%s10942_s0 + $0x78] sm:$0xff]   ;;  %v7810_v33 = vld [vmem:[%s10942_s0 + $0x80] sm:$0xff]  }
   0xc   :  { %v7833_v34 = vld [vmem:[%s10942_s0 + $0x478] sm:$0xff]   ;;  %v7836_v35 = vld [vmem:[%s10942_s0 + $0x480] sm:$0xff]   ;;  %v7811_v36 = vld [vmem:[%s10942_s0 + $0x88] sm:$0xff]  }
   0xd   :  { %v7814_v37 = vld [vmem:[%s10942_s0 + $0x90] sm:$0xff]   ;;  %v7837_v38 = vld [vmem:[%s10942_s0 + $0x488] sm:$0xff]   ;;  %v7815_v40 = vld [vmem:[%s10942_s0 + $0x98] sm:$0xff]  }
   0xe   :  { %7260 = vmatmul.mubr.msk.bf16.vlgmr.msra.gmra.mxu0 %vm1840_vm1, %v7793_v5  ;;  %7520 = vmatmul.mubr.msk.bf16.vlgmr.msra.gmra.mxu1 %vm1840_vm1, %v7809_v10  ;;  %v7840_v39 = vld [vmem:[%s10942_s0 + $0x490] sm:$0xff]   ;;  %v7818_v41 = vld [vmem:[%s10942_s0 + $0xa0] sm:$0xff]   ;;  %v7841_v42 = vld [vmem:[%s10942_s0 + $0x498] sm:$0xff]  }
   0xf   :  { %7263 = vmatprep.mubr.msk.bf16.mxu0 %vm1840_vm1, %v7794_v6  ;;  %7523 = vmatprep.mubr.msk.bf16.mxu1 %vm1840_vm1, %v7812_v11  ;;  %v7844_v43 = vld [vmem:[%s10942_s0 + $0x4a0] sm:$0xff]   ;;  %v7819_v44 = vld [vmem:[%s10942_s0 + $0xa8] sm:$0xff]   ;;  %v7822_v45 = vld [vmem:[%s10942_s0 + $0xb0] sm:$0xff]  }
  0x10   :  { %v7845_v46 = vld [vmem:[%s10942_s0 + $0x4a8] sm:$0xff]   ;;  %v7848_v47 = vld [vmem:[%s10942_s0 + $0x4b0] sm:$0xff]   ;;  %v7823_v48 = vld [vmem:[%s10942_s0 + $0xb8] sm:$0xff]  }
  0x11   :  { %v7826_v49 = vld [vmem:[%s10942_s0 + $0xc0] sm:$0xff]   ;;  %v7849_v50 = vld [vmem:[%s10942_s0 + $0x4b8] sm:$0xff]   ;;  %v7827_v52 = vld [vmem:[%s10942_s0 + $0xc8] sm:$0xff]  }
  0x12   :  { %v7852_v51 = vld [vmem:[%s10942_s0 + $0x4c0] sm:$0xff]   ;;  %v7830_v53 = vld [vmem:[%s10942_s0 + $0xd0] sm:$0xff]   ;;  %v7853_v54 = vld [vmem:[%s10942_s0 + $0x4c8] sm:$0xff]  }
  0x13   :  { %v7856_v55 = vld [vmem:[%s10942_s0 + $0x4d0] sm:$0xff]   ;;  %v7831_v56 = vld [vmem:[%s10942_s0 + $0xd8] sm:$0xff]   ;;  %v7834_v57 = vld [vmem:[%s10942_s0 + $0xe0] sm:$0xff]  }
  0x14   :  { %v7857_v58 = vld [vmem:[%s10942_s0 + $0x4d8] sm:$0xff]   ;;  %v7860_v59 = vld [vmem:[%s10942_s0 + $0x4e0] sm:$0xff]   ;;  %v7835_v60 = vld [vmem:[%s10942_s0 + $0xe8] sm:$0xff]  }
  0x15   :  { %v7838_v61 = vld [vmem:[%s10942_s0 + $0xf0] sm:$0xff]   ;;  %v7861_v62 = vld [vmem:[%s10942_s0 + $0x4e8] sm:$0xff]   ;;  %v7839_v0 = vld [vmem:[%s10942_s0 + $0xf8] sm:$0xff]  }
  0x16   :  { %7264 = vmatmul.mubr.msk.bf16.gmra.mxu0 %vm1840_vm1, %v7795_v7  ;;  %7524 = vmatmul.mubr.msk.bf16.gmra.mxu1 %vm1840_vm1, %v7813_v14  ;;  %v7864_v63 = vld [vmem:[%s10942_s0 + $0x4f0] sm:$0xff]   ;;  %v7842_v1 = vld [vmem:[%s10942_s0 + $0x100] sm:$0xff]   ;;  %v7865_v2 = vld [vmem:[%s10942_s0 + $0x4f8] sm:$0xff]  }
  0x17   :  { %7267 = vmatprep.mubr.msk.bf16.mxu0 %vm1840_vm1, %v7796_v8  ;;  %7527 = vmatprep.mubr.msk.bf16.mxu1 %vm1840_vm1, %v7816_v15  ;;  %v7868_v3 = vld [vmem:[%s10942_s0 + $0x500] sm:$0xff]   ;;  %v7843_v4 = vld [vmem:[%s10942_s0 + $0x108] sm:$0xff]   ;;  %v7846_v5 = vld [vmem:[%s10942_s0 + $0x110] sm:$0xff]  }
  0x18   :  { %v7869_v6 = vld [vmem:[%s10942_s0 + $0x508] sm:$0xff]   ;;  %v7872_v7 = vld [vmem:[%s10942_s0 + $0x510] sm:$0xff]   ;;  %v7847_v8 = vld [vmem:[%s10942_s0 + $0x118] sm:$0xff]  }
  0x19   :  { %v7850_v9 = vld [vmem:[%s10942_s0 + $0x120] sm:$0xff]   ;;  %v7873_v10 = vld [vmem:[%s10942_s0 + $0x518] sm:$0xff]   ;;  %v7877_v14 = vld [vmem:[%s10942_s0 + $0x528] sm:$0xff]  }
  0x1a   :  { %v7876_v11 = vld [vmem:[%s10942_s0 + $0x520] sm:$0xff]   ;;  %v7880_v15 = vld [vmem:[%s10942_s0 + $0x530] sm:$0xff]  }
  0x1e   :  { %7268 = vmatmul.mubr.msk.bf16.gmra.mxu0 %vm1840_vm1, %v7797_v12  ;;  %7528 = vmatmul.mubr.msk.bf16.gmra.mxu1 %vm1840_vm1, %v7817_v18  ;;  %v7851_v12 = vld [vmem:[%s10942_s0 + $0x128] sm:$0xff]   ;;  %v7881_v18 = vld [vmem:[%s10942_s0 + $0x538] sm:$0xff]  }
  0x1f   :  { %7271 = vmatprep.mubr.msk.bf16.mxu0 %vm1840_vm1, %v7798_v13  ;;  %7531 = vmatprep.mubr.msk.bf16.mxu1 %vm1840_vm1, %v7820_v19  ;;  %v7854_v13 = vld [vmem:[%s10942_s0 + $0x130] sm:$0xff]   ;;  %v7884_v19 = vld [vmem:[%s10942_s0 + $0x540] sm:$0xff]  }
  0x26   :  { %7272 = vmatmul.mubr.msk.bf16.gmra.mxu0 %vm1840_vm1, %v7799_v16  ;;  %7532 = vmatmul.mubr.msk.bf16.gmra.mxu1 %vm1840_vm1, %v7821_v22  ;;  %v7855_v16 = vld [vmem:[%s10942_s0 + $0x138] sm:$0xff]   ;;  %v7885_v22 = vld [vmem:[%s10942_s0 + $0x548] sm:$0xff]  }
  0x27   :  { %7275 = vmatprep.mubr.msk.bf16.mxu0 %vm1840_vm1, %v7800_v17  ;;  %7535 = vmatprep.mubr.msk.bf16.mxu1 %vm1840_vm1, %v7824_v23  ;;  %v7858_v17 = vld [vmem:[%s10942_s0 + $0x140] sm:$0xff]   ;;  %v7888_v23 = vld [vmem:[%s10942_s0 + $0x550] sm:$0xff]  }
  0x2e   :  { %7276 = vmatmul.mubr.msk.bf16.gmra.mxu0 %vm1840_vm1, %v7801_v20  ;;  %7536 = vmatmul.mubr.msk.bf16.gmra.mxu1 %vm1840_vm1, %v7825_v26  ;;  %v7859_v20 = vld [vmem:[%s10942_s0 + $0x148] sm:$0xff]   ;;  %v7889_v26 = vld [vmem:[%s10942_s0 + $0x558] sm:$0xff]  }
  0x2f   :  { %7279 = vmatprep.mubr.msk.bf16.mxu0 %vm1840_vm1, %v7802_v21  ;;  %7539 = vmatprep.mubr.msk.bf16.mxu1 %vm1840_vm1, %v7828_v27  ;;  %v7862_v21 = vld [vmem:[%s10942_s0 + $0x150] sm:$0xff]   ;;  %v7892_v27 = vld [vmem:[%s10942_s0 + $0x560] sm:$0xff]  }
  0x36   :  { %7280 = vmatmul.mubr.msk.bf16.gmra.mxu0 %vm1840_vm1, %v7803_v24  ;;  %7540 = vmatmul.mubr.msk.bf16.gmra.mxu1 %vm1840_vm1, %v7829_v30  ;;  %v7863_v24 = vld [vmem:[%s10942_s0 + $0x158] sm:$0xff]   ;;  %v7893_v30 = vld [vmem:[%s10942_s0 + $0x568] sm:$0xff]  }
  0x37   :  { %7283 = vmatprep.mubr.msk.bf16.mxu0 %vm1840_vm1, %v7804_v25  ;;  %7543 = vmatprep.mubr.msk.bf16.mxu1 %vm1840_vm1, %v7832_v31  ;;  %v7866_v25 = vld [vmem:[%s10942_s0 + $0x160] sm:$0xff]   ;;  %v7896_v31 = vld [vmem:[%s10942_s0 + $0x570] sm:$0xff]  }
  0x3e   :  { %7284 = vmatmul.mubr.msk.bf16.gmra.mxu0 %vm1840_vm1, %v7805_v28  ;;  %7544 = vmatmul.mubr.msk.bf16.gmra.mxu1 %vm1840_vm1, %v7833_v34  ;;  %v7867_v28 = vld [vmem:[%s10942_s0 + $0x168] sm:$0xff]  }
  0x3f   :  { %7287 = vmatprep.mubr.msk.bf16.mxu0 %vm1840_vm1, %v7806_v29  ;;  %7547 = vmatprep.mubr.msk.bf16.mxu1 %vm1840_vm1, %v7836_v35  ;;  %v7870_v29 = vld [vmem:[%s10942_s0 + $0x170] sm:$0xff]   ;;  %v7929_v34 = vld [vmem:[%s10943_s3 + $0x8] sm:$0xff]   ;;  %v7874_v35 = vld [vmem:[%s10942_s0 + $0x180] sm:$0xff]  }
  0x46   :  { %7288 = vmatmul.mubr.msk.bf16.gmra.mxu0 %vm1840_vm1, %v7807_v32  ;;  %7548 = vmatmul.mubr.msk.bf16.gmra.mxu1 %vm1840_vm1, %v7837_v38  ;;  %v7871_v32 = vld [vmem:[%s10942_s0 + $0x178] sm:$0xff]   ;;  %v7875_v38 = vld [vmem:[%s10942_s0 + $0x188] sm:$0xff]  }
  0x47   :  { %7291 = vmatprep.mubr.msk.bf16.mxu0 %vm1840_vm1, %v7810_v33  ;;  %7551 = vmatprep.mubr.msk.bf16.mxu1 %vm1840_vm1, %v7840_v39  ;;  %v10947_v33 = vmov 0.0   ;;  %v7878_v39 = vld [vmem:[%s10942_s0 + $0x190] sm:$0xff]  }
  0x48   :  { %7771 = vmatprep.subr.bf16.mxu1 %v10947_v33 }
  0x49   :  { %7772 = vmatpush3.bf16.msra.mxu1 %v7929_v34 }
  0x4a   :  { %7773 = vmatprep.subr.bf16.mxu1 %v10947_v33 }
  0x4e   :  { %7292 = vmatmul.mubr.msk.bf16.gmra.mxu0 %vm1840_vm1, %v7811_v36  ;;  %7552 = vmatmul.mubr.msk.bf16.gmra.mxu1 %vm1840_vm1, %v7841_v42  ;;  %v7897_v36 = vld [vmem:[%s10942_s0 + $0x578] sm:$0xff]  }
  0x4f   :  { %7295 = vmatprep.mubr.msk.bf16.mxu0 %vm1840_vm1, %v7814_v37  ;;  %7555 = vmatprep.mubr.msk.bf16.mxu1 %vm1840_vm1, %v7844_v43  ;;  %v7900_v37 = vld [vmem:[%s10942_s0 + $0x580] sm:$0xff]  }
  0x50   :  { %v8500_v43 = vld [vmem:[%s10944_s2] ss:$0 sm:$0xff] }
  0x56   :  { %7296 = vmatmul.mubr.msk.bf16.gmra.mxu0 %vm1840_vm1, %v7815_v40  ;;  %7556 = vmatmul.mubr.msk.bf16.gmra.mxu1 %vm1840_vm1, %v7845_v46  ;;  %v7901_v40 = vld [vmem:[%s10942_s0 + $0x588] sm:$0xff]   ;;  %v7879_v46 = vld [vmem:[%s10942_s0 + $0x198] sm:$0xff]  }
  0x57   :  { %7299 = vmatprep.mubr.msk.bf16.mxu0 %vm1840_vm1, %v7818_v41  ;;  %7559 = vmatprep.mubr.msk.bf16.mxu1 %vm1840_vm1, %v7848_v47  ;;  %v7904_v41 = vld [vmem:[%s10942_s0 + $0x590] sm:$0xff]  }
  0x5e   :  { %7300 = vmatmul.mubr.msk.bf16.gmra.mxu0 %vm1840_vm1, %v7819_v44  ;;  %7560 = vmatmul.mubr.msk.bf16.gmra.mxu1 %vm1840_vm1, %v7849_v50  ;;  %v7882_v50 = vld [vmem:[%s10942_s0 + $0x1a0] sm:$0xff]  }
  0x5f   :  { %7303 = vmatprep.mubr.msk.bf16.mxu0 %vm1840_vm1, %v7822_v45  ;;  %7563 = vmatprep.mubr.msk.bf16.mxu1 %vm1840_vm1, %v7852_v51  ;;  %v7908_v51 = vld [vmem:[%s10942_s0 + $0x5a0] sm:$0xff]  }
  0x66   :  { %7304 = vmatmul.mubr.msk.bf16.gmra.mxu0 %vm1840_vm1, %v7823_v48  ;;  %7564 = vmatmul.mubr.msk.bf16.gmra.mxu1 %vm1840_vm1, %v7853_v54  ;;  %v7905_v48 = vld [vmem:[%s10942_s0 + $0x598] sm:$0xff]  }
  0x67   :  { %7307 = vmatprep.mubr.msk.bf16.mxu0 %vm1840_vm1, %v7826_v49  ;;  %7567 = vmatprep.mubr.msk.bf16.mxu1 %vm1840_vm1, %v7856_v55 }
  0x6e   :  { %7308 = vmatmul.mubr.msk.bf16.gmra.mxu0 %vm1840_vm1, %v7827_v52  ;;  %7568 = vmatmul.mubr.msk.bf16.gmra.mxu1 %vm1840_vm1, %v7857_v58 }
  0x6f   :  { %7311 = vmatprep.mubr.msk.bf16.mxu0 %vm1840_vm1, %v7830_v53  ;;  %7571 = vmatprep.mubr.msk.bf16.mxu1 %vm1840_vm1, %v7860_v59 }
  0x76   :  { %7312 = vmatmul.mubr.msk.bf16.gmra.mxu0 %vm1840_vm1, %v7831_v56  ;;  %7572 = vmatmul.mubr.msk.bf16.gmra.mxu1 %vm1840_vm1, %v7861_v62 }
  0x77   :  { %7315 = vmatprep.mubr.msk.bf16.mxu0 %vm1840_vm1, %v7834_v57  ;;  %7575 = vmatprep.mubr.msk.bf16.mxu1 %vm1840_vm1, %v7864_v63 }
  0x7e   :  { %7316 = vmatmul.mubr.msk.bf16.gmra.mxu0 %vm1840_vm1, %v7835_v60  ;;  %7576 = vmatmul.mubr.msk.bf16.gmra.mxu1 %vm1840_vm1, %v7865_v2  ;;  %v7883_v2 = vld [vmem:[%s10942_s0 + $0x1a8] sm:$0xff]  }
  0x7f   :  { %7319 = vmatprep.mubr.msk.bf16.mxu0 %vm1840_vm1, %v7838_v61  ;;  %7579 = vmatprep.mubr.msk.bf16.mxu1 %vm1840_vm1, %v7868_v3 }
  0x86   :  { %7320 = vmatmul.mubr.msk.bf16.gmra.mxu0 %vm1840_vm1, %v7839_v0  ;;  %7580 = vmatmul.mubr.msk.bf16.gmra.mxu1 %vm1840_vm1, %v7869_v6  ;;  %v7909_v6 = vld [vmem:[%s10942_s0 + $0x5a8] sm:$0xff]  }
  0x87   :  { %7323 = vmatprep.mubr.msk.bf16.mxu0 %vm1840_vm1, %v7842_v1  ;;  %7583 = vmatprep.mubr.msk.bf16.mxu1 %vm1840_vm1, %v7872_v7 }
  0x8e   :  { %7324 = vmatmul.mubr.msk.bf16.gmra.mxu0 %vm1840_vm1, %v7843_v4  ;;  %7584 = vmatmul.mubr.msk.bf16.gmra.mxu1 %vm1840_vm1, %v7873_v10  ;;  %v7886_v10 = vld [vmem:[%s10942_s0 + $0x1b0] sm:$0xff]  }
  0x8f   :  { %7327 = vmatprep.mubr.msk.bf16.mxu0 %vm1840_vm1, %v7846_v5  ;;  %7587 = vmatprep.mubr.msk.bf16.mxu1 %vm1840_vm1, %v7876_v11  ;;  %v7912_v11 = vld [vmem:[%s10942_s0 + $0x5b0] sm:$0xff]  }
  0x96   :  { %7328 = vmatmul.mubr.msk.bf16.gmra.mxu0 %vm1840_vm1, %v7847_v8  ;;  %7588 = vmatmul.mubr.msk.bf16.gmra.mxu1 %vm1840_vm1, %v7877_v14 }
  0x97   :  { %7331 = vmatprep.mubr.msk.bf16.mxu0 %vm1840_vm1, %v7850_v9  ;;  %7591 = vmatprep.mubr.msk.bf16.mxu1 %vm1840_vm1, %v7880_v15 }
  0x9e   :  { %7332 = vmatmul.mubr.msk.bf16.gmra.mxu0 %vm1840_vm1, %v7851_v12  ;;  %7592 = vmatmul.mubr.msk.bf16.gmra.mxu1 %vm1840_vm1, %v7881_v18 }
  0x9f   :  { %7335 = vmatprep.mubr.msk.bf16.mxu0 %vm1840_vm1, %v7854_v13  ;;  %7595 = vmatprep.mubr.msk.bf16.mxu1 %vm1840_vm1, %v7884_v19 }
  0xa6   :  { %7336 = vmatmul.mubr.msk.bf16.gmra.mxu0 %vm1840_vm1, %v7855_v16  ;;  %7596 = vmatmul.mubr.msk.bf16.gmra.mxu1 %vm1840_vm1, %v7885_v22 }
  0xa7   :  { %7339 = vmatprep.mubr.msk.bf16.mxu0 %vm1840_vm1, %v7858_v17  ;;  %7599 = vmatprep.mubr.msk.bf16.mxu1 %vm1840_vm1, %v7888_v23 }
  0xae   :  { %7340 = vmatmul.mubr.msk.bf16.gmra.mxu0 %vm1840_vm1, %v7859_v20  ;;  %7600 = vmatmul.mubr.msk.bf16.gmra.mxu1 %vm1840_vm1, %v7889_v26 }
  0xaf   :  { %7343 = vmatprep.mubr.msk.bf16.mxu0 %vm1840_vm1, %v7862_v21  ;;  %7603 = vmatprep.mubr.msk.bf16.mxu1 %vm1840_vm1, %v7892_v27 }
  0xb6   :  { %7344 = vmatmul.mubr.msk.bf16.gmra.mxu0 %vm1840_vm1, %v7863_v24  ;;  %7604 = vmatmul.mubr.msk.bf16.gmra.mxu1 %vm1840_vm1, %v7893_v30  ;;  %v7887_v30 = vld [vmem:[%s10942_s0 + $0x1b8] sm:$0xff]  }
  0xb7   :  { %7347 = vmatprep.mubr.msk.bf16.mxu0 %vm1840_vm1, %v7866_v25  ;;  %7607 = vmatprep.mubr.msk.bf16.mxu1 %vm1840_vm1, %v7896_v31 }
  0xbe   :  { %7348 = vmatmul.mubr.msk.bf16.gmra.mxu0 %vm1840_vm1, %v7867_v28  ;;  %7608 = vmatmul.mubr.msk.bf16.gmra.mxu1 %vm1840_vm1, %v7897_v36 }
  0xbf   :  { %7351 = vmatprep.mubr.msk.bf16.mxu0 %vm1840_vm1, %v7870_v29  ;;  %7611 = vmatprep.mubr.msk.bf16.mxu1 %vm1840_vm1, %v7900_v37 }
  0xc6   :  { %7352 = vmatmul.mubr.msk.bf16.gmra.mxu0 %vm1840_vm1, %v7871_v32  ;;  %7612 = vmatmul.mubr.msk.bf16.gmra.mxu1 %vm1840_vm1, %v7901_v40  ;;  %v7916_v40 = vld [vmem:[%s10942_s0 + $0x5c0] sm:$0xff]  }
  0xc7   :  { %7355 = vmatprep.mubr.msk.bf16.mxu0 %vm1840_vm1, %v7874_v35  ;;  %7615 = vmatprep.mubr.msk.bf16.mxu1 %vm1840_vm1, %v7904_v41  ;;  %v7913_v35 = vld [vmem:[%s10942_s0 + $0x5b8] sm:$0xff]  }
  0xce   :  { %v7261_v42 = vpop.f32.mrf.mxu0  ;;  %7356 = vmatmul.mubr.msk.bf16.gmra.mxu0 %vm1840_vm1, %v7875_v38  ;;  %v8523_v57 = vpop.f32.mrf.mxu1  ;;  %7616 = vmatmul.mubr.msk.bf16.gmra.mxu1 %vm1840_vm1, %v7905_v48 }
  0xcf   :  { %7359 = vmatprep.mubr.msk.bf16.mxu0 %vm1840_vm1, %v7878_v39  ;;  %v2656_v49 = vadd.f32 %v7261_v42, %v8500_v43  ;;  %7619 = vmatprep.mubr.msk.bf16.mxu1 %vm1840_vm1, %v7908_v51  ;;  %v7890_v39 = vld [vmem:[%s10942_s0 + $0x1c0] sm:$0xff]  }
  0xd0   :  { %v2647_v44 = vpop.f32.mrf.mxu0  ;;  %v8528_v61 = vpop.f32.mrf.mxu1 }
  0xd1   :  { %v2648_v45 = vadd.f32 %v8500_v43, %v2647_v44  ;;  %v4696_v58 = vmax.f32 %v2656_v49, 0.0 }
  0xd2   :  { %v7262_v47 = vpop.f32.mrf.mxu0  ;;  %v8536_v5 = vpop.f32.mrf.mxu1 }
  0xd3   :  { %v4694_v53 = vmax.f32 %v2648_v45, 0.0  ;;  %v2659_v54 = vadd.f32 %v7262_v47, %v8500_v43  ;;  %v5210_v7 = vsel %vm5206_vm2, %v4696_v58, 0.0 }
  0xd4   :  { %v2650_v52 = vpop.f32.mrf.mxu0  ;;  %v8549_v14 = vpop.f32.mrf.mxu1 }
  0xd5   :  { %v2651_v55 = vadd.f32 %v8500_v43, %v2650_v52  ;;  %v5207_v62 = vsel %vm5206_vm2, %v4694_v53, 0.0  ;;  %v4697_v63 = vmax.f32 %v2659_v54, 0.0 }
  0xd6   :  { %v7265_v56 = vpop.f32.mrf.mxu0  ;;  %7360 = vmatmul.mubr.msk.bf16.gmra.mxu0 %vm1840_vm1, %v7879_v46  ;;  %v8555_v20 = vpop.f32.mrf.mxu1  ;;  %7620 = vmatmul.mubr.msk.bf16.gmra.mxu1 %vm1840_vm1, %v7909_v6 }
  0xd7   :  { %v4695_v59 = vmax.f32 %v2651_v55, 0.0  ;;  %7363 = vmatprep.mubr.msk.bf16.mxu0 %vm1840_vm1, %v7882_v50  ;;  %v2672_v8 = vadd.f32 %v7265_v56, %v8500_v43  ;;  %v5212_v15 = vsel %vm5206_vm2, %v4697_v63, 0.0  ;;  %7623 = vmatprep.mubr.msk.bf16.mxu1 %vm1840_vm1, %v7912_v11 }
  0xd8   :  { %v2663_v60 = vpop.f32.mrf.mxu0  ;;  %v8561_v26 = vpop.f32.mrf.mxu1 }
  0xd9   :  { %v5208_v0 = vsel %vm5206_vm2, %v4695_v59, 0.0  ;;  %v2664_v1 = vadd.f32 %v8500_v43, %v2663_v60  ;;  %v4700_v21 = vmax.f32 %v2672_v8, 0.0  ;;  %v7920_v8 = vld [vmem:[%s10942_s0 + $0x5d0] sm:$0xff]  }
  0xda   :  { %v5209_v3 = vadd.f32 %v5208_v0, %v5207_v62  ;;  %v7266_v4 = vpop.f32.mrf.mxu0  ;;  %v8568_v34 = vpop.f32.mrf.mxu1  ;;  %v7891_v0 = vld [vmem:[%s10942_s0 + $0x1c8] sm:$0xff]  }
  0xdb   :  { %v4698_v9 = vmax.f32 %v2664_v1, 0.0  ;;  %v2675_v16 = vadd.f32 %v7266_v4, %v8500_v43  ;;  %v5218_v36 = vsel %vm5206_vm2, %v4700_v21, 0.0 }
  0xdc   :  { %v5211_v12 = vadd.f32 %v5210_v7, %v5209_v3  ;;  %v2666_v13 = vpop.f32.mrf.mxu0  ;;  %v8581_v44 = vpop.f32.mrf.mxu1  ;;  %v7894_v7 = vld [vmem:[%s10942_s0 + $0x1d0] sm:$0xff]  }
  0xdd   :  { %v2667_v17 = vadd.f32 %v8500_v43, %v2666_v13  ;;  %v5214_v22 = vsel %vm5206_vm2, %v4698_v9, 0.0  ;;  %v4701_v27 = vmax.f32 %v2675_v16, 0.0 }
  0xde   :  { %v5213_v18 = vadd.f32 %v5212_v15, %v5211_v12  ;;  %v7269_v19 = vpop.f32.mrf.mxu0  ;;  %7364 = vmatmul.mubr.msk.bf16.gmra.mxu0 %vm1840_vm1, %v7883_v2  ;;  %v8587_v50 = vpop.f32.mrf.mxu1  ;;  %7624 = vmatmul.mubr.msk.bf16.gmra.mxu1 %vm1840_vm1, %v7913_v35  ;;  %v7917_v2 = vld [vmem:[%s10942_s0 + $0x5c8] sm:$0xff]  }
  0xdf   :  { %v4699_v23 = vmax.f32 %v2667_v17, 0.0  ;;  %7367 = vmatprep.mubr.msk.bf16.mxu0 %vm1840_vm1, %v7886_v10  ;;  %v2688_v37 = vadd.f32 %v7269_v19, %v8500_v43  ;;  %v5220_v45 = vsel %vm5206_vm2, %v4701_v27, 0.0  ;;  %10953 = vst [vmem:[#allocation2_spill] sm:$0xff] %v8587_v50  ;;  %7627 = vmatprep.mubr.msk.bf16.mxu1 %vm1840_vm1, %v7916_v40  ;;  %v7898_v40 = vld [vmem:[%s10942_s0 + $0x1e0] sm:$0xff]  }
  0xe0   :  { %v5215_v24 = vadd.f32 %v5214_v22, %v5213_v18  ;;  %v2679_v25 = vpop.f32.mrf.mxu0  ;;  %v8593_v56 = vpop.f32.mrf.mxu1 }
  0xe1   :  { %v5216_v28 = vsel %vm5206_vm2, %v4699_v23, 0.0  ;;  %v2680_v29 = vadd.f32 %v8500_v43, %v2679_v25  ;;  %v4704_v51 = vmax.f32 %v2688_v37, 0.0  ;;  %10954 = vst [vmem:[#allocation3_spill] sm:$0xff] %v8593_v56 }
  0xe2   :  { %v5217_v31 = vadd.f32 %v5216_v28, %v5215_v24  ;;  %v7270_v32 = vpop.f32.mrf.mxu0  ;;  %v8600_v1 = vpop.f32.mrf.mxu1 }
  0xe3   :  { %v4702_v38 = vmax.f32 %v2680_v29, 0.0  ;;  %v2691_v46 = vadd.f32 %v7270_v32, %v8500_v43  ;;  %10955 = vst [vmem:[#allocation4_spill] sm:$0xff] %v8600_v1  ;;  %v5226_v3 = vsel %vm5206_vm2, %v4704_v51, 0.0  ;;  %v7895_v32 = vld [vmem:[%s10942_s0 + $0x1d8] sm:$0xff]  }
  0xe4   :  { %v5219_v41 = vadd.f32 %v5218_v36, %v5217_v31  ;;  %v2682_v42 = vpop.f32.mrf.mxu0  ;;  %v8613_v11 = vpop.f32.mrf.mxu1  ;;  %v7921_v36 = vld [vmem:[%s10942_s0 + $0x5d8] sm:$0xff]  }
  0xe5   :  { %v2683_v47 = vadd.f32 %v8500_v43, %v2682_v42  ;;  %v5222_v52 = vsel %vm5206_vm2, %v4702_v38, 0.0  ;;  %v4705_v58 = vmax.f32 %v2691_v46, 0.0  ;;  %10956 = vst [vmem:[#allocation5_spill] sm:$0xff] %v8613_v11 }
  0xe6   :  { %v5221_v48 = vadd.f32 %v5220_v45, %v5219_v41  ;;  %v7273_v49 = vpop.f32.mrf.mxu0  ;;  %7368 = vmatmul.mubr.msk.bf16.gmra.mxu0 %vm1840_vm1, %v7887_v30  ;;  %v8619_v18 = vpop.f32.mrf.mxu1  ;;  %7628 = vmatmul.mubr.msk.bf16.gmra.mxu1 %vm1840_vm1, %v7917_v2  ;;  %v7924_v41 = vld [vmem:[%s10942_s0 + $0x5e0] sm:$0xff]  }
  0xe7   :  { %v4703_v53 = vmax.f32 %v2683_v47, 0.0  ;;  %7371 = vmatprep.mubr.msk.bf16.mxu0 %vm1840_vm1, %v7890_v39  ;;  %v2704_v4 = vadd.f32 %v7273_v49, %v8500_v43  ;;  %v5228_v12 = vsel %vm5206_vm2, %v4705_v58, 0.0  ;;  %10957 = vst [vmem:[#allocation6_spill] sm:$0xff] %v8619_v18  ;;  %7631 = vmatprep.mubr.msk.bf16.mxu1 %vm1840_vm1, %v7920_v8  ;;  %v7925_v8 = vld [vmem:[%s10942_s0 + $0x5e8] sm:$0xff]  }
  0xe8   :  { %v5223_v54 = vadd.f32 %v5222_v52, %v5221_v48  ;;  %v2695_v55 = vpop.f32.mrf.mxu0  ;;  %v8625_v25 = vpop.f32.mrf.mxu1 }
  0xe9   :  { %v5224_v59 = vsel %vm5206_vm2, %v4703_v53, 0.0  ;;  %v2696_v60 = vadd.f32 %v8500_v43, %v2695_v55  ;;  %v4708_v19 = vmax.f32 %v2704_v4, 0.0  ;;  %10958 = vst [vmem:[#allocation7_spill] sm:$0xff] %v8625_v25 }
  0xea   :  { %v5225_v62 = vadd.f32 %v5224_v59, %v5223_v54  ;;  %v7274_v63 = vpop.f32.mrf.mxu0  ;;  %v8632_v35 = vpop.f32.mrf.mxu1 }
  0xeb   :  { %v4706_v6 = vmax.f32 %v2696_v60, 0.0  ;;  %v2707_v13 = vadd.f32 %v7274_v63, %v8500_v43  ;;  %10959 = vst [vmem:[#allocation8_spill] sm:$0xff] %v8632_v35  ;;  %v5234_v37 = vsel %vm5206_vm2, %v4708_v19, 0.0 }
  0xec   :  { %v5227_v9 = vadd.f32 %v5226_v3, %v5225_v62  ;;  %v2698_v10 = vpop.f32.mrf.mxu0  ;;  %v8645_v46 = vpop.f32.mrf.mxu1 }
  0xed   :  { %v2699_v15 = vadd.f32 %v8500_v43, %v2698_v10  ;;  %v5230_v21 = vsel %vm5206_vm2, %v4706_v6, 0.0  ;;  %v4709_v27 = vmax.f32 %v2707_v13, 0.0  ;;  %10960 = vst [vmem:[#allocation9_spill] sm:$0xff] %v8645_v46  ;;  %v7899_v6 = vld [vmem:[%s10942_s0 + $0x1e8] sm:$0xff]   ;;  %v7902_v13 = vld [vmem:[%s10942_s0 + $0x1f0] sm:$0xff]  }
  0xee   :  { %v5229_v16 = vadd.f32 %v5228_v12, %v5227_v9  ;;  %v7277_v17 = vpop.f32.mrf.mxu0  ;;  %7372 = vmatmul.mubr.msk.bf16.gmra.mxu0 %vm1840_vm1, %v7891_v0  ;;  %v8651_v53 = vpop.f32.mrf.mxu1  ;;  %7632 = vmatmul.mubr.msk.bf16.gmra.mxu1 %vm1840_vm1, %v7921_v36 }
  0xef   :  { %v4707_v22 = vmax.f32 %v2699_v15, 0.0  ;;  %7375 = vmatprep.mubr.msk.bf16.mxu0 %vm1840_vm1, %v7894_v7  ;;  %v2720_v38 = vadd.f32 %v7277_v17, %v8500_v43  ;;  %v5236_v47 = vsel %vm5206_vm2, %v4709_v27, 0.0  ;;  %10961 = vst [vmem:[#allocation10_spill] sm:$0xff] %v8651_v53  ;;  %7635 = vmatprep.mubr.msk.bf16.mxu1 %vm1840_vm1, %v7924_v41  ;;  %v7928_v15 = vld [vmem:[%s10942_s0 + $0x5f0] sm:$0xff]  }
  0xf0   :  { %v5231_v23 = vadd.f32 %v5230_v21, %v5229_v16  ;;  %v2711_v24 = vpop.f32.mrf.mxu0  ;;  %v8657_v62 = vpop.f32.mrf.mxu1 }
  0xf1   :  { %v5232_v28 = vsel %vm5206_vm2, %v4707_v22, 0.0  ;;  %v2712_v29 = vadd.f32 %v8500_v43, %v2711_v24  ;;  %v4712_v54 = vmax.f32 %v2720_v38, 0.0  ;;  %10962 = vst [vmem:[#allocation11_spill] sm:$0xff] %v8657_v62 }
  0xf2   :  { %v5233_v30 = vadd.f32 %v5232_v28, %v5231_v23  ;;  %v7278_v31 = vpop.f32.mrf.mxu0  ;;  %v8664_v7 = vpop.f32.mrf.mxu1 }
  0xf3   :  { %v4710_v39 = vmax.f32 %v2712_v29, 0.0  ;;  %v2723_v48 = vadd.f32 %v7278_v31, %v8500_v43  ;;  %10963 = vst [vmem:[#allocation12_spill] sm:$0xff] %v8664_v7  ;;  %v5242_v9 = vsel %vm5206_vm2, %v4712_v54, 0.0  ;;  %v7906_v54 = vld [vmem:[%s10942_s0 + $0x200] sm:$0xff]  }
  0xf4   :  { %v5235_v42 = vadd.f32 %v5234_v37, %v5233_v30  ;;  %v2714_v45 = vpop.f32.mrf.mxu0  ;;  %v8677_v19 = vpop.f32.mrf.mxu1 }
  0xf5   :  { %v2715_v49 = vadd.f32 %v8500_v43, %v2714_v45  ;;  %v5238_v55 = vsel %vm5206_vm2, %v4710_v39, 0.0  ;;  %v4713_v63 = vmax.f32 %v2723_v48, 0.0  ;;  %10964 = vst [vmem:[#allocation13_spill] sm:$0xff] %v8677_v19  ;;  %v7903_v45 = vld [vmem:[%s10942_s0 + $0x1f8] sm:$0xff]  }
  0xf6   :  { %v5237_v51 = vadd.f32 %v5236_v47, %v5235_v42  ;;  %v7281_v52 = vpop.f32.mrf.mxu0  ;;  %7376 = vmatmul.mubr.msk.bf16.gmra.mxu0 %vm1840_vm1, %v7895_v32  ;;  %v8683_v28 = vpop.f32.mrf.mxu1  ;;  %7636 = vmatmul.mubr.msk.bf16.gmra.mxu1 %vm1840_vm1, %v7925_v8  ;;  %v7930_v48 = vld [vmem:[%s10942_s0 + $0x5f8] sm:$0xff]  }
  0xf7   :  { %v4711_v58 = vmax.f32 %v2715_v49, 0.0  ;;  %7379 = vmatprep.mubr.msk.bf16.mxu0 %vm1840_vm1, %v7898_v40  ;;  %v2736_v10 = vadd.f32 %v7281_v52, %v8500_v43  ;;  %v5244_v21 = vsel %vm5206_vm2, %v4713_v63, 0.0  ;;  %10965 = vst [vmem:[#allocation14_spill] sm:$0xff] %v8683_v28  ;;  %7639 = vmatprep.mubr.msk.bf16.mxu1 %vm1840_vm1, %v7928_v15 }
  0xf8   :  { %v5239_v59 = vadd.f32 %v5238_v55, %v5237_v51  ;;  %v2727_v60 = vpop.f32.mrf.mxu0  ;;  %v8689_v37 = vpop.f32.mrf.mxu1  ;;  %v7933_v55 = vld [vmem:[%s10942_s0 + $0x600] sm:$0xff]  }
  0xf9   :  { %v5240_v0 = vsel %vm5206_vm2, %v4711_v58, 0.0  ;;  %v2728_v2 = vadd.f32 %v8500_v43, %v2727_v60  ;;  %v4716_v29 = vmax.f32 %v2736_v10, 0.0  ;;  %10966 = vst [vmem:[#allocation15_spill] sm:$0xff] %v8689_v37 }
  0xfa   :  { %v5241_v3 = vadd.f32 %v5240_v0, %v5239_v59  ;;  %v7282_v4 = vpop.f32.mrf.mxu0  ;;  %v8696_v47 = vpop.f32.mrf.mxu1 }
  0xfb   :  { %v4714_v12 = vmax.f32 %v2728_v2, 0.0  ;;  %v2739_v22 = vadd.f32 %v7282_v4, %v8500_v43  ;;  %10967 = vst [vmem:[#allocation16_spill] sm:$0xff] %v8696_v47  ;;  %v5250_v49 = vsel %vm5206_vm2, %v4716_v29, 0.0  ;;  %v7934_v29 = vld [vmem:[%s10942_s0 + $0x608] sm:$0xff]  }
  0xfc   :  { %v5243_v16 = vadd.f32 %v5242_v9, %v5241_v3  ;;  %v2730_v17 = vpop.f32.mrf.mxu0  ;;  %v8709_v60 = vpop.f32.mrf.mxu1 }
  0xfd   :  { %v2731_v23 = vadd.f32 %v8500_v43, %v2730_v17  ;;  %v5246_v30 = vsel %vm5206_vm2, %v4714_v12, 0.0  ;;  %v4717_v38 = vmax.f32 %v2739_v22, 0.0  ;;  %10968 = vst [vmem:[#allocation17_spill] sm:$0xff] %v8709_v60 }
  0xfe   :  { %v5245_v24 = vadd.f32 %v5244_v21, %v5243_v16  ;;  %v7285_v27 = vpop.f32.mrf.mxu0  ;;  %7380 = vmatmul.mubr.msk.bf16.gmra.mxu0 %vm1840_vm1, %v7899_v6  ;;  %v8715_v6 = vpop.f32.mrf.mxu1  ;;  %7640 = vmatmul.mubr.msk.bf16.gmra.mxu1 %vm1840_vm1, %v7930_v48 }
  0xff   :  { %v4715_v31 = vmax.f32 %v2731_v23, 0.0  ;;  %7383 = vmatprep.mubr.msk.bf16.mxu0 %vm1840_vm1, %v7902_v13  ;;  %v2752_v51 = vadd.f32 %v7285_v27, %v8500_v43  ;;  %v5252_v63 = vsel %vm5206_vm2, %v4717_v38, 0.0  ;;  %10969 = vst [vmem:[#allocation18_spill] sm:$0xff] %v8715_v6  ;;  %7643 = vmatprep.mubr.msk.bf16.mxu1 %vm1840_vm1, %v7933_v55  ;;  %v7937_v38 = vld [vmem:[%s10942_s0 + $0x610] sm:$0xff]  }
 0x100   :  { %v5247_v32 = vadd.f32 %v5246_v30, %v5245_v24  ;;  %v2743_v36 = vpop.f32.mrf.mxu0  ;;  %v8721_v15 = vpop.f32.mrf.mxu1  ;;  %v7907_v24 = vld [vmem:[%s10942_s0 + $0x208] sm:$0xff]  }
 0x101   :  { %v5248_v39 = vsel %vm5206_vm2, %v4715_v31, 0.0  ;;  %v2744_v40 = vadd.f32 %v8500_v43, %v2743_v36  ;;  %v4720_v8 = vmax.f32 %v2752_v51, 0.0  ;;  %10970 = vst [vmem:[#allocation19_spill] sm:$0xff] %v8721_v15  ;;  %v7910_v36 = vld [vmem:[%s10942_s0 + $0x210] sm:$0xff]  }
 0x102   :  { %v5249_v41 = vadd.f32 %v5248_v39, %v5247_v32  ;;  %v7286_v42 = vpop.f32.mrf.mxu0  ;;  %v8728_v27 = vpop.f32.mrf.mxu1 }
 0x103   :  { %v4718_v52 = vmax.f32 %v2744_v40, 0.0  ;;  %v2755_v0 = vadd.f32 %v7286_v42, %v8500_v43  ;;  %10971 = vst [vmem:[#allocation20_spill] sm:$0xff] %v8728_v27  ;;  %v5258_v30 = vsel %vm5206_vm2, %v4720_v8, 0.0 }
 0x104   :  { %v5251_v58 = vadd.f32 %v5250_v49, %v5249_v41  ;;  %v2746_v59 = vpop.f32.mrf.mxu0  ;;  %v8741_v41 = vpop.f32.mrf.mxu1 }
 0x105   :  { %v2747_v2 = vadd.f32 %v8500_v43, %v2746_v59  ;;  %v5254_v9 = vsel %vm5206_vm2, %v4718_v52, 0.0  ;;  %v4721_v16 = vmax.f32 %v2755_v0, 0.0  ;;  %10972 = vst [vmem:[#allocation21_spill] sm:$0xff] %v8741_v41 }
 0x106   :  { %v5253_v3 = vadd.f32 %v5252_v63, %v5251_v58  ;;  %v7289_v4 = vpop.f32.mrf.mxu0  ;;  %7384 = vmatmul.mubr.msk.bf16.gmra.mxu0 %vm1840_vm1, %v7903_v45  ;;  %v7549_v52 = vpop.f32.mrf.mxu1  ;;  %7644 = vmatmul.mubr.msk.bf16.gmra.mxu1 %vm1840_vm1, %v7934_v29 }
 0x107   :  { %v4719_v10 = vmax.f32 %v2747_v2, 0.0  ;;  %7387 = vmatprep.mubr.msk.bf16.mxu0 %vm1840_vm1, %v7906_v54  ;;  %v2768_v31 = vadd.f32 %v7289_v4, %v8500_v43  ;;  %v5260_v42 = vsel %vm5206_vm2, %v4721_v16, 0.0  ;;  %7647 = vmatprep.mubr.msk.bf16.mxu1 %vm1840_vm1, %v7937_v38 }
 0x108   :  { %v5255_v12 = vadd.f32 %v5254_v9, %v5253_v3  ;;  %v2759_v13 = vpop.f32.mrf.mxu0  ;;  %v3799_v0 = vpop.f32.mrf.mxu1 }
 0x109   :  { %v5256_v17 = vsel %vm5206_vm2, %v4719_v10, 0.0  ;;  %v2760_v21 = vadd.f32 %v8500_v43, %v2759_v13  ;;  %v4724_v54 = vmax.f32 %v2768_v31, 0.0  ;;  %v7911_v10 = vld [vmem:[%s10942_s0 + $0x218] sm:$0xff]   ;;  %v3800_v13 = vadd.f32 %v8500_v43, %v3799_v0 }
 0x10a   :  { %v5257_v22 = vadd.f32 %v5256_v17, %v5255_v12  ;;  %v7290_v23 = vpop.f32.mrf.mxu0  ;;  %v3808_v12 = vadd.f32 %v7549_v52, %v8500_v43  ;;  %v7550_v16 = vpop.f32.mrf.mxu1  ;;  %v7938_v17 = vld [vmem:[%s10942_s0 + $0x618] sm:$0xff]  }
 0x10b   :  { %v4722_v32 = vmax.f32 %v2760_v21, 0.0  ;;  %v2771_v45 = vadd.f32 %v7290_v23, %v8500_v43  ;;  %v5266_v21 = vsel %vm5206_vm2, %v4724_v54, 0.0  ;;  %v7914_v23 = vld [vmem:[%s10942_s0 + $0x220] sm:$0xff]  }
 0x10c   :  { %v5259_v39 = vadd.f32 %v5258_v30, %v5257_v22  ;;  %v2762_v40 = vpop.f32.mrf.mxu0  ;;  %v3802_v38 = vpop.f32.mrf.mxu1 }
 0x10d   :  { %v2763_v48 = vadd.f32 %v8500_v43, %v2762_v40  ;;  %v5262_v55 = vsel %vm5206_vm2, %v4722_v32, 0.0  ;;  %v4725_v2 = vmax.f32 %v2771_v45, 0.0  ;;  %v4982_v32 = vmax.f32 %v3800_v13, 0.0 }
 0x10e   :  { %v5261_v49 = vadd.f32 %v5260_v42, %v5259_v39  ;;  %v7293_v51 = vpop.f32.mrf.mxu0  ;;  %7388 = vmatmul.mubr.msk.bf16.gmra.mxu0 %vm1840_vm1, %v7907_v24  ;;  %v7941_v24 = vld [vmem:[%s10942_s0 + $0x620] sm:$0xff]   ;;  %v7553_v52 = vpop.f32.mrf.mxu1  ;;  %7648 = vmatmul.mubr.msk.bf16.gmra.mxu1 %vm1840_vm1, %v7938_v17  ;;  %v7915_v17 = vld [vmem:[%s10942_s0 + $0x228] sm:$0xff]  }
 0x10f   :  { %v4723_v58 = vmax.f32 %v2763_v48, 0.0  ;;  %7391 = vmatprep.mubr.msk.bf16.mxu0 %vm1840_vm1, %v7910_v36  ;;  %v2784_v22 = vadd.f32 %v7293_v51, %v8500_v43  ;;  %v3811_v36 = vadd.f32 %v7550_v16, %v8500_v43  ;;  %v5268_v39 = vsel %vm5206_vm2, %v4725_v2, 0.0  ;;  %7651 = vmatprep.mubr.msk.bf16.mxu1 %vm1840_vm1, %v7941_v24  ;;  %v7942_v24 = vld [vmem:[%s10942_s0 + $0x628] sm:$0xff]  }
 0x110   :  { %v5263_v59 = vadd.f32 %v5262_v55, %v5261_v49  ;;  %v2775_v63 = vpop.f32.mrf.mxu0  ;;  %v4984_v49 = vmax.f32 %v3808_v12, 0.0  ;;  %v3803_v51 = vadd.f32 %v8500_v43, %v3802_v38  ;;  %v7945_v38 = vld [vmem:[%s10942_s0 + $0x630] sm:$0xff]  }
 0x111   :  { %v5264_v3 = vsel %vm5206_vm2, %v4723_v58, 0.0  ;;  %v2776_v4 = vadd.f32 %v8500_v43, %v2775_v63  ;;  %v4728_v54 = vmax.f32 %v2784_v22, 0.0  ;;  %v5828_v63 = vsel %vm5206_vm2, %v4982_v32, 0.0 }
 0x112   :  { %v5265_v8 = vadd.f32 %v5264_v3, %v5263_v59  ;;  %v7294_v9 = vpop.f32.mrf.mxu0  ;;  %v4985_v0 = vmax.f32 %v3811_v36, 0.0  ;;  %v4983_v2 = vmax.f32 %v3803_v51, 0.0  ;;  %v3815_v3 = vpop.f32.mrf.mxu1  ;;  %v3824_v36 = vadd.f32 %v7553_v52, %v8500_v43 }
 0x113   :  { %v4726_v30 = vmax.f32 %v2776_v4, 0.0  ;;  %v2787_v40 = vadd.f32 %v7294_v9, %v8500_v43 }
 0x114   :  { %v5267_v29 = vadd.f32 %v5266_v21, %v5265_v8  ;;  %v2778_v31 = vpop.f32.mrf.mxu0  ;;  %v5831_v21 = vsel %vm5206_vm2, %v4984_v49, 0.0  ;;  %v5829_v22 = vsel %vm5206_vm2, %v4983_v2, 0.0 }
 0x115   :  { %v2779_v42 = vadd.f32 %v8500_v43, %v2778_v31  ;;  %v5276_v58 = vsel %vm5206_vm2, %v4726_v30, 0.0  ;;  %v4729_v4 = vmax.f32 %v2787_v40, 0.0  ;;  %v7918_v31 = vld [vmem:[%s10942_s0 + $0x230] sm:$0xff]   ;;  %v5830_v32 = vadd.f32 %v5829_v22, %v5828_v63 }
 0x116   :  { %v8773_v45 = vadd.f32 %v5268_v39, %v5267_v29  ;;  %v7297_v48 = vpop.f32.mrf.mxu0  ;;  %7392 = vmatmul.mubr.msk.bf16.gmra.mxu0 %vm1840_vm1, %v7911_v10  ;;  %v3816_v10 = vadd.f32 %v8500_v43, %v3815_v3  ;;  %v5279_v29 = vsel %vm5206_vm2, %v4728_v54, 0.0  ;;  %7652 = vmatmul.mubr.msk.bf16.gmra.mxu1 %vm1840_vm1, %v7942_v24 }
 0x117   :  { %v4727_v55 = vmax.f32 %v2779_v42, 0.0  ;;  %7395 = vmatprep.mubr.msk.bf16.mxu0 %vm1840_vm1, %v7914_v23  ;;  %v2800_v13 = vadd.f32 %v7297_v48, %v8500_v43  ;;  %v7554_v23 = vpop.f32.mrf.mxu1  ;;  %v5833_v42 = vsel %vm5206_vm2, %v4985_v0, 0.0  ;;  %v5281_v51 = vsel %vm5206_vm2, %v4729_v4, 0.0  ;;  %7655 = vmatprep.mubr.msk.bf16.mxu1 %vm1840_vm1, %v7945_v38 }
 0x118   :  { %v2791_v59 = vpop.f32.mrf.mxu0  ;;  %v4986_v48 = vmax.f32 %v3816_v10, 0.0  ;;  %v3827_v3 = vadd.f32 %v7554_v23, %v8500_v43 }
 0x119   :  { %v5277_v8 = vsel %vm5206_vm2, %v4727_v55, 0.0  ;;  %v2792_v9 = vadd.f32 %v8500_v43, %v2791_v59  ;;  %v3818_v49 = vpop.f32.mrf.mxu1  ;;  %v4732_v59 = vmax.f32 %v2800_v13, 0.0 }
 0x11a   :  { %v5278_v12 = vadd.f32 %v5277_v8, %v5276_v58  ;;  %v7298_v16 = vpop.f32.mrf.mxu0  ;;  %v5832_v58 = vadd.f32 %v5831_v21, %v5830_v32  ;;  %v5835_v2 = vsel %vm5206_vm2, %v4986_v48, 0.0  ;;  %v4989_v38 = vmax.f32 %v3827_v3, 0.0 }
 0x11b   :  { %v4730_v30 = vmax.f32 %v2792_v9, 0.0  ;;  %v2803_v54 = vadd.f32 %v7298_v16, %v8500_v43  ;;  %v7557_v8 = vpop.f32.mrf.mxu1  ;;  %v4988_v9 = vmax.f32 %v3824_v36, 0.0  ;;  %v7919_v36 = vld [vmem:[%s10942_s0 + $0x238] sm:$0xff]   ;;  %v5287_v48 = vsel %vm5206_vm2, %v4732_v59, 0.0 }
 0x11c   :  { %v5280_v39 = vadd.f32 %v5279_v29, %v5278_v12  ;;  %v2794_v40 = vpop.f32.mrf.mxu0  ;;  %v5834_v10 = vadd.f32 %v5833_v42, %v5832_v58  ;;  %v5270_v12 = vrot.slane %v8773_v45, 4  ;;  %v7946_v42 = vld [vmem:[%s10942_s0 + $0x638] sm:$0xff]   ;;  %v7949_v58 = vld [vmem:[%s10942_s0 + $0x640] sm:$0xff]   ;;  %v3840_v3 = vadd.f32 %v7557_v8, %v8500_v43 }
 0x11d   :  { %v2795_v55 = vadd.f32 %v8500_v43, %v2794_v40  ;;  %v5283_v0 = vsel %vm5206_vm2, %v4730_v30, 0.0  ;;  %v3831_v21 = vpop.f32.mrf.mxu1  ;;  %v4733_v22 = vmax.f32 %v2803_v54, 0.0  ;;  %v7922_v54 = vld [vmem:[%s10942_s0 + $0x240] sm:$0xff]  }
 0x11e   :  { %v5282_v63 = vadd.f32 %v5281_v51, %v5280_v39  ;;  %v7301_v52 = vpop.f32.mrf.mxu0  ;;  %7396 = vmatmul.mubr.msk.bf16.gmra.mxu0 %vm1840_vm1, %v7915_v17  ;;  %v3819_v17 = vadd.f32 %v8500_v43, %v3818_v49  ;;  %v5836_v29 = vadd.f32 %v5835_v2, %v5834_v10  ;;  %v3832_v59 = vadd.f32 %v8500_v43, %v3831_v21 }
 0x11f   :  { %v4731_v4 = vmax.f32 %v2795_v55, 0.0  ;;  %7399 = vmatprep.mubr.msk.bf16.mxu0 %vm1840_vm1, %v7918_v31  ;;  %v2816_v31 = vadd.f32 %v7301_v52, %v8500_v43  ;;  %v7558_v40 = vpop.f32.mrf.mxu1  ;;  %v5839_v55 = vsel %vm5206_vm2, %v4988_v9, 0.0  ;;  %7656 = vmatmul.mubr.msk.bf16.gmra.mxu1 %vm1840_vm1, %v7946_v42 }
 0x120   :  { %v5284_v13 = vadd.f32 %v5283_v0, %v5282_v63  ;;  %v2807_v16 = vpop.f32.mrf.mxu0  ;;  %v4987_v39 = vmax.f32 %v3819_v17, 0.0  ;;  %7659 = vmatprep.mubr.msk.bf16.mxu1 %vm1840_vm1, %v7949_v58 }
 0x121   :  { %v5285_v23 = vsel %vm5206_vm2, %v4731_v4, 0.0  ;;  %v2808_v24 = vadd.f32 %v8500_v43, %v2807_v16  ;;  %v3834_v0 = vpop.f32.mrf.mxu1  ;;  %v5289_v4 = vsel %vm5206_vm2, %v4733_v22, 0.0  ;;  %v4736_v16 = vmax.f32 %v2816_v31, 0.0 }
 0x122   :  { %v5286_v30 = vadd.f32 %v5285_v23, %v5284_v13  ;;  %v7302_v32 = vpop.f32.mrf.mxu0  ;;  %v5837_v2 = vsel %vm5206_vm2, %v4987_v39, 0.0  ;;  %v5841_v23 = vsel %vm5206_vm2, %v4989_v38, 0.0  ;;  %v4992_v39 = vmax.f32 %v3840_v3, 0.0  ;;  %v7950_v3 = vld [vmem:[%s10942_s0 + $0x648] sm:$0xff]  }
 0x123   :  { %v4734_v49 = vmax.f32 %v2808_v24, 0.0  ;;  %v2819_v51 = vadd.f32 %v7302_v32, %v8500_v43  ;;  %v5838_v13 = vadd.f32 %v5837_v2, %v5836_v29  ;;  %v4990_v24 = vmax.f32 %v3832_v59, 0.0 }
 0x124   :  { %v5288_v63 = vadd.f32 %v5287_v48, %v5286_v30  ;;  %v2810_v52 = vpop.f32.mrf.mxu0  ;;  %v7561_v30 = vpop.f32.mrf.mxu1  ;;  %v8845_v29 = vadd.f32 %v5270_v12, %v8773_v45  ;;  %v7923_v45 = vld [vmem:[%s10942_s0 + $0x248] sm:$0xff]   ;;  %v3843_v12 = vadd.f32 %v7558_v40, %v8500_v43  ;;  %v3835_v58 = vadd.f32 %v8500_v43, %v3834_v0  ;;  %v7953_v0 = vld [vmem:[%s10942_s0 + $0x650] sm:$0xff]  }
 0x125   :  { %v2811_v10 = vadd.f32 %v8500_v43, %v2810_v52  ;;  %v5291_v8 = vsel %vm5206_vm2, %v4734_v49, 0.0  ;;  %v4737_v21 = vmax.f32 %v2819_v51, 0.0  ;;  %v5840_v22 = vadd.f32 %v5839_v55, %v5838_v13  ;;  %v7926_v13 = vld [vmem:[%s10942_s0 + $0x250] sm:$0xff]  }
 0x126   :  { %v5290_v9 = vadd.f32 %v5289_v4, %v5288_v63  ;;  %v7305_v17 = vpop.f32.mrf.mxu0  ;;  %7400 = vmatmul.mubr.msk.bf16.gmra.mxu0 %vm1840_vm1, %v7919_v36  ;;  %v5843_v38 = vsel %vm5206_vm2, %v4990_v24, 0.0  ;;  %v3847_v48 = vpop.f32.mrf.mxu1  ;;  %v8857_v52 = vadd.f32 %v7561_v30, %v8500_v43  ;;  %v5295_v59 = vsel %vm5206_vm2, %v4736_v16, 0.0 }
 0x127   :  { %v4735_v32 = vmax.f32 %v2811_v10, 0.0  ;;  %7403 = vmatprep.mubr.msk.bf16.mxu0 %vm1840_vm1, %v7922_v54  ;;  %v2832_v49 = vadd.f32 %v7305_v17, %v8500_v43  ;;  %v5842_v63 = vadd.f32 %v5841_v23, %v5840_v22  ;;  %v5297_v4 = vsel %vm5206_vm2, %v4737_v21, 0.0  ;;  %7660 = vmatmul.mubr.msk.bf16.gmra.mxu1 %vm1840_vm1, %v7950_v3 }
 0x128   :  { %v5292_v31 = vadd.f32 %v5291_v8, %v5290_v9  ;;  %v2823_v36 = vpop.f32.mrf.mxu0  ;;  %v7562_v2 = vpop.f32.mrf.mxu1  ;;  %v5847_v23 = vsel %vm5206_vm2, %v4992_v39, 0.0  ;;  %v4993_v24 = vmax.f32 %v3843_v12, 0.0  ;;  %v4991_v30 = vmax.f32 %v3835_v58, 0.0  ;;  %7663 = vmatprep.mubr.msk.bf16.mxu1 %vm1840_vm1, %v7953_v0 }
 0x129   :  { %v5293_v42 = vsel %vm5206_vm2, %v4735_v32, 0.0  ;;  %v2824_v51 = vadd.f32 %v8500_v43, %v2823_v36  ;;  %v5844_v40 = vadd.f32 %v5843_v38, %v5842_v63  ;;  %v4740_v16 = vmax.f32 %v2832_v49, 0.0 }
 0x12a   :  { %v5294_v54 = vadd.f32 %v5293_v42, %v5292_v31  ;;  %v7306_v55 = vpop.f32.mrf.mxu0  ;;  %v3850_v8 = vpop.f32.mrf.mxu1  ;;  %v3848_v22 = vadd.f32 %v8500_v43, %v3847_v48  ;;  %v5845_v42 = vsel %vm5206_vm2, %v4991_v30, 0.0  ;;  %v4996_v39 = vmax.f32 %v8857_v52, 0.0 }
 0x12b   :  { %v4738_v10 = vmax.f32 %v2824_v51, 0.0  ;;  %v2835_v21 = vadd.f32 %v7306_v55, %v8500_v43  ;;  %v5849_v48 = vsel %vm5206_vm2, %v4993_v24, 0.0  ;;  %v3859_v58 = vadd.f32 %v7562_v2, %v8500_v43 }
 0x12c   :  { %v5296_v9 = vadd.f32 %v5295_v59, %v5294_v54  ;;  %v2826_v17 = vpop.f32.mrf.mxu0  ;;  %v7565_v51 = vpop.f32.mrf.mxu1  ;;  %v5846_v54 = vadd.f32 %v5845_v42, %v5844_v40  ;;  %v3851_v52 = vadd.f32 %v8500_v43, %v3850_v8  ;;  %v7927_v40 = vld [vmem:[%s10942_s0 + $0x258] sm:$0xff]  }
 0x12d   :  { %v2827_v32 = vadd.f32 %v8500_v43, %v2826_v17  ;;  %v5299_v36 = vsel %vm5206_vm2, %v4738_v10, 0.0  ;;  %v7954_v8 = vld [vmem:[%s10942_s0 + $0x658] sm:$0xff]  }
 0x12e   :  { %v5298_v31 = vadd.f32 %v5297_v4, %v5296_v9  ;;  %v7309_v38 = vpop.f32.mrf.mxu0  ;;  %7404 = vmatmul.mubr.msk.bf16.gmra.mxu0 %vm1840_vm1, %v7923_v45  ;;  %v4994_v45 = vmax.f32 %v3848_v22, 0.0  ;;  %v3863_v59 = vpop.f32.mrf.mxu1  ;;  %v4741_v4 = vmax.f32 %v2835_v21, 0.0  ;;  %v5848_v9 = vadd.f32 %v5847_v23, %v5846_v54  ;;  %v7931_v22 = vld [vmem:[%s10942_s0 + $0x260] sm:$0xff]  }
 0x12f   :  { %v4739_v49 = vmax.f32 %v2827_v32, 0.0  ;;  %v2848_v63 = vadd.f32 %v7309_v38, %v8500_v43  ;;  %7407 = vmatprep.mubr.msk.bf16.mxu0 %vm1840_vm1, %v7926_v13  ;;  %v4995_v30 = vmax.f32 %v3851_v52, 0.0  ;;  %v5303_v21 = vsel %vm5206_vm2, %v4740_v16, 0.0  ;;  %v8906_v16 = vld [vmem:[%s10944_s2] ss:$0 sm:$0xff]  ;;  %7664 = vmatmul.mubr.msk.bf16.gmra.mxu1 %vm1840_vm1, %v7954_v8 }
 0x130   :  { %v5300_v55 = vadd.f32 %v5299_v36, %v5298_v31  ;;  %v2839_v12 = vpop.f32.mrf.mxu0  ;;  %v5851_v0 = vsel %vm5206_vm2, %v4994_v45, 0.0  ;;  %v7566_v2 = vpop.f32.mrf.mxu1  ;;  %v5850_v31 = vadd.f32 %v5849_v48, %v5848_v9  ;;  %v7957_v36 = vld [vmem:[%s10942_s0 + $0x660] sm:$0xff]  }
 0x131   :  { %v5301_v3 = vsel %vm5206_vm2, %v4739_v49, 0.0  ;;  %v2840_v10 = vadd.f32 %v8500_v43, %v2839_v12  ;;  %v4744_v17 = vmax.f32 %v2848_v63, 0.0  ;;  %v4997_v49 = vmax.f32 %v3859_v58, 0.0  ;;  %7667 = vmatprep.mubr.msk.bf16.mxu1 %vm1840_vm1, %v7957_v36 }
 0x132   :  { %v5302_v13 = vadd.f32 %v5301_v3, %v5300_v55  ;;  %v7310_v24 = vpop.f32.mrf.mxu0  ;;  %v5853_v63 = vsel %vm5206_vm2, %v4995_v30, 0.0  ;;  %v3866_v54 = vpop.f32.mrf.mxu1  ;;  %v5305_v55 = vsel %vm5206_vm2, %v4741_v4, 0.0  ;;  %v5855_v12 = vsel %vm5206_vm2, %v4996_v39, 0.0 }
 0x133   :  { %v4742_v32 = vmax.f32 %v2840_v10, 0.0  ;;  %v2851_v23 = vadd.f32 %v7310_v24, %v8500_v43  ;;  %v3872_v43 = vadd.f32 %v8906_v16, %v7565_v51  ;;  %v5852_v45 = vadd.f32 %v5851_v0, %v5850_v31 }
 0x134   :  { %v5304_v38 = vadd.f32 %v5303_v21, %v5302_v13  ;;  %v2842_v42 = vpop.f32.mrf.mxu0  ;;  %v5311_v52 = vsel %vm5206_vm2, %v4744_v17, 0.0  ;;  %v3864_v10 = vadd.f32 %v8906_v16, %v3863_v59  ;;  %v3875_v9 = vadd.f32 %v8906_v16, %v7566_v2  ;;  %v7569_v13 = vpop.f32.mrf.mxu1 }
 0x135   :  { %v2843_v48 = vadd.f32 %v8906_v16, %v2842_v42  ;;  %v5307_v51 = vsel %vm5206_vm2, %v4742_v32, 0.0  ;;  %v4745_v4 = vmax.f32 %v2851_v23, 0.0  ;;  %v5854_v39 = vadd.f32 %v5853_v63, %v5852_v45  ;;  %v7935_v45 = vld [vmem:[%s10942_s0 + $0x270] sm:$0xff]  }
 0x136   :  { %v5306_v58 = vadd.f32 %v5305_v55, %v5304_v38  ;;  %v7313_v3 = vpop.f32.mrf.mxu0  ;;  %7408 = vmatmul.mubr.msk.bf16.gmra.mxu0 %vm1840_vm1, %v7927_v40  ;;  %v5857_v40 = vsel %vm5206_vm2, %v4997_v49, 0.0  ;;  %v5000_v30 = vmax.f32 %v3872_v43, 0.0  ;;  %v4998_v59 = vmax.f32 %v3864_v10, 0.0  ;;  %v3879_v21 = vpop.f32.mrf.mxu1  ;;  %v7958_v43 = vld [vmem:[%s10942_s0 + $0x668] sm:$0xff]  }
 0x137   :  { %v4743_v24 = vmax.f32 %v2843_v48, 0.0  ;;  %7411 = vmatprep.mubr.msk.bf16.mxu0 %vm1840_vm1, %v7931_v22  ;;  %v2864_v8 = vadd.f32 %v8906_v16, %v7313_v3  ;;  %v5856_v23 = vadd.f32 %v5855_v12, %v5854_v39  ;;  %v7932_v22 = vld [vmem:[%s10942_s0 + $0x268] sm:$0xff]   ;;  %v5001_v42 = vmax.f32 %v3875_v9, 0.0  ;;  %v7961_v3 = vld [vmem:[%s10942_s0 + $0x670] sm:$0xff]   ;;  %7668 = vmatmul.mubr.msk.bf16.gmra.mxu1 %vm1840_vm1, %v7958_v43 }
 0x138   :  { %v5308_v17 = vadd.f32 %v5307_v51, %v5306_v58  ;;  %v2855_v0 = vpop.f32.mrf.mxu0  ;;  %v5859_v36 = vsel %vm5206_vm2, %v4998_v59, 0.0  ;;  %v3867_v49 = vadd.f32 %v8906_v16, %v3866_v54  ;;  %v7570_v63 = vpop.f32.mrf.mxu1  ;;  %v5313_v55 = vsel %vm5206_vm2, %v4745_v4, 0.0  ;;  %7671 = vmatprep.mubr.msk.bf16.mxu1 %vm1840_vm1, %v7961_v3  ;;  %v7936_v3 = vld [vmem:[%s10942_s0 + $0x278] sm:$0xff]  }
 0x139   :  { %v5309_v2 = vsel %vm5206_vm2, %v4743_v24, 0.0  ;;  %v2856_v32 = vadd.f32 %v8906_v16, %v2855_v0  ;;  %v5858_v58 = vadd.f32 %v5857_v40, %v5856_v23  ;;  %v3888_v51 = vadd.f32 %v8906_v16, %v7569_v13 }
 0x13a   :  { %v5310_v31 = vadd.f32 %v5309_v2, %v5308_v17  ;;  %v7314_v38 = vpop.f32.mrf.mxu0  ;;  %v4999_v9 = vmax.f32 %v3867_v49, 0.0  ;;  %v3880_v24 = vadd.f32 %v8906_v16, %v3879_v21  ;;  %v3882_v4 = vpop.f32.mrf.mxu1  ;;  %v4748_v39 = vmax.f32 %v2864_v8, 0.0 }
 0x13b   :  { %v4746_v48 = vmax.f32 %v2856_v32, 0.0  ;;  %v2867_v12 = vadd.f32 %v8906_v16, %v7314_v38  ;;  %v5863_v0 = vsel %vm5206_vm2, %v5000_v30, 0.0  ;;  %v5860_v59 = vadd.f32 %v5859_v36, %v5858_v58 }
 0x13c   :  { %v5312_v54 = vadd.f32 %v5311_v52, %v5310_v31  ;;  %v2858_v10 = vpop.f32.mrf.mxu0  ;;  %v5865_v32 = vsel %vm5206_vm2, %v5001_v42, 0.0  ;;  %v5861_v52 = vsel %vm5206_vm2, %v4999_v9, 0.0  ;;  %v5002_v23 = vmax.f32 %v3880_v24, 0.0  ;;  %v7573_v31 = vpop.f32.mrf.mxu1  ;;  %v7962_v24 = vld [vmem:[%s10942_s0 + $0x678] sm:$0xff]  }
 0x13d   :  { %v2859_v17 = vadd.f32 %v8906_v16, %v2858_v10  ;;  %v5315_v13 = vsel %vm5206_vm2, %v4746_v48, 0.0  ;;  %v4749_v21 = vmax.f32 %v2867_v12, 0.0  ;;  %v5862_v30 = vadd.f32 %v5861_v52, %v5860_v59 }
 0x13e   :  { %v5314_v2 = vadd.f32 %v5313_v55, %v5312_v54  ;;  %v7317_v40 = vpop.f32.mrf.mxu0  ;;  %7412 = vmatmul.mubr.msk.bf16.gmra.mxu0 %vm1840_vm1, %v7932_v22  ;;  %v5004_v42 = vmax.f32 %v3888_v51, 0.0  ;;  %v3891_v49 = vadd.f32 %v8906_v16, %v7570_v63  ;;  %v3895_v55 = vpop.f32.mrf.mxu1  ;;  %v5867_v58 = vsel %vm5206_vm2, %v5002_v23, 0.0 }
 0x13f   :  { %v4747_v8 = vmax.f32 %v2859_v17, 0.0  ;;  %7415 = vmatprep.mubr.msk.bf16.mxu0 %vm1840_vm1, %v7935_v45  ;;  %v8952_v22 = vadd.f32 %v8906_v16, %v7317_v40  ;;  %v5864_v12 = vadd.f32 %v5863_v0, %v5862_v30  ;;  %v3883_v9 = vadd.f32 %v8906_v16, %v3882_v4  ;;  %v7965_v4 = vld [vmem:[%s10942_s0 + $0x680] sm:$0xff]   ;;  %7672 = vmatmul.mubr.msk.bf16.gmra.mxu1 %vm1840_vm1, %v7962_v24 }
 0x140   :  { %v5316_v38 = vadd.f32 %v5315_v13, %v5314_v2  ;;  %v2871_v36 = vpop.f32.mrf.mxu0  ;;  %v5005_v10 = vmax.f32 %v3891_v49, 0.0  ;;  %v3904_v51 = vadd.f32 %v8906_v16, %v7573_v31  ;;  %v7574_v63 = vpop.f32.mrf.mxu1  ;;  %v5319_v17 = vsel %vm5206_vm2, %v4748_v39, 0.0  ;;  %v7939_v2 = vld [vmem:[%s10942_s0 + $0x280] sm:$0xff]   ;;  %7675 = vmatprep.mubr.msk.bf16.mxu1 %vm1840_vm1, %v7965_v4  ;;  %v7940_v4 = vld [vmem:[%s10942_s0 + $0x288] sm:$0xff]  }
 0x141   :  { %v5317_v43 = vsel %vm5206_vm2, %v4747_v8, 0.0  ;;  %v2872_v48 = vadd.f32 %v8906_v16, %v2871_v36  ;;  %v5866_v40 = vadd.f32 %v5865_v32, %v5864_v12  ;;  %v5321_v52 = vsel %vm5206_vm2, %v4749_v21, 0.0 }
 0x142   :  { %v5318_v45 = vadd.f32 %v5317_v43, %v5316_v38  ;;  %v7318_v54 = vpop.f32.mrf.mxu0  ;;  %v5871_v13 = vsel %vm5206_vm2, %v5004_v42, 0.0  ;;  %v5003_v8 = vmax.f32 %v3883_v9, 0.0  ;;  %v3898_v39 = vpop.f32.mrf.mxu1  ;;  %v4752_v30 = vmax.f32 %v8952_v22, 0.0 }
 0x143   :  { %v4750_v0 = vmax.f32 %v2872_v48, 0.0  ;;  %v2883_v59 = vadd.f32 %v8906_v16, %v7318_v54  ;;  %v5868_v36 = vadd.f32 %v5867_v58, %v5866_v40  ;;  %v5873_v49 = vsel %vm5206_vm2, %v5005_v10, 0.0 }
 0x144   :  { %v5320_v23 = vadd.f32 %v5319_v17, %v5318_v45  ;;  %v2874_v31 = vpop.f32.mrf.mxu0  ;;  %v5869_v48 = vsel %vm5206_vm2, %v5003_v8, 0.0  ;;  %v5008_v21 = vmax.f32 %v3904_v51, 0.0  ;;  %v3896_v12 = vadd.f32 %v8906_v16, %v3895_v55  ;;  %v7577_v45 = vpop.f32.mrf.mxu1 }
 0x145   :  { %v2875_v38 = vadd.f32 %v8906_v16, %v2874_v31  ;;  %v5323_v42 = vsel %vm5206_vm2, %v4750_v0, 0.0  ;;  %v4753_v22 = vmax.f32 %v2883_v59, 0.0  ;;  %v5870_v58 = vadd.f32 %v5869_v48, %v5868_v36  ;;  %v7969_v48 = vld [vmem:[%s10942_s0 + $0x690] sm:$0xff]  }
 0x146   :  { %v5322_v32 = vadd.f32 %v5321_v52, %v5320_v23  ;;  %v7321_v43 = vpop.f32.mrf.mxu0  ;;  %7416 = vmatmul.mubr.msk.bf16.gmra.mxu0 %vm1840_vm1, %v7936_v3  ;;  %v5006_v3 = vmax.f32 %v3896_v12, 0.0  ;;  %v3907_v17 = vadd.f32 %v8906_v16, %v7574_v63  ;;  %v3899_v51 = vadd.f32 %v8906_v16, %v3898_v39  ;;  %v3911_v55 = vpop.f32.mrf.mxu1  ;;  %v7966_v39 = vld [vmem:[%s10942_s0 + $0x688] sm:$0xff]  }
 0x147   :  { %v4751_v54 = vmax.f32 %v2875_v38, 0.0  ;;  %7419 = vmatprep.mubr.msk.bf16.mxu0 %vm1840_vm1, %v7939_v2  ;;  %v2896_v24 = vadd.f32 %v8906_v16, %v7321_v43  ;;  %v5872_v59 = vadd.f32 %v5871_v13, %v5870_v58  ;;  %v5272_v2 = vrot.slane %v8845_v29, 2  ;;  %v7943_v13 = vld [vmem:[%s10942_s0 + $0x290] sm:$0xff]   ;;  %7676 = vmatmul.mubr.msk.bf16.gmra.mxu1 %vm1840_vm1, %v7966_v39 }
 0x148   :  { %v5324_v10 = vadd.f32 %v5323_v42, %v5322_v32  ;;  %v2887_v9 = vpop.f32.mrf.mxu0  ;;  %v5875_v63 = vsel %vm5206_vm2, %v5006_v3, 0.0  ;;  %v5007_v31 = vmax.f32 %v3899_v51, 0.0  ;;  %v7578_v8 = vpop.f32.mrf.mxu1  ;;  %v5327_v38 = vsel %vm5206_vm2, %v4752_v30, 0.0  ;;  %7679 = vmatprep.mubr.msk.bf16.mxu1 %vm1840_vm1, %v7969_v48 }
 0x149   :  { %v5325_v40 = vsel %vm5206_vm2, %v4751_v54, 0.0  ;;  %v2888_v0 = vadd.f32 %v8906_v16, %v2887_v9  ;;  %v5879_v32 = vsel %vm5206_vm2, %v5008_v21, 0.0  ;;  %v5874_v43 = vadd.f32 %v5873_v49, %v5872_v59 }
 0x14a   :  { %v5326_v52 = vadd.f32 %v5325_v40, %v5324_v10  ;;  %v7322_v23 = vpop.f32.mrf.mxu0  ;;  %v5329_v12 = vsel %vm5206_vm2, %v4753_v22, 0.0  ;;  %v5009_v58 = vmax.f32 %v3907_v17, 0.0  ;;  %v5877_v10 = vsel %vm5206_vm2, %v5007_v31, 0.0  ;;  %v3914_v30 = vpop.f32.mrf.mxu1 }
 0x14b   :  { %v4754_v36 = vmax.f32 %v2888_v0, 0.0  ;;  %v4756_v9 = vmax.f32 %v2896_v24, 0.0  ;;  %v2899_v3 = vadd.f32 %v8906_v16, %v7322_v23  ;;  %v5876_v40 = vadd.f32 %v5875_v63, %v5874_v43 }
 0x14c   :  { %v5328_v42 = vadd.f32 %v5327_v38, %v5326_v52  ;;  %v2890_v54 = vpop.f32.mrf.mxu0  ;;  %v3920_v22 = vadd.f32 %v8906_v16, %v7577_v45  ;;  %v3912_v59 = vadd.f32 %v8906_v16, %v3911_v55  ;;  %v7581_v17 = vpop.f32.mrf.mxu1  ;;  %v3923_v63 = vadd.f32 %v8906_v16, %v7578_v8  ;;  %v7944_v8 = vld [vmem:[%s10942_s0 + $0x298] sm:$0xff]  }
 0x14d   :  { %v2891_v51 = vadd.f32 %v8906_v16, %v2890_v54  ;;  %v5331_v49 = vsel %vm5206_vm2, %v4754_v36, 0.0  ;;  %v5878_v23 = vadd.f32 %v5877_v10, %v5876_v40  ;;  %v9021_v31 = vadd.f32 %v5272_v2, %v8845_v29  ;;  %v7970_v10 = vld [vmem:[%s10942_s0 + $0x698] sm:$0xff]  }
 0x14e   :  { %v5330_v21 = vadd.f32 %v5329_v12, %v5328_v42  ;;  %v7325_v0 = vpop.f32.mrf.mxu0  ;;  %7420 = vmatmul.mubr.msk.bf16.gmra.mxu0 %vm1840_vm1, %v7940_v4  ;;  %v5881_v55 = vsel %vm5206_vm2, %v5009_v58, 0.0  ;;  %v5010_v38 = vmax.f32 %v3912_v59, 0.0  ;;  %v3927_v36 = vpop.f32.mrf.mxu1  ;;  %v4757_v39 = vmax.f32 %v2899_v3, 0.0 }
 0x14f   :  { %v4755_v52 = vmax.f32 %v2891_v51, 0.0  ;;  %v2912_v24 = vadd.f32 %v8906_v16, %v7325_v0  ;;  %7423 = vmatprep.mubr.msk.bf16.mxu0 %vm1840_vm1, %v7943_v13  ;;  %v5880_v13 = vadd.f32 %v5879_v32, %v5878_v23  ;;  %v5012_v29 = vmax.f32 %v3920_v22, 0.0  ;;  %v7947_v32 = vld [vmem:[%s10942_s0 + $0x2a0] sm:$0xff]   ;;  %7680 = vmatmul.mubr.msk.bf16.gmra.mxu1 %vm1840_vm1, %v7970_v10 }
 0x150   :  { %v5332_v4 = vadd.f32 %v5331_v49, %v5330_v21  ;;  %v2903_v45 = vpop.f32.mrf.mxu0  ;;  %v5883_v2 = vsel %vm5206_vm2, %v5010_v38, 0.0  ;;  %v3915_v48 = vadd.f32 %v8906_v16, %v3914_v30  ;;  %v7582_v58 = vpop.f32.mrf.mxu1  ;;  %v5335_v3 = vsel %vm5206_vm2, %v4756_v9, 0.0  ;;  %v7973_v49 = vld [vmem:[%s10942_s0 + $0x6a0] sm:$0xff]  }
 0x151   :  { %v5333_v43 = vsel %vm5206_vm2, %v4755_v52, 0.0  ;;  %v2904_v12 = vadd.f32 %v8906_v16, %v2903_v45  ;;  %v4760_v51 = vmax.f32 %v2912_v24, 0.0  ;;  %v5882_v40 = vadd.f32 %v5881_v55, %v5880_v13  ;;  %7683 = vmatprep.mubr.msk.bf16.mxu1 %vm1840_vm1, %v7973_v49  ;;  %v7948_v49 = vld [vmem:[%s10942_s0 + $0x2a8] sm:$0xff]  }
 0x152   :  { %v5334_v42 = vadd.f32 %v5333_v43, %v5332_v4  ;;  %v7326_v54 = vpop.f32.mrf.mxu0  ;;  %v5013_v21 = vmax.f32 %v3923_v63, 0.0  ;;  %v5011_v52 = vmax.f32 %v3915_v48, 0.0  ;;  %v3930_v23 = vpop.f32.mrf.mxu1  ;;  %v5337_v9 = vsel %vm5206_vm2, %v4757_v39, 0.0 }
 0x153   :  { %v4758_v30 = vmax.f32 %v2904_v12, 0.0  ;;  %v2915_v22 = vadd.f32 %v8906_v16, %v7326_v54  ;;  %v5884_v4 = vadd.f32 %v5883_v2, %v5882_v40  ;;  %v3928_v45 = vadd.f32 %v8906_v16, %v3927_v36 }
 0x154   :  { %v5336_v0 = vadd.f32 %v5335_v3, %v5334_v42  ;;  %v2906_v59 = vpop.f32.mrf.mxu0  ;;  %v5887_v38 = vsel %vm5206_vm2, %v5012_v29, 0.0  ;;  %v5885_v43 = vsel %vm5206_vm2, %v5011_v52, 0.0  ;;  %v3936_v12 = vadd.f32 %v8906_v16, %v7581_v17  ;;  %v9049_v13 = vpop.f32.mrf.mxu1 }
 0x155   :  { %v2907_v24 = vadd.f32 %v8906_v16, %v2906_v59  ;;  %v5274_v39 = vrot.slane %v9021_v31, 1  ;;  %v5889_v36 = vsel %vm5206_vm2, %v5013_v21, 0.0  ;;  %v5886_v54 = vadd.f32 %v5885_v43, %v5884_v4 }
 0x156   :  { %v5338_v55 = vadd.f32 %v5337_v9, %v5336_v0  ;;  %v7329_v63 = vpop.f32.mrf.mxu0  ;;  %7424 = vmatmul.mubr.msk.bf16.gmra.mxu0 %vm1840_vm1, %v7944_v8  ;;  %v5348_v29 = vsel %vm5206_vm2, %v4760_v51, 0.0  ;;  %v5345_v2 = vsel %vm5206_vm2, %v4758_v30, 0.0  ;;  %v4761_v17 = vmax.f32 %v2915_v22, 0.0  ;;  %v9058_v3 = vpop.f32.mrf.mxu1  ;;  %v7974_v9 = vld [vmem:[%s10942_s0 + $0x6a8] sm:$0xff]  }
 0x157   :  { %v4759_v42 = vmax.f32 %v2907_v24, 0.0  ;;  %7427 = vmatprep.mubr.msk.bf16.mxu0 %vm1840_vm1, %v7947_v32  ;;  %v5888_v0 = vadd.f32 %v5887_v38, %v5886_v54  ;;  %v5014_v32 = vmax.f32 %v3928_v45, 0.0  ;;  %v5016_v51 = vmax.f32 %v3936_v12, 0.0  ;;  %v7951_v45 = vld [vmem:[%s10942_s0 + $0x2b0] sm:$0xff]   ;;  %7684 = vmatmul.mubr.msk.bf16.gmra.mxu1 %vm1840_vm1, %v7974_v9 }
 0x158   :  { %v5339_v8 = vrot.slane %v5338_v55, 4  ;;  %v2919_v48 = vpop.f32.mrf.mxu0  ;;  %v3931_v30 = vadd.f32 %v8906_v16, %v3930_v23  ;;  %v9066_v22 = vpop.f32.mrf.mxu1  ;;  %v2928_v24 = vadd.f32 %v8906_v16, %v7329_v63  ;;  %v3939_v38 = vadd.f32 %v8906_v16, %v7582_v58  ;;  %v7977_v23 = vld [vmem:[%s10942_s0 + $0x6b0] sm:$0xff]  }
 0x159   :  { %v5346_v10 = vsel %vm5206_vm2, %v4759_v42, 0.0  ;;  %v2920_v40 = vadd.f32 %v8906_v16, %v2919_v48  ;;  %v5275_v43 = vadd.f32 %v5274_v39, %v9021_v31  ;;  %v5897_v58 = vsel %vm5206_vm2, %v5014_v32, 0.0  ;;  %7687 = vmatprep.mubr.msk.bf16.mxu1 %vm1840_vm1, %v7977_v23 }
 0x15a   :  { %v5340_v59 = vadd.f32 %v5339_v8, %v5338_v55  ;;  %v5347_v21 = vadd.f32 %v5346_v10, %v5345_v2  ;;  %v7330_v52 = vpop.f32.mrf.mxu0  ;;  %v9075_v55 = vadd.f32 %v5889_v36, %v5888_v0  ;;  %v5015_v8 = vmax.f32 %v3931_v30, 0.0  ;;  %v9082_v63 = vpop.f32.mrf.mxu1 }
 0x15b   :  { %v4762_v4 = vmax.f32 %v2920_v40, 0.0  ;;  %v5350_v2 = vsel %vm5206_vm2, %v4761_v17, 0.0  ;;  %v2931_v48 = vadd.f32 %v8906_v16, %v7330_v52  ;;  %v5900_v31 = vsel %vm5206_vm2, %v5016_v51, 0.0 }
 0x15c   :  { %10973 = vst [vmem:[#allocation22_spill] sm:$0xff] %v9075_v55  ;;  %v5341_v12 = vrot.slane %v5340_v59, 2  ;;  %v5349_v42 = vadd.f32 %v5348_v29, %v5347_v21  ;;  %v2922_v54 = vpop.f32.mrf.mxu0  ;;  %v5898_v39 = vsel %vm5206_vm2, %v5015_v8, 0.0  ;;  %v9091_v29 = vpop.f32.mrf.mxu1  ;;  %v4764_v17 = vmax.f32 %v2928_v24, 0.0 }
 0x15d   :  { %v2923_v36 = vadd.f32 %v8906_v16, %v2922_v54  ;;  %v5352_v21 = vsel %vm5206_vm2, %v4762_v4, 0.0  ;;  %v5017_v32 = vmax.f32 %v3939_v38, 0.0  ;;  %v5899_v51 = vadd.f32 %v5898_v39, %v5897_v58 }
 0x15e   :  { %v5342_v10 = vadd.f32 %v5341_v12, %v5340_v59  ;;  %v5351_v40 = vadd.f32 %v5350_v2, %v5349_v42  ;;  %v7333_v0 = vpop.f32.mrf.mxu0  ;;  %7428 = vmatmul.mubr.msk.bf16.gmra.mxu0 %vm1840_vm1, %v7948_v49  ;;  %v6312_v59 = vmul.f32 0.00390625, %v5275_v43  ;;  %v9097_v42 = vpop.f32.mrf.mxu1  ;;  %v4765_v54 = vmax.f32 %v2931_v48, 0.0  ;;  %v7978_v43 = vld [vmem:[%s10942_s0 + $0x6b8] sm:$0xff]  }
 0x15f   :  { %v4763_v52 = vmax.f32 %v2923_v36, 0.0  ;;  %7431 = vmatprep.mubr.msk.bf16.mxu0 %vm1840_vm1, %v7951_v45  ;;  %v7952_v45 = vld [vmem:[%s10942_s0 + $0x2b8] sm:$0xff]   ;;  %v5901_v38 = vadd.f32 %v5900_v31, %v5899_v51  ;;  %v5356_v48 = vsel %vm5206_vm2, %v4764_v17, 0.0  ;;  %v2944_v36 = vadd.f32 %v8906_v16, %v7333_v0  ;;  %v7981_v31 = vld [vmem:[%s10942_s0 + $0x6c0] sm:$0xff]   ;;  %7688 = vmatmul.mubr.msk.bf16.gmra.mxu1 %vm1840_vm1, %v7978_v43 }
 0x160   :  { %v5343_v30 = vrot.slane %v5342_v10, 1  ;;  %v5353_v49 = vadd.f32 %v5352_v21, %v5351_v40  ;;  %v2935_v12 = vpop.f32.mrf.mxu0  ;;  %v9104_v23 = vpop.f32.mrf.mxu1  ;;  %v5902_v40 = vsel %vm5206_vm2, %v5017_v32, 0.0  ;;  %v6328_v39 = vpack.c.bf16 %v6312_v59, %v6312_v59  ;;  %7691 = vmatprep.mubr.msk.bf16.mxu1 %vm1840_vm1, %v7981_v31  ;;  %v7956_v31 = vld [vmem:[%s10942_s0 + $0x2c8] sm:$0xff]  }
 0x161   :  { %v5354_v8 = vsel %vm5206_vm2, %v4763_v52, 0.0  ;;  %v2936_v9 = vadd.f32 %v8906_v16, %v2935_v12  ;;  %v3944_v17 = vadd.f32 %v8906_v16, %v9058_v3  ;;  %v5358_v0 = vsel %vm5206_vm2, %v4765_v54, 0.0 }
 0x162   :  { %v5344_v24 = vadd.f32 %v5343_v30, %v5342_v10  ;;  %v5355_v4 = vadd.f32 %v5354_v8, %v5353_v49  ;;  %v7334_v2 = vpop.f32.mrf.mxu0  ;;  %v7955_v10 = vld [vmem:[%s10942_s0 + $0x2c0] sm:$0xff]   ;;  %v9120_v49 = vpop.f32.mrf.mxu1  ;;  %v3952_v32 = vadd.f32 %v8906_v16, %v9049_v13  ;;  %v4768_v3 = vmax.f32 %v2944_v36, 0.0 }
 0x163   :  { %v4766_v58 = vmax.f32 %v2936_v9, 0.0  ;;  %v2947_v12 = vadd.f32 %v8906_v16, %v7334_v2  ;;  %v6371_v13 = vunpack.c.l.b16 %v6328_v39 }
 0x164   :  { %v6313_v21 = vmul.f32 0.00390625, %v5344_v24  ;;  %v5357_v52 = vadd.f32 %v5356_v48, %v5355_v4  ;;  %v2938_v30 = vpop.f32.mrf.mxu0  ;;  %v5018_v24 = vmax.f32 %v3944_v17, 0.0  ;;  %v5903_v4 = vadd.f32 %v5902_v40, %v5901_v38  ;;  %v9128_v48 = vpop.f32.mrf.mxu1 }
 0x165   :  { %v2939_v51 = vadd.f32 %v8906_v16, %v2938_v30  ;;  %v5360_v54 = vsel %vm5206_vm2, %v4766_v58, 0.0  ;;  %v4769_v17 = vmax.f32 %v2947_v12, 0.0  ;;  %v5020_v58 = vmax.f32 %v3952_v32, 0.0  ;;  %v7982_v12 = vld [vmem:[%s10942_s0 + $0x6c8] sm:$0xff]  }
 0x166   :  { %v6329_v8 = vpack.c.bf16 %v6313_v21, %v6313_v21  ;;  %v5359_v9 = vadd.f32 %v5358_v0, %v5357_v52  ;;  %v7337_v59 = vpop.f32.mrf.mxu0  ;;  %7432 = vmatmul.mubr.msk.bf16.gmra.mxu0 %vm1840_vm1, %v7952_v45  ;;  %v5904_v38 = vsel %vm5206_vm2, %v5018_v24, 0.0  ;;  %v9136_v40 = vpop.f32.mrf.mxu1  ;;  %v5364_v32 = vsel %vm5206_vm2, %v4768_v3, 0.0 }
 0x167   :  { %v4767_v2 = vmax.f32 %v2939_v51, 0.0  ;;  %v2960_v30 = vadd.f32 %v8906_v16, %v7337_v59  ;;  %7435 = vmatprep.mubr.msk.bf16.mxu0 %vm1840_vm1, %v7955_v10  ;;  %v5905_v39 = vadd.f32 %v5904_v38, %v5903_v4  ;;  %v7985_v4 = vld [vmem:[%s10942_s0 + $0x6d0] sm:$0xff]   ;;  %v5366_v3 = vsel %vm5206_vm2, %v4769_v17, 0.0  ;;  %7692 = vmatmul.mubr.msk.bf16.gmra.mxu1 %vm1840_vm1, %v7982_v12 }
 0x168   :  { %v6372_v21 = vunpack.c.l.b16 %v6329_v8  ;;  %v5361_v52 = vadd.f32 %v5360_v54, %v5359_v9  ;;  %v2951_v45 = vpop.f32.mrf.mxu0  ;;  %v3955_v8 = vadd.f32 %v8906_v16, %v9066_v22  ;;  %v9148_v9 = vpop.f32.mrf.mxu1  ;;  %v7959_v54 = vld [vmem:[%s10942_s0 + $0x2d0] sm:$0xff]   ;;  %7695 = vmatprep.mubr.msk.bf16.mxu1 %vm1840_vm1, %v7985_v4 }
 0x169   :  { %v5362_v43 = vsel %vm5206_vm2, %v4767_v2, 0.0  ;;  %v2952_v36 = vadd.f32 %v8906_v16, %v2951_v45  ;;  %v4772_v59 = vmax.f32 %v2960_v30, 0.0  ;;  %v5908_v45 = vsel %vm5206_vm2, %v5020_v58, 0.0 }
 0x16a   :  { %v9141_v0 = vsel %vm6387_vm3, %v6372_v21, %v6371_v13  ;;  %v5363_v10 = vadd.f32 %v5362_v43, %v5361_v52  ;;  %v7338_v51 = vpop.f32.mrf.mxu0  ;;  %v3947_v21 = vadd.f32 %v8906_v16, %v9082_v63  ;;  %v9163_v52 = vpop.f32.mrf.mxu1  ;;  %v3968_v58 = vadd.f32 %v8906_v16, %v9091_v29  ;;  %v7960_v29 = vld [vmem:[%s10942_s0 + $0x2d8] sm:$0xff]  }
 0x16b   :  { %v4770_v24 = vmax.f32 %v2952_v36, 0.0  ;;  %v2963_v22 = vadd.f32 %v8906_v16, %v7338_v51  ;;  %v5021_v36 = vmax.f32 %v3955_v8, 0.0  ;;  %v3960_v51 = vadd.f32 %v8906_v16, %v9097_v42 }
 0x16c   :  { %v5365_v2 = vadd.f32 %v5364_v32, %v5363_v10  ;;  %v2954_v13 = vpop.f32.mrf.mxu0  ;;  %v5019_v10 = vmax.f32 %v3947_v21, 0.0  ;;  %v9171_v32 = vpop.f32.mrf.mxu1  ;;  %v5372_v63 = vsel %vm5206_vm2, %v4772_v59, 0.0 }
 0x16d   :  { %v2955_v30 = vadd.f32 %v8906_v16, %v2954_v13  ;;  %v5368_v17 = vsel %vm5206_vm2, %v4770_v24, 0.0  ;;  %v4773_v8 = vmax.f32 %v2963_v22, 0.0  ;;  %v5022_v21 = vmax.f32 %v3960_v51, 0.0 }
 0x16e   :  { %v5367_v38 = vadd.f32 %v5366_v3, %v5365_v2  ;;  %v7341_v43 = vpop.f32.mrf.mxu0  ;;  %7436 = vmatmul.mubr.msk.bf16.gmra.mxu0 %vm1840_vm1, %v7956_v31  ;;  %v5906_v42 = vsel %vm5206_vm2, %v5019_v10, 0.0  ;;  %v9181_v3 = vpop.f32.mrf.mxu1  ;;  %v5910_v4 = vsel %vm5206_vm2, %v5021_v36, 0.0  ;;  %v3971_v22 = vadd.f32 %v8906_v16, %v9104_v23  ;;  %v7989_v23 = vld [vmem:[%s10942_s0 + $0x6e0] sm:$0xff]  }
 0x16f   :  { %v4771_v13 = vmax.f32 %v2955_v30, 0.0  ;;  %7439 = vmatprep.mubr.msk.bf16.mxu0 %vm1840_vm1, %v7959_v54  ;;  %v2976_v59 = vadd.f32 %v8906_v16, %v7341_v43  ;;  %v5907_v54 = vadd.f32 %v5906_v42, %v5905_v39  ;;  %v7986_v39 = vld [vmem:[%s10942_s0 + $0x6d8] sm:$0xff]  }
 0x170   :  { %v5369_v31 = vadd.f32 %v5368_v17, %v5367_v38  ;;  %v2967_v2 = vpop.f32.mrf.mxu0  ;;  %v3963_v38 = vadd.f32 %v8906_v16, %v9120_v49  ;;  %v9194_v10 = vpop.f32.mrf.mxu1  ;;  %v7963_v17 = vld [vmem:[%s10942_s0 + $0x2e0] sm:$0xff]   ;;  %7696 = vmatmul.mubr.msk.bf16.gmra.mxu1 %vm1840_vm1, %v7986_v39 }
 0x171   :  { %v5370_v12 = vsel %vm5206_vm2, %v4771_v13, 0.0  ;;  %v2968_v24 = vadd.f32 %v8906_v16, %v2967_v2  ;;  %v5909_v36 = vadd.f32 %v5908_v45, %v5907_v54  ;;  %v5024_v13 = vmax.f32 %v3968_v58, 0.0  ;;  %7699 = vmatprep.mubr.msk.bf16.mxu1 %vm1840_vm1, %v7989_v23  ;;  %v7964_v23 = vld [vmem:[%s10942_s0 + $0x2e8] sm:$0xff]  }
 0x172   :  { %v5371_v30 = vadd.f32 %v5370_v12, %v5369_v31  ;;  %v7342_v33 = vpop.f32.mrf.mxu0  ;;  %v5912_v2 = vsel %vm5206_vm2, %v5022_v21, 0.0  ;;  %v5023_v42 = vmax.f32 %v3963_v38, 0.0  ;;  %v3984_v12 = vadd.f32 %v8906_v16, %v9128_v48 }
 0x173   :  { %v4774_v43 = vmax.f32 %v2968_v24, 0.0  ;;  %v2979_v51 = vadd.f32 %v8906_v16, %v7342_v33  ;;  %v9209_v24 = vpop.f32.mrf.mxu1  ;;  %v5374_v33 = vsel %vm5206_vm2, %v4773_v8, 0.0  ;;  %v4776_v27 = vmax.f32 %v2976_v59, 0.0 }
 0x174   :  { %v5373_v49 = vadd.f32 %v5372_v63, %v5371_v30  ;;  %v2970_v31 = vpop.f32.mrf.mxu0  ;;  %v5911_v58 = vadd.f32 %v5910_v4, %v5909_v36  ;;  %v5025_v63 = vmax.f32 %v3971_v22, 0.0  ;;  %v5914_v30 = vsel %vm5206_vm2, %v5023_v42, 0.0 }
 0x175   :  { %v2971_v45 = vadd.f32 %v8906_v16, %v2970_v31  ;;  %v3976_v21 = vadd.f32 %v8906_v16, %v9136_v40  ;;  %v9217_v38 = vpop.f32.mrf.mxu1  ;;  %v5376_v48 = vsel %vm5206_vm2, %v4774_v43, 0.0  ;;  %v4777_v8 = vmax.f32 %v2979_v51, 0.0 }
 0x176   :  { %v5375_v54 = vadd.f32 %v5374_v33, %v5373_v49  ;;  %v7345_v6 = vpop.f32.mrf.mxu0  ;;  %7440 = vmatmul.mubr.msk.bf16.gmra.mxu0 %vm1840_vm1, %v7960_v29  ;;  %v5913_v4 = vadd.f32 %v5912_v2, %v5911_v58  ;;  %v5916_v36 = vsel %vm5206_vm2, %v5024_v13, 0.0  ;;  %v5028_v49 = vmax.f32 %v3984_v12, 0.0 }
 0x177   :  { %v4775_v59 = vmax.f32 %v2971_v45, 0.0  ;;  %7443 = vmatprep.mubr.msk.bf16.mxu0 %vm1840_vm1, %v7963_v17  ;;  %v5026_v31 = vmax.f32 %v3976_v21, 0.0  ;;  %v9224_v40 = vpop.f32.mrf.mxu1  ;;  %v2992_v39 = vadd.f32 %v8906_v16, %v7345_v6  ;;  %v5918_v2 = vsel %vm5206_vm2, %v5025_v63, 0.0  ;;  %v7990_v6 = vld [vmem:[%s10942_s0 + $0x6e8] sm:$0xff]   ;;  %v7967_v63 = vld [vmem:[%s10942_s0 + $0x2f0] sm:$0xff]  }
 0x178   :  { %v5377_v29 = vadd.f32 %v5376_v48, %v5375_v54  ;;  %v2983_v22 = vpop.f32.mrf.mxu0  ;;  %v5915_v51 = vadd.f32 %v5914_v30, %v5913_v4  ;;  %v3987_v13 = vadd.f32 %v8906_v16, %v9148_v9  ;;  %v3979_v12 = vadd.f32 %v8906_v16, %v9163_v52  ;;  %v7993_v9 = vld [vmem:[%s10942_s0 + $0x6f0] sm:$0xff]   ;;  %7700 = vmatmul.mubr.msk.bf16.gmra.mxu1 %vm1840_vm1, %v7990_v6 }
 0x179   :  { %v5378_v42 = vsel %vm5206_vm2, %v4775_v59, 0.0  ;;  %v2984_v43 = vadd.f32 %v8906_v16, %v2983_v22  ;;  %v9237_v45 = vpop.f32.mrf.mxu1  ;;  %v5380_v58 = vsel %vm5206_vm2, %v4776_v27, 0.0  ;;  %v5382_v54 = vsel %vm5206_vm2, %v4777_v8, 0.0  ;;  %7703 = vmatprep.mubr.msk.bf16.mxu1 %vm1840_vm1, %v7993_v9 }
 0x17a   :  { %v5379_v33 = vadd.f32 %v5378_v42, %v5377_v29  ;;  %v7346_v17 = vpop.f32.mrf.mxu0  ;;  %v5917_v21 = vadd.f32 %v5916_v36, %v5915_v51  ;;  %v5920_v4 = vsel %vm5206_vm2, %v5026_v31, 0.0  ;;  %v5027_v29 = vmax.f32 %v3979_v12, 0.0 }
 0x17b   :  { %v4778_v30 = vmax.f32 %v2984_v43, 0.0  ;;  %v2995_v48 = vadd.f32 %v8906_v16, %v7346_v17  ;;  %v9252_v27 = vpop.f32.mrf.mxu1  ;;  %v4780_v8 = vmax.f32 %v2992_v39, 0.0  ;;  %v5924_v42 = vsel %vm5206_vm2, %v5028_v49, 0.0 }
 0x17c   :  { %v5381_v52 = vadd.f32 %v5380_v58, %v5379_v33  ;;  %v2986_v59 = vpop.f32.mrf.mxu0  ;;  %v5919_v43 = vadd.f32 %v5918_v2, %v5917_v21  ;;  %v5029_v41 = vmax.f32 %v3987_v13, 0.0  ;;  %v5922_v33 = vsel %vm5206_vm2, %v5027_v29, 0.0 }
 0x17d   :  { %v2987_v22 = vadd.f32 %v8906_v16, %v2986_v59  ;;  %v3992_v17 = vadd.f32 %v8906_v16, %v9181_v3  ;;  %v9260_v31 = vpop.f32.mrf.mxu1  ;;  %v5384_v39 = vsel %vm5206_vm2, %v4778_v30, 0.0  ;;  %v4000_v2 = vadd.f32 %v8906_v16, %v9171_v32 }
 0x17e   :  { %v5383_v36 = vadd.f32 %v5382_v54, %v5381_v52  ;;  %v7349_v51 = vpop.f32.mrf.mxu0  ;;  %7444 = vmatmul.mubr.msk.bf16.gmra.mxu0 %vm1840_vm1, %v7964_v23  ;;  %v5921_v49 = vadd.f32 %v5920_v4, %v5919_v43  ;;  %v4781_v13 = vmax.f32 %v2995_v48, 0.0  ;;  %v5388_v32 = vsel %vm5206_vm2, %v4780_v8, 0.0  ;;  %v7968_v48 = vld [vmem:[%s10942_s0 + $0x2f8] sm:$0xff]  }
 0x17f   :  { %v4779_v12 = vmax.f32 %v2987_v22, 0.0  ;;  %7447 = vmatprep.mubr.msk.bf16.mxu0 %vm1840_vm1, %v7967_v63  ;;  %v3008_v58 = vadd.f32 %v8906_v16, %v7349_v51  ;;  %v5030_v54 = vmax.f32 %v3992_v17, 0.0  ;;  %v9269_v21 = vpop.f32.mrf.mxu1  ;;  %v4003_v63 = vadd.f32 %v8906_v16, %v9194_v10  ;;  %v7994_v43 = vld [vmem:[%s10942_s0 + $0x6f8] sm:$0xff]  }
 0x180   :  { %v5385_v23 = vadd.f32 %v5384_v39, %v5383_v36  ;;  %v2999_v3 = vpop.f32.mrf.mxu0  ;;  %v5923_v52 = vadd.f32 %v5922_v33, %v5921_v49  ;;  %v5926_v4 = vsel %vm5206_vm2, %v5029_v41, 0.0  ;;  %v3995_v29 = vadd.f32 %v8906_v16, %v9209_v24  ;;  %v7971_v36 = vld [vmem:[%s10942_s0 + $0x300] sm:$0xff]   ;;  %7704 = vmatmul.mubr.msk.bf16.gmra.mxu1 %vm1840_vm1, %v7994_v43 }
 0x181   :  { %v5386_v6 = vsel %vm5206_vm2, %v4779_v12, 0.0  ;;  %v3000_v30 = vadd.f32 %v8906_v16, %v2999_v3  ;;  %v9282_v22 = vpop.f32.mrf.mxu1  ;;  %v5032_v33 = vmax.f32 %v4000_v2, 0.0  ;;  %v7997_v41 = vld [vmem:[%s10942_s0 + $0x700] sm:$0xff]   ;;  %v5390_v24 = vsel %vm5206_vm2, %v4781_v13, 0.0 }
 0x182   :  { %v5387_v59 = vadd.f32 %v5386_v6, %v5385_v23  ;;  %v7350_v9 = vpop.f32.mrf.mxu0  ;;  %v5925_v51 = vadd.f32 %v5924_v42, %v5923_v52  ;;  %v5928_v12 = vsel %vm5206_vm2, %v5030_v54, 0.0  ;;  %v5031_v49 = vmax.f32 %v3995_v29, 0.0  ;;  %7707 = vmatprep.mubr.msk.bf16.mxu1 %vm1840_vm1, %v7997_v41 }
 0x183   :  { %v4782_v10 = vmax.f32 %v3000_v30, 0.0  ;;  %v3011_v8 = vadd.f32 %v8906_v16, %v7350_v9  ;;  %v9296_v23 = vpop.f32.mrf.mxu1  ;;  %v4784_v3 = vmax.f32 %v3008_v58, 0.0  ;;  %v5033_v9 = vmax.f32 %v4003_v63, 0.0 }
 0x184   :  { %v5389_v17 = vadd.f32 %v5388_v32, %v5387_v59  ;;  %v3002_v39 = vpop.f32.mrf.mxu0  ;;  %v5927_v30 = vadd.f32 %v5926_v4, %v5925_v51  ;;  %v5930_v52 = vsel %vm5206_vm2, %v5031_v49, 0.0  ;;  %v9303_v13 = vadd.f32 %v8906_v16, %v9217_v38 }
 0x185   :  { %v3003_v6 = vadd.f32 %v8906_v16, %v3002_v39  ;;  %v4008_v54 = vadd.f32 %v8906_v16, %v9224_v40  ;;  %v9307_v32 = vpop.f32.mrf.mxu1  ;;  %v5392_v58 = vsel %vm5206_vm2, %v4782_v10, 0.0  ;;  %v4785_v63 = vmax.f32 %v3011_v8, 0.0 }
 0x186   :  { %v5391_v42 = vadd.f32 %v5390_v24, %v5389_v17  ;;  %v7353_v2 = vpop.f32.mrf.mxu0  ;;  %7448 = vmatmul.mubr.msk.bf16.gmra.mxu0 %vm1840_vm1, %v7968_v48  ;;  %v5929_v48 = vadd.f32 %v5928_v12, %v5927_v30  ;;  %v5932_v51 = vsel %vm5206_vm2, %v5032_v33, 0.0  ;;  %v5396_v17 = vsel %vm5206_vm2, %v4784_v3, 0.0  ;;  %v7972_v12 = vld [vmem:[%s10942_s0 + $0x308] sm:$0xff]  }
 0x187   :  { %v4783_v59 = vmax.f32 %v3003_v6, 0.0  ;;  %7451 = vmatprep.mubr.msk.bf16.mxu0 %vm1840_vm1, %v7971_v36  ;;  %v3024_v38 = vadd.f32 %v8906_v16, %v7353_v2  ;;  %v5034_v40 = vmax.f32 %v4008_v54, 0.0  ;;  %v9315_v24 = vpop.f32.mrf.mxu1  ;;  %v4019_v36 = vadd.f32 %v8906_v16, %v9237_v45  ;;  %v7998_v30 = vld [vmem:[%s10942_s0 + $0x708] sm:$0xff]  }
 0x188   :  { %v5393_v4 = vadd.f32 %v5392_v58, %v5391_v42  ;;  %v3015_v29 = vpop.f32.mrf.mxu0  ;;  %v5931_v8 = vadd.f32 %v5930_v52, %v5929_v48  ;;  %v5934_v33 = vsel %vm5206_vm2, %v5033_v9, 0.0  ;;  %v4011_v49 = vadd.f32 %v8906_v16, %v9252_v27  ;;  %v7975_v42 = vld [vmem:[%s10942_s0 + $0x310] sm:$0xff]   ;;  %7708 = vmatmul.mubr.msk.bf16.gmra.mxu1 %vm1840_vm1, %v7998_v30 }
 0x189   :  { %v5394_v43 = vsel %vm5206_vm2, %v4783_v59, 0.0  ;;  %v3016_v10 = vadd.f32 %v8906_v16, %v3015_v29  ;;  %v9328_v6 = vpop.f32.mrf.mxu1  ;;  %v5398_v45 = vsel %vm5206_vm2, %v4785_v63, 0.0  ;;  %v5036_v52 = vmax.f32 %v9303_v13, 0.0  ;;  %v8001_v16 = vld [vmem:[%s10942_s0 + $0x710] sm:$0xff]   ;;  %v9347_v63 = vld [vmem:[%s10944_s2] ss:$0 sm:$0xff] }
 0x18a   :  { %v5395_v41 = vadd.f32 %v5394_v43, %v5393_v4  ;;  %v7354_v39 = vpop.f32.mrf.mxu0  ;;  %v5933_v2 = vadd.f32 %v5932_v51, %v5931_v8  ;;  %v4788_v9 = vmax.f32 %v3024_v38, 0.0  ;;  %v5936_v58 = vsel %vm5206_vm2, %v5034_v40, 0.0  ;;  %7711 = vmatprep.mubr.msk.bf16.mxu1 %vm1840_vm1, %v8001_v16  ;;  %v7976_v16 = vld [vmem:[%s10942_s0 + $0x318] sm:$0xff]  }
 0x18b   :  { %v4786_v3 = vmax.f32 %v3016_v10, 0.0  ;;  %v5035_v59 = vmax.f32 %v4011_v49, 0.0  ;;  %v9342_v48 = vpop.f32.mrf.mxu1  ;;  %v3027_v4 = vadd.f32 %v9347_v63, %v7354_v39  ;;  %v5037_v51 = vmax.f32 %v4019_v36, 0.0 }
 0x18c   :  { %v5397_v27 = vadd.f32 %v5396_v17, %v5395_v41  ;;  %v3018_v54 = vpop.f32.mrf.mxu0  ;;  %v5935_v29 = vadd.f32 %v5934_v33, %v5933_v2  ;;  %v4032_v40 = vadd.f32 %v9347_v63, %v9260_v31  ;;  %v4024_v8 = vadd.f32 %v9347_v63, %v9269_v21 }
 0x18d   :  { %v3019_v13 = vadd.f32 %v9347_v63, %v3018_v54  ;;  %v5938_v38 = vsel %vm5206_vm2, %v5035_v59, 0.0  ;;  %v9357_v17 = vpop.f32.mrf.mxu1  ;;  %v5400_v41 = vsel %vm5206_vm2, %v4786_v3, 0.0  ;;  %v5404_v33 = vsel %vm5206_vm2, %v4788_v9, 0.0 }
 0x18e   :  { %v5399_v43 = vadd.f32 %v5398_v45, %v5397_v27  ;;  %v7357_v10 = vpop.f32.mrf.mxu0  ;;  %7452 = vmatmul.mubr.msk.bf16.gmra.mxu0 %vm1840_vm1, %v7972_v12  ;;  %v5937_v12 = vadd.f32 %v5936_v58, %v5935_v29  ;;  %v5940_v21 = vsel %vm5206_vm2, %v5036_v52, 0.0  ;;  %v5038_v45 = vmax.f32 %v4024_v8, 0.0 }
 0x18f   :  { %v4787_v39 = vmax.f32 %v3019_v13, 0.0  ;;  %v3040_v36 = vadd.f32 %v9347_v63, %v7357_v10  ;;  %7455 = vmatprep.mubr.msk.bf16.mxu0 %vm1840_vm1, %v7975_v42  ;;  %v9366_v2 = vpop.f32.mrf.mxu1  ;;  %v4789_v30 = vmax.f32 %v3027_v4, 0.0  ;;  %v5942_v9 = vsel %vm5206_vm2, %v5037_v51, 0.0  ;;  %v8002_v13 = vld [vmem:[%s10942_s0 + $0x718] sm:$0xff]  }
 0x190   :  { %v5401_v31 = vadd.f32 %v5400_v41, %v5399_v43  ;;  %v3031_v49 = vpop.f32.mrf.mxu0  ;;  %v5939_v54 = vadd.f32 %v5938_v38, %v5937_v12  ;;  %v4035_v52 = vadd.f32 %v9347_v63, %v9282_v22  ;;  %v4027_v58 = vadd.f32 %v9347_v63, %v9296_v23  ;;  %v7979_v43 = vld [vmem:[%s10942_s0 + $0x320] sm:$0xff]   ;;  %7712 = vmatmul.mubr.msk.bf16.gmra.mxu1 %vm1840_vm1, %v8002_v13 }
 0x191   :  { %v5402_v3 = vsel %vm5206_vm2, %v4787_v39, 0.0  ;;  %v3032_v27 = vadd.f32 %v9347_v63, %v3031_v49  ;;  %v9378_v4 = vpop.f32.mrf.mxu1  ;;  %v4792_v29 = vmax.f32 %v3040_v36, 0.0  ;;  %v5040_v38 = vmax.f32 %v4032_v40, 0.0  ;;  %v8005_v22 = vld [vmem:[%s10942_s0 + $0x720] sm:$0xff]  }
 0x192   :  { %v5403_v59 = vadd.f32 %v5402_v3, %v5401_v31  ;;  %v7358_v42 = vpop.f32.mrf.mxu0  ;;  %v5941_v10 = vadd.f32 %v5940_v21, %v5939_v54  ;;  %v5944_v51 = vsel %vm5206_vm2, %v5038_v45, 0.0  ;;  %v5039_v12 = vmax.f32 %v4027_v58, 0.0  ;;  %7715 = vmatprep.mubr.msk.bf16.mxu1 %vm1840_vm1, %v8005_v22 }
 0x193   :  { %v4790_v8 = vmax.f32 %v3032_v27, 0.0  ;;  %v3043_v41 = vadd.f32 %v9347_v63, %v7358_v42  ;;  %v9391_v31 = vpop.f32.mrf.mxu1  ;;  %v5406_v36 = vsel %vm5206_vm2, %v4789_v30, 0.0  ;;  %v4048_v40 = vadd.f32 %v9347_v63, %v9307_v32 }
 0x194   :  { %v5405_v23 = vadd.f32 %v5404_v33, %v5403_v59  ;;  %v3034_v39 = vpop.f32.mrf.mxu0  ;;  %v5943_v21 = vadd.f32 %v5942_v9, %v5941_v10  ;;  %v5041_v33 = vmax.f32 %v4035_v52, 0.0  ;;  %v5946_v27 = vsel %vm5206_vm2, %v5039_v12, 0.0 }
 0x195   :  { %v3035_v49 = vadd.f32 %v9347_v63, %v3034_v39  ;;  %v4040_v54 = vadd.f32 %v9347_v63, %v9315_v24  ;;  %v9401_v59 = vpop.f32.mrf.mxu1  ;;  %v5417_v30 = vsel %vm5206_vm2, %v4792_v29, 0.0  ;;  %v5948_v32 = vsel %vm5206_vm2, %v5040_v38, 0.0 }
 0x196   :  { %v5407_v45 = vadd.f32 %v5406_v36, %v5405_v23  ;;  %v7361_v3 = vpop.f32.mrf.mxu0  ;;  %7456 = vmatmul.mubr.msk.bf16.gmra.mxu0 %vm1840_vm1, %v7976_v16  ;;  %v5945_v9 = vadd.f32 %v5944_v51, %v5943_v21  ;;  %v5414_v52 = vsel %vm5206_vm2, %v4790_v8, 0.0  ;;  %v4793_v58 = vmax.f32 %v3043_v41, 0.0  ;;  %v7980_v51 = vld [vmem:[%s10942_s0 + $0x328] sm:$0xff]  }
 0x197   :  { %v4791_v42 = vmax.f32 %v3035_v49, 0.0  ;;  %7459 = vmatprep.mubr.msk.bf16.mxu0 %vm1840_vm1, %v7979_v43  ;;  %v5042_v24 = vmax.f32 %v4040_v54, 0.0  ;;  %v9409_v23 = vpop.f32.mrf.mxu1  ;;  %v5044_v12 = vmax.f32 %v4048_v40, 0.0  ;;  %v5950_v22 = vsel %vm5206_vm2, %v5041_v33, 0.0  ;;  %v8006_v49 = vld [vmem:[%s10942_s0 + $0x728] sm:$0xff]  }
 0x198   :  { %v5408_v16 = vrot.slane %v5407_v45, 4  ;;  %v3047_v10 = vpop.f32.mrf.mxu0  ;;  %v5947_v39 = vadd.f32 %v5946_v27, %v5945_v9  ;;  %v4051_v8 = vadd.f32 %v9347_v63, %v9328_v6  ;;  %v3056_v21 = vadd.f32 %v9347_v63, %v7361_v3  ;;  %v8009_v6 = vld [vmem:[%s10942_s0 + $0x730] sm:$0xff]   ;;  %7716 = vmatmul.mubr.msk.bf16.gmra.mxu1 %vm1840_vm1, %v8006_v49 }
 0x199   :  { %v5415_v13 = vsel %vm5206_vm2, %v4791_v42, 0.0  ;;  %v3048_v29 = vadd.f32 %v9347_v63, %v3047_v10  ;;  %v9419_v41 = vpop.f32.mrf.mxu1  ;;  %v5952_v54 = vsel %vm5206_vm2, %v5042_v24, 0.0  ;;  %v4043_v3 = vadd.f32 %v9347_v63, %v9342_v48  ;;  %7719 = vmatprep.mubr.msk.bf16.mxu1 %vm1840_vm1, %v8009_v6 }
 0x19a   :  { %v5409_v43 = vadd.f32 %v5408_v16, %v5407_v45  ;;  %v5416_v36 = vadd.f32 %v5415_v13, %v5414_v52  ;;  %v7362_v38 = vpop.f32.mrf.mxu0  ;;  %v7983_v45 = vld [vmem:[%s10942_s0 + $0x330] sm:$0xff]   ;;  %v5949_v27 = vadd.f32 %v5948_v32, %v5947_v39  ;;  %v5419_v10 = vsel %vm5206_vm2, %v4793_v58, 0.0 }
 0x19b   :  { %v4794_v40 = vmax.f32 %v3048_v29, 0.0  ;;  %v3059_v9 = vadd.f32 %v9347_v63, %v7362_v38  ;;  %v9435_v52 = vpop.f32.mrf.mxu1  ;;  %v5956_v24 = vsel %vm5206_vm2, %v5044_v12, 0.0  ;;  %v4796_v48 = vmax.f32 %v3056_v21, 0.0 }
 0x19c   :  { %v5410_v33 = vrot.slane %v5409_v43, 2  ;;  %v5418_v42 = vadd.f32 %v5417_v30, %v5416_v36  ;;  %v3050_v16 = vpop.f32.mrf.mxu0  ;;  %v5951_v13 = vadd.f32 %v5950_v22, %v5949_v27  ;;  %v5045_v30 = vmax.f32 %v4051_v8, 0.0 }
 0x19d   :  { %v3051_v32 = vadd.f32 %v9347_v63, %v3050_v16  ;;  %v5043_v36 = vmax.f32 %v4043_v3, 0.0  ;;  %v9441_v38 = vpop.f32.mrf.mxu1  ;;  %v5421_v15 = vsel %vm5206_vm2, %v4794_v40, 0.0  ;;  %v4797_v22 = vmax.f32 %v3059_v9, 0.0 }
 0x19e   :  { %v5411_v29 = vadd.f32 %v5410_v33, %v5409_v43  ;;  %v5420_v39 = vadd.f32 %v5419_v10, %v5418_v42  ;;  %v7365_v55 = vpop.f32.mrf.mxu0  ;;  %7460 = vmatmul.mubr.msk.bf16.gmra.mxu0 %vm1840_vm1, %v7980_v51  ;;  %v5953_v16 = vadd.f32 %v5952_v54, %v5951_v13  ;;  %v5958_v6 = vsel %vm5206_vm2, %v5045_v30, 0.0  ;;  %v7987_v13 = vld [vmem:[%s10942_s0 + $0x340] sm:$0xff]  }
 0x19f   :  { %v4795_v58 = vmax.f32 %v3051_v32, 0.0  ;;  %7463 = vmatprep.mubr.msk.bf16.mxu0 %vm1840_vm1, %v7983_v45  ;;  %v5954_v51 = vsel %vm5206_vm2, %v5043_v36, 0.0  ;;  %v9448_v8 = vpop.f32.mrf.mxu1  ;;  %v3072_v49 = vadd.f32 %v9347_v63, %v7365_v55  ;;  %v4056_v9 = vadd.f32 %v9347_v63, %v9366_v2  ;;  %v8010_v55 = vld [vmem:[%s10942_s0 + $0x738] sm:$0xff]  }
 0x1a0   :  { %v5412_v12 = vrot.slane %v5411_v29, 1  ;;  %v5422_v43 = vadd.f32 %v5421_v15, %v5420_v39  ;;  %v3063_v27 = vpop.f32.mrf.mxu0  ;;  %v5955_v40 = vadd.f32 %v5954_v51, %v5953_v16  ;;  %v7984_v15 = vld [vmem:[%s10942_s0 + $0x338] sm:$0xff]   ;;  %v5425_v10 = vsel %vm5206_vm2, %v4796_v48, 0.0  ;;  %v8013_v39 = vld [vmem:[%s10942_s0 + $0x740] sm:$0xff]   ;;  %7720 = vmatmul.mubr.msk.bf16.gmra.mxu1 %vm1840_vm1, %v8010_v55 }
 0x1a1   :  { %v5423_v33 = vsel %vm5206_vm2, %v4795_v58, 0.0  ;;  %v3064_v21 = vadd.f32 %v9347_v63, %v3063_v27  ;;  %v9459_v3 = vpop.f32.mrf.mxu1  ;;  %v5427_v2 = vsel %vm5206_vm2, %v4797_v22, 0.0  ;;  %v4064_v16 = vadd.f32 %v9347_v63, %v9357_v17  ;;  %7723 = vmatprep.mubr.msk.bf16.mxu1 %vm1840_vm1, %v8013_v39 }
 0x1a2   :  { %v5413_v42 = vadd.f32 %v5412_v12, %v5411_v29  ;;  %v5424_v45 = vadd.f32 %v5423_v33, %v5422_v43  ;;  %v7366_v54 = vpop.f32.mrf.mxu0  ;;  %v5957_v29 = vadd.f32 %v5956_v24, %v5955_v40  ;;  %v4800_v48 = vmax.f32 %v3072_v49, 0.0 }
 0x1a3   :  { %v4798_v32 = vmax.f32 %v3064_v21, 0.0  ;;  %v9474_v12 = vpop.f32.mrf.mxu1  ;;  %v3075_v43 = vadd.f32 %v9347_v63, %v7366_v54  ;;  %v5046_v22 = vmax.f32 %v4056_v9, 0.0  ;;  %v4059_v9 = vadd.f32 %v9347_v63, %v9391_v31 }
 0x1a4   :  { %v6314_v30 = vmul.f32 0.00390625, %v5413_v42  ;;  %v5426_v36 = vadd.f32 %v5425_v10, %v5424_v45  ;;  %v3066_v58 = vpop.f32.mrf.mxu0  ;;  %v9478_v24 = vadd.f32 %v5958_v6, %v5957_v29  ;;  %v4067_v42 = vadd.f32 %v9347_v63, %v9378_v4 }
 0x1a5   :  { %v3067_v27 = vadd.f32 %v9347_v63, %v3066_v58  ;;  %v9481_v40 = vpop.f32.mrf.mxu1  ;;  %v5429_v17 = vsel %vm5206_vm2, %v4798_v32, 0.0  ;;  %v5433_v55 = vsel %vm5206_vm2, %v4800_v48, 0.0  ;;  %v4801_v32 = vmax.f32 %v3075_v43, 0.0 }
 0x1a6   :  { %10974 = vst [vmem:[#allocation23_spill] sm:$0xff] %v9478_v24  ;;  %v6330_v51 = vpack.c.bf16 %v6314_v30, %v6314_v30  ;;  %v5428_v33 = vadd.f32 %v5427_v2, %v5426_v36  ;;  %v7369_v21 = vpop.f32.mrf.mxu0  ;;  %7464 = vmatmul.mubr.msk.bf16.gmra.mxu0 %vm1840_vm1, %v7984_v15  ;;  %v5048_v15 = vmax.f32 %v4064_v16, 0.0  ;;  %v7988_v2 = vld [vmem:[%s10942_s0 + $0x348] sm:$0xff]   ;;  %v5966_v31 = vsel %vm5206_vm2, %v5046_v22, 0.0 }
 0x1a7   :  { %v4799_v49 = vmax.f32 %v3067_v27, 0.0  ;;  %7467 = vmatprep.mubr.msk.bf16.mxu0 %vm1840_vm1, %v7987_v13  ;;  %v9491_v10 = vpop.f32.mrf.mxu1  ;;  %v5047_v36 = vmax.f32 %v4059_v9, 0.0  ;;  %v8014_v16 = vld [vmem:[%s10942_s0 + $0x748] sm:$0xff]   ;;  %v3088_v48 = vadd.f32 %v9347_v63, %v7369_v21  ;;  %v7991_v27 = vld [vmem:[%s10942_s0 + $0x350] sm:$0xff]   ;;  %v4072_v21 = vadd.f32 %v9347_v63, %v9409_v23 }
 0x1a8   :  { %v6373_v45 = vunpack.c.l.b16 %v6330_v51  ;;  %v5430_v54 = vadd.f32 %v5429_v17, %v5428_v33  ;;  %v3079_v6 = vpop.f32.mrf.mxu0  ;;  %v5049_v51 = vmax.f32 %v4067_v42, 0.0  ;;  %v8017_v33 = vld [vmem:[%s10942_s0 + $0x750] sm:$0xff]   ;;  %v5969_v9 = vsel %vm5206_vm2, %v5048_v15, 0.0  ;;  %7724 = vmatmul.mubr.msk.bf16.gmra.mxu1 %vm1840_vm1, %v8014_v16 }
 0x1a9   :  { %v5431_v29 = vsel %vm5206_vm2, %v4799_v49, 0.0  ;;  %v3080_v13 = vadd.f32 %v9347_v63, %v3079_v6  ;;  %v9504_v58 = vpop.f32.mrf.mxu1  ;;  %v5967_v49 = vsel %vm5206_vm2, %v5047_v36, 0.0  ;;  %v5435_v6 = vsel %vm5206_vm2, %v4801_v32, 0.0  ;;  %7727 = vmatprep.mubr.msk.bf16.mxu1 %vm1840_vm1, %v8017_v33 }
 0x1aa   :  { %v9498_v4 = vsel %vm6389_vm4, %v6373_v45, %v9141_v0  ;;  %v5432_v39 = vadd.f32 %v5431_v29, %v5430_v54  ;;  %v7370_v30 = vpop.f32.mrf.mxu0  ;;  %v4080_v45 = vadd.f32 %v9347_v63, %v9401_v59  ;;  %v4804_v59 = vmax.f32 %v3088_v48, 0.0 }
 0x1ab   :  { %v4802_v43 = vmax.f32 %v3080_v13, 0.0  ;;  %v3091_v0 = vadd.f32 %v9347_v63, %v7370_v30  ;;  %v9522_v54 = vpop.f32.mrf.mxu1  ;;  %v5971_v32 = vsel %vm5206_vm2, %v5049_v51, 0.0  ;;  %v7992_v51 = vld [vmem:[%s10942_s0 + $0x358] sm:$0xff]   ;;  %v4083_v33 = vadd.f32 %v9347_v63, %v9419_v41  ;;  %v8021_v41 = vld [vmem:[%s10942_s0 + $0x760] sm:$0xff]  }
 0x1ac   :  { %v5434_v22 = vadd.f32 %v5433_v55, %v5432_v39  ;;  %v3082_v17 = vpop.f32.mrf.mxu0  ;;  %v5968_v55 = vadd.f32 %v5967_v49, %v5966_v31  ;;  %v5050_v39 = vmax.f32 %v4072_v21, 0.0  ;;  %v5052_v31 = vmax.f32 %v4080_v45, 0.0 }
 0x1ad   :  { %v3083_v42 = vadd.f32 %v9347_v63, %v3082_v17  ;;  %v9528_v30 = vpop.f32.mrf.mxu1  ;;  %v5437_v23 = vsel %vm5206_vm2, %v4802_v43, 0.0  ;;  %v4075_v45 = vadd.f32 %v9347_v63, %v9435_v52 }
 0x1ae   :  { %v5436_v29 = vadd.f32 %v5435_v6, %v5434_v22  ;;  %v7373_v13 = vpop.f32.mrf.mxu0  ;;  %7468 = vmatmul.mubr.msk.bf16.gmra.mxu0 %vm1840_vm1, %v7988_v2  ;;  %v4805_v22 = vmax.f32 %v3091_v0, 0.0  ;;  %v5970_v2 = vadd.f32 %v5969_v9, %v5968_v55  ;;  %v5973_v43 = vsel %vm5206_vm2, %v5050_v39, 0.0  ;;  %v8018_v9 = vld [vmem:[%s10942_s0 + $0x758] sm:$0xff]   ;;  %v7995_v39 = vld [vmem:[%s10942_s0 + $0x360] sm:$0xff]  }
 0x1af   :  { %v4803_v36 = vmax.f32 %v3083_v42, 0.0  ;;  %7471 = vmatprep.mubr.msk.bf16.mxu0 %vm1840_vm1, %v7991_v27  ;;  %v9535_v49 = vpop.f32.mrf.mxu1  ;;  %v3104_v16 = vadd.f32 %v9347_v63, %v7373_v13  ;;  %v5977_v24 = vsel %vm5206_vm2, %v5052_v31, 0.0 }
 0x1b0   :  { %v5438_v15 = vadd.f32 %v5437_v23, %v5436_v29  ;;  %v3095_v17 = vpop.f32.mrf.mxu0  ;;  %v5972_v0 = vadd.f32 %v5971_v32, %v5970_v2  ;;  %v5441_v29 = vsel %vm5206_vm2, %v4804_v59, 0.0  ;;  %v5053_v32 = vmax.f32 %v4083_v33, 0.0  ;;  %7728 = vmatmul.mubr.msk.bf16.gmra.mxu1 %vm1840_vm1, %v8018_v9 }
 0x1b1   :  { %v5439_v21 = vsel %vm5206_vm2, %v4803_v36, 0.0  ;;  %v3096_v48 = vadd.f32 %v9347_v63, %v3095_v17  ;;  %v9548_v42 = vpop.f32.mrf.mxu1  ;;  %v5443_v59 = vsel %vm5206_vm2, %v4805_v22, 0.0  ;;  %v4096_v22 = vadd.f32 %v9347_v63, %v9441_v38  ;;  %7731 = vmatprep.mubr.msk.bf16.mxu1 %vm1840_vm1, %v8021_v41 }
 0x1b2   :  { %v5440_v27 = vadd.f32 %v5439_v21, %v5438_v15  ;;  %v7374_v6 = vpop.f32.mrf.mxu0  ;;  %v5974_v36 = vadd.f32 %v5973_v43, %v5972_v0  ;;  %v5051_v15 = vmax.f32 %v4075_v45, 0.0  ;;  %v4808_v21 = vmax.f32 %v3104_v16, 0.0 }
 0x1b3   :  { %v4806_v13 = vmax.f32 %v3096_v48, 0.0  ;;  %v3107_v55 = vadd.f32 %v9347_v63, %v7374_v6  ;;  %v9561_v17 = vpop.f32.mrf.mxu1  ;;  %v5979_v31 = vsel %vm5206_vm2, %v5053_v32, 0.0  ;;  %v4099_v38 = vadd.f32 %v9347_v63, %v9459_v3  ;;  %v8022_v32 = vld [vmem:[%s10942_s0 + $0x768] sm:$0xff]   ;;  %v7999_v3 = vld [vmem:[%s10942_s0 + $0x370] sm:$0xff]  }
 0x1b4   :  { %v5442_v52 = vadd.f32 %v5441_v29, %v5440_v27  ;;  %v3098_v23 = vpop.f32.mrf.mxu0  ;;  %v5975_v47 = vsel %vm5206_vm2, %v5051_v15, 0.0  ;;  %v4088_v29 = vadd.f32 %v9347_v63, %v9448_v8  ;;  %v5449_v15 = vsel %vm5206_vm2, %v4808_v21, 0.0 }
 0x1b5   :  { %v3099_v2 = vadd.f32 %v9347_v63, %v3098_v23  ;;  %v9568_v27 = vpop.f32.mrf.mxu1  ;;  %v5445_v43 = vsel %vm5206_vm2, %v4806_v13, 0.0  ;;  %v4809_v0 = vmax.f32 %v3107_v55, 0.0  ;;  %v5976_v45 = vadd.f32 %v5975_v47, %v5974_v36  ;;  %v7996_v47 = vld [vmem:[%s10942_s0 + $0x368] sm:$0xff]  }
 0x1b6   :  { %v5444_v48 = vadd.f32 %v5443_v59, %v5442_v52  ;;  %v7377_v6 = vpop.f32.mrf.mxu0  ;;  %7472 = vmatmul.mubr.msk.bf16.gmra.mxu0 %vm1840_vm1, %v7992_v51  ;;  %v5054_v36 = vmax.f32 %v4088_v29, 0.0  ;;  %v4091_v21 = vadd.f32 %v9347_v63, %v9474_v12 }
 0x1b7   :  { %v4807_v33 = vmax.f32 %v3099_v2, 0.0  ;;  %7475 = vmatprep.mubr.msk.bf16.mxu0 %vm1840_vm1, %v7995_v39  ;;  %v9579_v9 = vpop.f32.mrf.mxu1  ;;  %v3120_v55 = vadd.f32 %v9347_v63, %v7377_v6  ;;  %v5978_v23 = vadd.f32 %v5977_v24, %v5976_v45  ;;  %v8025_v24 = vld [vmem:[%s10942_s0 + $0x770] sm:$0xff]   ;;  %v8047_v45 = vld [vmem:[%s10943_s3] sm:$0xff]  }
 0x1b8   :  { %v5446_v16 = vadd.f32 %v5445_v43, %v5444_v48  ;;  %v3111_v51 = vpop.f32.mrf.mxu0  ;;  %v5056_v48 = vmax.f32 %v4096_v22, 0.0  ;;  %v5451_v22 = vsel %vm5206_vm2, %v4809_v0, 0.0  ;;  %v5055_v12 = vmax.f32 %v4091_v21, 0.0  ;;  %7732 = vmatmul.mubr.msk.bf16.gmra.mxu1 %vm1840_vm1, %v8022_v32 }
 0x1b9   :  { %v5447_v13 = vsel %vm5206_vm2, %v4807_v33, 0.0  ;;  %v3112_v39 = vadd.f32 %v9347_v63, %v3111_v51  ;;  %v9589_v8 = vpop.f32.mrf.mxu1  ;;  %v5980_v33 = vadd.f32 %v5979_v31, %v5978_v23  ;;  %v4812_v29 = vmax.f32 %v3120_v55, 0.0  ;;  %7735 = vmatprep.mubr.msk.bf16.mxu1 %vm1840_vm1, %v8025_v24  ;;  %7774 = vmatpush3.bf16.msra.mxu1 %v8047_v45 }
 0x1ba   :  { %v5448_v41 = vadd.f32 %v5447_v13, %v5446_v16  ;;  %v7378_v52 = vpop.f32.mrf.mxu0  ;;  %v5981_v16 = vsel %vm5206_vm2, %v5054_v36, 0.0  ;;  %v4112_v0 = vadd.f32 %v9347_v63, %v9481_v40  ;;  %v4104_v55 = vadd.f32 %v9347_v63, %v9491_v10 }
 0x1bb   :  { %v4810_v59 = vmax.f32 %v3112_v39, 0.0  ;;  %v3123_v2 = vadd.f32 %v9347_v63, %v7378_v52  ;;  %v9605_v51 = vpop.f32.mrf.mxu1  ;;  %v5057_v39 = vmax.f32 %v4099_v38, 0.0  ;;  %v5982_v23 = vadd.f32 %v5981_v16, %v5980_v33 }
 0x1bc   :  { %v5450_v6 = vadd.f32 %v5449_v15, %v5448_v41  ;;  %v3114_v43 = vpop.f32.mrf.mxu0  ;;  %v4115_v32 = vadd.f32 %v9347_v63, %v9504_v58  ;;  %v5457_v24 = vsel %vm5206_vm2, %v4812_v29, 0.0  ;;  %v5058_v21 = vmax.f32 %v4104_v55, 0.0  ;;  %v8003_v29 = vld [vmem:[%s10942_s0 + $0x380] sm:$0xff]  }
 0x1bd   :  { %v3115_v13 = vadd.f32 %v9347_v63, %v3114_v43  ;;  %v5453_v31 = vsel %vm5206_vm2, %v4810_v59, 0.0  ;;  %v9614_v36 = vpop.f32.mrf.mxu1  ;;  %v4813_v15 = vmax.f32 %v3123_v2, 0.0  ;;  %v5985_v59 = vsel %vm5206_vm2, %v5056_v48, 0.0  ;;  %v8000_v48 = vld [vmem:[%s10942_s0 + $0x378] sm:$0xff]  }
 0x1be   :  { %v5452_v41 = vadd.f32 %v5451_v22, %v5450_v6  ;;  %v7381_v52 = vpop.f32.mrf.mxu0  ;;  %7476 = vmatmul.mubr.msk.bf16.gmra.mxu0 %vm1840_vm1, %v7996_v47  ;;  %v5983_v6 = vsel %vm5206_vm2, %v5055_v12, 0.0  ;;  %v5987_v58 = vsel %vm5206_vm2, %v5057_v39, 0.0  ;;  %v8029_v39 = vld [vmem:[%s10942_s0 + $0x780] sm:$0xff]   ;;  %v5989_v12 = vsel %vm5206_vm2, %v5058_v21, 0.0 }
 0x1bf   :  { %v4811_v60 = vmax.f32 %v3115_v13, 0.0  ;;  %7479 = vmatprep.mubr.msk.bf16.mxu0 %vm1840_vm1, %v7999_v3  ;;  %v9627_v2 = vpop.f32.mrf.mxu1  ;;  %v3136_v40 = vadd.f32 %v9347_v63, %v7381_v52  ;;  %v5984_v43 = vadd.f32 %v5983_v6, %v5982_v23  ;;  %v5459_v45 = vsel %vm5206_vm2, %v4813_v15, 0.0 }
 0x1c0   :  { %v5454_v38 = vadd.f32 %v5453_v31, %v5452_v41  ;;  %v3127_v47 = vpop.f32.mrf.mxu0  ;;  %v5060_v31 = vmax.f32 %v4112_v0, 0.0  ;;  %v5061_v55 = vmax.f32 %v4115_v32, 0.0  ;;  %v4120_v32 = vadd.f32 %v9347_v63, %v9535_v49 }
 0x1c1   :  { %v5455_v3 = vsel %vm5206_vm2, %v4811_v60, 0.0  ;;  %v3128_v10 = vadd.f32 %v9347_v63, %v3127_v47  ;;  %v9637_v22 = vpop.f32.mrf.mxu1  ;;  %v8026_v60 = vld [vmem:[%s10942_s0 + $0x778] sm:$0xff]   ;;  %v5986_v41 = vadd.f32 %v5985_v59, %v5984_v43  ;;  %v4816_v47 = vmax.f32 %v3136_v40, 0.0 }
 0x1c2   :  { %v5456_v33 = vadd.f32 %v5455_v3, %v5454_v38  ;;  %v7382_v16 = vpop.f32.mrf.mxu0  ;;  %v4107_v38 = vadd.f32 %v9347_v63, %v9522_v54  ;;  %7736 = vmatmul.mubr.msk.bf16.gmra.mxu1 %vm1840_vm1, %v8026_v60 }
 0x1c3   :  { %v4814_v13 = vmax.f32 %v3128_v10, 0.0  ;;  %v9652_v15 = vpop.f32.mrf.mxu1  ;;  %v3139_v6 = vadd.f32 %v9347_v63, %v7382_v16  ;;  %v5988_v0 = vadd.f32 %v5987_v58, %v5986_v41  ;;  %v5993_v16 = vsel %vm5206_vm2, %v5060_v31, 0.0  ;;  %7739 = vmatprep.mubr.msk.bf16.mxu1 %vm1840_vm1, %v8029_v39  ;;  %v8004_v39 = vld [vmem:[%s10942_s0 + $0x388] sm:$0xff]  }
 0x1c4   :  { %v5458_v52 = vadd.f32 %v5457_v24, %v5456_v33  ;;  %v3130_v23 = vpop.f32.mrf.mxu0  ;;  %v5059_v43 = vmax.f32 %v4107_v38, 0.0  ;;  %v4128_v24 = vadd.f32 %v9347_v63, %v9528_v30  ;;  %v5995_v30 = vsel %vm5206_vm2, %v5061_v55, 0.0 }
 0x1c5   :  { %v3131_v59 = vadd.f32 %v9347_v63, %v3130_v23  ;;  %v9661_v54 = vpop.f32.mrf.mxu1  ;;  %v5461_v40 = vsel %vm5206_vm2, %v4814_v13, 0.0  ;;  %v5990_v58 = vadd.f32 %v5989_v12, %v5988_v0  ;;  %v4817_v60 = vmax.f32 %v3139_v6, 0.0  ;;  %v8030_v6 = vld [vmem:[%s10942_s0 + $0x788] sm:$0xff]  }
 0x1c6   :  { %v5460_v3 = vadd.f32 %v5459_v45, %v5458_v52  ;;  %v7385_v10 = vpop.f32.mrf.mxu0  ;;  %7480 = vmatmul.mubr.msk.bf16.gmra.mxu0 %vm1840_vm1, %v8000_v48  ;;  %v5991_v49 = vsel %vm5206_vm2, %v5059_v43, 0.0  ;;  %v5062_v45 = vmax.f32 %v4120_v32, 0.0  ;;  %v5064_v55 = vmax.f32 %v4128_v24, 0.0  ;;  %v8007_v43 = vld [vmem:[%s10942_s0 + $0x390] sm:$0xff]  }
 0x1c7   :  { %v4815_v33 = vmax.f32 %v3131_v59, 0.0  ;;  %7483 = vmatprep.mubr.msk.bf16.mxu0 %vm1840_vm1, %v8003_v29  ;;  %v9670_v41 = vpop.f32.mrf.mxu1  ;;  %v5992_v29 = vadd.f32 %v5991_v49, %v5990_v58  ;;  %v3152_v31 = vadd.f32 %v9347_v63, %v7385_v10  ;;  %v4131_v38 = vadd.f32 %v9347_v63, %v9548_v42  ;;  %v8033_v42 = vld [vmem:[%s10942_s0 + $0x790] sm:$0xff]  }
 0x1c8   :  { %v5462_v48 = vadd.f32 %v5461_v40, %v5460_v3  ;;  %v3143_v21 = vpop.f32.mrf.mxu0  ;;  %v5465_v0 = vsel %vm5206_vm2, %v4816_v47, 0.0  ;;  %v4123_v47 = vadd.f32 %v9347_v63, %v9561_v17 }
 0x1c9   :  { %v5463_v13 = vsel %vm5206_vm2, %v4815_v33, 0.0  ;;  %v3144_v52 = vadd.f32 %v9347_v63, %v3143_v21  ;;  %v9680_v59 = vpop.f32.mrf.mxu1  ;;  %v5994_v32 = vadd.f32 %v5993_v16, %v5992_v29  ;;  %v5997_v33 = vsel %vm5206_vm2, %v5062_v45, 0.0 }
 0x1ca   :  { %v5464_v23 = vadd.f32 %v5463_v13, %v5462_v48  ;;  %v7386_v12 = vpop.f32.mrf.mxu0  ;;  %v5065_v58 = vmax.f32 %v4131_v38, 0.0  ;;  %v5467_v21 = vsel %vm5206_vm2, %v4817_v60, 0.0  ;;  %v4144_v16 = vadd.f32 %v9347_v63, %v9568_v27  ;;  %7740 = vmatmul.mubr.msk.bf16.gmra.mxu1 %vm1840_vm1, %v8030_v6 }
 0x1cb   :  { %v4818_v3 = vmax.f32 %v3144_v52, 0.0  ;;  %v3155_v10 = vadd.f32 %v9347_v63, %v7386_v12  ;;  %v9696_v48 = vpop.f32.mrf.mxu1  ;;  %v5996_v13 = vadd.f32 %v5995_v30, %v5994_v32  ;;  %v4820_v52 = vmax.f32 %v3152_v31, 0.0  ;;  %7743 = vmatprep.mubr.msk.bf16.mxu1 %vm1840_vm1, %v8033_v42  ;;  %v8008_v42 = vld [vmem:[%s10942_s0 + $0x398] sm:$0xff]  }
 0x1cc   :  { %v5466_v24 = vadd.f32 %v5465_v0, %v5464_v23  ;;  %v3146_v40 = vpop.f32.mrf.mxu0  ;;  %v6001_v45 = vsel %vm5206_vm2, %v5064_v55, 0.0  ;;  %v5063_v12 = vmax.f32 %v4123_v47, 0.0  ;;  %v4136_v32 = vadd.f32 %v9347_v63, %v9579_v9 }
 0x1cd   :  { %v3147_v49 = vadd.f32 %v9347_v63, %v3146_v40  ;;  %v9704_v38 = vpop.f32.mrf.mxu1  ;;  %v5469_v17 = vsel %vm5206_vm2, %v4818_v3, 0.0  ;;  %v4821_v60 = vmax.f32 %v3155_v10, 0.0  ;;  %v5998_v30 = vadd.f32 %v5997_v33, %v5996_v13 }
 0x1ce   :  { %v5468_v29 = vadd.f32 %v5467_v21, %v5466_v24  ;;  %v7389_v23 = vpop.f32.mrf.mxu0  ;;  %7484 = vmatmul.mubr.msk.bf16.gmra.mxu0 %vm1840_vm1, %v8004_v39  ;;  %v6003_v39 = vsel %vm5206_vm2, %v5065_v58, 0.0  ;;  %v5999_v55 = vsel %vm5206_vm2, %v5063_v12, 0.0  ;;  %v5066_v58 = vmax.f32 %v4136_v32, 0.0  ;;  %v8011_v12 = vld [vmem:[%s10942_s0 + $0x3a0] sm:$0xff]  }
 0x1cf   :  { %v4819_v0 = vmax.f32 %v3147_v49, 0.0  ;;  %7487 = vmatprep.mubr.msk.bf16.mxu0 %vm1840_vm1, %v8007_v43  ;;  %v9714_v24 = vpop.f32.mrf.mxu1  ;;  %v6000_v10 = vadd.f32 %v5999_v55, %v5998_v30  ;;  %v5068_v43 = vmax.f32 %v4144_v16, 0.0  ;;  %v4147_v47 = vadd.f32 %v9347_v63, %v9589_v8  ;;  %v8034_v49 = vld [vmem:[%s10942_s0 + $0x798] sm:$0xff]   ;;  %v8037_v8 = vld [vmem:[%s10942_s0 + $0x7a0] sm:$0xff]  }
 0x1d0   :  { %v5470_v27 = vadd.f32 %v5469_v17, %v5468_v29  ;;  %v3159_v31 = vpop.f32.mrf.mxu0  ;;  %v4139_v9 = vadd.f32 %v9347_v63, %v9605_v51  ;;  %v5473_v13 = vsel %vm5206_vm2, %v4820_v52, 0.0  ;;  %v3168_v16 = vadd.f32 %v9347_v63, %v7389_v23 }
 0x1d1   :  { %v5471_v6 = vsel %vm5206_vm2, %v4819_v0, 0.0  ;;  %v3160_v3 = vadd.f32 %v9347_v63, %v3159_v31  ;;  %v9725_v21 = vpop.f32.mrf.mxu1  ;;  %v6002_v17 = vadd.f32 %v6001_v45, %v6000_v10  ;;  %v5475_v23 = vsel %vm5206_vm2, %v4821_v60, 0.0 }
 0x1d2   :  { %v5472_v40 = vadd.f32 %v5471_v6, %v5470_v27  ;;  %v7390_v33 = vpop.f32.mrf.mxu0  ;;  %v6005_v27 = vsel %vm5206_vm2, %v5066_v58, 0.0  ;;  %v5067_v31 = vmax.f32 %v4139_v9, 0.0  ;;  %v5069_v6 = vmax.f32 %v4147_v47, 0.0  ;;  %7744 = vmatmul.mubr.msk.bf16.gmra.mxu1 %vm1840_vm1, %v8034_v49 }
 0x1d3   :  { %v4822_v29 = vmax.f32 %v3160_v3, 0.0  ;;  %v3171_v0 = vadd.f32 %v9347_v63, %v7390_v33  ;;  %v9740_v52 = vpop.f32.mrf.mxu1  ;;  %v6004_v32 = vadd.f32 %v6003_v39, %v6002_v17  ;;  %v6009_v10 = vsel %vm5206_vm2, %v5068_v43, 0.0  ;;  %7747 = vmatprep.mubr.msk.bf16.mxu1 %vm1840_vm1, %v8037_v8 }
 0x1d4   :  { %v5474_v51 = vadd.f32 %v5473_v13, %v5472_v40  ;;  %v3162_v30 = vpop.f32.mrf.mxu0  ;;  %v6007_v40 = vsel %vm5206_vm2, %v5067_v31, 0.0  ;;  %v4824_v58 = vmax.f32 %v3168_v16, 0.0  ;;  %v4160_v43 = vadd.f32 %v9347_v63, %v9614_v36  ;;  %v8012_v36 = vld [vmem:[%s10942_s0 + $0x3a8] sm:$0xff]  }
 0x1d5   :  { %v3163_v55 = vadd.f32 %v9347_v63, %v3162_v30  ;;  %v9747_v33 = vpop.f32.mrf.mxu1  ;;  %v5483_v9 = vsel %vm5206_vm2, %v4822_v29, 0.0  ;;  %v6006_v39 = vadd.f32 %v6005_v27, %v6004_v32  ;;  %v4825_v13 = vmax.f32 %v3171_v0, 0.0 }
 0x1d6   :  { %v5476_v45 = vadd.f32 %v5475_v23, %v5474_v51  ;;  %v7393_v3 = vpop.f32.mrf.mxu0  ;;  %7488 = vmatmul.mubr.msk.bf16.gmra.mxu0 %vm1840_vm1, %v8008_v42  ;;  %v4152_v17 = vadd.f32 %v9347_v63, %v9627_v2  ;;  %v6011_v29 = vsel %vm5206_vm2, %v5069_v6, 0.0  ;;  %v8038_v23 = vld [vmem:[%s10942_s0 + $0x7a8] sm:$0xff]   ;;  %v8015_v6 = vld [vmem:[%s10942_s0 + $0x3b0] sm:$0xff]  }
 0x1d7   :  { %v4823_v60 = vmax.f32 %v3163_v55, 0.0  ;;  %7491 = vmatprep.mubr.msk.bf16.mxu0 %vm1840_vm1, %v8011_v12  ;;  %v9757_v51 = vpop.f32.mrf.mxu1  ;;  %v6008_v12 = vadd.f32 %v6007_v40, %v6006_v39  ;;  %v3184_v0 = vadd.f32 %v9347_v63, %v7393_v3  ;;  %v5486_v55 = vsel %vm5206_vm2, %v4824_v58, 0.0  ;;  %v8039_v40 = vld [vmem:[%s10942_s0 + $0x7b0] sm:$0xff]  }
 0x1d8   :  { %v5477_v47 = vrot.slane %v5476_v45, 4  ;;  %v3175_v42 = vpop.f32.mrf.mxu0  ;;  %v5070_v31 = vmax.f32 %v4152_v17, 0.0  ;;  %v4163_v3 = vadd.f32 %v9347_v63, %v9637_v22  ;;  %v5488_v17 = vsel %vm5206_vm2, %v4825_v13, 0.0 }
 0x1d9   :  { %v5484_v49 = vsel %vm5206_vm2, %v4823_v60, 0.0  ;;  %v3176_v16 = vadd.f32 %v9347_v63, %v3175_v42  ;;  %v9766_v2 = vpop.f32.mrf.mxu1 }
 0x1da   :  { %v5478_v30 = vadd.f32 %v5477_v47, %v5476_v45  ;;  %v5485_v8 = vadd.f32 %v5484_v49, %v5483_v9  ;;  %v7394_v27 = vpop.f32.mrf.mxu0  ;;  %v6010_v45 = vadd.f32 %v6009_v10, %v6008_v12  ;;  %v5072_v47 = vmax.f32 %v4160_v43, 0.0  ;;  %7748 = vmatmul.mubr.msk.bf16.gmra.mxu1 %vm1840_vm1, %v8038_v23 }
 0x1db   :  { %v4826_v32 = vmax.f32 %v3176_v16, 0.0  ;;  %v6013_v42 = vsel %vm5206_vm2, %v5070_v31, 0.0  ;;  %v9781_v58 = vpop.f32.mrf.mxu1  ;;  %v3187_v49 = vadd.f32 %v9347_v63, %v7394_v27  ;;  %v4828_v12 = vmax.f32 %v3184_v0, 0.0  ;;  %7751 = vmatprep.mubr.msk.bf16.mxu1 %vm1840_vm1, %v8039_v40 }
 0x1dc   :  { %v5479_v9 = vrot.slane %v5478_v30, 2  ;;  %v5487_v60 = vadd.f32 %v5486_v55, %v5485_v8  ;;  %v3178_v39 = vpop.f32.mrf.mxu0  ;;  %v6012_v16 = vadd.f32 %v6011_v29, %v6010_v45  ;;  %v4155_v43 = vadd.f32 %v9347_v63, %v9652_v15 }
 0x1dd   :  { %v3179_v10 = vadd.f32 %v9347_v63, %v3178_v39  ;;  %v9789_v8 = vpop.f32.mrf.mxu1  ;;  %v5490_v13 = vsel %vm5206_vm2, %v4826_v32, 0.0  ;;  %v6017_v55 = vsel %vm5206_vm2, %v5072_v47, 0.0 }
 0x1de   :  { %v5480_v22 = vadd.f32 %v5479_v9, %v5478_v30  ;;  %v5489_v37 = vadd.f32 %v5488_v17, %v5487_v60  ;;  %v7397_v28 = vpop.f32.mrf.mxu0  ;;  %7492 = vmatmul.mubr.msk.bf16.gmra.mxu0 %vm1840_vm1, %v8012_v36  ;;  %v6014_v29 = vadd.f32 %v6013_v42, %v6012_v16  ;;  %v5073_v30 = vmax.f32 %v4163_v3, 0.0  ;;  %v8040_v17 = vld [vmem:[%s10942_s0 + $0x7b8] sm:$0xff]  }
 0x1df   :  { %v4827_v27 = vmax.f32 %v3179_v10, 0.0  ;;  %7495 = vmatprep.mubr.msk.bf16.mxu0 %vm1840_vm1, %v8015_v6  ;;  %v5071_v15 = vmax.f32 %v4155_v43, 0.0  ;;  %v9796_v45 = vpop.f32.mrf.mxu1  ;;  %v4829_v9 = vmax.f32 %v3187_v49, 0.0  ;;  %v4168_v6 = vadd.f32 %v9347_v63, %v9670_v41  ;;  %v8019_v10 = vld [vmem:[%s10942_s0 + $0x3c0] sm:$0xff]  }
 0x1e0   :  { %v5481_v0 = vrot.slane %v5480_v22, 1  ;;  %v5491_v31 = vadd.f32 %v5490_v13, %v5489_v37  ;;  %v3191_v36 = vpop.f32.mrf.mxu0  ;;  %v5494_v3 = vsel %vm5206_vm2, %v4828_v12, 0.0  ;;  %v8016_v37 = vld [vmem:[%s10942_s0 + $0x3b8] sm:$0xff]   ;;  %v3200_v49 = vadd.f32 %v9347_v63, %v7397_v28  ;;  %v8041_v12 = vld [vmem:[%s10942_s0 + $0x7c0] sm:$0xff]  }
 0x1e1   :  { %v5492_v23 = vsel %vm5206_vm2, %v4827_v27, 0.0  ;;  %v3192_v32 = vadd.f32 %v9347_v63, %v3191_v36  ;;  %v6015_v47 = vsel %vm5206_vm2, %v5071_v15, 0.0  ;;  %v9807_v42 = vpop.f32.mrf.mxu1  ;;  %v6019_v16 = vsel %vm5206_vm2, %v5073_v30, 0.0 }
 0x1e2   :  { %v5482_v60 = vadd.f32 %v5481_v0, %v5480_v22  ;;  %v5493_v40 = vadd.f32 %v5492_v23, %v5491_v31  ;;  %v7398_v39 = vpop.f32.mrf.mxu0  ;;  %v6016_v22 = vadd.f32 %v6015_v47, %v6014_v29  ;;  %v9823_v0 = vld [vmem:[%s10944_s2] ss:$0 sm:$0xff]  ;;  %v5074_v63 = vmax.f32 %v4168_v6, 0.0  ;;  %7752 = vmatmul.mubr.msk.bf16.gmra.mxu1 %vm1840_vm1, %v8040_v17 }
 0x1e3   :  { %v4830_v41 = vmax.f32 %v3192_v32, 0.0  ;;  %v4176_v28 = vadd.f32 %v9823_v0, %v9661_v54  ;;  %v9827_v31 = vpop.f32.mrf.mxu1  ;;  %v5496_v29 = vsel %vm5206_vm2, %v4829_v9, 0.0  ;;  %v3203_v30 = vadd.f32 %v9823_v0, %v7398_v39  ;;  %7755 = vmatprep.mubr.msk.bf16.mxu1 %vm1840_vm1, %v8041_v12 }
 0x1e4   :  { %v6315_v43 = vmul.f32 0.00390625, %v5482_v60  ;;  %v5495_v13 = vadd.f32 %v5494_v3, %v5493_v40  ;;  %v3194_v27 = vpop.f32.mrf.mxu0  ;;  %v6018_v15 = vadd.f32 %v6017_v55, %v6016_v22  ;;  %v6021_v3 = vsel %vm5206_vm2, %v5074_v63, 0.0 }
 0x1e5   :  { %v3195_v36 = vadd.f32 %v9823_v0, %v3194_v27  ;;  %v4179_v54 = vadd.f32 %v9823_v0, %v9680_v59  ;;  %v9836_v6 = vpop.f32.mrf.mxu1  ;;  %v4832_v9 = vmax.f32 %v3200_v49, 0.0  ;;  %v5498_v40 = vsel %vm5206_vm2, %v4830_v41, 0.0 }
 0x1e6   :  { %v6331_v23 = vpack.c.bf16 %v6315_v43, %v6315_v43  ;;  %v5497_v32 = vadd.f32 %v5496_v29, %v5495_v13  ;;  %v7401_v60 = vpop.f32.mrf.mxu0  ;;  %7496 = vmatmul.mubr.msk.bf16.gmra.mxu0 %vm1840_vm1, %v8016_v37  ;;  %v6020_v55 = vadd.f32 %v6019_v16, %v6018_v15  ;;  %v5076_v43 = vmax.f32 %v4176_v28, 0.0  ;;  %v8020_v28 = vld [vmem:[%s10942_s0 + $0x3c8] sm:$0xff]  }
 0x1e7   :  { %v4831_v39 = vmax.f32 %v3195_v36, 0.0  ;;  %7499 = vmatprep.mubr.msk.bf16.mxu0 %vm1840_vm1, %v8019_v10  ;;  %v4171_v59 = vadd.f32 %v9823_v0, %v9696_v48  ;;  %v9844_v13 = vpop.f32.mrf.mxu1  ;;  %v4833_v27 = vmax.f32 %v3203_v30, 0.0  ;;  %v5077_v63 = vmax.f32 %v4179_v54, 0.0  ;;  %v8042_v30 = vld [vmem:[%s10942_s0 + $0x7c8] sm:$0xff]  }
 0x1e8   :  { %v6374_v47 = vunpack.c.l.b16 %v6331_v23  ;;  %v5499_v37 = vadd.f32 %v5498_v40, %v5497_v32  ;;  %v3207_v22 = vpop.f32.mrf.mxu0  ;;  %v6022_v41 = vadd.f32 %v6021_v3, %v6020_v55  ;;  %v5502_v36 = vsel %vm5206_vm2, %v4832_v9, 0.0  ;;  %v8023_v23 = vld [vmem:[%s10942_s0 + $0x3d0] sm:$0xff]  }
 0x1e9   :  { %v5500_v17 = vsel %vm5206_vm2, %v4831_v39, 0.0  ;;  %v3208_v49 = vadd.f32 %v9823_v0, %v3207_v22  ;;  %v5075_v48 = vmax.f32 %v4171_v59, 0.0  ;;  %v9855_v29 = vpop.f32.mrf.mxu1  ;;  %v3216_v15 = vadd.f32 %v9823_v0, %v7401_v60  ;;  %v8043_v32 = vld [vmem:[%s10942_s0 + $0x7d0] sm:$0xff]  }
 0x1ea   :  { %v9850_v10 = vsel %vm6391_vm5, %v6374_v47, %v9498_v4  ;;  %v5501_v16 = vadd.f32 %v5500_v17, %v5499_v37  ;;  %v7402_v12 = vpop.f32.mrf.mxu0  ;;  %v6025_v39 = vsel %vm5206_vm2, %v5076_v43, 0.0  ;;  %v5504_v60 = vsel %vm5206_vm2, %v4833_v27, 0.0  ;;  %7756 = vmatmul.mubr.msk.bf16.gmra.mxu1 %vm1840_vm1, %v8042_v30 }
 0x1eb   :  { %v4834_v4 = vmax.f32 %v3208_v49, 0.0  ;;  %v3219_v54 = vadd.f32 %v9823_v0, %v7402_v12  ;;  %v6023_v55 = vsel %vm5206_vm2, %v5075_v48, 0.0  ;;  %v9871_v9 = vpop.f32.mrf.mxu1  ;;  %v4184_v22 = vadd.f32 %v9823_v0, %v9714_v24  ;;  %7759 = vmatprep.mubr.msk.bf16.mxu1 %vm1840_vm1, %v8043_v32  ;;  %v8024_v32 = vld [vmem:[%s10942_s0 + $0x3d8] sm:$0xff]  }
 0x1ec   :  { %v5503_v3 = vadd.f32 %v5502_v36, %v5501_v16  ;;  %v3210_v40 = vpop.f32.mrf.mxu0  ;;  %v6024_v37 = vadd.f32 %v6023_v55, %v6022_v41  ;;  %v6027_v49 = vsel %vm5206_vm2, %v5077_v63, 0.0  ;;  %v4192_v43 = vadd.f32 %v9823_v0, %v9704_v38 }
 0x1ed   :  { %v3211_v47 = vadd.f32 %v9823_v0, %v3210_v40  ;;  %v9881_v16 = vpop.f32.mrf.mxu1  ;;  %v4836_v27 = vmax.f32 %v3216_v15, 0.0  ;;  %v5506_v12 = vsel %vm5206_vm2, %v4834_v4, 0.0  ;;  %v4195_v63 = vadd.f32 %v9823_v0, %v9725_v21 }
 0x1ee   :  { %v5505_v59 = vadd.f32 %v5504_v60, %v5503_v3  ;;  %v7405_v17 = vpop.f32.mrf.mxu0  ;;  %7500 = vmatmul.mubr.msk.bf16.gmra.mxu0 %vm1840_vm1, %v8020_v28  ;;  %v6026_v24 = vadd.f32 %v6025_v39, %v6024_v37  ;;  %v4837_v28 = vmax.f32 %v3219_v54, 0.0  ;;  %v5078_v4 = vmax.f32 %v4184_v22, 0.0  ;;  %v8044_v60 = vld [vmem:[%s10942_s0 + $0x7d8] sm:$0xff]   ;;  %v8027_v22 = vld [vmem:[%s10942_s0 + $0x3e0] sm:$0xff]  }
 0x1ef   :  { %v4835_v41 = vmax.f32 %v3211_v47, 0.0  ;;  %7503 = vmatprep.mubr.msk.bf16.mxu0 %vm1840_vm1, %v8023_v23  ;;  %v9889_v38 = vpop.f32.mrf.mxu1  ;;  %v3232_v23 = vadd.f32 %v9823_v0, %v7405_v17  ;;  %v5080_v54 = vmax.f32 %v4192_v43, 0.0  ;;  %v4187_v21 = vadd.f32 %v9823_v0, %v9740_v52 }
 0x1f0   :  { %v5507_v48 = vadd.f32 %v5506_v12, %v5505_v59  ;;  %v3223_v36 = vpop.f32.mrf.mxu0  ;;  %v9893_v15 = vadd.f32 %v6027_v49, %v6026_v24  ;;  %v5510_v47 = vsel %vm5206_vm2, %v4836_v27, 0.0  ;;  %v8045_v59 = vld [vmem:[%s10942_s0 + $0x7e0] sm:$0xff]   ;;  %v5081_v52 = vmax.f32 %v4195_v63, 0.0 }
 0x1f1   :  { %v5508_v3 = vsel %vm5206_vm2, %v4835_v41, 0.0  ;;  %v3224_v30 = vadd.f32 %v9823_v0, %v3223_v36  ;;  %v9901_v55 = vpop.f32.mrf.mxu1  ;;  %v5079_v43 = vmax.f32 %v4187_v21, 0.0  ;;  %v4200_v12 = vadd.f32 %v9823_v0, %v9757_v51 }
 0x1f2   :  { %10975 = vst [vmem:[#allocation24_spill] sm:$0xff] %v9893_v15  ;;  %v5509_v40 = vadd.f32 %v5508_v3, %v5507_v48  ;;  %v7406_v39 = vpop.f32.mrf.mxu0  ;;  %v5512_v27 = vsel %vm5206_vm2, %v4837_v28, 0.0  ;;  %v6035_v36 = vsel %vm5206_vm2, %v5078_v4, 0.0  ;;  %v4840_v3 = vmax.f32 %v3232_v23, 0.0  ;;  %7760 = vmatmul.mubr.msk.bf16.gmra.mxu1 %vm1840_vm1, %v8044_v60 }
 0x1f3   :  { %v4838_v37 = vmax.f32 %v3224_v30, 0.0  ;;  %v9915_v41 = vpop.f32.mrf.mxu1  ;;  %v3235_v24 = vadd.f32 %v9823_v0, %v7406_v39  ;;  %v6038_v63 = vsel %vm5206_vm2, %v5080_v54, 0.0  ;;  %v4208_v4 = vadd.f32 %v9823_v0, %v9747_v33  ;;  %7763 = vmatprep.mubr.msk.bf16.mxu1 %vm1840_vm1, %v8045_v59  ;;  %v8028_v59 = vld [vmem:[%s10942_s0 + $0x3e8] sm:$0xff]  }
 0x1f4   :  { %v5511_v17 = vadd.f32 %v5510_v47, %v5509_v40  ;;  %v3226_v49 = vpop.f32.mrf.mxu0  ;;  %v6036_v40 = vsel %vm5206_vm2, %v5079_v43, 0.0  ;;  %v5082_v23 = vmax.f32 %v4200_v12, 0.0  ;;  %v4211_v47 = vadd.f32 %v9823_v0, %v9766_v2 }
 0x1f5   :  { %v3227_v48 = vadd.f32 %v9823_v0, %v3226_v49  ;;  %v9924_v51 = vpop.f32.mrf.mxu1  ;;  %v5514_v28 = vsel %vm5206_vm2, %v4838_v37, 0.0  ;;  %v6037_v54 = vadd.f32 %v6036_v40, %v6035_v36  ;;  %v4841_v60 = vmax.f32 %v3235_v24, 0.0  ;;  %v8046_v24 = vld [vmem:[%s10942_s0 + $0x7e8] sm:$0xff]  }
 0x1f6   :  { %v5513_v30 = vadd.f32 %v5512_v27, %v5511_v17  ;;  %v7409_v15 = vpop.f32.mrf.mxu0  ;;  %7504 = vmatmul.mubr.msk.bf16.gmra.mxu0 %vm1840_vm1, %v8024_v32  ;;  %v5518_v33 = vsel %vm5206_vm2, %v4840_v3, 0.0  ;;  %v4203_v2 = vadd.f32 %v9823_v0, %v9781_v58  ;;  %v8031_v3 = vld [vmem:[%s10942_s0 + $0x3f0] sm:$0xff]   ;;  %v6042_v40 = vsel %vm5206_vm2, %v5082_v23, 0.0 }
 0x1f7   :  { %v4839_v39 = vmax.f32 %v3227_v48, 0.0  ;;  %7507 = vmatprep.mubr.msk.bf16.mxu0 %vm1840_vm1, %v8027_v22  ;;  %v9934_v17 = vpop.f32.mrf.mxu1  ;;  %v6040_v22 = vsel %vm5206_vm2, %v5081_v52, 0.0  ;;  %v6039_v27 = vadd.f32 %v6038_v63, %v6037_v54  ;;  %v3248_v52 = vadd.f32 %v9823_v0, %v7409_v15  ;;  %v8048_v58 = vld [vmem:[%s10942_s0 + $0x7f0] sm:$0xff]  }
 0x1f8   :  { %v5515_v32 = vadd.f32 %v5514_v28, %v5513_v30  ;;  %v3239_v21 = vpop.f32.mrf.mxu0  ;;  %v5084_v30 = vmax.f32 %v4208_v4, 0.0  ;;  %v5520_v15 = vsel %vm5206_vm2, %v4841_v60, 0.0 }
 0x1f9   :  { %v5516_v37 = vsel %vm5206_vm2, %v4839_v39, 0.0  ;;  %v3240_v49 = vadd.f32 %v9823_v0, %v3239_v21  ;;  %v9945_v48 = vpop.f32.mrf.mxu1  ;;  %v6041_v39 = vadd.f32 %v6040_v22, %v6039_v27  ;;  %v5083_v21 = vmax.f32 %v4203_v2, 0.0 }
 0x1fa   :  { %v5517_v43 = vadd.f32 %v5516_v37, %v5515_v32  ;;  %v7410_v12 = vpop.f32.mrf.mxu0  ;;  %v5085_v32 = vmax.f32 %v4211_v47, 0.0  ;;  %v4224_v22 = vadd.f32 %v9823_v0, %v9789_v8  ;;  %7764 = vmatmul.mubr.msk.bf16.gmra.mxu1 %vm1840_vm1, %v8046_v24  ;;  %v4216_v8 = vadd.f32 %v9823_v0, %v9796_v45  ;;  %v8049_v45 = vld [vmem:[%s10942_s0 + $0x7f8] sm:$0xff]  }
 0x1fb   :  { %v4842_v36 = vmax.f32 %v3240_v49, 0.0  ;;  %v9958_v54 = vpop.f32.mrf.mxu1  ;;  %v3251_v37 = vadd.f32 %v9823_v0, %v7410_v12  ;;  %v6043_v23 = vadd.f32 %v6042_v40, %v6041_v39  ;;  %v6044_v19 = vsel %vm5206_vm2, %v5083_v21, 0.0  ;;  %7767 = vmatprep.mubr.msk.bf16.mxu1 %vm1840_vm1, %v8048_v58  ;;  %v8032_v58 = vld [vmem:[%s10942_s0 + $0x3f8] sm:$0xff]  }
 0x1fc   :  { %v5519_v63 = vadd.f32 %v5518_v33, %v5517_v43  ;;  %v3242_v28 = vpop.f32.mrf.mxu0  ;;  %v4844_v33 = vmax.f32 %v3248_v52, 0.0  ;;  %v6046_v12 = vsel %vm5206_vm2, %v5084_v30, 0.0  ;;  %v6048_v2 = vsel %vm5206_vm2, %v5085_v32, 0.0 }
 0x1fd   :  { %v3243_v49 = vadd.f32 %v9823_v0, %v3242_v28  ;;  %v9967_v47 = vpop.f32.mrf.mxu1  ;;  %v5522_v60 = vsel %vm5206_vm2, %v4842_v36, 0.0  ;;  %v6045_v40 = vadd.f32 %v6044_v19, %v6043_v23  ;;  %v4845_v24 = vmax.f32 %v3251_v37, 0.0 }
 0x1fe   :  { %v5521_v4 = vadd.f32 %v5520_v15, %v5519_v63  ;;  %v7413_v7 = vpop.f32.mrf.mxu0  ;;  %7508 = vmatmul.mubr.msk.bf16.gmra.mxu0 %vm1840_vm1, %v8028_v59  ;;  %v5088_v19 = vmax.f32 %v4224_v22, 0.0  ;;  %v5086_v32 = vmax.f32 %v4216_v8, 0.0  ;;  %v5526_v15 = vsel %vm5206_vm2, %v4844_v33, 0.0 }
 0x1ff   :  { %v4843_v43 = vmax.f32 %v3243_v49, 0.0  ;;  %7511 = vmatprep.mubr.msk.bf16.mxu0 %vm1840_vm1, %v8031_v3  ;;  %v9977_v63 = vpop.f32.mrf.mxu1  ;;  %v3264_v36 = vadd.f32 %v9823_v0, %v7413_v7  ;;  %v6047_v39 = vadd.f32 %v6046_v12, %v6045_v40  ;;  %v8035_v49 = vld [vmem:[%s10942_s0 + $0x400] sm:$0xff]   ;;  %v4219_v40 = vadd.f32 %v9823_v0, %v9827_v31 }
 0x200   :  { %v5523_v59 = vadd.f32 %v5522_v60, %v5521_v4  ;;  %v3255_v27 = vpop.f32.mrf.mxu0  ;;  %v6050_v22 = vsel %vm5206_vm2, %v5086_v32, 0.0 }
 0x201   :  { %v5524_v52 = vsel %vm5206_vm2, %v4843_v43, 0.0  ;;  %v3256_v3 = vadd.f32 %v9823_v0, %v3255_v27  ;;  %v9985_v21 = vpop.f32.mrf.mxu1  ;;  %v6049_v60 = vadd.f32 %v6048_v2, %v6047_v39  ;;  %v4227_v43 = vadd.f32 %v9823_v0, %v9807_v42 }
 0x202   :  { %v5525_v30 = vadd.f32 %v5524_v52, %v5523_v59  ;;  %v7414_v28 = vpop.f32.mrf.mxu0  ;;  %v5528_v59 = vsel %vm5206_vm2, %v4845_v24, 0.0  ;;  %v4848_v33 = vmax.f32 %v3264_v36, 0.0  ;;  %v6054_v2 = vsel %vm5206_vm2, %v5088_v19, 0.0  ;;  %7768 = vmatmul.mubr.msk.bf16.gmra.mxu1 %vm1840_vm1, %v8049_v45 }
 0x203   :  { %v4846_v7 = vmax.f32 %v3256_v3, 0.0  ;;  %v3267_v37 = vadd.f32 %v9823_v0, %v7414_v28  ;;  %v9998_v12 = vpop.f32.mrf.mxu1  ;;  %v6051_v3 = vadd.f32 %v6050_v22, %v6049_v60  ;;  %v4240_v42 = vadd.f32 %v9823_v0, %v9836_v6 }
 0x204   :  { %v5527_v4 = vadd.f32 %v5526_v15, %v5525_v30  ;;  %v3258_v23 = vpop.f32.mrf.mxu0  ;;  %v5089_v31 = vmax.f32 %v4227_v43, 0.0  ;;  %v5087_v28 = vmax.f32 %v4219_v40, 0.0  ;;  %v4232_v15 = vadd.f32 %v9823_v0, %v9844_v13 }
 0x205   :  { %v3259_v27 = vadd.f32 %v9823_v0, %v3258_v23  ;;  %v10008_v30 = vpop.f32.mrf.mxu1  ;;  %v5530_v24 = vsel %vm5206_vm2, %v4846_v7, 0.0  ;;  %v4849_v32 = vmax.f32 %v3267_v37, 0.0  ;;  %v5092_v23 = vmax.f32 %v4240_v42, 0.0  ;;  %v8036_v37 = vld [vmem:[%s10942_s0 + $0x408] sm:$0xff]  }
 0x206   :  { %v5529_v8 = vadd.f32 %v5528_v59, %v5527_v4  ;;  %v7417_v52 = vpop.f32.mrf.mxu0  ;;  %7512 = vmatmul.mubr.msk.bf16.gmra.mxu0 %vm1840_vm1, %v8032_v58  ;;  %v6052_v7 = vsel %vm5206_vm2, %v5087_v28, 0.0  ;;  %v5090_v59 = vmax.f32 %v4232_v15, 0.0  ;;  %v4235_v28 = vadd.f32 %v9823_v0, %v9871_v9 }
 0x207   :  { %v4847_v36 = vmax.f32 %v3259_v27, 0.0  ;;  %7515 = vmatprep.mubr.msk.bf16.mxu0 %vm1840_vm1, %v8035_v49  ;;  %v3280_v58 = vadd.f32 %v9823_v0, %v7417_v52  ;;  %v10016_v6 = vpop.f32.mrf.mxu1  ;;  %v5534_v49 = vsel %vm5206_vm2, %v4848_v33, 0.0  ;;  %v6053_v43 = vadd.f32 %v6052_v7, %v6051_v3 }
 0x208   :  { %v5531_v39 = vadd.f32 %v5530_v24, %v5529_v8  ;;  %v3271_v19 = vpop.f32.mrf.mxu0  ;;  %v6056_v8 = vsel %vm5206_vm2, %v5089_v31, 0.0  ;;  %v4243_v52 = vadd.f32 %v9823_v0, %v9855_v29  ;;  %v5536_v33 = vsel %vm5206_vm2, %v4849_v32, 0.0 }
 0x209   :  { %v5532_v4 = vsel %vm5206_vm2, %v4847_v36, 0.0  ;;  %v3272_v45 = vadd.f32 %v9823_v0, %v3271_v19  ;;  %v10025_v13 = vpop.f32.mrf.mxu1  ;;  %v6055_v36 = vadd.f32 %v6054_v2, %v6053_v43  ;;  %v6062_v15 = vsel %vm5206_vm2, %v5092_v23, 0.0 }
 0x20a   :  { %v5533_v60 = vadd.f32 %v5532_v4, %v5531_v39  ;;  %v7418_v22 = vpop.f32.mrf.mxu0  ;;  %v4852_v39 = vmax.f32 %v3280_v58, 0.0  ;;  %v6058_v31 = vsel %vm5206_vm2, %v5090_v59, 0.0  ;;  %v5091_v32 = vmax.f32 %v4235_v28, 0.0 }
 0x20b   :  { %v4850_v27 = vmax.f32 %v3272_v45, 0.0  ;;  %v3283_v40 = vadd.f32 %v9823_v0, %v7418_v22  ;;  %v10034_v3 = vpop.f32.mrf.mxu1  ;;  %v6057_v29 = vadd.f32 %v6056_v8, %v6055_v36  ;;  %v4256_v2 = vadd.f32 %v9823_v0, %v9881_v16 }
 0x20c   :  { %v5535_v42 = vadd.f32 %v5534_v49, %v5533_v60  ;;  %v3274_v24 = vpop.f32.mrf.mxu0  ;;  %v5093_v60 = vmax.f32 %v4243_v52, 0.0  ;;  %v4259_v28 = vadd.f32 %v9823_v0, %v9901_v55 }
 0x20d   :  { %v3275_v19 = vadd.f32 %v9823_v0, %v3274_v24  ;;  %v10042_v7 = vpop.f32.mrf.mxu1  ;;  %v5538_v9 = vsel %vm5206_vm2, %v4850_v27, 0.0  ;;  %v4853_v58 = vmax.f32 %v3283_v40, 0.0  ;;  %v6059_v59 = vadd.f32 %v6058_v31, %v6057_v29 }
 0x20e   :  { %v5537_v4 = vadd.f32 %v5536_v33, %v5535_v42  ;;  %v7421_v45 = vpop.f32.mrf.mxu0  ;;  %7516 = vmatmul.mubr.msk.bf16.gmra.mxu0 %vm1840_vm1, %v8036_v37  ;;  %v6060_v33 = vsel %vm5206_vm2, %v5091_v32, 0.0  ;;  %v5096_v42 = vmax.f32 %v4256_v2, 0.0  ;;  %v4248_v27 = vadd.f32 %v9823_v0, %v9889_v38 }
 0x20f   :  { %v4851_v49 = vmax.f32 %v3275_v19, 0.0  ;;  %v3296_v23 = vadd.f32 %v9823_v0, %v7421_v45  ;;  %v10047_v37 = vpop.f32.mrf.mxu1  ;;  %v5542_v40 = vsel %vm5206_vm2, %v4852_v39, 0.0  ;;  %v6061_v36 = vadd.f32 %v6060_v33, %v6059_v59 }
 0x210   :  { %v5539_v22 = vadd.f32 %v5538_v9, %v5537_v4  ;;  %v3287_v43 = vpop.f32.mrf.mxu0  ;;  %v5544_v31 = vsel %vm5206_vm2, %v4853_v58, 0.0  ;;  %v6064_v45 = vsel %vm5206_vm2, %v5093_v60, 0.0  ;;  %v5094_v29 = vmax.f32 %v4248_v27, 0.0 }
 0x211   :  { %v5540_v8 = vsel %vm5206_vm2, %v4851_v49, 0.0  ;;  %v3288_v16 = vadd.f32 %v9823_v0, %v3287_v43  ;;  %v10056_v19 = vpop.f32.mrf.mxu1  ;;  %v4856_v2 = vmax.f32 %v3296_v23, 0.0  ;;  %v6063_v9 = vadd.f32 %v6062_v15, %v6061_v36 }
 0x212   :  { %v5541_v52 = vadd.f32 %v5540_v8, %v5539_v22  ;;  %v7422_v24 = vpop.f32.mrf.mxu0  ;;  %v4251_v39 = vadd.f32 %v9823_v0, %v9915_v41  ;;  %v6070_v43 = vsel %vm5206_vm2, %v5096_v42, 0.0  ;;  %v6066_v58 = vsel %vm5206_vm2, %v5094_v29, 0.0 }
 0x213   :  { %v3299_v4 = vadd.f32 %v9823_v0, %v7422_v24  ;;  %v10063_v49 = vpop.f32.mrf.mxu1  ;;  %v4854_v22 = vmax.f32 %v3288_v16, 0.0  ;;  %v6065_v60 = vadd.f32 %v6064_v45, %v6063_v9  ;;  %v5097_v8 = vmax.f32 %v4259_v28, 0.0 }
 0x214   :  { %v5543_v32 = vadd.f32 %v5542_v40, %v5541_v52  ;;  %v3290_v38 = vpop.f32.mrf.mxu0  ;;  %v5095_v27 = vmax.f32 %v4251_v39, 0.0  ;;  %v4272_v16 = vadd.f32 %v9823_v0, %v9924_v51  ;;  %v5555_v28 = vsel %vm5206_vm2, %v4856_v2, 0.0 }
 0x215   :  { %v3291_v55 = vadd.f32 %v9823_v0, %v3290_v38  ;;  %v10068_v23 = vpop.f32.mrf.mxu1  ;;  %v4857_v15 = vmax.f32 %v3299_v4, 0.0  ;;  %v6067_v36 = vadd.f32 %v6066_v58, %v6065_v60  ;;  %v5552_v4 = vsel %vm5206_vm2, %v4854_v22, 0.0 }
 0x216   :  { %v5545_v59 = vadd.f32 %v5544_v31, %v5543_v32  ;;  %v7425_v33 = vpop.f32.mrf.mxu0  ;;  %v6068_v42 = vsel %vm5206_vm2, %v5095_v27, 0.0  ;;  %v4264_v31 = vadd.f32 %v9823_v0, %v9934_v17  ;;  %v6072_v60 = vsel %vm5206_vm2, %v5097_v8, 0.0 }
 0x217   :  { %v4855_v40 = vmax.f32 %v3291_v55, 0.0  ;;  %v3312_v41 = vadd.f32 %v9823_v0, %v7425_v33  ;;  %v10076_v45 = vpop.f32.mrf.mxu1  ;;  %v6069_v39 = vadd.f32 %v6068_v42, %v6067_v36  ;;  %v5557_v33 = vsel %vm5206_vm2, %v4857_v15, 0.0 }
 0x218   :  { %v5546_v52 = vrot.slane %v5545_v59, 4  ;;  %v3303_v24 = vpop.f32.mrf.mxu0  ;;  %v5098_v55 = vmax.f32 %v4264_v31, 0.0  ;;  %v5100_v27 = vmax.f32 %v4272_v16, 0.0  ;;  %v4275_v15 = vadd.f32 %v9823_v0, %v9945_v48 }
 0x219   :  { %v5553_v29 = vsel %vm5206_vm2, %v4855_v40, 0.0  ;;  %v3304_v32 = vadd.f32 %v9823_v0, %v3303_v24  ;;  %v10082_v58 = vpop.f32.mrf.mxu1  ;;  %v4860_v22 = vmax.f32 %v3312_v41, 0.0  ;;  %v6071_v40 = vadd.f32 %v6070_v43, %v6069_v39 }
 0x21a   :  { %v5547_v38 = vadd.f32 %v5546_v52, %v5545_v59  ;;  %v5554_v51 = vadd.f32 %v5553_v29, %v5552_v4  ;;  %v7426_v9 = vpop.f32.mrf.mxu0  ;;  %v6074_v24 = vsel %vm5206_vm2, %v5098_v55, 0.0  ;;  %v4267_v41 = vadd.f32 %v9823_v0, %v9958_v54 }
 0x21b   :  { %v4858_v17 = vmax.f32 %v3304_v32, 0.0  ;;  %v10086_v35 = vpop.f32.mrf.mxu1  ;;  %v3315_v59 = vadd.f32 %v9823_v0, %v7426_v9  ;;  %v6073_v16 = vadd.f32 %v6072_v60, %v6071_v40  ;;  %v5101_v4 = vmax.f32 %v4275_v15, 0.0 }
 0x21c   :  { %v5548_v2 = vrot.slane %v5547_v38, 2  ;;  %v5556_v53 = vadd.f32 %v5555_v28, %v5554_v51  ;;  %v3306_v62 = vpop.f32.mrf.mxu0 }
 0x21d   :  { %v3307_v52 = vadd.f32 %v9823_v0, %v3306_v62  ;;  %v10095_v31 = vpop.f32.mrf.mxu1  ;;  %v5559_v43 = vsel %vm5206_vm2, %v4858_v17, 0.0  ;;  %v6078_v62 = vsel %vm5206_vm2, %v5100_v27, 0.0  ;;  %v6075_v48 = vadd.f32 %v6074_v24, %v6073_v16 }
 0x21e   :  { %v5549_v36 = vadd.f32 %v5548_v2, %v5547_v38  ;;  %v5558_v42 = vadd.f32 %v5557_v33, %v5556_v53  ;;  %v7429_v8 = vpop.f32.mrf.mxu0  ;;  %v5099_v38 = vmax.f32 %v4267_v41, 0.0  ;;  %v4861_v9 = vmax.f32 %v3315_v59, 0.0 }
 0x21f   :  { %v4859_v28 = vmax.f32 %v3307_v52, 0.0  ;;  %v10099_v53 = vpop.f32.mrf.mxu1  ;;  %v3328_v54 = vadd.f32 %v9823_v0, %v7429_v8  ;;  %v4288_v2 = vadd.f32 %v9823_v0, %v9967_v47  ;;  %v5563_v52 = vsel %vm5206_vm2, %v4860_v22, 0.0 }
 0x220   :  { %v5550_v29 = vrot.slane %v5549_v36, 1  ;;  %v5560_v32 = vadd.f32 %v5559_v43, %v5558_v42  ;;  %v3319_v51 = vpop.f32.mrf.mxu0  ;;  %v6076_v27 = vsel %vm5206_vm2, %v5099_v38, 0.0  ;;  %v4280_v41 = vadd.f32 %v9823_v0, %v9977_v63 }
 0x221   :  { %v5561_v39 = vsel %vm5206_vm2, %v4859_v28, 0.0  ;;  %v3320_v55 = vadd.f32 %v9823_v0, %v3319_v51  ;;  %v10107_v40 = vpop.f32.mrf.mxu1  ;;  %v6077_v15 = vadd.f32 %v6076_v27, %v6075_v48  ;;  %v5565_v47 = vsel %vm5206_vm2, %v4861_v9, 0.0 }
 0x222   :  { %v5551_v33 = vadd.f32 %v5550_v29, %v5549_v36  ;;  %v5562_v17 = vadd.f32 %v5561_v39, %v5560_v32  ;;  %v7430_v60 = vpop.f32.mrf.mxu0  ;;  %v6080_v36 = vsel %vm5206_vm2, %v5101_v4, 0.0  ;;  %v4864_v28 = vmax.f32 %v3328_v54, 0.0 }
 0x223   :  { %v4862_v24 = vmax.f32 %v3320_v55, 0.0  ;;  %v3331_v59 = vadd.f32 %v9823_v0, %v7430_v60  ;;  %v10114_v43 = vpop.f32.mrf.mxu1  ;;  %v6079_v22 = vadd.f32 %v6078_v62, %v6077_v15  ;;  %v5104_v48 = vmax.f32 %v4288_v2, 0.0 }
 0x224   :  { %v6316_v42 = vmul.f32 0.00390625, %v5551_v33  ;;  %v5564_v8 = vadd.f32 %v5563_v52, %v5562_v17  ;;  %v3322_v16 = vpop.f32.mrf.mxu0  ;;  %v5102_v39 = vmax.f32 %v4280_v41, 0.0  ;;  %v4291_v62 = vadd.f32 %v9823_v0, %v9985_v21 }
 0x225   :  { %v3323_v29 = vadd.f32 %v9823_v0, %v3322_v16  ;;  %v10118_v55 = vpop.f32.mrf.mxu1  ;;  %v5567_v4 = vsel %vm5206_vm2, %v4862_v24, 0.0  ;;  %v4865_v33 = vmax.f32 %v3331_v59, 0.0  ;;  %v6081_v63 = vadd.f32 %v6080_v36, %v6079_v22 }
 0x226   :  { %v6332_v32 = vpack.c.bf16 %v6316_v42, %v6316_v42  ;;  %v5566_v51 = vadd.f32 %v5565_v47, %v5564_v8  ;;  %v7433_v38 = vpop.f32.mrf.mxu0  ;;  %v6082_v9 = vsel %vm5206_vm2, %v5102_v39, 0.0  ;;  %v4283_v36 = vadd.f32 %v9823_v0, %v9998_v12 }
 0x227   :  { %v4863_v17 = vmax.f32 %v3323_v29, 0.0  ;;  %v10124_v54 = vpop.f32.mrf.mxu1  ;;  %v3344_v15 = vadd.f32 %v9823_v0, %v7433_v38  ;;  %v6083_v24 = vadd.f32 %v6082_v9, %v6081_v63  ;;  %v5571_v21 = vsel %vm5206_vm2, %v4864_v28, 0.0 }
 0x228   :  { %v6375_v60 = vunpack.c.l.b16 %v6332_v32  ;;  %v5568_v27 = vadd.f32 %v5567_v4, %v5566_v51  ;;  %v3335_v52 = vpop.f32.mrf.mxu0  ;;  %v5105_v22 = vmax.f32 %v4291_v62, 0.0  ;;  %v5103_v38 = vmax.f32 %v4283_v36, 0.0 }
 0x229   :  { %v5569_v2 = vsel %vm5206_vm2, %v4863_v17, 0.0  ;;  %v3336_v42 = vadd.f32 %v9823_v0, %v3335_v52  ;;  %v10135_v41 = vpop.f32.mrf.mxu1  ;;  %v4296_v39 = vadd.f32 %v9823_v0, %v10016_v6  ;;  %v5573_v12 = vsel %vm5206_vm2, %v4865_v33, 0.0 }
 0x22a   :  { %v10131_v59 = vsel %vm6393_vm6, %v6375_v60, %v9850_v10  ;;  %v5570_v8 = vadd.f32 %v5569_v2, %v5568_v27  ;;  %v7434_v16 = vpop.f32.mrf.mxu0  ;;  %v4304_v10 = vadd.f32 %v9823_v0, %v10008_v30  ;;  %v4868_v17 = vmax.f32 %v3344_v15, 0.0 }
 0x22b   :  { %v4866_v47 = vmax.f32 %v3336_v42, 0.0  ;;  %v3347_v29 = vadd.f32 %v9823_v0, %v7434_v16  ;;  %v10143_v4 = vpop.f32.mrf.mxu1  ;;  %v6086_v63 = vsel %vm5206_vm2, %v5104_v48, 0.0  ;;  %v6084_v52 = vsel %vm5206_vm2, %v5103_v38, 0.0 }
 0x22c   :  { %v5572_v32 = vadd.f32 %v5571_v21, %v5570_v8  ;;  %v3338_v51 = vpop.f32.mrf.mxu0  ;;  %v5106_v9 = vmax.f32 %v4296_v39, 0.0  ;;  %v4307_v30 = vadd.f32 %v9823_v0, %v10025_v13  ;;  %v6085_v33 = vadd.f32 %v6084_v52, %v6083_v24 }
 0x22d   :  { %v3339_v28 = vadd.f32 %v9823_v0, %v3338_v51  ;;  %v10151_v62 = vpop.f32.mrf.mxu1  ;;  %v5575_v6 = vsel %vm5206_vm2, %v4866_v47, 0.0  ;;  %v4869_v2 = vmax.f32 %v3347_v29, 0.0  ;;  %v6088_v16 = vsel %vm5206_vm2, %v5105_v22, 0.0 }
 0x22e   :  { %v5574_v60 = vadd.f32 %v5573_v12, %v5572_v32  ;;  %v7437_v27 = vpop.f32.mrf.mxu0  ;;  %v5108_v48 = vmax.f32 %v4304_v10, 0.0  ;;  %v6087_v51 = vadd.f32 %v6086_v63, %v6085_v33  ;;  %v6090_v47 = vsel %vm5206_vm2, %v5106_v9, 0.0 }
 0x22f   :  { %v4867_v42 = vmax.f32 %v3339_v28, 0.0  ;;  %v10155_v36 = vpop.f32.mrf.mxu1  ;;  %v3360_v32 = vadd.f32 %v9823_v0, %v7437_v27  ;;  %v5109_v29 = vmax.f32 %v4307_v30, 0.0  ;;  %v4299_v24 = vadd.f32 %v9823_v0, %v10034_v3 }
 0x230   :  { %v5576_v15 = vadd.f32 %v5575_v6, %v5574_v60  ;;  %v3351_v8 = vpop.f32.mrf.mxu0  ;;  %v5579_v22 = vsel %vm5206_vm2, %v4868_v17, 0.0  ;;  %v5581_v10 = vsel %vm5206_vm2, %v4869_v2, 0.0  ;;  %v6089_v60 = vadd.f32 %v6088_v16, %v6087_v51 }
 0x231   :  { %v5577_v21 = vsel %vm5206_vm2, %v4867_v42, 0.0  ;;  %v3352_v13 = vadd.f32 %v9823_v0, %v3351_v8  ;;  %v10163_v12 = vpop.f32.mrf.mxu1  ;;  %v5107_v6 = vmax.f32 %v4299_v24, 0.0  ;;  %v4320_v63 = vadd.f32 %v9823_v0, %v10042_v7 }
 0x232   :  { %v5578_v38 = vadd.f32 %v5577_v21, %v5576_v15  ;;  %v7438_v39 = vpop.f32.mrf.mxu0  ;;  %v4312_v9 = vadd.f32 %v9823_v0, %v10047_v37  ;;  %v6094_v17 = vsel %vm5206_vm2, %v5108_v48, 0.0  ;;  %v6091_v2 = vadd.f32 %v6090_v47, %v6089_v60 }
 0x233   :  { %v4870_v28 = vmax.f32 %v3352_v13, 0.0  ;;  %v10171_v30 = vpop.f32.mrf.mxu1  ;;  %v3363_v3 = vadd.f32 %v9823_v0, %v7438_v39  ;;  %v4872_v33 = vmax.f32 %v3360_v32, 0.0  ;;  %v6096_v16 = vsel %vm5206_vm2, %v5109_v29, 0.0 }
 0x234   :  { %v5580_v27 = vadd.f32 %v5579_v22, %v5578_v38  ;;  %v3354_v52 = vpop.f32.mrf.mxu0  ;;  %v6092_v21 = vsel %vm5206_vm2, %v5107_v6, 0.0  ;;  %v5110_v38 = vmax.f32 %v4312_v9, 0.0  ;;  %v5112_v22 = vmax.f32 %v4320_v63, 0.0 }
 0x235   :  { %v3355_v42 = vadd.f32 %v9823_v0, %v3354_v52  ;;  %v10178_v7 = vpop.f32.mrf.mxu1  ;;  %v5583_v37 = vsel %vm5206_vm2, %v4870_v28, 0.0  ;;  %v6093_v51 = vadd.f32 %v6092_v21, %v6091_v2  ;;  %v4323_v48 = vadd.f32 %v9823_v0, %v10056_v19 }
 0x236   :  { %v5582_v15 = vadd.f32 %v5581_v10, %v5580_v27  ;;  %v7441_v8 = vpop.f32.mrf.mxu0  ;;  %v4315_v32 = vadd.f32 %v9823_v0, %v10063_v49  ;;  %v4873_v29 = vmax.f32 %v3363_v3, 0.0  ;;  %v5587_v27 = vsel %vm5206_vm2, %v4872_v33, 0.0 }
 0x237   :  { %v4871_v13 = vmax.f32 %v3355_v42, 0.0  ;;  %v10185_v47 = vpop.f32.mrf.mxu1  ;;  %v6095_v28 = vadd.f32 %v6094_v17, %v6093_v51  ;;  %v3376_v6 = vadd.f32 %v9823_v0, %v7441_v8  ;;  %v6104_v49 = vsel %vm5206_vm2, %v5110_v38, 0.0 }
 0x238   :  { %v5584_v39 = vadd.f32 %v5583_v37, %v5582_v15  ;;  %v3367_v24 = vpop.f32.mrf.mxu0  ;;  %v5111_v9 = vmax.f32 %v4315_v32, 0.0  ;;  %v5113_v3 = vmax.f32 %v4323_v48, 0.0  ;;  %v5589_v33 = vsel %vm5206_vm2, %v4873_v29, 0.0 }
 0x239   :  { %v5585_v10 = vsel %vm5206_vm2, %v4871_v13, 0.0  ;;  %v3368_v60 = vadd.f32 %v9823_v0, %v3367_v24  ;;  %v10191_v42 = vpop.f32.mrf.mxu1  ;;  %v10193_v2 = vadd.f32 %v6096_v16, %v6095_v28  ;;  %v6107_v51 = vsel %vm5206_vm2, %v5112_v22, 0.0 }
 0x23a   :  { %v5586_v52 = vadd.f32 %v5585_v10, %v5584_v39  ;;  %v7442_v63 = vpop.f32.mrf.mxu0  ;;  %v6105_v37 = vsel %vm5206_vm2, %v5111_v9, 0.0  ;;  %v4328_v38 = vadd.f32 %v9823_v0, %v10076_v45  ;;  %v4876_v32 = vmax.f32 %v3376_v6, 0.0 }
 0x23b   :  { %v4874_v19 = vmax.f32 %v3368_v60, 0.0  ;;  %10976 = vst [vmem:[#allocation25_spill] sm:$0xff] %v10193_v2  ;;  %v10197_v17 = vpop.f32.mrf.mxu1  ;;  %v3379_v8 = vadd.f32 %v9823_v0, %v7442_v63  ;;  %v6106_v24 = vadd.f32 %v6105_v37, %v6104_v49  ;;  %v6109_v29 = vsel %vm5206_vm2, %v5113_v3, 0.0 }
 0x23c   :  { %v5588_v15 = vadd.f32 %v5587_v27, %v5586_v52  ;;  %v3370_v21 = vpop.f32.mrf.mxu0  ;;  %v4336_v22 = vadd.f32 %v9823_v0, %v10068_v23  ;;  %v5114_v63 = vmax.f32 %v4328_v38, 0.0 }
 0x23d   :  { %v3371_v13 = vadd.f32 %v9823_v0, %v3370_v21  ;;  %v10205_v48 = vpop.f32.mrf.mxu1  ;;  %v5591_v10 = vsel %vm5206_vm2, %v4874_v19, 0.0  ;;  %v6108_v52 = vadd.f32 %v6107_v51, %v6106_v24  ;;  %v4877_v49 = vmax.f32 %v3379_v8, 0.0 }
 0x23e   :  { %v5590_v39 = vadd.f32 %v5589_v33, %v5588_v15  ;;  %v7445_v16 = vpop.f32.mrf.mxu0  ;;  %v6111_v37 = vsel %vm5206_vm2, %v5114_v63, 0.0  ;;  %v5595_v33 = vsel %vm5206_vm2, %v4876_v32, 0.0  ;;  %v4339_v51 = vadd.f32 %v9823_v0, %v10082_v58 }
 0x23f   :  { %v4875_v60 = vmax.f32 %v3371_v13, 0.0  ;;  %v10211_v9 = vpop.f32.mrf.mxu1  ;;  %v6110_v19 = vadd.f32 %v6109_v29, %v6108_v52  ;;  %v3392_v13 = vadd.f32 %v9823_v0, %v7445_v16  ;;  %v5116_v24 = vmax.f32 %v4336_v22, 0.0 }
 0x240   :  { %v5592_v28 = vadd.f32 %v5591_v10, %v5590_v39  ;;  %v3383_v27 = vpop.f32.mrf.mxu0  ;;  %v4331_v10 = vadd.f32 %v9823_v0, %v10086_v35  ;;  %v5597_v29 = vsel %vm5206_vm2, %v4877_v49, 0.0  ;;  %v4352_v58 = vadd.f32 %v9823_v0, %v10095_v31 }
 0x241   :  { %v5593_v45 = vsel %vm5206_vm2, %v4875_v60, 0.0  ;;  %v3384_v15 = vadd.f32 %v9823_v0, %v3383_v27  ;;  %v10216_v3 = vpop.f32.mrf.mxu1  ;;  %v6112_v38 = vadd.f32 %v6111_v37, %v6110_v19  ;;  %v4880_v22 = vmax.f32 %v3392_v13, 0.0  ;;  %v10239_v37 = vld [vmem:[%s10944_s2] ss:$0 sm:$0xff] }
 0x242   :  { %v5594_v6 = vadd.f32 %v5593_v45, %v5592_v28  ;;  %v7446_v21 = vpop.f32.mrf.mxu0  ;;  %v5115_v52 = vmax.f32 %v4331_v10, 0.0  ;;  %v6115_v49 = vsel %vm5206_vm2, %v5116_v24, 0.0  ;;  %v5120_v10 = vmax.f32 %v4352_v58, 0.0 }
 0x243   :  { %v4878_v23 = vmax.f32 %v3384_v15, 0.0  ;;  %v10224_v60 = vpop.f32.mrf.mxu1  ;;  %v3395_v28 = vadd.f32 %v9823_v0, %v7446_v21  ;;  %v5117_v15 = vmax.f32 %v4339_v51, 0.0 }
 0x244   :  { %v5596_v8 = vadd.f32 %v5595_v33, %v5594_v6  ;;  %v3386_v39 = vpop.f32.mrf.mxu0  ;;  %v6113_v21 = vsel %vm5206_vm2, %v5115_v52, 0.0 }
 0x245   :  { %v3387_v32 = vadd.f32 %v9823_v0, %v3386_v39  ;;  %v10231_v63 = vpop.f32.mrf.mxu1  ;;  %v5599_v45 = vsel %vm5206_vm2, %v4878_v23, 0.0  ;;  %v4344_v0 = vadd.f32 %v10239_v37, %v10099_v53  ;;  %v4881_v33 = vmax.f32 %v3395_v28, 0.0 }
 0x246   :  { %v5598_v16 = vadd.f32 %v5597_v29, %v5596_v8  ;;  %v7449_v27 = vpop.f32.mrf.mxu0  ;;  %v6114_v24 = vadd.f32 %v6113_v21, %v6112_v38  ;;  %v6117_v28 = vsel %vm5206_vm2, %v5117_v15, 0.0 }
 0x247   :  { %v4879_v35 = vmax.f32 %v3387_v32, 0.0  ;;  %v10243_v31 = vpop.f32.mrf.mxu1  ;;  %v3408_v23 = vadd.f32 %v10239_v37, %v7449_v27  ;;  %v5118_v29 = vmax.f32 %v4344_v0, 0.0  ;;  %v4355_v27 = vadd.f32 %v10239_v37, %v10107_v40 }
 0x248   :  { %v5600_v6 = vadd.f32 %v5599_v45, %v5598_v16  ;;  %v3399_v19 = vpop.f32.mrf.mxu0  ;;  %v5603_v16 = vsel %vm5206_vm2, %v4880_v22, 0.0  ;;  %v6116_v2 = vadd.f32 %v6115_v49, %v6114_v24  ;;  %v5605_v38 = vsel %vm5206_vm2, %v4881_v33, 0.0 }
 0x249   :  { %v5601_v13 = vsel %vm5206_vm2, %v4879_v35, 0.0  ;;  %v3400_v51 = vadd.f32 %v10239_v37, %v3399_v19  ;;  %v10248_v32 = vpop.f32.mrf.mxu1  ;;  %v4884_v58 = vmax.f32 %v3408_v23, 0.0  ;;  %v6119_v22 = vsel %vm5206_vm2, %v5118_v29, 0.0 }
 0x24a   :  { %v5602_v8 = vadd.f32 %v5601_v13, %v5600_v6  ;;  %v7450_v39 = vpop.f32.mrf.mxu0  ;;  %v6123_v13 = vsel %vm5206_vm2, %v5120_v10, 0.0  ;;  %v6118_v15 = vadd.f32 %v6117_v28, %v6116_v2  ;;  %v4347_v49 = vadd.f32 %v10239_v37, %v10114_v43 }
 0x24b   :  { %v4882_v52 = vmax.f32 %v3400_v51, 0.0  ;;  %v3411_v53 = vadd.f32 %v10239_v37, %v7450_v39  ;;  %v10255_v6 = vpop.f32.mrf.mxu1  ;;  %v5121_v29 = vmax.f32 %v4355_v27, 0.0  ;;  %v4368_v28 = vadd.f32 %v10239_v37, %v10118_v55 }
 0x24c   :  { %v5604_v45 = vadd.f32 %v5603_v16, %v5602_v8  ;;  %v3402_v35 = vpop.f32.mrf.mxu0  ;;  %v6120_v16 = vadd.f32 %v6119_v22, %v6118_v15  ;;  %v4371_v27 = vadd.f32 %v10239_v37, %v10135_v41 }
 0x24d   :  { %v3403_v19 = vadd.f32 %v10239_v37, %v3402_v35  ;;  %v10263_v51 = vpop.f32.mrf.mxu1  ;;  %v5607_v40 = vsel %vm5206_vm2, %v4882_v52, 0.0  ;;  %v4885_v8 = vmax.f32 %v3411_v53, 0.0 }
 0x24e   :  { %v5606_v21 = vadd.f32 %v5605_v38, %v5604_v45  ;;  %v7453_v0 = vpop.f32.mrf.mxu0  ;;  %v5119_v45 = vmax.f32 %v4347_v49, 0.0 }
 0x24f   :  { %v4883_v39 = vmax.f32 %v3403_v19, 0.0  ;;  %v3424_v33 = vadd.f32 %v10239_v37, %v7453_v0  ;;  %v10267_v35 = vpop.f32.mrf.mxu1  ;;  %v4360_v19 = vadd.f32 %v10239_v37, %v10124_v54  ;;  %v5613_v0 = vsel %vm5206_vm2, %v4885_v8, 0.0 }
 0x250   :  { %v5608_v23 = vadd.f32 %v5607_v40, %v5606_v21  ;;  %v3415_v24 = vpop.f32.mrf.mxu0  ;;  %v6121_v38 = vsel %vm5206_vm2, %v5119_v45, 0.0  ;;  %v5611_v21 = vsel %vm5206_vm2, %v4884_v58, 0.0 }
 0x251   :  { %v5609_v2 = vsel %vm5206_vm2, %v4883_v39, 0.0  ;;  %v4888_v10 = vmax.f32 %v3424_v33, 0.0  ;;  %v3416_v43 = vadd.f32 %v10239_v37, %v3415_v24  ;;  %v10278_v22 = vpop.f32.mrf.mxu1  ;;  %v6122_v49 = vadd.f32 %v6121_v38, %v6120_v16 }
 0x252   :  { %v5610_v52 = vadd.f32 %v5609_v2, %v5608_v23  ;;  %v7454_v53 = vpop.f32.mrf.mxu0  ;;  %v6125_v33 = vsel %vm5206_vm2, %v5121_v29, 0.0  ;;  %v5122_v23 = vmax.f32 %v4360_v19, 0.0  ;;  %v5124_v2 = vmax.f32 %v4368_v28, 0.0 }
 0x253   :  { %v4886_v15 = vmax.f32 %v3416_v43, 0.0  ;;  %v3427_v55 = vadd.f32 %v10239_v37, %v7454_v53  ;;  %v10284_v24 = vpop.f32.mrf.mxu1  ;;  %v5624_v54 = vsel %vm5206_vm2, %v4888_v10, 0.0  ;;  %v6124_v45 = vadd.f32 %v6123_v13, %v6122_v49 }
 0x254   :  { %v5612_v40 = vadd.f32 %v5611_v21, %v5610_v52  ;;  %v3418_v39 = vpop.f32.mrf.mxu0  ;;  %v6127_v8 = vsel %vm5206_vm2, %v5122_v23, 0.0  ;;  %v5125_v16 = vmax.f32 %v4371_v27, 0.0  ;;  %v4363_v43 = vadd.f32 %v10239_v37, %v10143_v4 }
 0x255   :  { %v3419_v41 = vadd.f32 %v10239_v37, %v3418_v39  ;;  %v10291_v52 = vpop.f32.mrf.mxu1  ;;  %v5621_v29 = vsel %vm5206_vm2, %v4886_v15, 0.0  ;;  %v6126_v10 = vadd.f32 %v6125_v33, %v6124_v45  ;;  %v4889_v21 = vmax.f32 %v3427_v55, 0.0 }
 0x256   :  { %v5614_v58 = vadd.f32 %v5613_v0, %v5612_v40  ;;  %v7457_v46 = vpop.f32.mrf.mxu0  ;;  %v5123_v28 = vmax.f32 %v4363_v43, 0.0  ;;  %v4376_v0 = vadd.f32 %v10239_v37, %v10155_v36  ;;  %v4384_v15 = vadd.f32 %v10239_v37, %v10151_v62 }
 0x257   :  { %v4887_v53 = vmax.f32 %v3419_v41, 0.0  ;;  %v3440_v38 = vadd.f32 %v10239_v37, %v7457_v46  ;;  %v10297_v49 = vpop.f32.mrf.mxu1  ;;  %v6128_v40 = vadd.f32 %v6127_v8, %v6126_v10  ;;  %v6131_v55 = vsel %vm5206_vm2, %v5124_v2, 0.0 }
 0x258   :  { %v5615_v19 = vrot.slane %v5614_v58, 4  ;;  %v3431_v13 = vpop.f32.mrf.mxu0  ;;  %v6129_v23 = vsel %vm5206_vm2, %v5123_v28, 0.0  ;;  %v6133_v43 = vsel %vm5206_vm2, %v5125_v16, 0.0  ;;  %v5126_v62 = vmax.f32 %v4376_v0, 0.0 }
 0x259   :  { %v5622_v27 = vsel %vm5206_vm2, %v4887_v53, 0.0  ;;  %v3432_v4 = vadd.f32 %v10239_v37, %v3431_v13  ;;  %v10305_v41 = vpop.f32.mrf.mxu1  ;;  %v4892_v36 = vmax.f32 %v3440_v38, 0.0  ;;  %v6130_v53 = vadd.f32 %v6129_v23, %v6128_v40 }
 0x25a   :  { %v5616_v39 = vadd.f32 %v5615_v19, %v5614_v58  ;;  %v5623_v46 = vadd.f32 %v5622_v27, %v5621_v29  ;;  %v7458_v33 = vpop.f32.mrf.mxu0  ;;  %v5626_v29 = vsel %vm5206_vm2, %v4889_v21, 0.0  ;;  %v5128_v28 = vmax.f32 %v4384_v15, 0.0 }
 0x25b   :  { %v4890_v45 = vmax.f32 %v3432_v4, 0.0  ;;  %v3443_v8 = vadd.f32 %v10239_v37, %v7458_v33  ;;  %v10309_v58 = vpop.f32.mrf.mxu1  ;;  %v6132_v19 = vadd.f32 %v6131_v55, %v6130_v53  ;;  %v6135_v16 = vsel %vm5206_vm2, %v5126_v62, 0.0 }
 0x25c   :  { %v5617_v25 = vrot.slane %v5616_v39, 2  ;;  %v5625_v13 = vadd.f32 %v5624_v54, %v5623_v46  ;;  %v3434_v10 = vpop.f32.mrf.mxu0  ;;  %v4387_v54 = vadd.f32 %v10239_v37, %v10163_v12  ;;  %v5632_v0 = vsel %vm5206_vm2, %v4892_v36, 0.0 }
 0x25d   :  { %v3435_v2 = vadd.f32 %v10239_v37, %v3434_v10  ;;  %v10316_v40 = vpop.f32.mrf.mxu1  ;;  %v5628_v46 = vsel %vm5206_vm2, %v4890_v45, 0.0  ;;  %v6134_v33 = vadd.f32 %v6133_v43, %v6132_v19  ;;  %v4893_v15 = vmax.f32 %v3443_v8, 0.0 }
 0x25e   :  { %v5618_v27 = vadd.f32 %v5617_v25, %v5616_v39  ;;  %v5627_v38 = vadd.f32 %v5626_v29, %v5625_v13  ;;  %v7461_v4 = vpop.f32.mrf.mxu0  ;;  %v4379_v39 = vadd.f32 %v10239_v37, %v10171_v30  ;;  %v5129_v43 = vmax.f32 %v4387_v54, 0.0 }
 0x25f   :  { %v4891_v21 = vmax.f32 %v3435_v2, 0.0  ;;  %v10322_v53 = vpop.f32.mrf.mxu1  ;;  %v3456_v13 = vadd.f32 %v10239_v37, %v7461_v4  ;;  %v6136_v36 = vadd.f32 %v6135_v16, %v6134_v33  ;;  %v6139_v30 = vsel %vm5206_vm2, %v5128_v28, 0.0 }
 0x260   :  { %v5619_v23 = vrot.slane %v5618_v27, 1  ;;  %v5629_v55 = vadd.f32 %v5628_v46, %v5627_v38  ;;  %v3447_v25 = vpop.f32.mrf.mxu0  ;;  %v5127_v2 = vmax.f32 %v4379_v39, 0.0  ;;  %v4400_v46 = vadd.f32 %v10239_v37, %v10178_v7 }
 0x261   :  { %v5630_v12 = vsel %vm5206_vm2, %v4891_v21, 0.0  ;;  %v3448_v10 = vadd.f32 %v10239_v37, %v3447_v25  ;;  %v10327_v19 = vpop.f32.mrf.mxu1  ;;  %v5634_v33 = vsel %vm5206_vm2, %v4893_v15, 0.0  ;;  %v6141_v7 = vsel %vm5206_vm2, %v5129_v43, 0.0 }
 0x262   :  { %v5620_v62 = vadd.f32 %v5619_v23, %v5618_v27  ;;  %v5631_v45 = vadd.f32 %v5630_v12, %v5629_v55  ;;  %v7462_v29 = vpop.f32.mrf.mxu0  ;;  %v6137_v16 = vsel %vm5206_vm2, %v5127_v2, 0.0  ;;  %v4392_v27 = vadd.f32 %v10239_v37, %v10185_v47 }
 0x263   :  { %v4894_v8 = vmax.f32 %v3448_v10, 0.0  ;;  %v3459_v38 = vadd.f32 %v10239_v37, %v7462_v29  ;;  %v10336_v54 = vpop.f32.mrf.mxu1  ;;  %v4896_v23 = vmax.f32 %v3456_v13, 0.0  ;;  %v6138_v25 = vadd.f32 %v6137_v16, %v6136_v36 }
 0x264   :  { %v6317_v21 = vmul.f32 0.00390625, %v5620_v62  ;;  %v5633_v4 = vadd.f32 %v5632_v0, %v5631_v45  ;;  %v3450_v18 = vpop.f32.mrf.mxu0  ;;  %v5130_v0 = vmax.f32 %v4392_v27, 0.0  ;;  %v5132_v13 = vmax.f32 %v4400_v46, 0.0 }
 0x265   :  { %v3451_v55 = vadd.f32 %v10239_v37, %v3450_v18  ;;  %v10341_v10 = vpop.f32.mrf.mxu1  ;;  %v5636_v62 = vsel %vm5206_vm2, %v4894_v8, 0.0  ;;  %v4897_v45 = vmax.f32 %v3459_v38, 0.0  ;;  %v6140_v29 = vadd.f32 %v6139_v30, %v6138_v25 }
 0x266   :  { %v6333_v28 = vpack.c.bf16 %v6317_v21, %v6317_v21  ;;  %v5635_v39 = vadd.f32 %v5634_v33, %v5633_v4  ;;  %v7465_v12 = vpop.f32.mrf.mxu0  ;;  %v6143_v18 = vsel %vm5206_vm2, %v5130_v0, 0.0  ;;  %v4403_v46 = vadd.f32 %v10239_v37, %v10191_v42 }
 0x267   :  { %v4895_v47 = vmax.f32 %v3451_v55, 0.0  ;;  %v10345_v36 = vpop.f32.mrf.mxu1  ;;  %v3472_v43 = vadd.f32 %v10239_v37, %v7465_v12  ;;  %v6142_v16 = vadd.f32 %v6141_v7, %v6140_v29  ;;  %v4395_v27 = vadd.f32 %v10239_v37, %v10197_v17 }
 0x268   :  { %v6376_v2 = vunpack.c.l.b16 %v6333_v28  ;;  %v5637_v1 = vadd.f32 %v5636_v62, %v5635_v39  ;;  %v3463_v15 = vpop.f32.mrf.mxu0  ;;  %v5640_v55 = vsel %vm5206_vm2, %v4896_v23, 0.0  ;;  %v5642_v62 = vsel %vm5206_vm2, %v4897_v45, 0.0 }
 0x269   :  { %v5638_v21 = vsel %vm5206_vm2, %v4895_v47, 0.0  ;;  %v3464_v4 = vadd.f32 %v10239_v37, %v3463_v15  ;;  %v10358_v33 = vpop.f32.mrf.mxu1  ;;  %v6144_v39 = vadd.f32 %v6143_v18, %v6142_v16  ;;  %v5131_v0 = vmax.f32 %v4395_v27, 0.0 }
 0x26a   :  { %v10352_v8 = vsel %vm6395_vm7, %v6376_v2, %v10131_v59  ;;  %v5639_v38 = vadd.f32 %v5638_v21, %v5637_v1  ;;  %v7466_v30 = vpop.f32.mrf.mxu0  ;;  %v5133_v59 = vmax.f32 %v4403_v46, 0.0  ;;  %v4416_v17 = vadd.f32 %v10239_v37, %v10205_v48 }
 0x26b   :  { %v4898_v25 = vmax.f32 %v3464_v4, 0.0  ;;  %v3475_v28 = vadd.f32 %v10239_v37, %v7466_v30  ;;  %v10362_v1 = vpop.f32.mrf.mxu1  ;;  %v4408_v23 = vadd.f32 %v10239_v37, %v10211_v9  ;;  %v4900_v47 = vmax.f32 %v3472_v43, 0.0 }
 0x26c   :  { %v5641_v12 = vadd.f32 %v5640_v55, %v5639_v38  ;;  %v3466_v7 = vpop.f32.mrf.mxu0  ;;  %v6147_v2 = vsel %vm5206_vm2, %v5132_v13, 0.0  ;;  %v6145_v18 = vsel %vm5206_vm2, %v5131_v0, 0.0  ;;  %v6149_v48 = vsel %vm5206_vm2, %v5133_v59, 0.0 }
 0x26d   :  { %v3467_v42 = vadd.f32 %v10239_v37, %v3466_v7  ;;  %v10372_v21 = vpop.f32.mrf.mxu1  ;;  %v5644_v4 = vsel %vm5206_vm2, %v4898_v25, 0.0  ;;  %v4901_v45 = vmax.f32 %v3475_v28, 0.0  ;;  %v6146_v38 = vadd.f32 %v6145_v18, %v6144_v39 }
 0x26e   :  { %v5643_v29 = vadd.f32 %v5642_v62, %v5641_v12  ;;  %v7469_v15 = vpop.f32.mrf.mxu0  ;;  %v5134_v27 = vmax.f32 %v4408_v23, 0.0  ;;  %v4419_v9 = vadd.f32 %v10239_v37, %v10216_v3  ;;  %v5136_v7 = vmax.f32 %v4416_v17, 0.0 }
 0x26f   :  { %v4899_v16 = vmax.f32 %v3467_v42, 0.0  ;;  %v10378_v43 = vpop.f32.mrf.mxu1  ;;  %v6148_v12 = vadd.f32 %v6147_v2, %v6146_v38  ;;  %v3488_v28 = vadd.f32 %v10239_v37, %v7469_v15  ;;  %v4411_v59 = vadd.f32 %v10239_v37, %v10224_v60 }
 0x270   :  { %v5645_v30 = vadd.f32 %v5644_v4, %v5643_v29  ;;  %v3479_v46 = vpop.f32.mrf.mxu0  ;;  %v6151_v0 = vsel %vm5206_vm2, %v5134_v27, 0.0  ;;  %v5648_v3 = vsel %vm5206_vm2, %v4900_v47, 0.0  ;;  %v5137_v29 = vmax.f32 %v4419_v9, 0.0 }
 0x271   :  { %v5646_v13 = vsel %vm5206_vm2, %v4899_v16, 0.0  ;;  %v3480_v55 = vadd.f32 %v10239_v37, %v3479_v46  ;;  %v10386_v62 = vpop.f32.mrf.mxu1  ;;  %v6150_v23 = vadd.f32 %v6149_v48, %v6148_v12  ;;  %v5650_v18 = vsel %vm5206_vm2, %v4901_v45, 0.0 }
 0x272   :  { %v5647_v25 = vadd.f32 %v5646_v13, %v5645_v30  ;;  %v7470_v39 = vpop.f32.mrf.mxu0  ;;  %v5135_v15 = vmax.f32 %v4411_v59, 0.0  ;;  %v6155_v60 = vsel %vm5206_vm2, %v5136_v7, 0.0  ;;  %v4432_v47 = vadd.f32 %v10239_v37, %v10231_v63 }
 0x273   :  { %v4902_v42 = vmax.f32 %v3480_v55, 0.0  ;;  %v3491_v17 = vadd.f32 %v10239_v37, %v7470_v39  ;;  %v10391_v16 = vpop.f32.mrf.mxu1  ;;  %v6152_v30 = vadd.f32 %v6151_v0, %v6150_v23  ;;  %v4904_v46 = vmax.f32 %v3488_v28, 0.0 }
 0x274   :  { %v5649_v2 = vadd.f32 %v5648_v3, %v5647_v25  ;;  %v3482_v4 = vpop.f32.mrf.mxu0  ;;  %v6153_v45 = vsel %vm5206_vm2, %v5135_v15, 0.0  ;;  %v4424_v9 = vadd.f32 %v10239_v37, %v10243_v31  ;;  %v6157_v25 = vsel %vm5206_vm2, %v5137_v29, 0.0 }
 0x275   :  { %v3483_v38 = vadd.f32 %v10239_v37, %v3482_v4  ;;  %v10400_v13 = vpop.f32.mrf.mxu1  ;;  %v5652_v55 = vsel %vm5206_vm2, %v4902_v42, 0.0  ;;  %v6154_v7 = vadd.f32 %v6153_v45, %v6152_v30  ;;  %v4905_v0 = vmax.f32 %v3491_v17, 0.0 }
 0x276   :  { %v5651_v48 = vadd.f32 %v5650_v18, %v5649_v2  ;;  %v7473_v27 = vpop.f32.mrf.mxu0  ;;  %v5138_v63 = vmax.f32 %v4424_v9, 0.0  ;;  %v4435_v28 = vadd.f32 %v10239_v37, %v10248_v32  ;;  %v5140_v2 = vmax.f32 %v4432_v47, 0.0 }
 0x277   :  { %v4903_v12 = vmax.f32 %v3483_v38, 0.0  ;;  %v10406_v3 = vpop.f32.mrf.mxu1  ;;  %v6156_v18 = vadd.f32 %v6155_v60, %v6154_v7  ;;  %v3504_v4 = vadd.f32 %v10239_v37, %v7473_v27  ;;  %v4427_v17 = vadd.f32 %v10239_v37, %v10255_v6 }
 0x278   :  { %v5653_v39 = vadd.f32 %v5652_v55, %v5651_v48  ;;  %v3495_v59 = vpop.f32.mrf.mxu0  ;;  %v6159_v15 = vsel %vm5206_vm2, %v5138_v63, 0.0  ;;  %v5656_v32 = vsel %vm5206_vm2, %v4904_v46, 0.0  ;;  %v5141_v47 = vmax.f32 %v4435_v28, 0.0 }
 0x279   :  { %v5654_v23 = vsel %vm5206_vm2, %v4903_v12, 0.0  ;;  %v3496_v31 = vadd.f32 %v10239_v37, %v3495_v59  ;;  %v10414_v38 = vpop.f32.mrf.mxu1  ;;  %v6158_v48 = vadd.f32 %v6157_v25, %v6156_v18  ;;  %v5139_v55 = vmax.f32 %v4427_v17, 0.0 }
 0x27a   :  { %v5655_v42 = vadd.f32 %v5654_v23, %v5653_v39  ;;  %v7474_v29 = vpop.f32.mrf.mxu0  ;;  %v5658_v27 = vsel %vm5206_vm2, %v4905_v0, 0.0  ;;  %v6163_v6 = vsel %vm5206_vm2, %v5140_v2, 0.0  ;;  %v4908_v59 = vmax.f32 %v3504_v4, 0.0 }
 0x27b   :  { %v4906_v30 = vmax.f32 %v3496_v31, 0.0  ;;  %v3507_v9 = vadd.f32 %v10239_v37, %v7474_v29  ;;  %v10418_v12 = vpop.f32.mrf.mxu1  ;;  %v6160_v39 = vadd.f32 %v6159_v15, %v6158_v48  ;;  %v6161_v25 = vsel %vm5206_vm2, %v5139_v55, 0.0 }
 0x27c   :  { %v5657_v45 = vadd.f32 %v5656_v32, %v5655_v42  ;;  %v3498_v60 = vpop.f32.mrf.mxu0  ;;  %v4440_v23 = vadd.f32 %v10239_v37, %v10267_v35  ;;  %v4448_v0 = vadd.f32 %v10239_v37, %v10263_v51  ;;  %v6165_v4 = vsel %vm5206_vm2, %v5141_v47, 0.0 }
 0x27d   :  { %v3499_v7 = vadd.f32 %v10239_v37, %v3498_v60  ;;  %v10426_v31 = vpop.f32.mrf.mxu1  ;;  %v5660_v28 = vsel %vm5206_vm2, %v4906_v30, 0.0  ;;  %v6162_v42 = vadd.f32 %v6161_v25, %v6160_v39  ;;  %v4909_v2 = vmax.f32 %v3507_v9, 0.0 }
 0x27e   :  { %v5659_v63 = vadd.f32 %v5658_v27, %v5657_v45  ;;  %v7477_v46 = vpop.f32.mrf.mxu0  ;;  %v5142_v17 = vmax.f32 %v4440_v23, 0.0  ;;  %v4451_v30 = vadd.f32 %v10239_v37, %v10278_v22  ;;  %v4443_v9 = vadd.f32 %v10239_v37, %v10284_v24 }
 0x27f   :  { %v4907_v18 = vmax.f32 %v3499_v7, 0.0  ;;  %v10432_v32 = vpop.f32.mrf.mxu1  ;;  %v6164_v45 = vadd.f32 %v6163_v6, %v6162_v42  ;;  %v3520_v55 = vadd.f32 %v10239_v37, %v7477_v46  ;;  %v5664_v47 = vsel %vm5206_vm2, %v4908_v59, 0.0 }
 0x280   :  { %v5661_v29 = vadd.f32 %v5660_v28, %v5659_v63  ;;  %v3511_v15 = vpop.f32.mrf.mxu0  ;;  %v5144_v63 = vmax.f32 %v4448_v0, 0.0  ;;  %v3696_v6 = vadd.f32 %v10239_v37, %v8523_v57  ;;  %v5666_v22 = vsel %vm5206_vm2, %v4909_v2, 0.0 }
 0x281   :  { %v5662_v48 = vsel %vm5206_vm2, %v4907_v18, 0.0  ;;  %v3512_v35 = vadd.f32 %v10239_v37, %v3511_v15  ;;  %v10441_v27 = vpop.f32.mrf.mxu1  ;;  %v10444_v39 = vadd.f32 %v6165_v4, %v6164_v45  ;;  %v5143_v46 = vmax.f32 %v4443_v9, 0.0 }
 0x282   :  { %v5663_v60 = vadd.f32 %v5662_v48, %v5661_v29  ;;  %v7478_v51 = vpop.f32.mrf.mxu0  ;;  %v6173_v59 = vsel %vm5206_vm2, %v5142_v17, 0.0  ;;  %v5145_v42 = vmax.f32 %v4451_v30, 0.0  ;;  %v4912_v29 = vmax.f32 %v3520_v55, 0.0 }
 0x283   :  { %v4910_v7 = vmax.f32 %v3512_v35, 0.0  ;;  %10977 = vst [vmem:[#allocation26_spill] sm:$0xff] %v10444_v39  ;;  %v10449_v28 = vpop.f32.mrf.mxu1  ;;  %v3523_v24 = vadd.f32 %v10239_v37, %v7478_v51  ;;  %v6174_v4 = vsel %vm5206_vm2, %v5143_v46, 0.0  ;;  %v4456_v57 = vadd.f32 %v10239_v37, %v10297_v49 }
 0x284   :  { %v5665_v25 = vadd.f32 %v5664_v47, %v5663_v60  ;;  %v3514_v23 = vpop.f32.mrf.mxu0  ;;  %v6176_v45 = vsel %vm5206_vm2, %v5144_v63, 0.0  ;;  %v4464_v60 = vadd.f32 %v10239_v37, %v10291_v52  ;;  %v4956_v17 = vmax.f32 %v3696_v6, 0.0 }
 0x285   :  { %v3515_v18 = vadd.f32 %v10239_v37, %v3514_v23  ;;  %v10457_v2 = vpop.f32.mrf.mxu1  ;;  %v5668_v48 = vsel %vm5206_vm2, %v4910_v7, 0.0  ;;  %v6175_v51 = vadd.f32 %v6174_v4, %v6173_v59  ;;  %v5146_v9 = vmax.f32 %v4456_v57, 0.0 }
 0x286   :  { %v5667_v15 = vadd.f32 %v5666_v22, %v5665_v25  ;;  %v7481_v0 = vpop.f32.mrf.mxu0  ;;  %v4913_v22 = vmax.f32 %v3523_v24, 0.0  ;;  %v6178_v7 = vsel %vm5206_vm2, %v5145_v42, 0.0  ;;  %v5672_v23 = vsel %vm5206_vm2, %v4912_v29, 0.0 }
 0x287   :  { %v4911_v35 = vmax.f32 %v3515_v18, 0.0  ;;  %v10463_v47 = vpop.f32.mrf.mxu1  ;;  %v3536_v46 = vadd.f32 %v10239_v37, %v7481_v0  ;;  %v6177_v6 = vadd.f32 %v6176_v45, %v6175_v51  ;;  %v5148_v4 = vmax.f32 %v4464_v60, 0.0 }
 0x288   :  { %v5669_v30 = vadd.f32 %v5668_v48, %v5667_v15  ;;  %v3527_v55 = vpop.f32.mrf.mxu0  ;;  %v6180_v24 = vsel %vm5206_vm2, %v5146_v9, 0.0  ;;  %v4467_v42 = vadd.f32 %v10239_v37, %v10305_v41  ;;  %v4459_v29 = vadd.f32 %v10239_v37, %v10309_v58 }
 0x289   :  { %v5670_v49 = vsel %vm5206_vm2, %v4911_v35, 0.0  ;;  %v3528_v25 = vadd.f32 %v10239_v37, %v3527_v55  ;;  %v10470_v18 = vpop.f32.mrf.mxu1  ;;  %v6179_v35 = vadd.f32 %v6178_v7, %v6177_v6  ;;  %v10482_v45 = vadd.f32 %v10239_v37, %v8528_v61 }
 0x28a   :  { %v5671_v63 = vadd.f32 %v5670_v49, %v5669_v30  ;;  %v7482_v52 = vpop.f32.mrf.mxu0  ;;  %v5674_v30 = vsel %vm5206_vm2, %v4913_v22, 0.0  ;;  %v10487_v55 = vsel %vm5206_vm2, %v4956_v17, 0.0  ;;  %v5147_v41 = vmax.f32 %v4459_v29, 0.0 }
 0x28b   :  { %v4914_v59 = vmax.f32 %v3528_v25, 0.0  ;;  %v3539_v15 = vadd.f32 %v10239_v37, %v7482_v52  ;;  %v10478_v0 = vpop.f32.mrf.mxu1  ;;  %v6181_v49 = vadd.f32 %v6180_v24, %v6179_v35  ;;  %v4916_v58 = vmax.f32 %v3536_v46, 0.0 }
 0x28c   :  { %v5673_v57 = vadd.f32 %v5672_v23, %v5671_v63  ;;  %v3530_v48 = vpop.f32.mrf.mxu0  ;;  %v5149_v63 = vmax.f32 %v4467_v42, 0.0  ;;  %v6184_v22 = vsel %vm5206_vm2, %v5148_v4, 0.0  ;;  %v4480_v46 = vadd.f32 %v10239_v37, %v10316_v40 }
 0x28d   :  { %v3531_v60 = vadd.f32 %v10239_v37, %v3530_v48  ;;  %v10489_v25 = vpop.f32.mrf.mxu1  ;;  %v5676_v7 = vsel %vm5206_vm2, %v4914_v59, 0.0  ;;  %v4917_v52 = vmax.f32 %v3539_v15, 0.0  ;;  %v6182_v48 = vsel %vm5206_vm2, %v5147_v41, 0.0 }
 0x28e   :  { %v5675_v51 = vadd.f32 %v5674_v30, %v5673_v57  ;;  %v7485_v9 = vpop.f32.mrf.mxu0  ;;  %v6183_v29 = vadd.f32 %v6182_v48, %v6181_v49  ;;  %v4472_v4 = vadd.f32 %v10239_v37, %v10322_v53 }
 0x28f   :  { %v4915_v23 = vmax.f32 %v3531_v60, 0.0  ;;  %v10494_v17 = vpop.f32.mrf.mxu1  ;;  %v3552_v24 = vadd.f32 %v10239_v37, %v7485_v9  ;;  %v10508_v60 = vadd.f32 %v10239_v37, %v8536_v5  ;;  %v6186_v9 = vsel %vm5206_vm2, %v5149_v63, 0.0 }
 0x290   :  { %v5677_v61 = vadd.f32 %v5676_v7, %v5675_v51  ;;  %v3543_v6 = vpop.f32.mrf.mxu0  ;;  %v5680_v51 = vsel %vm5206_vm2, %v4916_v58, 0.0  ;;  %v5150_v49 = vmax.f32 %v4472_v4, 0.0  ;;  %v5682_v53 = vsel %vm5206_vm2, %v4917_v52, 0.0 }
 0x291   :  { %v5678_v57 = vsel %vm5206_vm2, %v4915_v23, 0.0  ;;  %v3544_v35 = vadd.f32 %v10239_v37, %v3543_v6  ;;  %v10504_v30 = vpop.f32.mrf.mxu1  ;;  %v6185_v23 = vadd.f32 %v6184_v22, %v6183_v29  ;;  %v4920_v48 = vmax.f32 %v3552_v24, 0.0 }
 0x292   :  { %v5679_v42 = vadd.f32 %v5678_v57, %v5677_v61  ;;  %v7486_v15 = vpop.f32.mrf.mxu0  ;;  %v5152_v5 = vmax.f32 %v4480_v46, 0.0  ;;  %v6188_v63 = vsel %vm5206_vm2, %v5150_v49, 0.0  ;;  %v4475_v52 = vadd.f32 %v10239_v37, %v10336_v54 }
 0x293   :  { %v3555_v40 = vadd.f32 %v10239_v37, %v7486_v15  ;;  %v4918_v7 = vmax.f32 %v3544_v35, 0.0  ;;  %v10513_v6 = vpop.f32.mrf.mxu1  ;;  %v6187_v58 = vadd.f32 %v6186_v9, %v6185_v23  ;;  %v5693_v49 = vsel %vm5206_vm2, %v4920_v48, 0.0 }
 0x294   :  { %v5681_v41 = vadd.f32 %v5680_v51, %v5679_v42  ;;  %v3546_v61 = vpop.f32.mrf.mxu0  ;;  %v4483_v42 = vadd.f32 %v10239_v37, %v10327_v19 }
 0x295   :  { %v3547_v57 = vadd.f32 %v10239_v37, %v3546_v61  ;;  %v10520_v35 = vpop.f32.mrf.mxu1  ;;  %v4921_v22 = vmax.f32 %v3555_v40, 0.0  ;;  %v5690_v46 = vsel %vm5206_vm2, %v4918_v7, 0.0  ;;  %v6189_v4 = vadd.f32 %v6188_v63, %v6187_v58 }
 0x296   :  { %v5683_v59 = vadd.f32 %v5682_v53, %v5681_v41  ;;  %v7489_v39 = vpop.f32.mrf.mxu0  ;;  %v5153_v9 = vmax.f32 %v4483_v42, 0.0  ;;  %v5151_v61 = vmax.f32 %v4475_v52, 0.0  ;;  %v4496_v40 = vadd.f32 %v10239_v37, %v10341_v10 }
 0x297   :  { %v4919_v15 = vmax.f32 %v3547_v57, 0.0  ;;  %v3568_v29 = vadd.f32 %v10239_v37, %v7489_v39  ;;  %v10526_v41 = vpop.f32.mrf.mxu1  ;;  %v6192_v53 = vsel %vm5206_vm2, %v5152_v5, 0.0  ;;  %v5695_v58 = vsel %vm5206_vm2, %v4921_v22, 0.0 }
 0x298   :  { %v5684_v24 = vrot.slane %v5683_v59, 4  ;;  %v3559_v51 = vpop.f32.mrf.mxu0  ;;  %v6194_v48 = vsel %vm5206_vm2, %v5153_v9, 0.0  ;;  %v4488_v22 = vadd.f32 %v10239_v37, %v10345_v36 }
 0x299   :  { %v5691_v23 = vsel %vm5206_vm2, %v4919_v15, 0.0  ;;  %v3560_v19 = vadd.f32 %v10239_v37, %v3559_v51  ;;  %v10534_v57 = vpop.f32.mrf.mxu1  ;;  %v4924_v63 = vmax.f32 %v3568_v29, 0.0  ;;  %v6190_v15 = vsel %vm5206_vm2, %v5151_v61, 0.0 }
 0x29a   :  { %v5685_v39 = vadd.f32 %v5684_v24, %v5683_v59  ;;  %v5692_v54 = vadd.f32 %v5691_v23, %v5690_v46  ;;  %v7490_v7 = vpop.f32.mrf.mxu0  ;;  %v6191_v10 = vadd.f32 %v6190_v15, %v6189_v4  ;;  %v5156_v46 = vmax.f32 %v4496_v40, 0.0 }
 0x29b   :  { %v4922_v42 = vmax.f32 %v3560_v19, 0.0  ;;  %v3571_v11 = vadd.f32 %v10239_v37, %v7490_v7  ;;  %v10539_v24 = vpop.f32.mrf.mxu1  ;;  %v5154_v9 = vmax.f32 %v4488_v22, 0.0  ;;  %v5701_v22 = vsel %vm5206_vm2, %v4924_v63, 0.0 }
 0x29c   :  { %v5686_v51 = vrot.slane %v5685_v39, 2  ;;  %v5694_v52 = vadd.f32 %v5693_v49, %v5692_v54  ;;  %v3562_v59 = vpop.f32.mrf.mxu0  ;;  %v6193_v19 = vadd.f32 %v6192_v53, %v6191_v10  ;;  %v4499_v49 = vadd.f32 %v10239_v37, %v10358_v33 }
 0x29d   :  { %v3563_v5 = vadd.f32 %v10239_v37, %v3562_v59  ;;  %v5697_v4 = vsel %vm5206_vm2, %v4922_v42, 0.0  ;;  %v4925_v40 = vmax.f32 %v3571_v11, 0.0  ;;  %v10549_v36 = vpop.f32.mrf.mxu1  ;;  %v6196_v53 = vsel %vm5206_vm2, %v5154_v9, 0.0 }
 0x29e   :  { %v5687_v29 = vadd.f32 %v5686_v51, %v5685_v39  ;;  %v5696_v23 = vadd.f32 %v5695_v58, %v5694_v52  ;;  %v7493_v61 = vpop.f32.mrf.mxu0  ;;  %v6195_v56 = vadd.f32 %v6194_v48, %v6193_v19  ;;  %v5157_v58 = vmax.f32 %v4499_v49, 0.0 }
 0x29f   :  { %v4923_v54 = vmax.f32 %v3563_v5, 0.0  ;;  %v3584_v7 = vadd.f32 %v10239_v37, %v7493_v61  ;;  %v6200_v11 = vsel %vm5206_vm2, %v5156_v46, 0.0  ;;  %v4512_v46 = vadd.f32 %v10239_v37, %v10372_v21 }
 0x2a0   :  { %v5688_v15 = vrot.slane %v5687_v29, 1  ;;  %v5698_v59 = vadd.f32 %v5697_v4, %v5696_v23  ;;  %v3575_v50 = vpop.f32.mrf.mxu0  ;;  %v6197_v10 = vadd.f32 %v6196_v53, %v6195_v56  ;;  %v4491_v23 = vadd.f32 %v10239_v37, %v10362_v1 }
 0x2a1   :  { %v5699_v39 = vsel %vm5206_vm2, %v4923_v54, 0.0  ;;  %v3576_v33 = vadd.f32 %v10239_v37, %v3575_v50  ;;  %v4928_v52 = vmax.f32 %v3584_v7, 0.0  ;;  %v4504_v50 = vadd.f32 %v10239_v37, %v10378_v43 }
 0x2a2   :  { %v5689_v51 = vadd.f32 %v5688_v15, %v5687_v29  ;;  %v5700_v42 = vadd.f32 %v5699_v39, %v5698_v59  ;;  %v7494_v5 = vpop.f32.mrf.mxu0  ;;  %v10561_v29 = vpop.f32.mrf.mxu1  ;;  %v5703_v56 = vsel %vm5206_vm2, %v4925_v40, 0.0  ;;  %v5155_v49 = vmax.f32 %v4491_v23, 0.0 }
 0x2a3   :  { %v4926_v48 = vmax.f32 %v3576_v33, 0.0  ;;  %v3587_v4 = vadd.f32 %v10239_v37, %v7494_v5  ;;  %v5709_v1 = vsel %vm5206_vm2, %v4928_v52, 0.0  ;;  %v6202_v15 = vsel %vm5206_vm2, %v5157_v58, 0.0 }
 0x2a4   :  { %v6318_v19 = vmul.f32 0.00390625, %v5689_v51  ;;  %v5702_v61 = vadd.f32 %v5701_v22, %v5700_v42  ;;  %v3578_v54 = vpop.f32.mrf.mxu0  ;;  %v6198_v43 = vsel %vm5206_vm2, %v5155_v49, 0.0  ;;  %v5158_v33 = vmax.f32 %v4504_v50, 0.0  ;;  %v10571_v23 = vpop.f32.mrf.mxu1 }
 0x2a5   :  { %v3579_v63 = vadd.f32 %v10239_v37, %v3578_v54  ;;  %v5705_v39 = vsel %vm5206_vm2, %v4926_v48, 0.0  ;;  %v4929_v42 = vmax.f32 %v3587_v4, 0.0  ;;  %v6199_v5 = vadd.f32 %v6198_v43, %v6197_v10 }
 0x2a6   :  { %v6334_v7 = vpack.c.bf16 %v6318_v19, %v6318_v19  ;;  %v5704_v9 = vadd.f32 %v5703_v56, %v5702_v61  ;;  %v7497_v59 = vpop.f32.mrf.mxu0  ;;  %v5160_v52 = vmax.f32 %v4512_v46, 0.0  ;;  %v4515_v4 = vadd.f32 %v10239_v37, %v10386_v62 }
 0x2a7   :  { %v4927_v53 = vmax.f32 %v3579_v63, 0.0  ;;  %v3600_v19 = vadd.f32 %v10239_v37, %v7497_v59  ;;  %v6201_v61 = vadd.f32 %v6200_v11, %v6199_v5  ;;  %v6204_v50 = vsel %vm5206_vm2, %v5158_v33, 0.0  ;;  %v10588_v11 = vpop.f32.mrf.mxu1 }
 0x2a8   :  { %v6377_v40 = vunpack.c.l.b16 %v6334_v7  ;;  %v5706_v51 = vadd.f32 %v5705_v39, %v5704_v9  ;;  %v3591_v22 = vpop.f32.mrf.mxu0  ;;  %v4507_v63 = vadd.f32 %v10239_v37, %v10391_v16  ;;  %v5161_v9 = vmax.f32 %v4515_v4, 0.0  ;;  %v10604_v4 = vld [vmem:[%s10944_s2] ss:$0 sm:$0xff] }
 0x2a9   :  { %v5707_v21 = vsel %vm5206_vm2, %v4927_v53, 0.0  ;;  %v3592_v58 = vadd.f32 %v10239_v37, %v3591_v22  ;;  %v6203_v7 = vadd.f32 %v6202_v15, %v6201_v61  ;;  %v5711_v62 = vsel %vm5206_vm2, %v4929_v42, 0.0 }
 0x2aa   :  { %v10578_v48 = vsel %vm6397_vm8, %v6377_v40, %v10352_v8  ;;  %v5708_v54 = vadd.f32 %v5707_v21, %v5706_v51  ;;  %v7498_v10 = vpop.f32.mrf.mxu0  ;;  %v4528_v8 = vadd.f32 %v10239_v37, %v10400_v13  ;;  %v6208_v39 = vsel %vm5206_vm2, %v5160_v52, 0.0 }
 0x2ab   :  { %v4930_v56 = vmax.f32 %v3592_v58, 0.0  ;;  %v3603_v49 = vadd.f32 %v10239_v37, %v7498_v10  ;;  %v5159_v43 = vmax.f32 %v4507_v63, 0.0  ;;  %v4932_v33 = vmax.f32 %v3600_v19, 0.0 }
 0x2ac   :  { %v5710_v46 = vadd.f32 %v5709_v1, %v5708_v54  ;;  %v3594_v59 = vpop.f32.mrf.mxu0  ;;  %v6205_v40 = vadd.f32 %v6204_v50, %v6203_v7  ;;  %v6210_v15 = vsel %vm5206_vm2, %v5161_v9, 0.0  ;;  %v5164_v42 = vmax.f32 %v4528_v8, 0.0  ;;  %v10598_v54 = vpop.f32.mrf.mxu1 }
 0x2ad   :  { %v3595_v53 = vadd.f32 %v10239_v37, %v3594_v59  ;;  %v5713_v16 = vsel %vm5206_vm2, %v4930_v56, 0.0  ;;  %v4933_v5 = vmax.f32 %v3603_v49, 0.0  ;;  %v6206_v13 = vsel %vm5206_vm2, %v5159_v43, 0.0 }
 0x2ae   :  { %v5712_v51 = vadd.f32 %v5711_v62, %v5710_v46  ;;  %v7501_v1 = vpop.f32.mrf.mxu0  ;;  %v6207_v58 = vadd.f32 %v6206_v13, %v6205_v40  ;;  %v4520_v52 = vadd.f32 %v10239_v37, %v10406_v3  ;;  %v4531_v56 = vadd.f32 %v10604_v4, %v10414_v38  ;;  %v10615_v38 = vpop.f32.mrf.mxu1 }
 0x2af   :  { %v4931_v22 = vmax.f32 %v3595_v53, 0.0  ;;  %v3616_v10 = vadd.f32 %v10604_v4, %v7501_v1  ;;  %v4523_v46 = vadd.f32 %v10604_v4, %v10418_v12  ;;  %v5717_v7 = vsel %vm5206_vm2, %v4932_v33, 0.0 }
 0x2b0   :  { %v5714_v21 = vadd.f32 %v5713_v16, %v5712_v51  ;;  %v3607_v61 = vpop.f32.mrf.mxu0  ;;  %v6209_v49 = vadd.f32 %v6208_v39, %v6207_v58  ;;  %v5162_v37 = vmax.f32 %v4520_v52, 0.0  ;;  %v5165_v59 = vmax.f32 %v4531_v56, 0.0 }
 0x2b1   :  { %v5715_v19 = vsel %vm5206_vm2, %v4931_v22, 0.0  ;;  %v3608_v50 = vadd.f32 %v10604_v4, %v3607_v61  ;;  %v5163_v40 = vmax.f32 %v4523_v46, 0.0  ;;  %v5719_v39 = vsel %vm5206_vm2, %v4933_v5, 0.0 }
 0x2b2   :  { %v5716_v63 = vadd.f32 %v5715_v19, %v5714_v21  ;;  %v7502_v3 = vpop.f32.mrf.mxu0  ;;  %v6211_v43 = vadd.f32 %v6210_v15, %v6209_v49  ;;  %v6212_v53 = vsel %vm5206_vm2, %v5162_v37, 0.0  ;;  %v6216_v16 = vsel %vm5206_vm2, %v5164_v42, 0.0  ;;  %v10628_v49 = vpop.f32.mrf.mxu1 }
 0x2b3   :  { %v4934_v9 = vmax.f32 %v3608_v50, 0.0  ;;  %v3619_v8 = vadd.f32 %v10604_v4, %v7502_v3  ;;  %v4936_v1 = vmax.f32 %v3616_v10, 0.0  ;;  %v6214_v21 = vsel %vm5206_vm2, %v5163_v40, 0.0 }
 0x2b4   :  { %v5718_v62 = vadd.f32 %v5717_v7, %v5716_v63  ;;  %v3610_v51 = vpop.f32.mrf.mxu0  ;;  %v6213_v33 = vadd.f32 %v6212_v53, %v6211_v43  ;;  %v6218_v58 = vsel %vm5206_vm2, %v5165_v59, 0.0  ;;  %v4544_v61 = vadd.f32 %v10604_v4, %v10426_v31 }
 0x2b5   :  { %v3611_v12 = vadd.f32 %v10604_v4, %v3610_v51  ;;  %v5721_v22 = vsel %vm5206_vm2, %v4934_v9, 0.0  ;;  %v4536_v5 = vadd.f32 %v10604_v4, %v10432_v32  ;;  %v4937_v19 = vmax.f32 %v3619_v8, 0.0 }
 0x2b6   :  { %v5720_v13 = vadd.f32 %v5719_v39, %v5718_v62  ;;  %v7505_v15 = vpop.f32.mrf.mxu0  ;;  %v6215_v10 = vadd.f32 %v6214_v21, %v6213_v33  ;;  %v4547_v46 = vadd.f32 %v10604_v4, %v10441_v27  ;;  %v10636_v31 = vadd.f32 %v10604_v4, %v8549_v14  ;;  %v10643_v14 = vpop.f32.mrf.mxu1 }
 0x2b7   :  { %v4935_v52 = vmax.f32 %v3611_v12, 0.0  ;;  %v3632_v50 = vadd.f32 %v10604_v4, %v7505_v15  ;;  %v5166_v37 = vmax.f32 %v4536_v5, 0.0  ;;  %v5725_v32 = vsel %vm5206_vm2, %v4936_v1, 0.0 }
 0x2b8   :  { %v5722_v42 = vadd.f32 %v5721_v22, %v5720_v13  ;;  %v3623_v56 = vpop.f32.mrf.mxu0  ;;  %v6217_v7 = vadd.f32 %v6216_v16, %v6215_v10  ;;  %v5168_v8 = vmax.f32 %v4544_v61, 0.0  ;;  %v4539_v27 = vadd.f32 %v10604_v4, %v10449_v28 }
 0x2b9   :  { %v5723_v63 = vsel %vm5206_vm2, %v4935_v52, 0.0  ;;  %v3624_v3 = vadd.f32 %v10604_v4, %v3623_v56  ;;  %v6220_v62 = vsel %vm5206_vm2, %v5166_v37, 0.0  ;;  %v4940_v51 = vmax.f32 %v3632_v50, 0.0 }
 0x2ba   :  { %v5724_v9 = vadd.f32 %v5723_v63, %v5722_v42  ;;  %v7506_v59 = vpop.f32.mrf.mxu0  ;;  %v6219_v39 = vadd.f32 %v6218_v58, %v6217_v7  ;;  %v5727_v1 = vsel %vm5206_vm2, %v4937_v19, 0.0  ;;  %v5169_v16 = vmax.f32 %v4547_v46, 0.0  ;;  %v10655_v63 = vpop.f32.mrf.mxu1 }
 0x2bb   :  { %v4938_v43 = vmax.f32 %v3624_v3, 0.0  ;;  %v3635_v53 = vadd.f32 %v10604_v4, %v7506_v59  ;;  %v4560_v13 = vadd.f32 %v10604_v4, %v10457_v2  ;;  %v5167_v15 = vmax.f32 %v4539_v27, 0.0 }
 0x2bc   :  { %v5726_v40 = vadd.f32 %v5725_v32, %v5724_v9  ;;  %v3626_v12 = vpop.f32.mrf.mxu0  ;;  %v6221_v22 = vadd.f32 %v6220_v62, %v6219_v39  ;;  %v4552_v58 = vadd.f32 %v10604_v4, %v10463_v47  ;;  %v6224_v28 = vsel %vm5206_vm2, %v5168_v8, 0.0 }
 0x2bd   :  { %v3627_v33 = vadd.f32 %v10604_v4, %v3626_v12  ;;  %v5729_v61 = vsel %vm5206_vm2, %v4938_v43, 0.0  ;;  %v4941_v5 = vmax.f32 %v3635_v53, 0.0  ;;  %v5733_v19 = vsel %vm5206_vm2, %v4940_v51, 0.0 }
 0x2be   :  { %v5728_v21 = vadd.f32 %v5727_v1, %v5726_v40  ;;  %v7509_v52 = vpop.f32.mrf.mxu0  ;;  %v6222_v50 = vsel %vm5206_vm2, %v5167_v15, 0.0  ;;  %v5170_v56 = vmax.f32 %v4552_v58, 0.0  ;;  %v6226_v37 = vsel %vm5206_vm2, %v5169_v16, 0.0  ;;  %v10670_v16 = vpop.f32.mrf.mxu1 }
 0x2bf   :  { %v4939_v42 = vmax.f32 %v3627_v33, 0.0  ;;  %v6223_v3 = vadd.f32 %v6222_v50, %v6221_v22  ;;  %v5172_v46 = vmax.f32 %v4560_v13, 0.0  ;;  %v3648_v7 = vadd.f32 %v10604_v4, %v7509_v52 }
 0x2c0   :  { %v5730_v10 = vadd.f32 %v5729_v61, %v5728_v21  ;;  %v3639_v2 = vpop.f32.mrf.mxu0  ;;  %v4563_v59 = vadd.f32 %v10604_v4, %v10470_v18  ;;  %v5735_v62 = vsel %vm5206_vm2, %v4941_v5, 0.0  ;;  %v6228_v53 = vsel %vm5206_vm2, %v5170_v56, 0.0 }
 0x2c1   :  { %v5731_v47 = vsel %vm5206_vm2, %v4939_v42, 0.0  ;;  %v3640_v9 = vadd.f32 %v10604_v4, %v3639_v2  ;;  %v6225_v43 = vadd.f32 %v6224_v28, %v6223_v3  ;;  %v4555_v40 = vadd.f32 %v10604_v4, %v10478_v0  ;;  %v10678_v2 = vpop.f32.mrf.mxu1 }
 0x2c2   :  { %v5732_v32 = vadd.f32 %v5731_v47, %v5730_v10  ;;  %v7510_v8 = vpop.f32.mrf.mxu0  ;;  %v4576_v1 = vadd.f32 %v10604_v4, %v10489_v25  ;;  %v6232_v18 = vsel %vm5206_vm2, %v5172_v46, 0.0  ;;  %v4944_v21 = vmax.f32 %v3648_v7, 0.0 }
 0x2c3   :  { %v4942_v39 = vmax.f32 %v3640_v9, 0.0  ;;  %v3651_v27 = vadd.f32 %v10604_v4, %v7510_v8  ;;  %v6227_v33 = vadd.f32 %v6226_v37, %v6225_v43  ;;  %v5171_v13 = vmax.f32 %v4555_v40, 0.0 }
 0x2c4   :  { %v5734_v51 = vadd.f32 %v5733_v19, %v5732_v32  ;;  %v3642_v12 = vpop.f32.mrf.mxu0  ;;  %v5173_v52 = vmax.f32 %v4563_v59, 0.0  ;;  %v4568_v58 = vadd.f32 %v10604_v4, %v10494_v17  ;;  %v5176_v10 = vmax.f32 %v4576_v1, 0.0 }
 0x2c5   :  { %v3643_v22 = vadd.f32 %v10604_v4, %v3642_v12  ;;  %v6229_v28 = vadd.f32 %v6228_v53, %v6227_v33  ;;  %v5737_v61 = vsel %vm5206_vm2, %v4942_v39, 0.0  ;;  %v6230_v25 = vsel %vm5206_vm2, %v5171_v13, 0.0  ;;  %v10695_v12 = vpop.f32.mrf.mxu1 }
 0x2c6   :  { %v5736_v15 = vadd.f32 %v5735_v62, %v5734_v51  ;;  %v7513_v0 = vpop.f32.mrf.mxu0  ;;  %v4945_v19 = vmax.f32 %v3651_v27, 0.0  ;;  %v5174_v50 = vmax.f32 %v4568_v58, 0.0  ;;  %v4579_v17 = vadd.f32 %v10604_v4, %v10504_v30 }
 0x2c7   :  { %v4943_v5 = vmax.f32 %v3643_v22, 0.0  ;;  %v6231_v37 = vadd.f32 %v6230_v25, %v6229_v28  ;;  %v10978_v46 = vmax.f32 %v10482_v45, 0.0  ;;  %v6234_v7 = vsel %vm5206_vm2, %v5173_v52, 0.0 }
 0x2c8   :  { %v5738_v42 = vadd.f32 %v5737_v61, %v5736_v15  ;;  %v3655_v56 = vpop.f32.mrf.mxu0  ;;  %v4571_v8 = vadd.f32 %v10604_v4, %v10513_v6  ;;  %v5741_v62 = vsel %vm5206_vm2, %v4944_v21, 0.0  ;;  %v3664_v53 = vadd.f32 %v10604_v4, %v7513_v0 }
 0x2c9   :  { %v5739_v3 = vsel %vm5206_vm2, %v4943_v5, 0.0  ;;  %v3656_v47 = vadd.f32 %v10604_v4, %v3655_v56  ;;  %v10687_v32 = vsel %vm5206_vm2, %v10978_v46, 0.0  ;;  %v6233_v43 = vadd.f32 %v6232_v18, %v6231_v37 }
 0x2ca   :  { %v5740_v9 = vadd.f32 %v5739_v3, %v5738_v42  ;;  %v7514_v59 = vpop.f32.mrf.mxu0  ;;  %v6242_v30 = vsel %vm5206_vm2, %v5174_v50, 0.0  ;;  %v5177_v45 = vmax.f32 %v4579_v17, 0.0  ;;  %v5175_v39 = vmax.f32 %v4571_v8, 0.0 }
 0x2cb   :  { %v4946_v40 = vmax.f32 %v3656_v47, 0.0  ;;  %v4957_v1 = vmax.f32 %v10508_v60, 0.0  ;;  %v5743_v33 = vsel %vm5206_vm2, %v4945_v19, 0.0  ;;  %v10699_v13 = vadd.f32 %v6234_v7, %v6233_v43 }
 0x2cc   :  { %v5742_v51 = vadd.f32 %v5741_v62, %v5740_v9  ;;  %v3658_v27 = vpop.f32.mrf.mxu0  ;;  %v6245_v6 = vsel %vm5206_vm2, %v5176_v10, 0.0  ;;  %v3667_v22 = vadd.f32 %v10604_v4, %v7514_v59  ;;  %v6243_v21 = vsel %vm5206_vm2, %v5175_v39, 0.0  ;;  %v10710_v10 = vpop.f32.mrf.mxu1 }
 0x2cd   :  { %v3659_v15 = vadd.f32 %v10604_v4, %v3658_v27  ;;  %v4955_v0 = vmax.f32 %v10636_v31, 0.0  ;;  %v4948_v58 = vmax.f32 %v3664_v53, 0.0  ;;  %v5745_v28 = vsel %vm5206_vm2, %v4946_v40, 0.0 }
 0x2ce   :  { %v5744_v18 = vadd.f32 %v5743_v33, %v5742_v51  ;;  %v7517_v52 = vpop.f32.mrf.mxu0  ;;  %v6244_v60 = vadd.f32 %v6243_v21, %v6242_v30  ;;  %v6247_v25 = vsel %vm5206_vm2, %v5177_v45, 0.0  ;;  %v4584_v42 = vadd.f32 %v10604_v4, %v10526_v41  ;;  %v10735_v40 = vpop.f32.mrf.mxu1 }
 0x2cf   :  { %v4947_v5 = vmax.f32 %v3659_v15, 0.0  ;;  %v10713_v50 = vsel %vm5206_vm2, %v4957_v1, 0.0  ;;  %v4592_v31 = vadd.f32 %v10604_v4, %v10520_v35  ;;  %v10720_v3 = vadd.f32 %v10604_v4, %v8555_v20 }
 0x2d0   :  { %v5746_v61 = vadd.f32 %v5745_v28, %v5744_v18  ;;  %v3671_v19 = vpop.f32.mrf.mxu0  ;;  %v6246_v56 = vadd.f32 %v6245_v6, %v6244_v60  ;;  %v4949_v47 = vmax.f32 %v3667_v22, 0.0  ;;  %v5178_v41 = vmax.f32 %v4584_v42, 0.0 }
 0x2d1   :  { %v3672_v37 = vadd.f32 %v10604_v4, %v3671_v19  ;;  %v5747_v17 = vsel %vm5206_vm2, %v4947_v5, 0.0  ;;  %v10724_v7 = vsel %vm5206_vm2, %v4955_v0, 0.0  ;;  %v4595_v8 = vadd.f32 %v10604_v4, %v10534_v57  ;;  %v10750_v0 = vpop.f32.mrf.mxu1 }
 0x2d2   :  { %v7518_v46 = vpop.f32.mrf.mxu0  ;;  %v5748_v9 = vadd.f32 %v5747_v17, %v5746_v61  ;;  %v6248_v59 = vadd.f32 %v6247_v25, %v6246_v56  ;;  %v10730_v35 = vadd.f32 %v10604_v4, %v8561_v26  ;;  %v5749_v20 = vsel %vm5206_vm2, %v4948_v58, 0.0 }
 0x2d3   :  { %v3680_v62 = vadd.f32 %v10604_v4, %v7517_v52  ;;  %v6249_v43 = vsel %vm5206_vm2, %v5178_v41, 0.0  ;;  %v5180_v30 = vmax.f32 %v4592_v31, 0.0  ;;  %v4950_v45 = vmax.f32 %v3672_v37, 0.0  ;;  %v10762_v41 = vpop.f32.mrf.mxu1 }
 0x2d4   :  { %v3674_v53 = vpop.f32.mrf.mxu0  ;;  %v5750_v51 = vadd.f32 %v5749_v20, %v5748_v9  ;;  %v4587_v39 = vadd.f32 %v10604_v4, %v10539_v24  ;;  %v5751_v57 = vsel %vm5206_vm2, %v4949_v47, 0.0  ;;  %v6250_v27 = vadd.f32 %v6249_v43, %v6248_v59 }
 0x2d5   :  { %v3683_v26 = vadd.f32 %v10604_v4, %v7518_v46  ;;  %v3675_v1 = vadd.f32 %v10604_v4, %v3674_v53  ;;  %v10744_v33 = vadd.f32 %v10604_v4, %v8568_v34  ;;  %v5181_v18 = vmax.f32 %v4595_v8, 0.0 }
 0x2d6   :  { %v5752_v6 = vadd.f32 %v5751_v57, %v5750_v51  ;;  %v5179_v22 = vmax.f32 %v4587_v39, 0.0  ;;  %v4952_v21 = vmax.f32 %v3680_v62, 0.0  ;;  %v4608_v52 = vadd.f32 %v10604_v4, %v10549_v36 }
 0x2d7   :  { %v4951_v15 = vmax.f32 %v3675_v1, 0.0  ;;  %v4600_v24 = vadd.f32 %v10604_v4, %v10561_v29  ;;  %v6253_v28 = vsel %vm5206_vm2, %v5180_v30, 0.0  ;;  %v5759_v60 = vsel %vm5206_vm2, %v4950_v45, 0.0 }
 0x2d8   :  { %v5753_v58 = vrot.slane %v5752_v6, 4  ;;  %v6251_v34 = vsel %vm5206_vm2, %v5179_v22, 0.0  ;;  %v4953_v61 = vmax.f32 %v3683_v26, 0.0  ;;  %v6255_v36 = vsel %vm5206_vm2, %v5181_v18, 0.0 }
 0x2d9   :  { %v6252_v25 = vadd.f32 %v6251_v34, %v6250_v27  ;;  %v5760_v5 = vsel %vm5206_vm2, %v4951_v15, 0.0  ;;  %v5182_v42 = vmax.f32 %v4600_v24, 0.0  ;;  %v4611_v29 = vadd.f32 %v10604_v4, %v10571_v23  ;;  %v10775_v27 = vpop.f32.mrf.mxu1 }
 0x2da   :  { %v5754_v19 = vadd.f32 %v5753_v58, %v5752_v6  ;;  %v5761_v56 = vadd.f32 %v5760_v5, %v5759_v60  ;;  %v5762_v31 = vsel %vm5206_vm2, %v4952_v21, 0.0  ;;  %v5184_v47 = vmax.f32 %v4608_v52, 0.0 }
 0x2db   :  { %v6254_v37 = vadd.f32 %v6253_v28, %v6252_v25  ;;  %v4603_v17 = vadd.f32 %v10604_v4, %v10588_v11  ;;  %v4958_v46 = vmax.f32 %v10730_v35, 0.0  ;;  %v6257_v8 = vsel %vm5206_vm2, %v5182_v42, 0.0  ;;  %v10980_v25 = vld [vmem:[#allocation3_spill] sm:$0xff] }
 0x2dc   :  { %v5755_v9 = vrot.slane %v5754_v19, 2  ;;  %v5763_v59 = vadd.f32 %v5762_v31, %v5761_v56  ;;  %v5764_v20 = vsel %vm5206_vm2, %v4953_v61, 0.0  ;;  %v4616_v23 = vadd.f32 %v10604_v4, %v10615_v38  ;;  %v10979_v61 = vld [vmem:[#allocation2_spill] sm:$0xff] }
 0x2dd   :  { %v6256_v62 = vadd.f32 %v6255_v36, %v6254_v37  ;;  %v5183_v43 = vmax.f32 %v4603_v17, 0.0  ;;  %v3707_v53 = vadd.f32 %v10604_v4, %v8581_v44  ;;  %v5185_v30 = vmax.f32 %v4611_v29, 0.0 }
 0x2de   :  { %v5756_v51 = vadd.f32 %v5755_v9, %v5754_v19  ;;  %v5765_v11 = vadd.f32 %v5764_v20, %v5763_v59  ;;  %v6261_v45 = vsel %vm5206_vm2, %v5184_v47, 0.0  ;;  %v4624_v57 = vadd.f32 %v10604_v4, %v10598_v54 }
 0x2df   :  { %v6258_v35 = vadd.f32 %v6257_v8, %v6256_v62  ;;  %v6259_v39 = vsel %vm5206_vm2, %v5183_v43, 0.0  ;;  %v5186_v38 = vmax.f32 %v4616_v23, 0.0  ;;  %v4619_v44 = vadd.f32 %v10604_v4, %v10643_v14  ;;  %v10787_v14 = vpop.f32.mrf.mxu1  ;;  %v10981_v8 = vld [vmem:[#allocation5_spill] sm:$0xff] }
 0x2e0   :  { %v5757_v26 = vrot.slane %v5756_v51, 1  ;;  %v5767_v1 = vadd.f32 %v10687_v32, %v5765_v11  ;;  %v4960_v6 = vmax.f32 %v10720_v3, 0.0  ;;  %v4961_v18 = vmax.f32 %v10744_v33, 0.0 }
 0x2e1   :  { %v6260_v22 = vadd.f32 %v6259_v39, %v6258_v35  ;;  %v4627_v21 = vadd.f32 %v10604_v4, %v10628_v49  ;;  %v6263_v52 = vsel %vm5206_vm2, %v5185_v30, 0.0  ;;  %v5187_v24 = vmax.f32 %v4619_v44, 0.0  ;;  %v10803_v47 = vpop.f32.mrf.mxu1  ;;  %v10982_v30 = vld [vmem:[#allocation4_spill] sm:$0xff] }
 0x2e2   :  { %v5758_v15 = vadd.f32 %v5757_v26, %v5756_v51  ;;  %v5769_v54 = vadd.f32 %v10724_v7, %v5767_v1  ;;  %v5774_v32 = vsel %vm5206_vm2, %v4958_v46, 0.0  ;;  %v4959_v58 = vmax.f32 %v3707_v53, 0.0 }
 0x2e3   :  { %v6262_v28 = vadd.f32 %v6261_v45, %v6260_v22  ;;  %v5188_v60 = vmax.f32 %v4624_v57, 0.0  ;;  %v6265_v34 = vsel %vm5206_vm2, %v5186_v38, 0.0  ;;  %v4632_v49 = vadd.f32 %v10604_v4, %v10670_v16  ;;  %v4666_v39 = vpop.f32.mrf.mxu1 }
 0x2e4   :  { %v6319_v3 = vmul.f32 0.00390625, %v5758_v15  ;;  %v5771_v33 = vadd.f32 %v10487_v55, %v5769_v54  ;;  %v3728_v7 = vadd.f32 %v10604_v4, %v10979_v61  ;;  %v3720_v5 = vadd.f32 %v10604_v4, %v10980_v25 }
 0x2e5   :  { %v6264_v42 = vadd.f32 %v6263_v52, %v6262_v28  ;;  %v5189_v19 = vmax.f32 %v4627_v21, 0.0  ;;  %v6267_v29 = vsel %vm5206_vm2, %v5187_v24, 0.0  ;;  %v4635_v55 = vadd.f32 %v10604_v4, %v10695_v12  ;;  %v10983_v52 = vld [vmem:[#allocation6_spill] sm:$0xff]  ;;  %v10831_v28 = vpop.f32.mrf.mxu1 }
 0x2e6   :  { %v6335_v36 = vpack.c.bf16 %v6319_v3, %v6319_v3  ;;  %v5773_v56 = vadd.f32 %v10713_v50, %v5771_v33  ;;  %v5776_v31 = vsel %vm5206_vm2, %v4959_v58, 0.0  ;;  %v6269_v16 = vsel %vm5206_vm2, %v5188_v60, 0.0 }
 0x2e7   :  { %v6266_v37 = vadd.f32 %v6265_v34, %v6264_v42  ;;  %v4640_v9 = vadd.f32 %v10604_v4, %v10655_v63  ;;  %v5190_v59 = vmax.f32 %v4632_v49, 0.0  ;;  %v4962_v50 = vmax.f32 %v3720_v5, 0.0 }
 0x2e8   :  { %v6378_v17 = vunpack.c.l.b16 %v6335_v36  ;;  %v5775_v46 = vadd.f32 %v5774_v32, %v5773_v56  ;;  %v3723_v20 = vadd.f32 %v10604_v4, %v10981_v8  ;;  %v4643_v12 = vadd.f32 %v10604_v4, %v10678_v2  ;;  %v10984_v32 = vld [vmem:[#allocation7_spill] sm:$0xff] }
 0x2e9   :  { %v6268_v62 = vadd.f32 %v6267_v29, %v6266_v37  ;;  %v6271_v53 = vsel %vm5206_vm2, %v5189_v19, 0.0  ;;  %v5191_v51 = vmax.f32 %v4635_v55, 0.0  ;;  %v5778_v11 = vsel %vm5206_vm2, %v4960_v6, 0.0  ;;  %v10986_v29 = vld [vmem:[#allocation8_spill] sm:$0xff] }
 0x2ea   :  { %v10813_v43 = vsel %vm6399_vm9, %v6378_v17, %v10578_v48  ;;  %v5777_v23 = vadd.f32 %v5776_v31, %v5775_v46  ;;  %v5780_v63 = vsel %vm5206_vm2, %v4961_v18, 0.0  ;;  %v3731_v45 = vadd.f32 %v10604_v4, %v10982_v30  ;;  %v4679_v31 = vpop.f32.mrf.mxu1 }
 0x2eb   :  { %v6270_v35 = vadd.f32 %v6269_v16, %v6268_v62  ;;  %v5192_v26 = vmax.f32 %v4640_v9, 0.0  ;;  %v6273_v2 = vsel %vm5206_vm2, %v5190_v59, 0.0  ;;  %v4648_v48 = vadd.f32 %v10604_v4, %v10735_v40 }
 0x2ec   :  { %v5779_v57 = vadd.f32 %v5778_v11, %v5777_v23  ;;  %v4964_v1 = vmax.f32 %v3728_v7, 0.0  ;;  %v4963_v38 = vmax.f32 %v3723_v20, 0.0  ;;  %v5193_v22 = vmax.f32 %v4643_v12, 0.0  ;;  %v10988_v11 = vld [vmem:[#allocation11_spill] sm:$0xff] }
 0x2ed   :  { %v6272_v44 = vadd.f32 %v6271_v53, %v6270_v35  ;;  %v5782_v6 = vsel %vm5206_vm2, %v4962_v50, 0.0  ;;  %v6275_v18 = vsel %vm5206_vm2, %v5191_v51, 0.0  ;;  %v4651_v15 = vadd.f32 %v10604_v4, %v10762_v41  ;;  %v10985_v41 = vld [vmem:[#allocation9_spill] sm:$0xff] }
 0x2ee   :  { %v5781_v21 = vadd.f32 %v5780_v63, %v5779_v57  ;;  %v4965_v54 = vmax.f32 %v3731_v45, 0.0  ;;  %v3744_v24 = vadd.f32 %v10604_v4, %v10983_v52  ;;  %v3736_v58 = vadd.f32 %v10604_v4, %v10984_v32  ;;  %v7770_v45 = vpop.f32.mrf.mxu1 }
 0x2ef   :  { %v6274_v40 = vadd.f32 %v6273_v2, %v6272_v44  ;;  %v6277_v3 = vsel %vm5206_vm2, %v5192_v26, 0.0  ;;  %v4656_v33 = vadd.f32 %v10604_v4, %v10710_v10  ;;  %v5194_v34 = vmax.f32 %v4648_v48, 0.0  ;;  %v10989_v48 = vld [vmem:[#allocation10_spill] sm:$0xff] }
 0x2f0   :  { %v5783_v60 = vadd.f32 %v5782_v6, %v5781_v21  ;;  %v5784_v49 = vsel %vm5206_vm2, %v4963_v38, 0.0  ;;  %v3739_v61 = vadd.f32 %v10604_v4, %v10985_v41  ;;  %v6279_v7 = vsel %vm5206_vm2, %v5193_v22, 0.0 }
 0x2f1   :  { %v6276_v25 = vadd.f32 %v6275_v18, %v6274_v40  ;;  %v4659_v42 = vadd.f32 %v10604_v4, %v10750_v0  ;;  %v5195_v19 = vmax.f32 %v4651_v15, 0.0  ;;  %v5786_v36 = vsel %vm5206_vm2, %v4964_v1, 0.0  ;;  %v10990_v1 = vld [vmem:[#allocation13_spill] sm:$0xff] }
 0x2f2   :  { %v5785_v5 = vadd.f32 %v5784_v49, %v5783_v60  ;;  %v4966_v56 = vmax.f32 %v3736_v58, 0.0  ;;  %v3747_v10 = vadd.f32 %v10604_v4, %v10986_v29  ;;  %v10987_v16 = vmov 0.0  }
 0x2f3   :  { %v6278_v55 = vadd.f32 %v6277_v3, %v6276_v25  ;;  %7775 = vmatprep.mubr.msk.bf16.mxu1 %vm8056_vm10, %v10987_v16  ;;  %v5196_v17 = vmax.f32 %v4656_v33, 0.0  ;;  %v6281_v46 = vsel %vm5206_vm2, %v5194_v34, 0.0  ;;  %v4664_v9 = vadd.f32 %v10604_v4, %v10787_v14  ;;  %v10991_v33 = vld [vmem:[#allocation12_spill] sm:$0xff] }
 0x2f4   :  { %v5787_v37 = vadd.f32 %v5786_v36, %v5785_v5  ;;  %v5788_v0 = vsel %vm5206_vm2, %v4965_v54, 0.0  ;;  %v4968_v59 = vmax.f32 %v3744_v24, 0.0  ;;  %v4967_v50 = vmax.f32 %v3739_v61, 0.0  ;;  %v4682_v24 = vpop.f32.mrf.mxu1  ;;  %v10993_v36 = vld [vmem:[#allocation15_spill] sm:$0xff] }
 0x2f5   :  { %v6280_v8 = vadd.f32 %v6279_v7, %v6278_v55  ;;  %v5197_v62 = vmax.f32 %v4659_v42, 0.0  ;;  %v6283_v12 = vsel %vm5206_vm2, %v5195_v19, 0.0  ;;  %v4667_v23 = vadd.f32 %v10604_v4, %v4666_v39  ;;  %v10992_v42 = vld [vmem:[#allocation14_spill] sm:$0xff] }
 0x2f6   :  { %v5789_v20 = vadd.f32 %v5788_v0, %v5787_v37  ;;  %v5790_v53 = vsel %vm5206_vm2, %v4966_v56, 0.0  ;;  %v4969_v51 = vmax.f32 %v3747_v10, 0.0  ;;  %v3752_v63 = vadd.f32 %v10604_v4, %v10988_v11 }
 0x2f7   :  { %v6282_v30 = vadd.f32 %v6281_v46, %v6280_v8  ;;  %v6285_v35 = vsel %vm5206_vm2, %v5196_v17, 0.0  ;;  %v4672_v57 = vadd.f32 %v10604_v4, %v10775_v27  ;;  %v5198_v26 = vmax.f32 %v4664_v9, 0.0  ;;  %v10994_v46 = vld [vmem:[#allocation17_spill] sm:$0xff] }
 0x2f8   :  { %v5791_v14 = vadd.f32 %v5790_v53, %v5789_v20  ;;  %v5792_v2 = vsel %vm5206_vm2, %v4967_v50, 0.0  ;;  %v3760_v39 = vadd.f32 %v10604_v4, %v10989_v48  ;;  %v3755_v38 = vadd.f32 %v10604_v4, %v10990_v1  ;;  %v10996_v1 = vld [vmem:[#allocation19_spill] sm:$0xff] }
 0x2f9   :  { %v6284_v44 = vadd.f32 %v6283_v12, %v6282_v30  ;;  %v6287_v6 = vsel %vm5206_vm2, %v5197_v62, 0.0  ;;  %v4675_v21 = vadd.f32 %v10604_v4, %v10803_v47  ;;  %v5199_v18 = vmax.f32 %v4667_v23, 0.0  ;;  %v10995_v23 = vld [vmem:[#allocation16_spill] sm:$0xff] }
 0x2fa   :  { %v5793_v22 = vadd.f32 %v5792_v2, %v5791_v14  ;;  %v5794_v15 = vsel %vm5206_vm2, %v4968_v59, 0.0  ;;  %v5796_v27 = vsel %vm5206_vm2, %v4969_v51, 0.0  ;;  %v4970_v54 = vmax.f32 %v3752_v63, 0.0 }
 0x2fb   :  { %v6286_v52 = vadd.f32 %v6285_v35, %v6284_v44  ;;  %v5200_v58 = vmax.f32 %v4672_v57, 0.0  ;;  %v6289_v40 = vsel %vm5206_vm2, %v5198_v26, 0.0  ;;  %v4680_v60 = vadd.f32 %v10604_v4, %v4679_v31 }
 0x2fc   :  { %v5795_v32 = vadd.f32 %v5794_v15, %v5793_v22  ;;  %v4972_v3 = vmax.f32 %v3760_v39, 0.0  ;;  %v3763_v34 = vadd.f32 %v10604_v4, %v10991_v33  ;;  %v4971_v49 = vmax.f32 %v3755_v38, 0.0 }
 0x2fd   :  { %v6288_v47 = vadd.f32 %v6287_v6, %v6286_v52  ;;  %v5201_v61 = vmax.f32 %v4675_v21, 0.0  ;;  %v6291_v7 = vsel %vm5206_vm2, %v5199_v18, 0.0  ;;  %v4683_v25 = vadd.f32 %v10604_v4, %v4682_v24  ;;  %v10997_v6 = vld [vmem:[#allocation22_spill] sm:$0xff]  ;;  %v10999_v24 = vld [vmem:[#allocation23_spill] sm:$0xff] }
 0x2fe   :  { %v5797_v41 = vadd.f32 %v5796_v27, %v5795_v32  ;;  %v5798_v5 = vsel %vm5206_vm2, %v4970_v54, 0.0  ;;  %v3776_v19 = vadd.f32 %v10604_v4, %v10992_v42  ;;  %v3768_v56 = vadd.f32 %v10604_v4, %v10993_v36  ;;  %v10998_v54 = vld [vmem:[#allocation21_spill] sm:$0xff]  ;;  %v11004_v36 = vld [vmem:[#allocation26_spill] sm:$0xff] }
 0x2ff   :  { %v6290_v29 = vadd.f32 %v6289_v40, %v6288_v47  ;;  %v6293_v55 = vsel %vm5206_vm2, %v5200_v58, 0.0  ;;  %v4688_v31 = vadd.f32 %v10604_v4, %v10831_v28  ;;  %v5202_v16 = vmax.f32 %v4680_v60, 0.0  ;;  %v11000_v40 = vld [vmem:[#allocation18_spill] sm:$0xff] }
 0x300   :  { %v5799_v10 = vadd.f32 %v5798_v5, %v5797_v41  ;;  %v4973_v37 = vmax.f32 %v3763_v34, 0.0  ;;  %v5800_v17 = vsel %vm5206_vm2, %v4971_v49, 0.0  ;;  %v3771_v9 = vadd.f32 %v10604_v4, %v10994_v46  ;;  %v11003_v5 = vld [vmem:[#allocation20_spill] sm:$0xff] }
 0x301   :  { %v6292_v0 = vadd.f32 %v6291_v7, %v6290_v29  ;;  %v6295_v50 = vsel %vm5206_vm2, %v5201_v61, 0.0  ;;  %v4691_v8 = vadd.f32 %v10604_v4, %v7770_v45  ;;  %v5203_v20 = vmax.f32 %v4683_v25, 0.0  ;;  %v11002_v61 = vld [vmem:[#allocation25_spill] sm:$0xff] }
 0x302   :  { %v5801_v59 = vadd.f32 %v5800_v17, %v5799_v10  ;;  %v5802_v62 = vsel %vm5206_vm2, %v4972_v3, 0.0  ;;  %v4974_v12 = vmax.f32 %v3768_v56, 0.0  ;;  %v3779_v28 = vadd.f32 %v10604_v4, %v10995_v23  ;;  %v11001_v3 = vld [vmem:[#allocation24_spill] sm:$0xff] }
 0x303   :  { %v6294_v53 = vadd.f32 %v6293_v55, %v6292_v0  ;;  %v4976_v51 = vmax.f32 %v3776_v19, 0.0  ;;  %v5204_v63 = vmax.f32 %v4688_v31, 0.0  ;;  %v6297_v30 = vsel %vm5206_vm2, %v5202_v16, 0.0 }
 0x304   :  { %v5803_v11 = vadd.f32 %v5802_v62, %v5801_v59  ;;  %v5804_v14 = vsel %vm5206_vm2, %v4973_v37, 0.0  ;;  %v4975_v35 = vmax.f32 %v3771_v9, 0.0  ;;  %v5205_v2 = vmax.f32 %v4691_v8, 0.0 }
 0x305   :  { %v6296_v57 = vadd.f32 %v6295_v50, %v6294_v53  ;;  %v6299_v45 = vsel %vm5206_vm2, %v5203_v20, 0.0  ;;  %v5806_v48 = vsel %vm5206_vm2, %v4974_v12, 0.0  ;;  %v4977_v39 = vmax.f32 %v3779_v28, 0.0 }
 0x306   :  { %v5805_v26 = vadd.f32 %v5804_v14, %v5803_v11  ;;  %v3784_v38 = vadd.f32 %v10604_v4, %v10996_v1  ;;  %v5810_v22 = vsel %vm5206_vm2, %v4976_v51, 0.0  ;;  %v5891_v21 = vrot.slane %v10997_v6, 4 }
 0x307   :  { %v6298_v44 = vadd.f32 %v6297_v30, %v6296_v57  ;;  %v6301_v15 = vsel %vm5206_vm2, %v5204_v63, 0.0  ;;  %v5808_v27 = vsel %vm5206_vm2, %v4975_v35, 0.0  ;;  %v3787_v52 = vadd.f32 %v10604_v4, %v10998_v54 }
 0x308   :  { %v5807_v18 = vadd.f32 %v5806_v48, %v5805_v26  ;;  %v5960_v32 = vrot.slane %v10999_v24, 4  ;;  %v3792_v60 = vadd.f32 %v10604_v4, %v11000_v40  ;;  %v6029_v33 = vrot.slane %v11001_v3, 4 }
 0x309   :  { %v6300_v58 = vadd.f32 %v6299_v45, %v6298_v44  ;;  %v6303_v49 = vsel %vm5206_vm2, %v5205_v2, 0.0  ;;  %v5812_v47 = vsel %vm5206_vm2, %v4977_v39, 0.0  ;;  %v4978_v41 = vmax.f32 %v3784_v38, 0.0 }
 0x30a   :  { %v5809_v34 = vadd.f32 %v5808_v27, %v5807_v18  ;;  %v6098_v7 = vrot.slane %v11002_v61, 4  ;;  %v3795_v42 = vadd.f32 %v10604_v4, %v11003_v5  ;;  %v5892_v19 = vadd.f32 %v5891_v21, %v10997_v6 }
 0x30b   :  { %v6302_v25 = vadd.f32 %v6301_v15, %v6300_v58  ;;  %v6167_v56 = vrot.slane %v11004_v36, 4  ;;  %v4979_v10 = vmax.f32 %v3787_v52, 0.0  ;;  %v5961_v55 = vadd.f32 %v5960_v32, %v10999_v24 }
 0x30c   :  { %v5811_v29 = vadd.f32 %v5810_v22, %v5809_v34  ;;  %v6236_v31 = vrot.slane %v10699_v13, 4  ;;  %v6030_v37 = vadd.f32 %v6029_v33, %v11001_v3  ;;  %v4980_v46 = vmax.f32 %v3792_v60, 0.0 }
 0x30d   :  { %v6304_v16 = vadd.f32 %v6303_v49, %v6302_v25  ;;  %v5814_v9 = vsel %vm5206_vm2, %v4978_v41, 0.0  ;;  %v6099_v0 = vadd.f32 %v6098_v7, %v11002_v61  ;;  %v5893_v59 = vrot.slane %v5892_v19, 2 }
 0x30e   :  { %v5813_v17 = vadd.f32 %v5812_v47, %v5811_v29  ;;  %v6168_v50 = vadd.f32 %v6167_v56, %v11004_v36  ;;  %v4981_v20 = vmax.f32 %v3795_v42, 0.0  ;;  %v5816_v62 = vsel %vm5206_vm2, %v4979_v10, 0.0 }
 0x30f   :  { %v6305_v4 = vrot.slane %v6304_v16, 4  ;;  %v5962_v12 = vrot.slane %v5961_v55, 2  ;;  %v6237_v23 = vadd.f32 %v6236_v31, %v10699_v13  ;;  %v6031_v28 = vrot.slane %v6030_v37, 2 }
 0x310   :  { %v5815_v8 = vadd.f32 %v5814_v9, %v5813_v17  ;;  %v5818_v11 = vsel %vm5206_vm2, %v4980_v46, 0.0  ;;  %v6100_v63 = vrot.slane %v6099_v0, 2  ;;  %v5894_v30 = vadd.f32 %v5893_v59, %v5892_v19 }
 0x311   :  { %v6306_v51 = vadd.f32 %v6305_v4, %v6304_v16  ;;  %v6169_v14 = vrot.slane %v6168_v50, 2  ;;  %v5820_v57 = vsel %vm5206_vm2, %v4981_v20, 0.0  ;;  %v5963_v26 = vadd.f32 %v5962_v12, %v5961_v55 }
 0x312   :  { %v5817_v53 = vadd.f32 %v5816_v62, %v5815_v8  ;;  %v6238_v2 = vrot.slane %v6237_v23, 2  ;;  %v6032_v45 = vadd.f32 %v6031_v28, %v6030_v37  ;;  %v6101_v1 = vadd.f32 %v6100_v63, %v6099_v0 }
 0x313   :  { %v6307_v39 = vrot.slane %v6306_v51, 2  ;;  %v5895_v38 = vrot.slane %v5894_v30, 1  ;;  %v6170_v44 = vadd.f32 %v6169_v14, %v6168_v50  ;;  %v5964_v22 = vrot.slane %v5963_v26, 1 }
 0x314   :  { %v5819_v35 = vadd.f32 %v5818_v11, %v5817_v53  ;;  %v6239_v6 = vadd.f32 %v6238_v2, %v6237_v23  ;;  %v6033_v21 = vrot.slane %v6032_v45, 1  ;;  %v6102_v27 = vrot.slane %v6101_v1, 1 }
 0x315   :  { %v6308_v15 = vadd.f32 %v6307_v39, %v6306_v51  ;;  %v5896_v54 = vadd.f32 %v5895_v38, %v5894_v30  ;;  %v6171_v52 = vrot.slane %v6170_v44, 1  ;;  %v5965_v32 = vadd.f32 %v5964_v22, %v5963_v26 }
 0x316   :  { %v5821_v48 = vadd.f32 %v5820_v57, %v5819_v35  ;;  %v6240_v58 = vrot.slane %v6239_v6, 1  ;;  %v6034_v40 = vadd.f32 %v6033_v21, %v6032_v45  ;;  %v6103_v33 = vadd.f32 %v6102_v27, %v6101_v1  ;;  %v6987_v35 = vld [vmem:[%s10945_s4] ss:$0 sm:$0xff] }
 0x317   :  { %v6309_v3 = vrot.slane %v6308_v15, 1  ;;  %v6321_v34 = vmul.f32 0.00390625, %v5896_v54  ;;  %v6172_v49 = vadd.f32 %v6171_v52, %v6170_v44  ;;  %v6322_v41 = vmul.f32 0.00390625, %v5965_v32 }
 0x318   :  { %v5822_v13 = vrot.slane %v5821_v48, 4  ;;  %v6241_v61 = vadd.f32 %v6240_v58, %v6239_v6  ;;  %v6323_v7 = vmul.f32 0.00390625, %v6034_v40  ;;  %v6324_v42 = vmul.f32 0.00390625, %v6103_v33 }
 0x319   :  { %v6310_v5 = vadd.f32 %v6309_v3, %v6308_v15  ;;  %v6337_v19 = vpack.c.bf16 %v6321_v34, %v6321_v34  ;;  %v6325_v36 = vmul.f32 0.00390625, %v6172_v49  ;;  %v6338_v29 = vpack.c.bf16 %v6322_v41, %v6322_v41 }
 0x31a   :  { %v5823_v18 = vadd.f32 %v5822_v13, %v5821_v48  ;;  %v6326_v10 = vmul.f32 0.00390625, %v6241_v61  ;;  %v6339_v55 = vpack.c.bf16 %v6323_v7, %v6323_v7  ;;  %v6340_v37 = vpack.c.bf16 %v6324_v42, %v6324_v42 }
 0x31b   :  { %v6327_v31 = vmul.f32 0.00390625, %v6310_v5  ;;  %v6380_v17 = vunpack.c.l.b16 %v6337_v19  ;;  %v6341_v46 = vpack.c.bf16 %v6325_v36, %v6325_v36  ;;  %v6381_v0 = vunpack.c.l.b16 %v6338_v29 }
 0x31c   :  { %v5824_v24 = vrot.slane %v5823_v18, 2  ;;  %v6342_v4 = vpack.c.bf16 %v6326_v10, %v6326_v10  ;;  %v6382_v59 = vunpack.c.l.b16 %v6339_v55  ;;  %v6383_v20 = vunpack.c.l.b16 %v6340_v37 }
 0x31d   :  { %v6343_v50 = vpack.c.bf16 %v6327_v31, %v6327_v31  ;;  %v6384_v12 = vunpack.c.l.b16 %v6341_v46 }
 0x31e   :  { %v5825_v60 = vadd.f32 %v5824_v24, %v5823_v18  ;;  %v6385_v28 = vunpack.c.l.b16 %v6342_v4 }
 0x31f   :  { %v6386_v51 = vunpack.c.l.b16 %v6343_v50 }
 0x320   :  { %v5826_v47 = vrot.slane %v5825_v60, 1 }
 0x322   :  { %v5827_v25 = vadd.f32 %v5826_v47, %v5825_v60 }
 0x324   :  { %v6320_v56 = vmul.f32 0.00390625, %v5827_v25 }
 0x326   :  { %v6336_v16 = vpack.c.bf16 %v6320_v56, %v6320_v56 }
 0x328   :  { %v6379_v9 = vunpack.c.l.b16 %v6336_v16 }
 0x32a   :  { %v6401_v8 = vsel %vm6387_vm3, %v6380_v17, %v6379_v9 }
 0x32b   :  { %v6402_v62 = vsel %vm6389_vm4, %v6381_v0, %v6401_v8 }
 0x32c   :  { %v6403_v23 = vsel %vm6391_vm5, %v6382_v59, %v6402_v62 }
 0x32d   :  { %v6404_v53 = vsel %vm6393_vm6, %v6383_v20, %v6403_v23 }
 0x32e   :  { %v6405_v11 = vsel %vm6395_vm7, %v6384_v12, %v6404_v53 }
 0x32f   :  { %v6406_v63 = vsel %vm6397_vm8, %v6385_v28, %v6405_v11 }
 0x330   :  { %v6407_v30 = vsel %vm6399_vm9, %v6386_v51, %v6406_v63 }
 0x331   :  { %v6408_v14 = vpack.c.b16 %v6407_v30, %v10813_v43 }
 0x333   :  { %7776 = vmatmul.mubr.msk.bf16.vlgmr.msra.gmra.mxu1 %vm5206_vm2, %v6408_v14 }
 0x3f3   :  { %v6458_v57 = vpop.f32.mrf.mxu1 }
 0x3f4   :  { %v6459_v26 = vadd.f32 %v6987_v35, %v6458_v57 }
 0x3f5   :  { %v7777_v2 = vpop.f32.mrf.mxu1 }
 0x3f6   :  { %6465 = vst [vmem:[%s10946_s5] sm:$0xff] %v6459_v26 }
 0x3f7   :  { %v6461_v45 = vpop.f32.mrf.mxu1 }
 0x3f8   :  { %v6462_v48 = vadd.f32 %v6987_v35, %v6461_v45 }
 0x3f9   :  { %v7778_v39 = vpop.f32.mrf.mxu1 }
 0x3fa   :  { %6466 = vst [vmem:[%s10946_s5 + $0x8] sm:$0xff] %v6462_v48 }

</bundles_post_ra>
